<compile_context>
chip_gen: v5e
topology: v5e:2x2
jax: 0.10.0
libtpu: 0.0.40
codegen_flags: <defaults>
</compile_context>

<pallas_src>
import functools
import math

import jax
import jax.numpy as jnp
from jax import lax
from jax.experimental import pallas as pl
from jax.experimental.pallas import tpu as pltpu


def _round_up(x, m):
    return (x + m - 1) // m * m


def _gat_kernel(n_head, f_out,
                nnz_ref, keff_ref,
                ssrc_ref, sdst_ref, xk_ref, adj_ref, w_ref,
                out_ref, acc_ref):
    """One (row_tile q, col_tile k) grid step; heads are unrolled in the body.

    nnz_ref:  SMEM (n_q*n_k,) int32    nonzeros per adjacency tile
    keff_ref: SMEM (n_q*n_k,) int32    effective col-tile index (DMA-skip remap)
    ssrc_ref: (TQ, n_head) f32         per-head s_src for this row tile
    sdst_ref: (n_head, TK) f32         per-head s_dst for this col tile
    xk_ref:   (TK, F_pad)  bf16        padded features, col tile (ones col at f_out)
    adj_ref:  (TQ, TK)     int8        duplicate-edge counts for this tile
    w_ref:    (n_head, F_pad) f32      per-head diagonal weights (resident)
    out_ref:  (TQ, OUT_LANES) f32      all heads packed along output lanes
    acc_ref:  (n_head, TQ, F_pad) f32  accumulators (column f_out carries the row-sum)
    """
    q = pl.program_id(0)
    k = pl.program_id(1)
    n_k = pl.num_programs(1)

    @pl.when(k == 0)
    def _init():
        acc_ref[...] = jnp.zeros_like(acc_ref)

    @pl.when(nnz_ref[q * n_k + k] > 0)   # empty tiles: DMA already elided via keff remap
    def _compute():
        xk_bf = xk_ref[...]                                # (TK, F_pad) bf16
        cnt = adj_ref[...].astype(jnp.float32)             # duplicate-edge counts, f32
        edge_mask = cnt > 0.0
        # Static unroll over heads: the adj / xk tiles are reused for every head.
        for h in range(n_head):
            scores = ssrc_ref[:, h:h + 1] + sdst_ref[h:h + 1, :]        # (TQ, TK) f32
            lrelu = jnp.where(scores >= 0.0, scores, 0.2 * scores)      # leaky_relu(0.2)
            # select (not multiply) so non-edges never see inf*0 -> NaN.
            # No max-shift inside the exp: parity with the torch reference.
            e = jnp.where(edge_mask, cnt * jnp.exp(-lrelu), 0.0)        # (TQ, TK) f32
            # Aggregation on the MXU in bf16 with f32 accumulation; the ones column
            # of xk makes acc[h, :, f_out] the running row-sum (fused, no XLU reduce).
            acc_ref[h] += jnp.dot(e.astype(jnp.bfloat16), xk_bf,
                                  preferred_element_type=jnp.float32)

    @pl.when(k == n_k - 1)
    def _finalize():
        out_ref[...] = jnp.zeros_like(out_ref)
        for h in range(n_head):
            acc_h = acc_ref[h]                              # (TQ, F_pad) f32
            rowsum = acc_h[:, f_out:f_out + 1]              # (TQ, 1) fused row-sum
            w_h = w_ref[h:h + 1, :f_out]                    # (1, f_out)
            # exact divide (runs once per row tile). Rows with no edges (padding /
            # isolated nodes) produce inf/NaN, matching the torch module.
            out_ref[:, h * f_out:(h + 1) * f_out] = (acc_h[:, :f_out] * w_h) / rowsum


def kecg_multi_head_gat(x, edge, w, a_src_dst, *, n_head, f_out, tq=512, tk=512):
    """Wrapper: padding / adjacency-count build / score precompute + pallas_call.

    x:          (N, f_in)  float32 node features (f_in == f_out since diag=True)
    edge:       (2, E)     int32 COO edge indices (duplicates summed, as in
                           torch sparse COO coalescing)
    w:          (n_head, 1, f_out)     diagonal weights
    a_src_dst:  (n_head, 2*f_out, 1)   attention vector
    returns:    (n_head, N, f_out) float32
    """
    N, f_in = x.shape
    assert f_in == f_out, "diag=True requires f_in == f_out"
    # TODO(synk): diag=False (dense f_in x f_out projection) and bias=True not wired up.
    # TODO(synk): attn_dropout is identity here (eval-mode forward).

    f_pad = _round_up(f_out + 1, 128)            # +1 lane: fused row-sum "ones" column
    n_pad = _round_up(N, math.lcm(tq, tk))
    n_q, n_k = n_pad // tq, n_pad // tk
    out_lanes = _round_up(n_head * f_out, 128)   # heads packed along output lanes

    # --- per-head attention score vectors, precomputed once in XLA (O(N*F)) ---
    hw = x[None, :, :].astype(jnp.float32) * w[:, 0, :][:, None, :]       # (H, N, F)
    s_src = jnp.einsum('hnf,hf->hn', hw, a_src_dst[:, :f_out, 0])         # (H, N)
    s_dst = jnp.einsum('hnf,hf->hn', hw, a_src_dst[:, f_out:, 0])         # (H, N)
    ssrc_q = jnp.zeros((n_pad, n_head), jnp.float32).at[:N, :].set(s_src.T)
    sdst_k = jnp.zeros((n_head, n_pad), jnp.float32).at[:, :N].set(s_dst)

    # --- head-independent bf16 feature slab; column f_out == 1 fuses the row-sum ---
    x_pad = jnp.zeros((n_pad, f_pad), jnp.bfloat16)
    x_pad = x_pad.at[:N, :f_out].set(x.astype(jnp.bfloat16))
    x_pad = x_pad.at[:, f_out].set(1.0)

    # --- per-head diagonal weights, applied at finalize: e @ (x*w) == (e @ x) * w ---
    w_pad = jnp.zeros((n_head, f_pad), jnp.float32).at[:, :f_out].set(w[:, 0, :])

    # --- duplicate-edge counts (int8 in HBM: 4x less DMA than f32) ---
    # TODO(synk): for a static graph this preprocessing should be hoisted / run once.
    adj_cnt = jnp.zeros((n_pad, n_pad), jnp.int32).at[edge[0], edge[1]].add(1)
    # clip so >127 duplicates saturate instead of wrapping negative (silent edge drop)
    adj_i8 = jnp.minimum(adj_cnt, 127).astype(jnp.int8)

    # per-tile nonzero table straight from the edge list (O(E), no extra N^2 pass)
    bid = (edge[0] // tq) * n_k + (edge[1] // tk)
    block_nnz = jnp.zeros((n_q * n_k,), jnp.int32).at[bid].add(1)
    # "effective k": empty tiles are remapped to the last nonempty tile already in
    # VMEM, so BlockSpec issues no new DMA for them (compute is skipped via pl.when).
    ks = jnp.arange(n_k, dtype=jnp.int32)
    marked = jnp.where(block_nnz.reshape(n_q, n_k) > 0, ks[None, :], -1)
    keff = jnp.maximum(lax.cummax(marked, axis=1), 0).reshape(-1).astype(jnp.int32)

    grid_spec = pltpu.PrefetchScalarGridSpec(
        num_scalar_prefetch=2,
        grid=(n_q, n_k),
        in_specs=[
            pl.BlockSpec((tq, n_head), lambda q, k, nnz, ke: (q, 0)),                  # s_src
            pl.BlockSpec((n_head, tk), lambda q, k, nnz, ke: (0, ke[q * n_k + k])),    # s_dst
            pl.BlockSpec((tk, f_pad), lambda q, k, nnz, ke: (ke[q * n_k + k], 0)),     # x (bf16)
            pl.BlockSpec((tq, tk), lambda q, k, nnz, ke: (q, ke[q * n_k + k])),        # adj (int8)
            pl.BlockSpec((n_head, f_pad), lambda q, k, nnz, ke: (0, 0)),               # w (resident)
        ],
        out_specs=pl.BlockSpec((tq, out_lanes), lambda q, k, nnz, ke: (q, 0)),
        scratch_shapes=[
            pltpu.VMEM((n_head, tq, f_pad), jnp.float32),   # per-head accumulators
        ],
    )

    out = pl.pallas_call(
        functools.partial(_gat_kernel, n_head, f_out),
        out_shape=jax.ShapeDtypeStruct((n_pad, out_lanes), jnp.float32),
        grid_spec=grid_spec,
        compiler_params=pltpu.CompilerParams(
            # row-tile axis "parallel" (v7x: 2 TensorCores split it; keep n_q >= 2);
            # col-tile axis is the flash-style reduction -> "arbitrary".
            dimension_semantics=("parallel", "arbitrary"),
            # footprint at tq=tk=512, n_head<=8 is only a few MiB; 32 MiB scoped
            # limit is safe on v5e/v6e (128 MiB) and v7x (64 MiB).
            vmem_limit_bytes=32 * 1024 * 1024),
    )(block_nnz, keff, ssrc_q, sdst_k, x_pad, adj_i8, w_pad)

    # Unpack heads from the lane-packed slab (small XLA copy; a fused consumer
    # could take the packed (N, n_head*f_out) layout directly).
    packed = out[:N, :n_head * f_out]
    return packed.reshape(N, n_head, f_out).transpose(1, 0, 2)


def _reference(x, edge, w, a_src_dst, *, n_head, f_out):
    """Plain-JAX dense reference mirroring the PyTorch forward (eval mode).

    Duplicate edges are summed (torch sparse COO coalescing semantics).
    """
    N = x.shape[0]
    adj = jnp.zeros((N, N), jnp.float32).at[edge[0], edge[1]].add(1.0)
    outs = []
    for i in range(n_head):
        h = x * w[i]                                         # (N, F)
        a_s = a_src_dst[i, :f_out, 0]
        a_d = a_src_dst[i, f_out:, 0]
        scores = (h @ a_s)[:, None] + (h @ a_d)[None, :]     # (N, N)
        lrelu = jnp.where(scores >= 0, scores, 0.2 * scores)
        e = jnp.where(adj > 0, adj * jnp.exp(-lrelu), 0.0)
        rowsum = e.sum(axis=1, keepdims=True)
        outs.append((e @ h) / rowsum)
    return jnp.stack(outs, axis=0)


if __name__ == "__main__":
    n_head = 2
    N = 384
    f_out = 32            # diag=True -> f_in == f_out
    tq = tk = 256         # small-shape demo tiles (production default is 512)

    key = jax.random.PRNGKey(0)
    k_x, k_w, k_a, k_e1, k_e2, k_e3 = jax.random.split(key, 6)

    x = jax.random.normal(k_x, (N, f_out), jnp.float32)
    w = jax.random.uniform(k_w, (n_head, 1, f_out), jnp.float32,
                           minval=-0.5, maxval=0.5)
    a_src_dst = jax.random.uniform(k_a, (n_head, 2 * f_out, 1), jnp.float32,
                                   minval=-0.125, maxval=0.125)

    # Self-loops (every real row-sum > 0) plus random edges constructed so the
    # (row-tile 0, col-tile 1) adjacency block is empty, exercising the
    # DMA-skip (keff remap) + compute-skip path.
    idx = jnp.arange(N, dtype=jnp.int32)
    self_loops = jnp.stack([idx, idx], axis=0)
    n_rand = 2048
    src = jax.random.randint(k_e1, (n_rand,), 0, N, dtype=jnp.int32)
    dst_lo = jax.random.randint(k_e2, (n_rand,), 0, tk, dtype=jnp.int32)
    dst_any = jax.random.randint(k_e3, (n_rand,), 0, N, dtype=jnp.int32)
    dst = jnp.where(src < tq, dst_lo, dst_any)     # rows < 256 never point at cols >= 256
    edge = jnp.concatenate([self_loops, jnp.stack([src, dst], axis=0)], axis=1)

    out = kecg_multi_head_gat(x, edge, w, a_src_dst,
                              n_head=n_head, f_out=f_out, tq=tq, tk=tk)
    out = jax.block_until_ready(out)

    ref = _reference(x, edge, w, a_src_dst, n_head=n_head, f_out=f_out)
    assert out.shape == (n_head, N, f_out)
    err = float(jnp.max(jnp.abs(out - ref)))
    # bf16 feature storage / bf16 MXU inputs -> slightly looser tolerance than pure f32
    assert err < 2e-2, f"mismatch vs dense reference: {err}"

    print("KERNEL_OK")
</pallas_src>

<mosaic_0001>
module attributes {stable_mosaic.version = 11 : i64} {
  func.func @_gat_kernel(%arg0: i32, %arg1: i32, %arg2: memref<4xi32, #tpu.memory_space<smem>>, %arg3: memref<4xi32, #tpu.memory_space<smem>>, %arg4: memref<256x2xf32, #tpu.memory_space<vmem>>, %arg5: memref<2x256xf32, #tpu.memory_space<vmem>>, %arg6: memref<256x128xbf16, #tpu.memory_space<vmem>>, %arg7: memref<256x256xi8, #tpu.memory_space<vmem>>, %arg8: memref<2x128xf32, #tpu.memory_space<vmem>>, %arg9: memref<256x128xf32, #tpu.memory_space<vmem>>, %arg10: memref<2x256x128xf32, #tpu.memory_space<vmem>>) attributes {dimension_semantics = [#tpu.dimension_semantics<parallel>, #tpu.dimension_semantics<arbitrary>], iteration_bounds = array<i64: 2, 2>, scalar_prefetch = 2 : i64, scratch_operands = 1 : i64, tpu.core_type = #tpu.core_type<tc>, window_params = [{transform_indices = @transform_0, window_bounds = array<i64: 256, 2>}, {transform_indices = @transform_1, window_bounds = array<i64: 2, 256>}, {transform_indices = @transform_2, window_bounds = array<i64: 256, 128>}, {transform_indices = @transform_3, window_bounds = array<i64: 256, 256>}, {pipeline_mode = #tpu.pipeline_mode<synchronous>, transform_indices = @transform_4, window_bounds = array<i64: 2, 128>}, {transform_indices = @transform_5, window_bounds = array<i64: 256, 128>}]} {
    %c0_i32 = arith.constant 0 : i32
    %0 = arith.cmpi eq, %arg1, %c0_i32 : i32
    %1 = arith.extui %0 : i1 to i32
    %c0_i32_0 = arith.constant 0 : i32
    %2 = arith.cmpi ne, %1, %c0_i32_0 : i32
    scf.if %2 {
      %cst = arith.constant 0.000000e+00 : f32
      %13 = vector.broadcast %cst : f32 to vector<2x256x128xf32>
      %c0 = arith.constant 0 : index
      %c0_4 = arith.constant 0 : index
      %c0_5 = arith.constant 0 : index
      %14 = vector.load %arg10[%c0, %c0_4, %c0_5] : memref<2x256x128xf32, #tpu.memory_space<vmem>>, vector<2x256x128xf32>
      tpu.vector_store %arg10[%c0, %c0_4, %c0_5], %13 {strides = array<i32>} : memref<2x256x128xf32, #tpu.memory_space<vmem>>, vector<2x256x128xf32>,
    } else {
    }
    %c2_i32 = arith.constant 2 : i32
    %3 = arith.muli %arg0, %c2_i32 : i32
    %4 = arith.addi %3, %arg1 : i32
    %5 = arith.index_cast %4 : i32 to index
    %6 = memref.load %arg2[%5] : memref<4xi32, #tpu.memory_space<smem>>
    %c0_i32_1 = arith.constant 0 : i32
    %7 = arith.cmpi sgt, %6, %c0_i32_1 : i32
    %8 = arith.extui %7 : i1 to i32
    %c0_i32_2 = arith.constant 0 : i32
    %9 = arith.cmpi ne, %8, %c0_i32_2 : i32
    scf.if %9 {
      %c0 = arith.constant 0 : index
      %c0_4 = arith.constant 0 : index
      %13 = vector.load %arg6[%c0, %c0_4] : memref<256x128xbf16, #tpu.memory_space<vmem>>, vector<256x128xbf16>
      %c0_5 = arith.constant 0 : index
      %c0_6 = arith.constant 0 : index
      %14 = vector.load %arg7[%c0_5, %c0_6] : memref<256x256xi8, #tpu.memory_space<vmem>>, vector<256x256xi8>
      %15 = arith.sitofp %14 : vector<256x256xi8> to vector<256x256xf32>
      %cst = arith.constant 0.000000e+00 : f32
      %16 = vector.broadcast %cst : f32 to vector<256x256xf32>
      %17 = arith.cmpf ogt, %15, %16 : vector<256x256xf32>
      %c0_7 = arith.constant 0 : index
      %c0_8 = arith.constant 0 : index
      %18 = vector.load %arg4[%c0_7, %c0_8] : memref<256x2xf32, #tpu.memory_space<vmem>>, vector<256x1xf32>
      %c0_9 = arith.constant 0 : index
      %c0_10 = arith.constant 0 : index
      %19 = vector.load %arg5[%c0_9, %c0_10] : memref<2x256xf32, #tpu.memory_space<vmem>>, vector<1x256xf32>
      %20 = vector.broadcast %18 : vector<256x1xf32> to vector<256x256xf32>
      %21 = vector.broadcast %19 : vector<1x256xf32> to vector<256x256xf32>
      %22 = arith.addf %20, %21 : vector<256x256xf32>
      %cst_11 = arith.constant 0.000000e+00 : f32
      %23 = vector.broadcast %cst_11 : f32 to vector<256x256xf32>
      %24 = arith.cmpf oge, %22, %23 : vector<256x256xf32>
      %cst_12 = arith.constant 2.000000e-01 : f32
      %25 = vector.broadcast %cst_12 : f32 to vector<256x256xf32>
      %26 = arith.mulf %25, %22 : vector<256x256xf32>
      %27 = arith.select %24, %22, %26 : vector<256x256xi1>, vector<256x256xf32>
      %cst_13 = arith.constant 0.000000e+00 : f32
      %28 = vector.broadcast %cst_13 : f32 to vector<256x256xf32>
      %29 = arith.subf %28, %27 : vector<256x256xf32>
      %30 = math.exp %29 : vector<256x256xf32>
      %31 = arith.mulf %15, %30 : vector<256x256xf32>
      %cst_14 = arith.constant 0.000000e+00 : f32
      %32 = vector.broadcast %cst_14 : f32 to vector<256x256xf32>
      %33 = arith.select %17, %31, %32 : vector<256x256xi1>, vector<256x256xf32>
      %c0_15 = arith.constant 0 : index
      %c0_16 = arith.constant 0 : index
      %c0_17 = arith.constant 0 : index
      %34 = vector.load %arg10[%c0_15, %c0_16, %c0_17] : memref<2x256x128xf32, #tpu.memory_space<vmem>>, vector<1x256x128xf32>
      %35 = vector.shape_cast %34 : vector<1x256x128xf32> to vector<256x128xf32>
      %36 = arith.truncf %33 : vector<256x256xf32> to vector<256x256xbf16>
      %cst_18 = arith.constant dense<0.000000e+00> : vector<256x128xf32>
      %37 = tpu.matmul %36, %13, %cst_18 {dimension_numbers = #tpu.dot_dimension_numbers<[1], [0], [0], [1], [0, 0, 1, 1], [], []>} : vector<256x256xbf16>, vector<256x128xbf16>, vector<256x128xf32> -> vector<256x128xf32>
      %38 = arith.addf %35, %37 : vector<256x128xf32>
      %c0_19 = arith.constant 0 : index
      %c0_20 = arith.constant 0 : index
      %c0_21 = arith.constant 0 : index
      %39 = vector.load %arg10[%c0_19, %c0_20, %c0_21] : memref<2x256x128xf32, #tpu.memory_space<vmem>>, vector<1x256x128xf32>
      %40 = vector.shape_cast %39 : vector<1x256x128xf32> to vector<256x128xf32>
      %41 = vector.shape_cast %38 : vector<256x128xf32> to vector<1x256x128xf32>
      tpu.vector_store %arg10[%c0_19, %c0_20, %c0_21], %41 {strides = array<i32>} : memref<2x256x128xf32, #tpu.memory_space<vmem>>, vector<1x256x128xf32>,
      %c0_22 = arith.constant 0 : index
      %c1 = arith.constant 1 : index
      %42 = vector.load %arg4[%c0_22, %c1] : memref<256x2xf32, #tpu.memory_space<vmem>>, vector<256x1xf32>
      %c1_23 = arith.constant 1 : index
      %c0_24 = arith.constant 0 : index
      %43 = vector.load %arg5[%c1_23, %c0_24] : memref<2x256xf32, #tpu.memory_space<vmem>>, vector<1x256xf32>
      %44 = vector.broadcast %42 : vector<256x1xf32> to vector<256x256xf32>
      %45 = vector.broadcast %43 : vector<1x256xf32> to vector<256x256xf32>
      %46 = arith.addf %44, %45 : vector<256x256xf32>
      %cst_25 = arith.constant 0.000000e+00 : f32
      %47 = vector.broadcast %cst_25 : f32 to vector<256x256xf32>
      %48 = arith.cmpf oge, %46, %47 : vector<256x256xf32>
      %cst_26 = arith.constant 2.000000e-01 : f32
      %49 = vector.broadcast %cst_26 : f32 to vector<256x256xf32>
      %50 = arith.mulf %49, %46 : vector<256x256xf32>
      %51 = arith.select %48, %46, %50 : vector<256x256xi1>, vector<256x256xf32>
      %cst_27 = arith.constant 0.000000e+00 : f32
      %52 = vector.broadcast %cst_27 : f32 to vector<256x256xf32>
      %53 = arith.subf %52, %51 : vector<256x256xf32>
      %54 = math.exp %53 : vector<256x256xf32>
      %55 = arith.mulf %15, %54 : vector<256x256xf32>
      %cst_28 = arith.constant 0.000000e+00 : f32
      %56 = vector.broadcast %cst_28 : f32 to vector<256x256xf32>
      %57 = arith.select %17, %55, %56 : vector<256x256xi1>, vector<256x256xf32>
      %c1_29 = arith.constant 1 : index
      %c0_30 = arith.constant 0 : index
      %c0_31 = arith.constant 0 : index
      %58 = vector.load %arg10[%c1_29, %c0_30, %c0_31] : memref<2x256x128xf32, #tpu.memory_space<vmem>>, vector<1x256x128xf32>
      %59 = vector.shape_cast %58 : vector<1x256x128xf32> to vector<256x128xf32>
      %60 = arith.truncf %57 : vector<256x256xf32> to vector<256x256xbf16>
      %cst_32 = arith.constant dense<0.000000e+00> : vector<256x128xf32>
      %61 = tpu.matmul %60, %13, %cst_32 {dimension_numbers = #tpu.dot_dimension_numbers<[1], [0], [0], [1], [0, 0, 1, 1], [], []>} : vector<256x256xbf16>, vector<256x128xbf16>, vector<256x128xf32> -> vector<256x128xf32>
      %62 = arith.addf %59, %61 : vector<256x128xf32>
      %c1_33 = arith.constant 1 : index
      %c0_34 = arith.constant 0 : index
      %c0_35 = arith.constant 0 : index
      %63 = vector.load %arg10[%c1_33, %c0_34, %c0_35] : memref<2x256x128xf32, #tpu.memory_space<vmem>>, vector<1x256x128xf32>
      %64 = vector.shape_cast %63 : vector<1x256x128xf32> to vector<256x128xf32>
      %65 = vector.shape_cast %62 : vector<256x128xf32> to vector<1x256x128xf32>
      tpu.vector_store %arg10[%c1_33, %c0_34, %c0_35], %65 {strides = array<i32>} : memref<2x256x128xf32, #tpu.memory_space<vmem>>, vector<1x256x128xf32>,
    } else {
    }
    %c1_i32 = arith.constant 1 : i32
    %10 = arith.cmpi eq, %arg1, %c1_i32 : i32
    %11 = arith.extui %10 : i1 to i32
    %c0_i32_3 = arith.constant 0 : i32
    %12 = arith.cmpi ne, %11, %c0_i32_3 : i32
    scf.if %12 {
      %cst = arith.constant 0.000000e+00 : f32
      %13 = vector.broadcast %cst : f32 to vector<256x128xf32>
      %c0 = arith.constant 0 : index
      %c0_4 = arith.constant 0 : index
      %14 = vector.load %arg9[%c0, %c0_4] : memref<256x128xf32, #tpu.memory_space<vmem>>, vector<256x128xf32>
      tpu.vector_store %arg9[%c0, %c0_4], %13 {strides = array<i32>} : memref<256x128xf32, #tpu.memory_space<vmem>>, vector<256x128xf32>,
      %c0_5 = arith.constant 0 : index
      %c0_6 = arith.constant 0 : index
      %c0_7 = arith.constant 0 : index
      %15 = vector.load %arg10[%c0_5, %c0_6, %c0_7] : memref<2x256x128xf32, #tpu.memory_space<vmem>>, vector<1x256x128xf32>
      %16 = vector.shape_cast %15 : vector<1x256x128xf32> to vector<256x128xf32>
      %17 = vector.extract_strided_slice %16 {offsets = [0, 32], sizes = [256, 1], strides = [1, 1]} : vector<256x128xf32> to vector<256x1xf32>
      %c0_8 = arith.constant 0 : index
      %c0_9 = arith.constant 0 : index
      %18 = vector.load %arg8[%c0_8, %c0_9] : memref<2x128xf32, #tpu.memory_space<vmem>>, vector<1x32xf32>
      %19 = vector.extract_strided_slice %16 {offsets = [0, 0], sizes = [256, 32], strides = [1, 1]} : vector<256x128xf32> to vector<256x32xf32>
      %20 = vector.broadcast %18 : vector<1x32xf32> to vector<256x32xf32>
      %21 = arith.mulf %19, %20 : vector<256x32xf32>
      %22 = vector.broadcast %17 : vector<256x1xf32> to vector<256x32xf32>
      %23 = arith.divf %21, %22 : vector<256x32xf32>
      %c0_10 = arith.constant 0 : index
      %c0_11 = arith.constant 0 : index
      %24 = vector.load %arg9[%c0_10, %c0_11] : memref<256x128xf32, #tpu.memory_space<vmem>>, vector<256x32xf32>
      tpu.vector_store %arg9[%c0_10, %c0_11], %23 {strides = array<i32>} : memref<256x128xf32, #tpu.memory_space<vmem>>, vector<256x32xf32>,
      %c1 = arith.constant 1 : index
      %c0_12 = arith.constant 0 : index
      %c0_13 = arith.constant 0 : index
      %25 = vector.load %arg10[%c1, %c0_12, %c0_13] : memref<2x256x128xf32, #tpu.memory_space<vmem>>, vector<1x256x128xf32>
      %26 = vector.shape_cast %25 : vector<1x256x128xf32> to vector<256x128xf32>
      %27 = vector.extract_strided_slice %26 {offsets = [0, 32], sizes = [256, 1], strides = [1, 1]} : vector<256x128xf32> to vector<256x1xf32>
      %c1_14 = arith.constant 1 : index
      %c0_15 = arith.constant 0 : index
      %28 = vector.load %arg8[%c1_14, %c0_15] : memref<2x128xf32, #tpu.memory_space<vmem>>, vector<1x32xf32>
      %29 = vector.extract_strided_slice %26 {offsets = [0, 0], sizes = [256, 32], strides = [1, 1]} : vector<256x128xf32> to vector<256x32xf32>
      %30 = vector.broadcast %28 : vector<1x32xf32> to vector<256x32xf32>
      %31 = arith.mulf %29, %30 : vector<256x32xf32>
      %32 = vector.broadcast %27 : vector<256x1xf32> to vector<256x32xf32>
      %33 = arith.divf %31, %32 : vector<256x32xf32>
      %c0_16 = arith.constant 0 : index
      %c32 = arith.constant 32 : index
      %34 = vector.load %arg9[%c0_16, %c32] : memref<256x128xf32, #tpu.memory_space<vmem>>, vector<256x32xf32>
      tpu.vector_store %arg9[%c0_16, %c32], %33 {strides = array<i32>} : memref<256x128xf32, #tpu.memory_space<vmem>>, vector<256x32xf32>,
    } else {
    }
    return
  }
  func.func @transform_0(%arg0: i32, %arg1: i32, %arg2: memref<4xi32, #tpu.memory_space<smem>>, %arg3: memref<4xi32, #tpu.memory_space<smem>>) -> (i32, i32) {
    %c0_i32 = arith.constant 0 : i32
    %c0_i32_0 = arith.constant 0 : i32
    return %arg0, %c0_i32 : i32, i32
  }
  func.func @transform_1(%arg0: i32, %arg1: i32, %arg2: memref<4xi32, #tpu.memory_space<smem>>, %arg3: memref<4xi32, #tpu.memory_space<smem>>) -> (i32, i32) {
    %c2_i32 = arith.constant 2 : i32
    %0 = arith.muli %arg0, %c2_i32 : i32
    %1 = arith.addi %0, %arg1 : i32
    %2 = arith.index_cast %1 : i32 to index
    %3 = memref.load %arg3[%2] : memref<4xi32, #tpu.memory_space<smem>>
    %c0_i32 = arith.constant 0 : i32
    %c0_i32_0 = arith.constant 0 : i32
    return %c0_i32, %3 : i32, i32
  }
  func.func @transform_2(%arg0: i32, %arg1: i32, %arg2: memref<4xi32, #tpu.memory_space<smem>>, %arg3: memref<4xi32, #tpu.memory_space<smem>>) -> (i32, i32) {
    %c2_i32 = arith.constant 2 : i32
    %0 = arith.muli %arg0, %c2_i32 : i32
    %1 = arith.addi %0, %arg1 : i32
    %2 = arith.index_cast %1 : i32 to index
    %3 = memref.load %arg3[%2] : memref<4xi32, #tpu.memory_space<smem>>
    %c0_i32 = arith.constant 0 : i32
    %c0_i32_0 = arith.constant 0 : i32
    return %3, %c0_i32 : i32, i32
  }
  func.func @transform_3(%arg0: i32, %arg1: i32, %arg2: memref<4xi32, #tpu.memory_space<smem>>, %arg3: memref<4xi32, #tpu.memory_space<smem>>) -> (i32, i32) {
    %c2_i32 = arith.constant 2 : i32
    %0 = arith.muli %arg0, %c2_i32 : i32
    %1 = arith.addi %0, %arg1 : i32
    %2 = arith.index_cast %1 : i32 to index
    %3 = memref.load %arg3[%2] : memref<4xi32, #tpu.memory_space<smem>>
    %c0_i32 = arith.constant 0 : i32
    return %arg0, %3 : i32, i32
  }
  func.func @transform_4(%arg0: i32, %arg1: i32, %arg2: memref<4xi32, #tpu.memory_space<smem>>, %arg3: memref<4xi32, #tpu.memory_space<smem>>) -> (i32, i32) {
    %c0_i32 = arith.constant 0 : i32
    %c0_i32_0 = arith.constant 0 : i32
    %c0_i32_1 = arith.constant 0 : i32
    return %c0_i32, %c0_i32_0 : i32, i32
  }
  func.func @transform_5(%arg0: i32, %arg1: i32, %arg2: memref<4xi32, #tpu.memory_space<smem>>, %arg3: memref<4xi32, #tpu.memory_space<smem>>) -> (i32, i32) {
    %c0_i32 = arith.constant 0 : i32
    %c0_i32_0 = arith.constant 0 : i32
    return %arg0, %c0_i32 : i32, i32
  }
}

</mosaic_0001>

<bundles_post_ra>
// kernel: tpu_custom_call.1
= control target key start
LH: loop header
LB: loop body
LE: loop exit
PB: predicated region body
PF: predicated region fallthrough
CT: control target
= control target key end

     0   :  { %s5867_s30 = smov [#allocation4]   ;;  %s5868_s8 = smov [#allocation5]   ;;  %s9953_s0 = inlined_call_operand.vmem [shape: s32[4], index: 0, kind: input, shape index: {}]   ;;  %s9954_s2 = inlined_call_operand.vmem [shape: f32[512,2], index: 2, kind: input, shape index: {}]   ;;  %s9955_s3 = inlined_call_operand.vmem [shape: f32[2,512], index: 3, kind: input, shape index: {}]   ;;  %s9956_s4 = inlined_call_operand.hbm [shape: bf16[512,128], index: 4, kind: input, shape index: {}]   ;;  %s9957_s5 = inlined_call_operand.vmem [shape: s8[512,512], index: 5, kind: input, shape index: {}]   ;;  %s9958_s6 = inlined_call_operand.vmem [shape: f32[2,128], index: 6, kind: input, shape index: {}]   ;;  %s9959_s7 = inlined_call_operand.hbm [shape: f32[512,128], index: 7, kind: output, shape index: {}]   ;;  %s9960_s1 = inlined_call_operand.vmem [shape: s32[4], index: 1, kind: input, shape index: {}]  }
   0x1   :  { %10054 = sst [smem:[#allocation137_spill]] %s9954_s2  ;;  %s13_s26 = sshll.u32 %s9953_s0, 4  ;;  %s14_s26 = int_to_ptr.vmem [resolvable:$true] %s13_s26 }
   0x2   :  { %10055 = sst [smem:[#allocation138_spill]] %s9955_s3  ;;  %s18_s29 = sshll.u32 %s9960_s1, 4  ;;  %s19_s29 = int_to_ptr.vmem [resolvable:$true] %s18_s29 }
   0x3   :  { %10056 = sst [smem:[#allocation139_spill]] %s9958_s6 }
   0x4   :  { %10057 = sst [smem:[#allocation140_spill]] %s9959_s7 }
   0x5   :  { %16 = dma.vmem_to_smem %s14_s26, 16, %s5867_s30, [#allocation3] }
   0x6   :  { %21 = dma.vmem_to_smem %s19_s29, 16, %s5868_s8, [#allocation3] }
   0x7   :  { %5805 = dma.done.wait [#allocation3], 32 }
   0x8   :  { %5806 = vsyncadd [#allocation3], 4294967264 }
   0x9   :  { %24 = sfence }
   0xa   :  { %25 = vsyncpa [#allocation7], 0 }
   0xb   :  { %27 = vsyncpa [#allocation7 + $0x1], 0 }
   0xc   :  { %28 = vsyncpa [#allocation8], 0 }
   0xd   :  { %30 = vsyncpa [#allocation8 + $0x1], 0  ;;  %s5925_s9 = smov 0   ;;  %s5927_s0 = smov 0  }
   0xe   :  { %s5929_s10 = smov 0   ;;  %s5931_s1 = smov 0  }
   0xf   :  { %s5933_s11 = smov 0   ;;  %s5935_s12 = smov 0  }
  0x10   :  { %s5937_s13 = smov 0   ;;  %s5939_s14 = smov 0  }
  0x11   :  { %s5941_s15 = smov 0   ;;  %s5943_s16 = smov 0  }
  0x12   :  { %s5945_s17 = smov 0   ;;  %s5947_s18 = smov 0  }
  0x13   :  { %s5949_s19 = smov 0  }
  0x14 LB: > { %10058 = sst [smem:[#allocation15_spill]] %s5825_s10  ;;  %s9961_s20 = sadd.s32 4294967295, %s5865_s19   ;;  %s5865_s19 = sphi %s5949_s19, %s36_s19   ;;  %s5861_s18 = sphi %s5947_s18, %s10581_s18   ;;  %s5857_s17 = sphi %s5945_s17, %s10572_s17   ;;  %s5853_s16 = sphi %s5943_s16, %s10580_s16   ;;  %s5849_s15 = sphi %s5941_s15, %s10571_s15   ;;  %s5845_s14 = sphi %s5939_s14, %s10570_s14   ;;  %s5841_s13 = sphi %s5937_s13, %s10579_s13   ;;  %s5837_s12 = sphi %s5935_s12, %s10578_s12   ;;  %s5833_s11 = sphi %s5933_s11, %s10577_s11   ;;  %s5829_s1 = sphi %s5931_s1, %s10576_s1   ;;  %s5825_s10 = sphi %s5929_s10, %s10567_s10   ;;  %s5821_s0 = sphi %s5927_s0, %s10575_s0   ;;  %s5817_s9 = sphi %s5925_s9, %s10574_s9  }
  0x15   : > { %10059 = sst [smem:[#allocation16_spill]] %s5829_s1  ;;  %s45_s22 = sadd.s32 1, %s5857_s17 }
  0x16   : > { %10060 = sst [smem:[#allocation17_spill]] %s5845_s14  ;;  %s48_s23 = sadd.s32 1, %s5861_s18 }
  0x17   : > { %10061 = sst [smem:[#allocation18_spill]] %s5849_s15  ;;  %p46_p0 = scmp.ge.s32.totalorder %s45_s22, 2 }
  0x18   : > { %10062 = sst [smem:[#allocation19_spill]] %s5857_s17  ;;  %s4805_s24 = sshll.u32 %s5861_s18, 1 }
  0x19   : > { %s5994_s25 = sadd.s32 %s5857_s17, %s4805_s24  ;;  %s10583_s22 = smov (%p46_p0, %s45_s22), 0 }
  0x1a   : > { %10063 = sst [smem:[#allocation20_spill]] %s10583_s22  ;;  %s10585_s23 = smov (!%p46_p0, %s48_s23), %s5861_s18 }
  0x1b   : > { %s112_s27 = sld [smem:[#allocation5 + %s5994_s25]]  ;;  %p126_p1 = scmp.ne.s32.totalorder %s5845_s14, %s5841_s13 }
  0x1c   : > { %p50_p2 = scmp.ge.s32.totalorder %s10585_s23, 2  ;;  %p127_p3 = scmp.eq.s32.totalorder %s5865_s19, 0 }
  0x1d   : > { %p132_p4 = scmp.ne.s32.totalorder %s5841_s13, %s5837_s12  ;;  %p133_p5 = scmp.eq.s32.totalorder %s9961_s20, 0 }
  0x1e   : > { %s10587_s23 = smov (%p50_p2, %s10585_s23), 0  ;;  %p6011_p6 = por %p127_p3, %p126_p1 }
  0x1f   : > { %10064 = sst [smem:[#allocation21_spill]] %s10587_s23  ;;  %p6015_p7 = por %p133_p5, %p132_p4 }
  0x20   : > { %s4806_s30 = sshll.u32 %s10587_s23, 1  ;;  %s144_s8 = sld [smem:[#allocation5 + %s5994_s25]] }
  0x21   : > { %s114_s12 = sadd.s32 %s4806_s30, %s10583_s22  ;;  %s148_s24 = ssub.s32 %s5861_s18, %s10587_s23 }
  0x22   : > { %s115_s26 = sld [smem:[#allocation5 + %s114_s12]]  ;;  %s153_s21 = sadd.s32 1, %s5833_s11 }
  0x23   : > { %s147_s20 = sld [smem:[#allocation5 + %s114_s12]]  ;;  %p160_p8 = scmp.ne.s32.totalorder %s5833_s11, %s5829_s1 }
  0x24   : > { %p198_p9 = scmp.eq.s32.totalorder %s148_s24, 0  ;;  %s200_s17 = sadd.s32 1, %s5825_s10 }
  0x25   : > { %p6030_p10 = por %p160_p8, %p127_p3  ;;  %p210_p11 = scmp.ne.s32.totalorder %s5825_s10, %s5821_s0 }
  0x26   : > { %s6037_s6 = scalar_select %p198_p9, %s5825_s10, %s200_s17  }
  0x27   : > { %s10069_s3 = sadd.s32 4294967295, %s5865_s19   ;;  %p216_p13 = scmp.ne.s32.totalorder %s5821_s0, %s5817_s9 }
  0x28   : > { %10068 = sst [smem:[#allocation22_spill]] %s6037_s6  ;;  %p211_p12 = scmp.eq.s32.totalorder %s10069_s3, 3 }
  0x29   : > { %s116_s30 = ssub.s32 %s112_s27, %s115_s26  ;;  %s10070_s23 = sadd.s32 4294967294, %s5865_s19  }
  0x2a   : > { %p217_p0 = scmp.eq.s32.totalorder %s10070_s23, 3  ;;  %p117_p1 = scmp.eq.s32.totalorder %s116_s30, 0 }
  0x2b   : > { %s149_s12 = ssub.s32 %s144_s8, %s147_s20  ;;  %p6045_p2 = por %p211_p12, %p210_p11 }
  0x2c   : > { %s150_s22 = sor.u32 %s149_s12, %s148_s24  ;;  %s10072_s15 = sadd.s32 1, %s5845_s14 }
  0x2d   : > { %s6052_s1 = scalar_select %p117_p1, %s5845_s14, %s10072_s15  }
  0x2e   : > { %p151_p3 = scmp.eq.s32.totalorder %s150_s22, 0  ;;  %p6054_p4 = por %p217_p0, %p216_p13 }
  0x2f   : > { %10073 = sst [smem:[#allocation23_spill]] %s6052_s1  ;;  %p4810_p5 = scmp.ge.s32.totalorder %s5865_s19, 4 }
  0x30   : > { %s6059_s3 = scalar_select %p151_p3, %s5833_s11, %s153_s21  }
  0x31   : > { %236 = sbr.rel (%p4810_p5) target bundleno = 106 (0x6a), region = 20  ;;  %s264_s20 = sand.u32 (!%p4810_p5), 1, %s5845_s14  }
  0x32   : > { %10075 = sst [smem:[#allocation24_spill]] %s6059_s3  ;;  %s4811_s23 = sshll.u32 (!%p4810_p5), %s264_s20, 7 }
  0x33   : > { %s268_s27 = scalar_lea.vmem (!%p4810_p5), [#allocation6], %s4811_s23  ;;  %s265_s3 = scalar_lea.sflag (!%p4810_p5), [#allocation7], %s264_s20 }
  0x34   : > { %s279_s8 = sshll.u32 (!%p4810_p5), %s268_s27, 4  ;;  %s5703_s23 = scalar_lea.hbm (!%p4810_p5), %s9956_s4, 256  ;;  %s280_s8 = int_to_ptr.vmem [resolvable:$true] %s279_s8 }
  0x36   : > { %s5115_s15 = scalar_select %p6011_p6, [#allocation5], [#allocation11] }
  0x37   : > { %s5116_s22 = scalar_select %p6011_p6, %s5994_s25, 0 }
  0x39   : > { %s271_s26 = sld [smem:[%s5115_s15 + %s5116_s22]] }
  0x3f   : > { %s5096_s24 = sshll.u32 %s271_s26, 7 }
  0x40   : > { %s276_s12 = scalar_lea.hbm %s9956_s4, %s5096_s24 }
  0x41   : > { %s277_s1 = sshll.u32 %s276_s12, 4  ;;  %s278_s1 = int_to_ptr.hbm [resolvable:$true] %s277_s1 }
  0x42   : > { %s5697_s6 = sshra.s32 %s278_s1, 4  ;;  %s5698_s6 = int_to_ptr.hbm [resolvable:$true] %s5697_s6 }
  0x43   : > { %s5699_s14 = scalar_lea.hbm %s5698_s6, 128  ;;  %p5704_p12 = scmp.lt.s32.totalorder %s5698_s6, %s9956_s4 }
  0x44   : > { %p5700_p8 = scmp.ne.s32.totalorder %s5698_s6, %s5699_s14  ;;  %p5705_p13 = scmp.lt.s32.totalorder %s5703_s23, %s5699_s14 }
  0x46   : > { %p5701_p9 = pnand %p5700_p8, %p6011_p6  ;;  %p5706_p0 = por %p5705_p13, %p5704_p12 }
  0x48   : > { %p5702_p11 = pneg %p5701_p9 }
  0x4a   : > { %p5707_p1 = pnand %p5706_p0, %p5702_p11 }
  0x4c   : > { %5710 = shalt.err (!%p5707_p1)
}
  0x4d   : > { %s5869_s20 = smov 64   ;;  %s5870_s27 = smov 4  }
  0x4e   : > { %5117 = dma.hbm_to_vmem [thread:$0]  (%p6011_p6), %s278_s1, 2048, %s280_s8, %s265_s3, %s5869_s20, %s5869_s20, %s5870_s27  }
  0x4f   : > { %288 = sbr.rel (!%p6030_p10) target bundleno = 106 (0x6a), region = 36  ;;  %s295_s10 = sld [smem:[#allocation5 + %s5994_s25]] (%p6030_p10) }
  0x50   : > { %s290_s24 = sand.u32 (%p6030_p10), 1, %s5833_s11   ;;  %s5097_s21 = sshll.u32 (%p6030_p10), %s5861_s18, 5 }
  0x51   : > { %s4815_s30 = sshll.u32 (%p6030_p10), %s290_s24, 7 }
  0x52   : > { %s292_s7 = scalar_lea.vmem (%p6030_p10), [#allocation9], %s4815_s30 }
  0x55   : > { %s4818_s6 = sshll.u32 %s295_s10, 1 }
  0x56   : > { %s299_s14 = sadd.s32 %s5097_s21, %s4818_s6 }
  0x57   : > { %s4820_s12 = sshll.u32 %s299_s14, 3 }
  0x58   : > { %s6089_s22 = scalar_lea.vmem %s9957_s5, %s4820_s12 }
  0x59   : > { %v314_v0 = vld [vmem:[%s6089_s22] sm:$0xff]  ;;  %v316_v1 = vld [vmem:[%s6089_s22 + $0x8] sm:$0xff] }
  0x5a   : > { %v318_v2 = vld [vmem:[%s6089_s22 + $0x20] sm:$0xff]  ;;  %315 = vst [vmem:[%s292_s7] sm:$0xff] %v314_v0  ;;  %v320_v3 = vld [vmem:[%s6089_s22 + $0x28] sm:$0xff] }
  0x5b   : > { %317 = vst [vmem:[%s292_s7 + $0x8] sm:$0xff] %v316_v1  ;;  %v322_v4 = vld [vmem:[%s6089_s22 + $0x40] sm:$0xff]  ;;  %v324_v5 = vld [vmem:[%s6089_s22 + $0x48] sm:$0xff] }
  0x5c   : > { %319 = vst [vmem:[%s292_s7 + $0x10] sm:$0xff] %v318_v2  ;;  %v326_v6 = vld [vmem:[%s6089_s22 + $0x60] sm:$0xff]  ;;  %v328_v7 = vld [vmem:[%s6089_s22 + $0x68] sm:$0xff] }
  0x5d   : > { %321 = vst [vmem:[%s292_s7 + $0x18] sm:$0xff] %v320_v3  ;;  %v330_v8 = vld [vmem:[%s6089_s22 + $0x80] sm:$0xff]  ;;  %v332_v9 = vld [vmem:[%s6089_s22 + $0x88] sm:$0xff] }
  0x5e   : > { %323 = vst [vmem:[%s292_s7 + $0x20] sm:$0xff] %v322_v4  ;;  %v334_v10 = vld [vmem:[%s6089_s22 + $0xa0] sm:$0xff]  ;;  %v336_v11 = vld [vmem:[%s6089_s22 + $0xa8] sm:$0xff] }
  0x5f   : > { %325 = vst [vmem:[%s292_s7 + $0x28] sm:$0xff] %v324_v5  ;;  %v338_v12 = vld [vmem:[%s6089_s22 + $0xc0] sm:$0xff]  ;;  %v340_v13 = vld [vmem:[%s6089_s22 + $0xc8] sm:$0xff] }
  0x60   : > { %327 = vst [vmem:[%s292_s7 + $0x30] sm:$0xff] %v326_v6  ;;  %v342_v14 = vld [vmem:[%s6089_s22 + $0xe0] sm:$0xff]  ;;  %v344_v15 = vld [vmem:[%s6089_s22 + $0xe8] sm:$0xff] }
  0x61   : > { %329 = vst [vmem:[%s292_s7 + $0x38] sm:$0xff] %v328_v7 }
  0x62   : > { %331 = vst [vmem:[%s292_s7 + $0x40] sm:$0xff] %v330_v8 }
  0x63   : > { %333 = vst [vmem:[%s292_s7 + $0x48] sm:$0xff] %v332_v9 }
  0x64   : > { %335 = vst [vmem:[%s292_s7 + $0x50] sm:$0xff] %v334_v10 }
  0x65   : > { %337 = vst [vmem:[%s292_s7 + $0x58] sm:$0xff] %v336_v11 }
  0x66   : > { %339 = vst [vmem:[%s292_s7 + $0x60] sm:$0xff] %v338_v12 }
  0x67   : > { %341 = vst [vmem:[%s292_s7 + $0x68] sm:$0xff] %v340_v13 }
  0x68   : > { %343 = vst [vmem:[%s292_s7 + $0x70] sm:$0xff] %v342_v14 }
  0x69   : > { %345 = vst [vmem:[%s292_s7 + $0x78] sm:$0xff] %v344_v15 }
  0x6a PF: > { %p4821_p6 = scmp.ge.s32.totalorder %s5865_s19, 1  ;;  %p350_p10 = scmp.lt.s32.totalorder %s5865_s19, 5 }
  0x6c   : > { %p351_p3 = pnand %p4821_p6, %p350_p10 }
  0x6d   : > { %s356_s1 = sand.u32 (!%p351_p3), 1, %s5841_s13  }
  0x6e   : > { %354 = sbr.rel (%p351_p3) target bundleno = 1299 (0x513), region = 59  ;;  %s4822_s25 = sshll.u32 (!%p351_p3), %s356_s1, 7 }
  0x6f   : > { %s357_s28 = scalar_lea.sflag (!%p351_p3), [#allocation7], %s356_s1  ;;  %s6110_s3 = scalar_lea.vmem (!%p351_p3), [#allocation6], %s4822_s25 }
  0x73   : > { %5808 = dma.done.wait (%p6015_p7), %s357_s28, 2048  }
  0x74   : > { %5810 = vsyncadd (%p6015_p7), %s357_s28, 4294965248  ;;  %s10076_s8 = sld [smem:[#allocation16_spill]]  ;;  %s4827_s20 = sshll.u32 %s5853_s16, 1 }
  0x75   : > { %s10077_s26 = sld [smem:[#allocation18_spill]]  ;;  %s9971_s30 = sand.u32 1, %s5821_s0  }
  0x76   : > { %s4825_s6 = sshll.u32 %s5853_s16, 5  ;;  %s4824_s14 = sshll.u32 %s9971_s30, 8 }
  0x77   : > { %p413_p5 = scmp.lt.s32.totalorder %s4825_s6, 63  ;;  %s10078_s22 = sld [smem:[#allocation137_spill]] }
  0x78   : > { %s6138_s30 = scalar_lea.vmem [#allocation10], %s4824_s14 }
  0x79   : > { %s10589_s6 = smov (!%p413_p5, %s4825_s6), 63 }
  0x7a   : > { %s367_s27 = sand.u32 1, %s10076_s8   ;;  %s4826_s12 = sshll.u32 %s10589_s6, 3 }
  0x7b   : > { %s6119_s10 = sadd.s32 %s10077_s26, %s4827_s20  ;;  %s4823_s24 = sshll.u32 %s367_s27, 7 }
  0x7c   : > { %s420_s21 = sld [smem:[#allocation5 + %s6119_s10]]  ;;  %s6136_s27 = scalar_lea.vmem [#allocation9], %s4823_s24 }
  0x7d   : > { %s6129_s7 = scalar_lea.vmem %s10078_s22, %s4826_s12  ;;  %s10079_s8 = sld [smem:[#allocation138_spill]] }
  0x7e   : > { %p4830_p8 = scmp.ne.s32.totalorder %s10077_s26, 0 }
  0x82   : > { %s4828_s29 = sshll.u32 %s420_s21, 1 }
  0x83   : > { %p422_p7 = scmp.lt.s32.totalorder %s4828_s29, 3  ;;  %443 = sbr.rel (%p4830_p8) target bundleno = 201 (0xc9), region = 71 }
  0x85   : > { %s10591_s29 = smov (!%p422_p7, %s4828_s29), 3 }
  0x86   : > { %s4829_s1 = sshll.u32 %s10591_s29, 1 }
  0x87   : > { %s6134_s20 = scalar_lea.vmem %s10079_s8, %s4829_s1 }
  0x88   : > { %v5871_v16 = vmov 0.0  }
  0x89   : > { %444 = vst [vmem:[#allocation2 + $0xb0] sm:$0xff] %v5871_v16 }
  0x8a   : > { %445 = vst [vmem:[#allocation2 + $0x1b0] sm:$0xff] %v5871_v16 }
  0x8b   : > { %446 = vst [vmem:[#allocation2 + $0xd8] sm:$0xff] %v5871_v16 }
  0x8c   : > { %447 = vst [vmem:[#allocation2 + $0x18] sm:$0xff] %v5871_v16 }
  0x8d   : > { %448 = vst [vmem:[#allocation2 + $0x50] sm:$0xff] %v5871_v16 }
  0x8e   : > { %449 = vst [vmem:[#allocation2 + $0x168] sm:$0xff] %v5871_v16 }
  0x8f   : > { %450 = vst [vmem:[#allocation2 + $0x130] sm:$0xff] %v5871_v16 }
  0x90   : > { %451 = vst [vmem:[#allocation2 + $0x48] sm:$0xff] %v5871_v16 }
  0x91   : > { %452 = vst [vmem:[#allocation2 + $0x180] sm:$0xff] %v5871_v16 }
  0x92   : > { %453 = vst [vmem:[#allocation2 + $0x110] sm:$0xff] %v5871_v16 }
  0x93   : > { %454 = vst [vmem:[#allocation2 + $0x118] sm:$0xff] %v5871_v16 }
  0x94   : > { %455 = vst [vmem:[#allocation2 + $0x98] sm:$0xff] %v5871_v16 }
  0x95   : > { %456 = vst [vmem:[#allocation2 + $0x120] sm:$0xff] %v5871_v16 }
  0x96   : > { %457 = vst [vmem:[#allocation2 + $0x150] sm:$0xff] %v5871_v16 }
  0x97   : > { %458 = vst [vmem:[#allocation2 + $0x108] sm:$0xff] %v5871_v16 }
  0x98   : > { %459 = vst [vmem:[#allocation2 + $0x60] sm:$0xff] %v5871_v16 }
  0x99   : > { %460 = vst [vmem:[#allocation2 + $0xe0] sm:$0xff] %v5871_v16 }
  0x9a   : > { %461 = vst [vmem:[#allocation2 + $0x188] sm:$0xff] %v5871_v16 }
  0x9b   : > { %462 = vst [vmem:[#allocation2 + $0x138] sm:$0xff] %v5871_v16 }
  0x9c   : > { %463 = vst [vmem:[#allocation2 + $0x140] sm:$0xff] %v5871_v16 }
  0x9d   : > { %464 = vst [vmem:[#allocation2 + $0x80] sm:$0xff] %v5871_v16 }
  0x9e   : > { %465 = vst [vmem:[#allocation2 + $0x1a8] sm:$0xff] %v5871_v16 }
  0x9f   : > { %466 = vst [vmem:[#allocation2 + $0x1b8] sm:$0xff] %v5871_v16 }
  0xa0   : > { %467 = vst [vmem:[#allocation2 + $0x28] sm:$0xff] %v5871_v16 }
  0xa1   : > { %468 = vst [vmem:[#allocation2 + $0x1e8] sm:$0xff] %v5871_v16 }
  0xa2   : > { %469 = vst [vmem:[#allocation2 + $0xf8] sm:$0xff] %v5871_v16 }
  0xa3   : > { %470 = vst [vmem:[#allocation2 + $0x160] sm:$0xff] %v5871_v16 }
  0xa4   : > { %471 = vst [vmem:[#allocation2 + $0x30] sm:$0xff] %v5871_v16 }
  0xa5   : > { %472 = vst [vmem:[#allocation2 + $0x1e0] sm:$0xff] %v5871_v16 }
  0xa6   : > { %473 = vst [vmem:[#allocation2] sm:$0xff] %v5871_v16 }
  0xa7   : > { %474 = vst [vmem:[#allocation2 + $0xf0] sm:$0xff] %v5871_v16 }
  0xa8   : > { %475 = vst [vmem:[#allocation2 + $0x8] sm:$0xff] %v5871_v16 }
  0xa9   : > { %476 = vst [vmem:[#allocation2 + $0x148] sm:$0xff] %v5871_v16 }
  0xaa   : > { %477 = vst [vmem:[#allocation2 + $0x1d0] sm:$0xff] %v5871_v16 }
  0xab   : > { %478 = vst [vmem:[#allocation2 + $0x100] sm:$0xff] %v5871_v16 }
  0xac   : > { %479 = vst [vmem:[#allocation2 + $0xc8] sm:$0xff] %v5871_v16 }
  0xad   : > { %480 = vst [vmem:[#allocation2 + $0x40] sm:$0xff] %v5871_v16 }
  0xae   : > { %481 = vst [vmem:[#allocation2 + $0x1f8] sm:$0xff] %v5871_v16 }
  0xaf   : > { %482 = vst [vmem:[#allocation2 + $0x20] sm:$0xff] %v5871_v16 }
  0xb0   : > { %483 = vst [vmem:[#allocation2 + $0x128] sm:$0xff] %v5871_v16 }
  0xb1   : > { %484 = vst [vmem:[#allocation2 + $0x1a0] sm:$0xff] %v5871_v16 }
  0xb2   : > { %485 = vst [vmem:[#allocation2 + $0x1f0] sm:$0xff] %v5871_v16 }
  0xb3   : > { %486 = vst [vmem:[#allocation2 + $0xe8] sm:$0xff] %v5871_v16 }
  0xb4   : > { %487 = vst [vmem:[#allocation2 + $0x78] sm:$0xff] %v5871_v16 }
  0xb5   : > { %488 = vst [vmem:[#allocation2 + $0x70] sm:$0xff] %v5871_v16 }
  0xb6   : > { %489 = vst [vmem:[#allocation2 + $0x90] sm:$0xff] %v5871_v16 }
  0xb7   : > { %490 = vst [vmem:[#allocation2 + $0x1d8] sm:$0xff] %v5871_v16 }
  0xb8   : > { %491 = vst [vmem:[#allocation2 + $0xd0] sm:$0xff] %v5871_v16 }
  0xb9   : > { %492 = vst [vmem:[#allocation2 + $0xb8] sm:$0xff] %v5871_v16 }
  0xba   : > { %493 = vst [vmem:[#allocation2 + $0x88] sm:$0xff] %v5871_v16 }
  0xbb   : > { %494 = vst [vmem:[#allocation2 + $0xa8] sm:$0xff] %v5871_v16 }
  0xbc   : > { %495 = vst [vmem:[#allocation2 + $0x1c8] sm:$0xff] %v5871_v16 }
  0xbd   : > { %496 = vst [vmem:[#allocation2 + $0x170] sm:$0xff] %v5871_v16 }
  0xbe   : > { %497 = vst [vmem:[#allocation2 + $0x178] sm:$0xff] %v5871_v16 }
  0xbf   : > { %498 = vst [vmem:[#allocation2 + $0x68] sm:$0xff] %v5871_v16 }
  0xc0   : > { %499 = vst [vmem:[#allocation2 + $0x190] sm:$0xff] %v5871_v16 }
  0xc1   : > { %500 = vst [vmem:[#allocation2 + $0x198] sm:$0xff] %v5871_v16 }
  0xc2   : > { %501 = vst [vmem:[#allocation2 + $0x38] sm:$0xff] %v5871_v16 }
  0xc3   : > { %502 = vst [vmem:[#allocation2 + $0xc0] sm:$0xff] %v5871_v16 }
  0xc4   : > { %503 = vst [vmem:[#allocation2 + $0x1c0] sm:$0xff] %v5871_v16 }
  0xc5   : > { %504 = vst [vmem:[#allocation2 + $0x158] sm:$0xff] %v5871_v16 }
  0xc6   : > { %505 = vst [vmem:[#allocation2 + $0x10] sm:$0xff] %v5871_v16 }
  0xc7   : > { %506 = vst [vmem:[#allocation2 + $0x58] sm:$0xff] %v5871_v16 }
  0xc8   : > { %507 = vst [vmem:[#allocation2 + $0xa0] sm:$0xff] %v5871_v16 }
  0xc9 PF: > { %s510_s26 = sld [smem:[#allocation4 + %s6119_s10]] }
  0xcf   : > { %p4832_p9 = scmp.le.s32.totalorder %s510_s26, 0 }
  0xd1   : > { %514 = sbr.rel (%p4832_p9) target bundleno = 812 (0x32c), region = 75 }
  0xd6   : > { %v1931_v17 = vld [vmem:[%s6129_s7] sm:$0xff]  ;;  %v5872_v18 = vmov 1   ;;  %v5873_v19 = vmov 0   ;;  %v757_v20 = vld [vmem:[%s6129_s7 + $0x10] sm:$0xff]  ;;  %v1932_v21 = vld [vmem:[%s6129_s7 + $0x8] sm:$0xff] }
  0xd7   : > { %5242 = vset.pattern.permute.xlu0 %v5872_v18  ;;  %5243 = vset.pattern.permute.xlu1 %v5873_v19  ;;  %v758_v22 = vld [vmem:[%s6129_s7 + $0x18] sm:$0xff]  ;;  %v1935_v23 = vld [vmem:[%s6129_s7 + $0x20] sm:$0xff]  ;;  %v760_v24 = vld [vmem:[%s6129_s7 + $0x28] sm:$0xff] }
  0xd8   : > { %1967 = vperm.xlu0 %5242, %v1931_v17   ;;  %790 = vperm.xlu1 %5243, %v1931_v17   ;;  %v761_v25 = vld [vmem:[%s6129_s7 + $0x30] sm:$0xff]  ;;  %v762_v26 = vld [vmem:[%s6129_s7 + $0x38] sm:$0xff]  ;;  %v1940_v27 = vld [vmem:[%s6129_s7 + $0x48] sm:$0xff] }
  0xd9   : > { %5244 = vset.pattern.permute.xlu2 %v5872_v18  ;;  %v763_v28 = vld [vmem:[%s6129_s7 + $0x40] sm:$0xff]  ;;  %v1941_v29 = vld [vmem:[%s6129_s7 + $0x50] sm:$0xff]  ;;  %v1944_v30 = vld [vmem:[%s6129_s7 + $0x68] sm:$0xff] }
  0xda   : > { %1977 = vperm.xlu2 %5244, %v757_v20   ;;  %v766_v31 = vld [vmem:[%s6129_s7 + $0x58] sm:$0xff]  ;;  %v1945_v32 = vld [vmem:[%s6129_s7 + $0x70] sm:$0xff]  ;;  %v1943_v33 = vld [vmem:[%s6129_s7 + $0x60] sm:$0xff] }
  0xdb   : > { %v5105_v34 = vld [vmem:[%s6110_s3 + $0x38] sm:$0xff]  ;;  %v5104_v36 = vld [vmem:[%s6110_s3 + $0x30] sm:$0xff]  ;;  %v6243_v38 = vld [vmem:[%s6129_s7 + $0x88] sm:$0xff] }
  0xdc   : > { %v5113_v35 = vld [vmem:[%s6110_s3 + $0x78] sm:$0xff]  ;;  %1689 = vmatpush.bf16.msra.mxu0 %v5105_v34  ;;  %2771 = vmatpush.bf16.msra.mxu2 %v5105_v34  ;;  %v5112_v37 = vld [vmem:[%s6110_s3 + $0x70] sm:$0xff]  ;;  %v5103_v39 = vld [vmem:[%s6110_s3 + $0x28] sm:$0xff] }
  0xdd   : > { %1778 = vmatpush.bf16.msra.mxu1 %v5113_v35  ;;  %2860 = vmatpush.bf16.msra.mxu3 %v5113_v35  ;;  %v5111_v40 = vld [vmem:[%s6110_s3 + $0x68] sm:$0xff]  ;;  %v770_v41 = vld [vmem:[%s6129_s7 + $0x78] sm:$0xff]  ;;  %v4993_v42 = vld [vmem:[%s6134_s20 + $0x1] ss:$2 sm:$0x3] }
  0xde   : > { %v6251_v43 = vperm.slane %v4993_v42, 0  ;;  %v6253_v44 = vperm.slane %v4993_v42, 1  ;;  %v5102_v47 = vld [vmem:[%s6110_s3 + $0x20] sm:$0xff]  ;;  %v1949_v52 = vld [vmem:[%s6129_s7 + $0x90] sm:$0xff]  ;;  %v5101_v53 = vld [vmem:[%s6110_s3 + $0x18] sm:$0xff] }
  0xdf   : > { %v5110_v48 = vld [vmem:[%s6110_s3 + $0x60] sm:$0xff]  ;;  %v5109_v54 = vld [vmem:[%s6110_s3 + $0x58] sm:$0xff]  ;;  %v5100_v60 = vld [vmem:[%s6110_s3 + $0x10] sm:$0xff] }
  0xe0   : > { %1972 = vperm.xlu0 %5242, %v1932_v21   ;;  %795 = vperm.xlu1 %5243, %v1932_v21   ;;  %v771_v50 = vld [vmem:[%s6129_s7 + $0x80] sm:$0xff]  ;;  %v5108_v61 = vld [vmem:[%s6110_s3 + $0x50] sm:$0xff]  ;;  %v5099_v4 = vld [vmem:[%s6110_s3 + $0x8] sm:$0xff] }
  0xe1   : > { %1690 = vmatpush.bf16.msra.mxu0 %v5104_v36  ;;  %1779 = vmatpush.bf16.msra.mxu1 %v5112_v37  ;;  %v5107_v5 = vld [vmem:[%s6110_s3 + $0x48] sm:$0xff]  ;;  %v6272_v6 = vld [vmem:[%s6136_s27] sm:$0xff] }
  0xe2   : > { %1982 = vperm.xlu2 %5244, %v758_v22   ;;  %2772 = vmatpush.bf16.msra.mxu2 %v5104_v36  ;;  %v6276_v9 = vld [vmem:[%s6136_s27 + $0x8] sm:$0xff]  ;;  %v787_v10 = vld [vmem:[%s6134_s20] ss:$2 sm:$0x3]  ;;  %v563_v14 = vunpack.c.0.s8 %v6272_v6 }
  0xe3   : > { %2861 = vmatpush.bf16.msra.mxu3 %v5112_v37  ;;  %v5098_v21 = vld [vmem:[%s6110_s3] sm:$0xff] }
  0xe5   : > { %1691 = vmatpush.bf16.msra.mxu0 %v5103_v39  ;;  %1780 = vmatpush.bf16.msra.mxu1 %v5111_v40 }
  0xe6   : > { %2773 = vmatpush.bf16.msra.mxu2 %v5103_v39  ;;  %v566_v39 = vunpack.c.1.s8 %v6276_v9 }
  0xe7   : > { %2862 = vmatpush.bf16.msra.mxu3 %v5111_v40 }
  0xe8   : > { %5245 = vset.pattern.permute.xlu0 %v5873_v19  ;;  %805 = vperm.xlu1 %5243, %v758_v22   ;;  %v5106_v22 = vld [vmem:[%s6110_s3 + $0x40] sm:$0xff] }
  0xe9   : > { %800 = vperm.xlu0 %5245, %v757_v20   ;;  %1692 = vmatpush.bf16.msra.mxu0 %v5102_v47  ;;  %v6284_v20 = vld [vmem:[%s6129_s7 + $0xa8] sm:$0xff] }
  0xea   : > { %1987 = vperm.xlu2 %5244, %v1935_v23   ;;  %1781 = vmatpush.bf16.msra.mxu1 %v5110_v48 }
  0xeb   : > { %2774 = vmatpush.bf16.msra.mxu2 %v5102_v47  ;;  %2863 = vmatpush.bf16.msra.mxu3 %v5110_v48 }
  0xed   : > { %1693 = vmatpush.bf16.msra.mxu0 %v5101_v53 }
  0xee   : > { %1782 = vmatpush.bf16.msra.mxu1 %v5109_v54 }
  0xef   : > { %2775 = vmatpush.bf16.msra.mxu2 %v5101_v53  ;;  %2864 = vmatpush.bf16.msra.mxu3 %v5109_v54 }
  0xf0   : > { %5246 = vset.pattern.permute.xlu1 %v5872_v18 }
  0xf1   : > { %815 = vperm.xlu0 %5245, %v760_v24   ;;  %1992 = vperm.xlu1 %5246, %v760_v24   ;;  %v6289_v24 = vperm.slane %v787_v10, 0 }
  0xf2   : > { %5247 = vset.pattern.permute.xlu2 %v5873_v19  ;;  %1694 = vmatpush.bf16.msra.mxu0 %v5100_v60 }
  0xf3   : > { %810 = vperm.xlu2 %5247, %v1935_v23   ;;  %1783 = vmatpush.bf16.msra.mxu1 %v5108_v61  ;;  %v564_v23 = vunpack.c.0.s8 %v6276_v9 }
  0xf4   : > { %2776 = vmatpush.bf16.msra.mxu2 %v5100_v60  ;;  %2865 = vmatpush.bf16.msra.mxu3 %v5108_v61 }
  0xf6   : > { %1695 = vmatpush.bf16.msra.mxu0 %v5099_v4 }
  0xf7   : > { %1784 = vmatpush.bf16.msra.mxu1 %v5107_v5 }
  0xf8   : > { %2777 = vmatpush.bf16.msra.mxu2 %v5099_v4  ;;  %2866 = vmatpush.bf16.msra.mxu3 %v5107_v5 }
  0xf9   : > { %820 = vperm.xlu0 %5245, %v761_v25   ;;  %1997 = vperm.xlu1 %5246, %v761_v25  }
  0xfa   : > { %1696 = vmatpush.bf16.msra.mxu0 %v5098_v21 }
  0xfb   : > { %5248 = vset.pattern.permute.xlu2 %v5872_v18  ;;  %1785 = vmatpush.bf16.msra.mxu1 %v5106_v22 }
  0xfc   : > { %2002 = vperm.xlu2 %5248, %v762_v26   ;;  %2778 = vmatpush.bf16.msra.mxu2 %v5098_v21 }
  0xfd   : > { %2867 = vmatpush.bf16.msra.mxu3 %v5106_v22 }
 0x101   : > { %5249 = vset.pattern.permute.xlu1 %v5873_v19  ;;  %5250 = vset.pattern.permute.xlu0 %v5872_v18 }
 0x102   : > { %825 = vperm.xlu1 %5249, %v762_v26   ;;  %2012 = vperm.xlu0 %5250, %v1940_v27   ;;  %v6293_v26 = vperm.slane %v787_v10, 1 }
 0x104   : > { %2007 = vperm.xlu2 %5248, %v763_v28  }
 0x10a   : > { %830 = vperm.xlu1 %5249, %v763_v28   ;;  %5254 = vset.pattern.permute.xlu0 %v5873_v19 }
 0x10b   : > { %840 = vperm.xlu0 %5254, %v1941_v29  }
 0x10c   : > { %5251 = vset.pattern.permute.xlu2 %v5873_v19 }
 0x10d   : > { %835 = vperm.xlu2 %5251, %v1940_v27  }
 0x112   : > { %5252 = vset.pattern.permute.xlu1 %v5872_v18 }
 0x113   : > { %2017 = vperm.xlu1 %5252, %v1941_v29   ;;  %855 = vperm.xlu0 %5254, %v1944_v30  }
 0x115   : > { %5253 = vset.pattern.permute.xlu2 %v5872_v18 }
 0x116   : > { %2022 = vperm.xlu2 %5253, %v766_v31  }
 0x11b   : > { %5255 = vset.pattern.permute.xlu1 %v5873_v19  ;;  %860 = vperm.xlu0 %5254, %v1945_v32  }
 0x11c   : > { %845 = vperm.xlu1 %5255, %v766_v31  }
 0x11e   : > { %2027 = vperm.xlu2 %5253, %v1943_v33  }
 0x123   : > { %5260 = vset.pattern.permute.xlu0 %v5872_v18 }
 0x124   : > { %5256 = vset.pattern.permute.xlu1 %v5872_v18  ;;  %2052 = vperm.xlu0 %5260, %v6243_v38  }
 0x125   : > { %2032 = vperm.xlu1 %5256, %v1944_v30   ;;  %v565_v30 = vunpack.c.1.s8 %v6272_v6 }
 0x126   : > { %5257 = vset.pattern.permute.xlu2 %v5873_v19 }
 0x127   : > { %850 = vperm.xlu2 %5257, %v1943_v33   ;;  %v6298_v33 = vcvt.s32.f32 %v564_v23  ;;  %v6308_v48 = vcvt.s32.f32 %v565_v30 }
 0x12c   : > { %5264 = vset.pattern.permute.xlu0 %v5873_v19 }
 0x12d   : > { %2037 = vperm.xlu1 %5256, %v1945_v32   ;;  %880 = vperm.xlu0 %5264, %v1949_v52   ;;  %v6296_v32 = vcvt.s32.f32 %v563_v14 }
 0x12f   : > { %5258 = vset.pattern.permute.xlu2 %v5872_v18 }
 0x130   : > { %2042 = vperm.xlu2 %5258, %v770_v41  }
 0x134   : > { %v1978_v45 = vpop.permute.xlu2 %1977 }
 0x135   : > { %5259 = vset.pattern.permute.xlu1 %v5873_v19  ;;  %v2134_v46 = vadd.f32 %v6251_v43, %v1978_v45  ;;  %v2135_v49 = vadd.f32 %v6253_v44, %v1978_v45  ;;  %895 = vperm.xlu0 %5264, %v6284_v20  }
 0x136   : > { %865 = vperm.xlu1 %5259, %v770_v41  }
 0x137   : > { %v2262_v51 = vmul.f32 0.2, %v2134_v46  ;;  %vm2198_vm0 = vcmp.ge.f32.partialorder %v2134_v46, 0.0  ;;  %v2263_v55 = vmul.f32 0.2, %v2135_v49  ;;  %vm2199_vm1 = vcmp.ge.f32.partialorder %v2135_v49, 0.0 }
 0x138   : > { %2047 = vperm.xlu2 %5258, %v771_v50  }
 0x139   : > { %v2326_v57 = vsel %vm2198_vm0, %v2134_v46, %v2262_v51  ;;  %v2327_v62 = vsel %vm2199_vm1, %v2135_v49, %v2263_v55 }
 0x13a   : > { %v2390_v0 = vsub.f32 0.0, %v2326_v57  ;;  %v2391_v2 = vsub.f32 0.0, %v2327_v62 }
 0x13c   : > { %v1983_v56 = vpop.permute.xlu2 %1982  ;;  %v2458_v11 = vmul.f32 1.442695, %v2390_v0  ;;  %v2460_v15 = vmul.f32 1.442695, %v2391_v2 }
 0x13d   : > { %v2136_v58 = vadd.f32 %v6251_v43, %v1983_v56  ;;  %v2137_v59 = vadd.f32 %v6253_v44, %v1983_v56 }
 0x13e   : > { %870 = vperm.xlu1 %5259, %v771_v50   ;;  %5281 = vpow2.f32 %v2458_v11 }
 0x13f   : > { %vm2200_vm2 = vcmp.ge.f32.partialorder %v2136_v58, 0.0  ;;  %vm2201_vm3 = vcmp.ge.f32.partialorder %v2137_v59, 0.0  ;;  %v2264_v63 = vmul.f32 0.2, %v2136_v58  ;;  %v2265_v1 = vmul.f32 0.2, %v2137_v59 }
 0x140   : > { %5261 = vset.pattern.permute.xlu2 %v5873_v19  ;;  %5283 = vpow2.f32 %v2460_v15 }
 0x141   : > { %v2328_v3 = vsel %vm2200_vm2, %v2136_v58, %v2264_v63  ;;  %v2329_v7 = vsel %vm2201_vm3, %v2137_v59, %v2265_v1  ;;  %875 = vperm.xlu2 %5261, %v6243_v38   ;;  %v774_v38 = vld [vmem:[%s6129_s7 + $0x98] sm:$0xff]  ;;  %v6315_v59 = vcvt.s32.f32 %v566_v39  ;;  %vm691_vm3 = vcmp.gt.f32.partialorder %v6296_v32, 0.0 }
 0x142   : > { %v2392_v8 = vsub.f32 0.0, %v2328_v3  ;;  %v2393_v12 = vsub.f32 0.0, %v2329_v7 }
 0x144   : > { %v1988_v13 = vpop.permute.xlu2 %1987  ;;  %v2462_v25 = vmul.f32 1.442695, %v2392_v8  ;;  %v2464_v28 = vmul.f32 1.442695, %v2393_v12  ;;  %v6310_v51 = vpop.eup %5281 }
 0x145   : > { %v2138_v16 = vadd.f32 %v6251_v43, %v1988_v13  ;;  %v2139_v17 = vadd.f32 %v6253_v44, %v1988_v13 }
 0x146   : > { %5262 = vset.pattern.permute.xlu1 %v5872_v18  ;;  %5285 = vpow2.f32 %v2462_v25  ;;  %v6312_v55 = vpop.eup %5283 }
 0x147   : > { %2057 = vperm.xlu1 %5262, %v1949_v52   ;;  %vm2202_vm4 = vcmp.ge.f32.partialorder %v2138_v16, 0.0  ;;  %vm2203_vm5 = vcmp.ge.f32.partialorder %v2139_v17, 0.0  ;;  %v2266_v27 = vmul.f32 0.2, %v2138_v16  ;;  %v2267_v29 = vmul.f32 0.2, %v2139_v17 }
 0x148   : > { %5287 = vpow2.f32 %v2464_v28 }
 0x149   : > { %v2330_v31 = vsel %vm2202_vm4, %v2138_v16, %v2266_v27  ;;  %v2331_v36 = vsel %vm2203_vm5, %v2139_v17, %v2267_v29  ;;  %5263 = vset.pattern.permute.xlu2 %v5872_v18  ;;  %vm693_vm4 = vcmp.gt.f32.partialorder %v6308_v48, 0.0 }
 0x14a   : > { %v1968_v34 = vpop.permute.xlu0 %1967  ;;  %v791_v35 = vpop.permute.xlu1 %790  ;;  %v2394_v37 = vsub.f32 0.0, %v2330_v31  ;;  %2062 = vperm.xlu2 %5263, %v774_v38   ;;  %v2395_v46 = vsub.f32 0.0, %v2331_v36 }
 0x14b   : > { %v2130_v40 = vadd.f32 %v6251_v43, %v1968_v34  ;;  %v2131_v41 = vadd.f32 %v6253_v44, %v1968_v34  ;;  %v953_v42 = vadd.f32 %v6289_v24, %v791_v35  ;;  %v954_v45 = vadd.f32 %v6293_v26, %v791_v35  ;;  %v1953_v35 = vld [vmem:[%s6129_s7 + $0xb0] sm:$0xff] }
 0x14c   : > { %v2466_v47 = vmul.f32 1.442695, %v2394_v37  ;;  %v2468_v58 = vmul.f32 1.442695, %v2395_v46  ;;  %v6317_v60 = vpop.eup %5285  ;;  %900 = vperm.xlu0 %5264, %v1953_v35  }
 0x14d   : > { %vm2194_vm6 = vcmp.ge.f32.partialorder %v2130_v40, 0.0  ;;  %vm2195_vm7 = vcmp.ge.f32.partialorder %v2131_v41, 0.0  ;;  %v2258_v49 = vmul.f32 0.2, %v2130_v40  ;;  %v2259_v50 = vmul.f32 0.2, %v2131_v41  ;;  %v811_v54 = vpop.permute.xlu2 %810 }
 0x14e   : > { %vm1017_vm8 = vcmp.ge.f32.partialorder %v953_v42, 0.0  ;;  %vm1018_vm9 = vcmp.ge.f32.partialorder %v954_v45, 0.0  ;;  %v1081_v52 = vmul.f32 0.2, %v953_v42  ;;  %v1082_v53 = vmul.f32 0.2, %v954_v45  ;;  %v6320_v4 = vpop.eup %5287 }
 0x14f   : > { %v2322_v56 = vsel %vm2194_vm6, %v2130_v40, %v2258_v49  ;;  %v2323_v57 = vsel %vm2195_vm7, %v2131_v41, %v2259_v50  ;;  %5265 = vset.pattern.permute.xlu1 %v5873_v19  ;;  %5289 = vpow2.f32 %v2466_v47  ;;  %v961_v3 = vadd.f32 %v6289_v24, %v811_v54 }
 0x150   : > { %v2386_v61 = vsub.f32 0.0, %v2322_v56  ;;  %v2387_v62 = vsub.f32 0.0, %v2323_v57  ;;  %v1145_v63 = vsel %vm1017_vm8, %v953_v42, %v1081_v52  ;;  %v1146_v0 = vsel %vm1018_vm9, %v954_v45, %v1082_v53  ;;  %885 = vperm.xlu1 %5265, %v774_v38  }
 0x151   : > { %v1209_v1 = vsub.f32 0.0, %v1145_v63  ;;  %v1210_v2 = vsub.f32 0.0, %v1146_v0  ;;  %5291 = vpow2.f32 %v2468_v58  ;;  %v962_v11 = vadd.f32 %v6293_v26, %v811_v54 }
 0x152   : > { %v2450_v5 = vmul.f32 1.442695, %v2386_v61  ;;  %v2452_v7 = vmul.f32 1.442695, %v2387_v62  ;;  %v1973_v8 = vpop.permute.xlu0 %1972  ;;  %v796_v10 = vpop.permute.xlu1 %795  ;;  %vm1025_vm10 = vcmp.ge.f32.partialorder %v961_v3, 0.0  ;;  %vm692_vm6 = vcmp.gt.f32.partialorder %v6298_v33, 0.0 }
 0x153   : > { %v1273_v12 = vmul.f32 1.442695, %v1209_v1  ;;  %v1275_v13 = vmul.f32 1.442695, %v1210_v2  ;;  %v2132_v14 = vadd.f32 %v6251_v43, %v1973_v8  ;;  %v2133_v15 = vadd.f32 %v6253_v44, %v1973_v8 }
 0x154   : > { %5293 = vpow2.f32 %v2450_v5  ;;  %v955_v16 = vadd.f32 %v6289_v24, %v796_v10  ;;  %v956_v17 = vadd.f32 %v6293_v26, %v796_v10  ;;  %vm1026_vm15 = vcmp.ge.f32.partialorder %v962_v11, 0.0  ;;  %5270 = vset.pattern.permute.xlu0 %v5872_v18 }
 0x155   : > { %5295 = vpow2.f32 %v2452_v7  ;;  %vm2196_vm11 = vcmp.ge.f32.partialorder %v2132_v14, 0.0  ;;  %vm2197_vm12 = vcmp.ge.f32.partialorder %v2133_v15, 0.0  ;;  %v2260_v21 = vmul.f32 0.2, %v2132_v14  ;;  %v6327_v23 = vpop.eup %5289 }
 0x156   : > { %5297 = vpow2.f32 %v1273_v12  ;;  %v2261_v22 = vmul.f32 0.2, %v2133_v15  ;;  %vm1019_vm13 = vcmp.ge.f32.partialorder %v955_v16, 0.0  ;;  %vm1020_vm14 = vcmp.ge.f32.partialorder %v956_v17, 0.0 }
 0x157   : > { %5299 = vpow2.f32 %v1275_v13  ;;  %v2324_v25 = vsel %vm2196_vm11, %v2132_v14, %v2260_v21  ;;  %v1083_v27 = vmul.f32 0.2, %v955_v16  ;;  %v1084_v28 = vmul.f32 0.2, %v956_v17  ;;  %v6329_v29 = vpop.eup %5291 }
 0x158   : > { %v2325_v30 = vsel %vm2197_vm12, %v2133_v15, %v2261_v22  ;;  %v2388_v31 = vsub.f32 0.0, %v2324_v25  ;;  %5266 = vset.pattern.permute.xlu1 %v5872_v18  ;;  %v1089_v34 = vmul.f32 0.2, %v961_v3  ;;  %v1090_v39 = vmul.f32 0.2, %v962_v11  ;;  %vm6373_vm12 = vmpackc.low %vm693_vm4, %vm691_vm3 }
 0x159   : > { %v2389_v36 = vsub.f32 0.0, %v2325_v30  ;;  %v1147_v37 = vsel %vm1019_vm13, %v955_v16, %v1083_v27  ;;  %v1148_v38 = vsel %vm1020_vm14, %v956_v17, %v1084_v28  ;;  %2072 = vperm.xlu1 %5266, %v6284_v20   ;;  %vm694_vm7 = vcmp.gt.f32.partialorder %v6315_v59, 0.0 }
 0x15a   : > { %v6334_v40 = vpop.eup %5293  ;;  %v2454_v41 = vmul.f32 1.442695, %v2388_v31  ;;  %v1211_v42 = vsub.f32 0.0, %v1147_v37  ;;  %v1212_v45 = vsub.f32 0.0, %v1148_v38  ;;  %v806_v46 = vpop.permute.xlu1 %805  ;;  %v1153_v47 = vsel %vm1025_vm10, %v961_v3, %v1089_v34  ;;  %vm6385_vm13 = vmpackc.low %vm694_vm7, %vm692_vm6 }
 0x15b   : > { %v6337_v49 = vpop.eup %5295  ;;  %v2456_v50 = vmul.f32 1.442695, %v2389_v36  ;;  %v959_v52 = vadd.f32 %v6289_v24, %v806_v46  ;;  %v960_v53 = vadd.f32 %v6293_v26, %v806_v46  ;;  %v801_v54 = vpop.permute.xlu0 %800  ;;  %v1154_v20 = vsel %vm1026_vm15, %v962_v11, %v1090_v39 }
 0x15c   : > { %v5298_v56 = vpop.eup %5297  ;;  %5301 = vpow2.f32 %v2454_v41  ;;  %v1277_v57 = vmul.f32 1.442695, %v1211_v42  ;;  %v1279_v58 = vmul.f32 1.442695, %v1212_v45  ;;  %v957_v61 = vadd.f32 %v6289_v24, %v801_v54 }
 0x15d   : > { %v6343_v62 = vpop.eup %5299  ;;  %5303 = vpow2.f32 %v2456_v50  ;;  %vm1023_vm0 = vcmp.ge.f32.partialorder %v959_v52, 0.0  ;;  %vm1024_vm1 = vcmp.ge.f32.partialorder %v960_v53, 0.0  ;;  %v1087_v63 = vmul.f32 0.2, %v959_v52  ;;  %v6359_v50 = vld [vmem:[%s6129_s7 + $0xb8] sm:$0xff] }
 0x15e   : > { %5305 = vpow2.f32 %v1277_v57  ;;  %v1088_v0 = vmul.f32 0.2, %v960_v53  ;;  %v958_v1 = vadd.f32 %v6293_v26, %v801_v54  ;;  %vm1021_vm2 = vcmp.ge.f32.partialorder %v957_v61, 0.0 }
 0x15f   : > { %5307 = vpow2.f32 %v1279_v58  ;;  %v1151_v2 = vsel %vm1023_vm0, %v959_v52, %v1087_v63  ;;  %v1085_v3 = vmul.f32 0.2, %v957_v61  ;;  %v1217_v5 = vsub.f32 0.0, %v1153_v47 }
 0x160   : > { %v1152_v7 = vsel %vm1024_vm1, %v960_v53, %v1088_v0  ;;  %v1215_v8 = vsub.f32 0.0, %v1151_v2  ;;  %vm1022_vm5 = vcmp.ge.f32.partialorder %v958_v1, 0.0  ;;  %v1086_v10 = vmul.f32 0.2, %v958_v1 }
 0x161   : > { %v1216_v11 = vsub.f32 0.0, %v1152_v7  ;;  %v1149_v12 = vsel %vm1021_vm2, %v957_v61, %v1085_v3  ;;  %v1218_v13 = vsub.f32 0.0, %v1154_v20  ;;  %v1289_v14 = vmul.f32 1.442695, %v1217_v5  ;;  %2077 = vperm.xlu1 %5266, %v1953_v35  }
 0x162   : > { %v5302_v15 = vpop.eup %5301  ;;  %v1285_v16 = vmul.f32 1.442695, %v1215_v8  ;;  %v1150_v17 = vsel %vm1022_vm5, %v958_v1, %v1086_v10  ;;  %v1213_v21 = vsub.f32 0.0, %v1149_v12  ;;  %v1401_v22 = vmul.f32 %v5298_v56, %v6296_v32 }
 0x163   : > { %v6352_v25 = vpop.eup %5303  ;;  %v1287_v27 = vmul.f32 1.442695, %v1216_v11  ;;  %v1214_v28 = vsub.f32 0.0, %v1150_v17  ;;  %v816_v30 = vpop.permute.xlu0 %815  ;;  %5309 = vpow2.f32 %v1289_v14  ;;  %v1291_v34 = vmul.f32 1.442695, %v1218_v13 }
 0x164   : > { %v1993_v31 = vpop.permute.xlu1 %1992  ;;  %v5306_v36 = vpop.eup %5305  ;;  %5311 = vpow2.f32 %v1285_v16  ;;  %v1281_v37 = vmul.f32 1.442695, %v1213_v21  ;;  %v963_v35 = vadd.f32 %v6289_v24, %v816_v30  ;;  %v964_v38 = vadd.f32 %v6293_v26, %v816_v30 }
 0x165   : > { %v5308_v39 = vpop.eup %5307  ;;  %5313 = vpow2.f32 %v1287_v27  ;;  %v1283_v41 = vmul.f32 1.442695, %v1214_v28  ;;  %v2140_v42 = vadd.f32 %v6251_v43, %v1993_v31  ;;  %v2141_v45 = vadd.f32 %v6253_v44, %v1993_v31 }
 0x166   : > { %5315 = vpow2.f32 %v1281_v37  ;;  %vm1027_vm8 = vcmp.ge.f32.partialorder %v963_v35, 0.0  ;;  %vm1028_vm9 = vcmp.ge.f32.partialorder %v964_v38, 0.0  ;;  %v1091_v46 = vmul.f32 0.2, %v963_v35 }
 0x167   : > { %5317 = vpow2.f32 %v1283_v41  ;;  %v1092_v47 = vmul.f32 0.2, %v964_v38  ;;  %vm2204_vm10 = vcmp.ge.f32.partialorder %v2140_v42, 0.0  ;;  %vm2205_vm11 = vcmp.ge.f32.partialorder %v2141_v45, 0.0 }
 0x168   : > { %v1155_v52 = vsel %vm1027_vm8, %v963_v35, %v1091_v46  ;;  %v2268_v53 = vmul.f32 0.2, %v2140_v42  ;;  %v2269_v54 = vmul.f32 0.2, %v2141_v45  ;;  %5319 = vpow2.f32 %v1291_v34 }
 0x169   : > { %v6361_v20 = vpop.eup %5309  ;;  %v1156_v56 = vsel %vm1028_vm9, %v964_v38, %v1092_v47  ;;  %v1219_v57 = vsub.f32 0.0, %v1155_v52  ;;  %v1403_v58 = vmul.f32 %v5306_v36, %v6308_v48  ;;  %v1402_v61 = vmul.f32 %v6343_v62, %v6298_v33  ;;  %5269 = vset.pattern.permute.xlu1 %v5873_v19 }
 0x16a   : > { %v6367_v63 = vpop.eup %5311  ;;  %v1220_v0 = vsub.f32 0.0, %v1156_v56  ;;  %v2332_v1 = vsel %vm2204_vm10, %v2140_v42, %v2268_v53  ;;  %v2333_v2 = vsel %vm2205_vm11, %v2141_v45, %v2269_v54  ;;  %v1404_v5 = vmul.f32 %v5308_v39, %v6315_v59  ;;  %905 = vperm.xlu1 %5269, %v6359_v50   ;;  %v1951_v39 = vld [vmem:[%s6129_s7 + $0xa0] sm:$0xff] }
 0x16b   : > { %v6379_v62 = vpop.eup %5313  ;;  %v1293_v7 = vmul.f32 1.442695, %v1219_v57  ;;  %v2396_v8 = vsub.f32 0.0, %v2332_v1  ;;  %v2397_v10 = vsub.f32 0.0, %v2333_v2  ;;  %v4898_v11 = vpack.c.bf16 %v1403_v58, %v1401_v22  ;;  %v821_v13 = vpop.permute.xlu0 %820  ;;  %2067 = vperm.xlu2 %5263, %v1951_v39  }
 0x16c   : > { %v1998_v14 = vpop.permute.xlu1 %1997  ;;  %v6389_v16 = vpop.eup %5315  ;;  %v1295_v17 = vmul.f32 1.442695, %v1220_v0  ;;  %v4946_v21 = vpack.c.bf16 %v1404_v5, %v1402_v61  ;;  %v2578_v27 = vmul.f32 %v6334_v40, %v6296_v32  ;;  %v2580_v28 = vmul.f32 %v5302_v15, %v6308_v48 }
 0x16d   : > { %v6394_v22 = vpop.eup %5317  ;;  %5321 = vpow2.f32 %v1293_v7  ;;  %v2470_v30 = vmul.f32 1.442695, %v2396_v8  ;;  %v2472_v31 = vmul.f32 1.442695, %v2397_v10  ;;  %4899 = vmatmul.msk.bf16.vlgmr.msra.gmra.mxu0 %vm6373_vm12, %v4898_v11  ;;  %v2579_v34 = vmul.f32 %v6337_v49, %v6298_v33  ;;  %v2003_v49 = vpop.permute.xlu2 %2002 }
 0x16e   : > { %v6400_v36 = vpop.eup %5319  ;;  %5323 = vpow2.f32 %v1295_v17  ;;  %4947 = vmatmul.msk.bf16.vlgmr.msra.gmra.mxu1 %vm6385_vm13, %v4946_v21  ;;  %v4995_v32 = vpack.c.bf16 %v2580_v28, %v2578_v27  ;;  %v2581_v48 = vmul.f32 %v6352_v25, %v6315_v59  ;;  %v965_v40 = vadd.f32 %v6289_v24, %v821_v13 }
 0x16f   : > { %5325 = vpow2.f32 %v2470_v30  ;;  %v966_v15 = vadd.f32 %v6293_v26, %v821_v13  ;;  %v2142_v37 = vadd.f32 %v6251_v43, %v1998_v14  ;;  %v2143_v33 = vadd.f32 %v6253_v44, %v1998_v14 }
 0x170   : > { %5327 = vpow2.f32 %v2472_v31  ;;  %4996 = vmatmul.msk.bf16.vlgmr.msra.gmra.mxu2 %vm6373_vm12, %v4995_v32  ;;  %v5043_v35 = vpack.c.bf16 %v2581_v48, %v2579_v34  ;;  %vm1029_vm14 = vcmp.ge.f32.partialorder %v965_v40, 0.0  ;;  %v1093_v38 = vmul.f32 0.2, %v965_v40 }
 0x171   : > { %vm1030_vm15 = vcmp.ge.f32.partialorder %v966_v15, 0.0  ;;  %v1094_v59 = vmul.f32 0.2, %v966_v15  ;;  %vm2206_vm0 = vcmp.ge.f32.partialorder %v2142_v37, 0.0  ;;  %vm2207_vm1 = vcmp.ge.f32.partialorder %v2143_v33, 0.0 }
 0x172   : > { %5044 = vmatmul.msk.bf16.vlgmr.msra.gmra.mxu3 %vm6385_vm13, %v5043_v35  ;;  %v1157_v25 = vsel %vm1029_vm14, %v965_v40, %v1093_v38  ;;  %v2270_v41 = vmul.f32 0.2, %v2142_v37  ;;  %v2271_v42 = vmul.f32 0.2, %v2143_v33  ;;  %v2144_v45 = vadd.f32 %v6251_v43, %v2003_v49 }
 0x173   : > { %v6416_v46 = vpop.eup %5321  ;;  %v1158_v47 = vsel %vm1030_vm15, %v966_v15, %v1094_v59  ;;  %v1221_v52 = vsub.f32 0.0, %v1157_v25  ;;  %v2145_v53 = vadd.f32 %v6253_v44, %v2003_v49  ;;  %v567_v54 = vunpack.c.2.s8 %v6272_v6  ;;  %5267 = vset.pattern.permute.xlu2 %v5873_v19 }
 0x174   : > { %v6420_v56 = vpop.eup %5323  ;;  %v1222_v57 = vsub.f32 0.0, %v1158_v47  ;;  %v2334_v58 = vsel %vm2206_vm0, %v2142_v37, %v2270_v41  ;;  %v2335_v61 = vsel %vm2207_vm1, %v2143_v33, %v2271_v42  ;;  %vm2208_vm2 = vcmp.ge.f32.partialorder %v2144_v45, 0.0  ;;  %v826_v0 = vpop.permute.xlu1 %825  ;;  %890 = vperm.xlu2 %5267, %v1951_v39   ;;  %v6433_v33 = vld [vmem:[%s6129_s7 + $0xc0] sm:$0xff] }
 0x175   : > { %v6422_v1 = vpop.eup %5325  ;;  %v1297_v2 = vmul.f32 1.442695, %v1221_v52  ;;  %v2398_v3 = vsub.f32 0.0, %v2334_v58  ;;  %v2399_v5 = vsub.f32 0.0, %v2335_v61  ;;  %vm2209_vm3 = vcmp.ge.f32.partialorder %v2145_v53, 0.0  ;;  %910 = vperm.xlu1 %5269, %v6433_v33   ;;  %v2008_v47 = vpop.permute.xlu2 %2007 }
 0x176   : > { %v6424_v7 = vpop.eup %5327  ;;  %v1299_v8 = vmul.f32 1.442695, %v1222_v57  ;;  %v2272_v10 = vmul.f32 0.2, %v2144_v45  ;;  %v2273_v11 = vmul.f32 0.2, %v2145_v53  ;;  %v967_v12 = vadd.f32 %v6289_v24, %v826_v0 }
 0x177   : > { %5329 = vpow2.f32 %v1297_v2  ;;  %v2474_v13 = vmul.f32 1.442695, %v2398_v3  ;;  %v2476_v14 = vmul.f32 1.442695, %v2399_v5  ;;  %v968_v17 = vadd.f32 %v6293_v26, %v826_v0  ;;  %v6456_v3 = vld [vmem:[%s6129_s7 + $0xc8] sm:$0xff] }
 0x178   : > { %5331 = vpow2.f32 %v1299_v8  ;;  %v2336_v21 = vsel %vm2208_vm2, %v2144_v45, %v2272_v10  ;;  %v2337_v27 = vsel %vm2209_vm3, %v2145_v53, %v2273_v11  ;;  %vm1031_vm4 = vcmp.ge.f32.partialorder %v967_v12, 0.0  ;;  %v2013_v8 = vpop.permute.xlu0 %2012  ;;  %2092 = vperm.xlu0 %5270, %v6456_v3  }
 0x179   : > { %5333 = vpow2.f32 %v2474_v13  ;;  %v2400_v28 = vsub.f32 0.0, %v2336_v21  ;;  %v2401_v30 = vsub.f32 0.0, %v2337_v27  ;;  %vm1032_vm5 = vcmp.ge.f32.partialorder %v968_v17, 0.0  ;;  %v1957_v21 = vld [vmem:[%s6129_s7 + $0xd0] sm:$0xff] }
 0x17a   : > { %5335 = vpow2.f32 %v2476_v14  ;;  %v1095_v31 = vmul.f32 0.2, %v967_v12  ;;  %v1096_v34 = vmul.f32 0.2, %v968_v17  ;;  %v569_v32 = vunpack.c.3.s8 %v6272_v6 }
 0x17b   : > { %v2478_v48 = vmul.f32 1.442695, %v2400_v28  ;;  %v2480_v40 = vmul.f32 1.442695, %v2401_v30  ;;  %v631_v15 = vcvt.s32.f32 %v567_v54  ;;  %v568_v37 = vunpack.c.2.s8 %v6276_v9 }
 0x17c   : > { %v1159_v49 = vsel %vm1031_vm4, %v967_v12, %v1095_v31  ;;  %v1160_v35 = vsel %vm1032_vm5, %v968_v17, %v1096_v34  ;;  %v633_v38 = vcvt.s32.f32 %v569_v32  ;;  %v570_v59 = vunpack.c.3.s8 %v6276_v9  ;;  %5268 = vset.pattern.permute.xlu2 %v5872_v18  ;;  %v831_v17 = vpop.permute.xlu1 %830 }
 0x17d   : > { %v6438_v25 = vpop.eup %5329  ;;  %5337 = vpow2.f32 %v2478_v48  ;;  %v1223_v6 = vsub.f32 0.0, %v1159_v49  ;;  %v1224_v39 = vsub.f32 0.0, %v1160_v35  ;;  %vm695_vm6 = vcmp.gt.f32.partialorder %v631_v15, 0.0  ;;  %2082 = vperm.xlu2 %5268, %v6359_v50   ;;  %5272 = vset.pattern.permute.xlu1 %v5872_v18 }
 0x17e   : > { %v6440_v41 = vpop.eup %5331  ;;  %5339 = vpow2.f32 %v2480_v40  ;;  %vm697_vm7 = vcmp.gt.f32.partialorder %v633_v38, 0.0  ;;  %v1405_v42 = vmul.f32 %v6389_v16, %v631_v15  ;;  %v1407_v45 = vmul.f32 %v6367_v63, %v633_v38  ;;  %2097 = vperm.xlu1 %5272, %v1957_v21  }
 0x17f   : > { %v6444_v52 = vpop.eup %5333  ;;  %v1301_v9 = vmul.f32 1.442695, %v1223_v6  ;;  %v1303_v53 = vmul.f32 1.442695, %v1224_v39  ;;  %vm6446_vm8 = vmpackc.low %vm697_vm7, %vm695_vm6  ;;  %v632_v57 = vcvt.s32.f32 %v568_v37  ;;  %v634_v58 = vcvt.s32.f32 %v570_v59  ;;  %v836_v39 = vpop.permute.xlu2 %835 }
 0x180   : > { %v6450_v61 = vpop.eup %5335  ;;  %v4901_v0 = vpack.c.bf16 %v1407_v45, %v1405_v42  ;;  %v2582_v2 = vmul.f32 %v6310_v51, %v631_v15  ;;  %v2584_v16 = vmul.f32 %v6317_v60, %v633_v38  ;;  %v2146_v63 = vadd.f32 %v6251_v43, %v2008_v47  ;;  %5274 = vset.pattern.permute.xlu0 %v5873_v19 }
 0x181   : > { %5341 = vpow2.f32 %v1301_v9  ;;  %vm696_vm9 = vcmp.gt.f32.partialorder %v632_v57, 0.0  ;;  %vm698_vm10 = vcmp.gt.f32.partialorder %v634_v58, 0.0  ;;  %v1406_v5 = vmul.f32 %v6394_v22, %v632_v57  ;;  %920 = vperm.xlu0 %5274, %v1957_v21  }
 0x182   : > { %5343 = vpow2.f32 %v1303_v53  ;;  %4902 = vmatmul.msk.bf16.gmra.mxu0 %vm6446_vm8, %v4901_v0  ;;  %v1408_v51 = vmul.f32 %v6379_v62, %v634_v58  ;;  %v4998_v60 = vpack.c.bf16 %v2584_v16, %v2582_v2  ;;  %v2583_v10 = vmul.f32 %v6312_v55, %v632_v57  ;;  %vm6467_vm11 = vmpackc.low %vm698_vm10, %vm696_vm9 }
 0x183   : > { %v6465_v11 = vpop.eup %5337  ;;  %v2585_v22 = vmul.f32 %v6320_v4, %v634_v58  ;;  %v2147_v13 = vadd.f32 %v6253_v44, %v2008_v47  ;;  %vm2210_vm12 = vcmp.ge.f32.partialorder %v2146_v63, 0.0  ;;  %v2274_v14 = vmul.f32 0.2, %v2146_v63 }
 0x184   : > { %v6475_v62 = vpop.eup %5339  ;;  %v4949_v55 = vpack.c.bf16 %v1408_v51, %v1406_v5  ;;  %4999 = vmatmul.msk.bf16.gmra.mxu2 %vm6446_vm8, %v4998_v60  ;;  %v2148_v27 = vadd.f32 %v6251_v43, %v2013_v8  ;;  %v2149_v28 = vadd.f32 %v6253_v44, %v2013_v8  ;;  %v969_v4 = vadd.f32 %v6289_v24, %v831_v17  ;;  %v6497_v8 = vld [vmem:[%s6136_s27 + $0x10] sm:$0xff] }
 0x185   : > { %v5046_v30 = vpack.c.bf16 %v2585_v22, %v2583_v10  ;;  %vm2211_vm13 = vcmp.ge.f32.partialorder %v2147_v13, 0.0  ;;  %v2275_v31 = vmul.f32 0.2, %v2147_v13  ;;  %v2338_v34 = vsel %vm2210_vm12, %v2146_v63, %v2274_v14  ;;  %2087 = vperm.xlu2 %5268, %v6433_v33   ;;  %v6500_v10 = vld [vmem:[%s6136_s27 + $0x18] sm:$0xff]  ;;  %v2018_v12 = vpop.permute.xlu1 %2017 }
 0x186   : > { %4950 = vmatmul.msk.bf16.gmra.mxu1 %vm6467_vm11, %v4949_v55  ;;  %v2402_v50 = vsub.f32 0.0, %v2338_v34  ;;  %vm2212_vm14 = vcmp.ge.f32.partialorder %v2148_v27, 0.0  ;;  %vm2213_vm15 = vcmp.ge.f32.partialorder %v2149_v28, 0.0  ;;  %v2276_v32 = vmul.f32 0.2, %v2148_v27  ;;  %5275 = vset.pattern.permute.xlu1 %v5873_v19 }
 0x187   : > { %v6485_v48 = vpop.eup %5341  ;;  %5047 = vmatmul.msk.bf16.gmra.mxu3 %vm6467_vm11, %v5046_v30  ;;  %v2339_v40 = vsel %vm2211_vm13, %v2147_v13, %v2275_v31  ;;  %v2277_v15 = vmul.f32 0.2, %v2149_v28  ;;  %v970_v37 = vadd.f32 %v6293_v26, %v831_v17  ;;  %vm1033_vm0 = vcmp.ge.f32.partialorder %v969_v4, 0.0 }
 0x188   : > { %v6490_v49 = vpop.eup %5343  ;;  %v2403_v35 = vsub.f32 0.0, %v2339_v40  ;;  %v2482_v38 = vmul.f32 1.442695, %v2402_v50  ;;  %v2340_v59 = vsel %vm2212_vm14, %v2148_v27, %v2276_v32  ;;  %v1097_v6 = vmul.f32 0.2, %v969_v4 }
 0x189   : > { %v2341_v42 = vsel %vm2213_vm15, %v2149_v28, %v2277_v15  ;;  %v2404_v45 = vsub.f32 0.0, %v2340_v59  ;;  %vm1034_vm1 = vcmp.ge.f32.partialorder %v970_v37, 0.0  ;;  %v1098_v47 = vmul.f32 0.2, %v970_v37 }
 0x18a   : > { %5345 = vpow2.f32 %v2482_v38  ;;  %v2484_v9 = vmul.f32 1.442695, %v2403_v35  ;;  %v2405_v53 = vsub.f32 0.0, %v2341_v42  ;;  %v1161_v54 = vsel %vm1033_vm0, %v969_v4, %v1097_v6 }
 0x18b   : > { %v2486_v57 = vmul.f32 1.442695, %v2404_v45  ;;  %v1162_v58 = vsel %vm1034_vm1, %v970_v37, %v1098_v47  ;;  %v1225_v0 = vsub.f32 0.0, %v1161_v54  ;;  %v971_v2 = vadd.f32 %v6289_v24, %v836_v39  ;;  %v782_v54 = vld [vmem:[%s6129_s7 + $0xd8] sm:$0xff] }
 0x18c   : > { %5347 = vpow2.f32 %v2484_v9  ;;  %v2488_v16 = vmul.f32 1.442695, %v2405_v53  ;;  %v1226_v63 = vsub.f32 0.0, %v1162_v58  ;;  %v972_v5 = vadd.f32 %v6293_v26, %v836_v39  ;;  %925 = vperm.xlu1 %5275, %v782_v54  }
 0x18d   : > { %5349 = vpow2.f32 %v2486_v57  ;;  %v1305_v51 = vmul.f32 1.442695, %v1225_v0  ;;  %vm1035_vm2 = vcmp.ge.f32.partialorder %v971_v2, 0.0  ;;  %v1099_v60 = vmul.f32 0.2, %v971_v2  ;;  %5271 = vset.pattern.permute.xlu2 %v5873_v19 }
 0x18e   : > { %5351 = vpow2.f32 %v2488_v16  ;;  %v1307_v22 = vmul.f32 1.442695, %v1226_v63  ;;  %vm1036_vm3 = vcmp.ge.f32.partialorder %v972_v5, 0.0  ;;  %v1100_v13 = vmul.f32 0.2, %v972_v5  ;;  %915 = vperm.xlu2 %5271, %v6456_v3   ;;  %v2023_v63 = vpop.permute.xlu2 %2022 }
 0x18f   : > { %5353 = vpow2.f32 %v1305_v51  ;;  %v1163_v33 = vsel %vm1035_vm2, %v971_v2, %v1099_v60  ;;  %v571_v14 = vunpack.c.0.s8 %v6497_v8  ;;  %v573_v17 = vunpack.c.1.s8 %v6497_v8 }
 0x190   : > { %v6505_v21 = vpop.eup %5345  ;;  %5355 = vpow2.f32 %v1307_v22  ;;  %v1164_v55 = vsel %vm1036_vm3, %v972_v5, %v1100_v13  ;;  %v1227_v27 = vsub.f32 0.0, %v1163_v33  ;;  %v572_v28 = vunpack.c.0.s8 %v6500_v10 }
 0x191   : > { %v1228_v4 = vsub.f32 0.0, %v1164_v55  ;;  %v635_v30 = vcvt.s32.f32 %v571_v14  ;;  %v637_v31 = vcvt.s32.f32 %v573_v17  ;;  %v574_v34 = vunpack.c.1.s8 %v6500_v10 }
 0x192   : > { %v6509_v50 = vpop.eup %5347  ;;  %v1309_v32 = vmul.f32 1.442695, %v1227_v27  ;;  %v636_v40 = vcvt.s32.f32 %v572_v28  ;;  %v2150_v15 = vadd.f32 %v6251_v43, %v2018_v12  ;;  %v2151_v37 = vadd.f32 %v6253_v44, %v2018_v12 }
 0x193   : > { %v6513_v35 = vpop.eup %5349  ;;  %v1311_v38 = vmul.f32 1.442695, %v1228_v4  ;;  %vm699_vm4 = vcmp.gt.f32.partialorder %v635_v30, 0.0  ;;  %vm701_vm5 = vcmp.gt.f32.partialorder %v637_v31, 0.0  ;;  %v1409_v59 = vmul.f32 %v6361_v20, %v635_v30 }
 0x194   : > { %v6517_v6 = vpop.eup %5351  ;;  %5357 = vpow2.f32 %v1309_v32  ;;  %v1411_v39 = vmul.f32 %v6416_v46, %v637_v31  ;;  %v638_v42 = vcvt.s32.f32 %v574_v34  ;;  %vm700_vm6 = vcmp.gt.f32.partialorder %v636_v40, 0.0  ;;  %vm6523_vm7 = vmpackc.low %vm701_vm5, %vm699_vm4  ;;  %5276 = vset.pattern.permute.xlu1 %v5872_v18 }
 0x195   : > { %v6521_v45 = vpop.eup %5353  ;;  %5359 = vpow2.f32 %v1311_v38  ;;  %v1410_v20 = vmul.f32 %v6400_v36, %v636_v40  ;;  %v2586_v9 = vmul.f32 %v6327_v23, %v635_v30  ;;  %v2588_v53 = vmul.f32 %v6422_v1, %v637_v31  ;;  %v846_v1 = vpop.permute.xlu1 %845 }
 0x196   : > { %v6531_v57 = vpop.eup %5355  ;;  %v4904_v46 = vpack.c.bf16 %v1411_v39, %v1409_v59  ;;  %vm702_vm8 = vcmp.gt.f32.partialorder %v638_v42, 0.0  ;;  %v1412_v3 = vmul.f32 %v6420_v56, %v638_v42  ;;  %v2587_v58 = vmul.f32 %v6329_v29, %v636_v40  ;;  %5273 = vset.pattern.permute.xlu2 %v5872_v18  ;;  %v841_v40 = vpop.permute.xlu0 %840 }
 0x197   : > { %vm6536_vm9 = vmpackc.low %vm702_vm8, %vm700_vm6  ;;  %v5001_v36 = vpack.c.bf16 %v2588_v53, %v2586_v9  ;;  %v2589_v23 = vmul.f32 %v6424_v7, %v638_v42  ;;  %vm2214_vm10 = vcmp.ge.f32.partialorder %v2150_v15, 0.0  ;;  %vm2215_vm11 = vcmp.ge.f32.partialorder %v2151_v37, 0.0  ;;  %2102 = vperm.xlu2 %5273, %v782_v54  }
 0x198   : > { %4905 = vmatmul.msk.bf16.gmra.mxu0 %vm6523_vm7, %v4904_v46  ;;  %v4952_v2 = vpack.c.bf16 %v1412_v3, %v1410_v20  ;;  %v2278_v16 = vmul.f32 0.2, %v2150_v15  ;;  %v2279_v56 = vmul.f32 0.2, %v2151_v37  ;;  %v975_v29 = vadd.f32 %v6289_v24, %v846_v1 }
 0x199   : > { %5002 = vmatmul.msk.bf16.gmra.mxu2 %vm6523_vm7, %v5001_v36  ;;  %v5049_v5 = vpack.c.bf16 %v2589_v23, %v2587_v58  ;;  %v976_v51 = vadd.f32 %v6293_v26, %v846_v1  ;;  %v2152_v7 = vadd.f32 %v6251_v43, %v2023_v63  ;;  %v2153_v60 = vadd.f32 %v6253_v44, %v2023_v63 }
 0x19a   : > { %v6549_v12 = vpop.eup %5357  ;;  %4953 = vmatmul.msk.bf16.gmra.mxu1 %vm6536_vm9, %v4952_v2  ;;  %v2342_v22 = vsel %vm2214_vm10, %v2150_v15, %v2278_v16  ;;  %v2343_v13 = vsel %vm2215_vm11, %v2151_v37, %v2279_v56  ;;  %vm1039_vm12 = vcmp.ge.f32.partialorder %v975_v29, 0.0  ;;  %v1103_v33 = vmul.f32 0.2, %v975_v29  ;;  %v1960_v15 = vld [vmem:[%s6129_s7 + $0xe8] sm:$0xff] }
 0x19b   : > { %v6555_v14 = vpop.eup %5359  ;;  %5050 = vmatmul.msk.bf16.gmra.mxu3 %vm6536_vm9, %v5049_v5  ;;  %v2406_v17 = vsub.f32 0.0, %v2342_v22  ;;  %v2407_v55 = vsub.f32 0.0, %v2343_v13  ;;  %vm1040_vm13 = vcmp.ge.f32.partialorder %v976_v51, 0.0  ;;  %v1104_v27 = vmul.f32 0.2, %v976_v51  ;;  %935 = vperm.xlu0 %5274, %v1960_v15  }
 0x19c   : > { %v1167_v28 = vsel %vm1039_vm12, %v975_v29, %v1103_v33  ;;  %vm2216_vm14 = vcmp.ge.f32.partialorder %v2152_v7, 0.0  ;;  %vm2217_vm15 = vcmp.ge.f32.partialorder %v2153_v60, 0.0  ;;  %v2280_v4 = vmul.f32 0.2, %v2152_v7  ;;  %2112 = vperm.xlu1 %5276, %v1960_v15  }
 0x19d   : > { %v2490_v30 = vmul.f32 1.442695, %v2406_v17  ;;  %v2492_v31 = vmul.f32 1.442695, %v2407_v55  ;;  %v1168_v34 = vsel %vm1040_vm13, %v976_v51, %v1104_v27  ;;  %v1231_v32 = vsub.f32 0.0, %v1167_v28  ;;  %v2033_v55 = vpop.permute.xlu1 %2032 }
 0x19e   : > { %v1232_v37 = vsub.f32 0.0, %v1168_v34  ;;  %v2281_v38 = vmul.f32 0.2, %v2153_v60  ;;  %v2344_v59 = vsel %vm2216_vm14, %v2152_v7, %v2280_v4  ;;  %v973_v39 = vadd.f32 %v6289_v24, %v841_v40 }
 0x19f   : > { %5361 = vpow2.f32 %v2490_v30  ;;  %v1317_v42 = vmul.f32 1.442695, %v1231_v32  ;;  %v2408_v47 = vsub.f32 0.0, %v2344_v59  ;;  %v974_v20 = vadd.f32 %v6293_v26, %v841_v40  ;;  %v2028_v40 = vpop.permute.xlu2 %2027 }
 0x1a0   : > { %5363 = vpow2.f32 %v2492_v31  ;;  %v1319_v9 = vmul.f32 1.442695, %v1232_v37  ;;  %v2345_v53 = vsel %vm2217_vm15, %v2153_v60, %v2281_v38  ;;  %vm1037_vm0 = vcmp.ge.f32.partialorder %v973_v39, 0.0 }
 0x1a1   : > { %v2409_v46 = vsub.f32 0.0, %v2345_v53  ;;  %v2494_v54 = vmul.f32 1.442695, %v2408_v47  ;;  %vm1038_vm1 = vcmp.ge.f32.partialorder %v974_v20, 0.0  ;;  %5365 = vpow2.f32 %v1317_v42 }
 0x1a2   : > { %v1101_v3 = vmul.f32 0.2, %v973_v39  ;;  %v1102_v58 = vmul.f32 0.2, %v974_v20  ;;  %v575_v0 = vunpack.c.2.s8 %v6497_v8  ;;  %5367 = vpow2.f32 %v1319_v9 }
 0x1a3   : > { %v2496_v36 = vmul.f32 1.442695, %v2409_v46  ;;  %v577_v23 = vunpack.c.3.s8 %v6497_v8  ;;  %v576_v1 = vunpack.c.2.s8 %v6500_v10  ;;  %v578_v29 = vunpack.c.3.s8 %v6500_v10 }
 0x1a4   : > { %v1165_v2 = vsel %vm1037_vm0, %v973_v39, %v1101_v3  ;;  %v1166_v16 = vsel %vm1038_vm1, %v974_v20, %v1102_v58  ;;  %v639_v56 = vcvt.s32.f32 %v575_v0  ;;  %5369 = vpow2.f32 %v2494_v54  ;;  %v1961_v0 = vld [vmem:[%s6129_s7 + $0xf0] sm:$0xff] }
 0x1a5   : > { %v6569_v63 = vpop.eup %5361  ;;  %v1229_v5 = vsub.f32 0.0, %v1165_v2  ;;  %v1230_v51 = vsub.f32 0.0, %v1166_v16  ;;  %v641_v7 = vcvt.s32.f32 %v577_v23  ;;  %5371 = vpow2.f32 %v2496_v36  ;;  %2117 = vperm.xlu1 %5276, %v1961_v0   ;;  %940 = vperm.xlu0 %5274, %v1961_v0  }
 0x1a6   : > { %v6571_v60 = vpop.eup %5363  ;;  %vm703_vm2 = vcmp.gt.f32.partialorder %v639_v56, 0.0  ;;  %v640_v22 = vcvt.s32.f32 %v576_v1  ;;  %v642_v13 = vcvt.s32.f32 %v578_v29  ;;  %v1413_v33 = vmul.f32 %v6438_v25, %v639_v56 }
 0x1a7   : > { %v1313_v8 = vmul.f32 1.442695, %v1229_v5  ;;  %vm705_vm3 = vcmp.gt.f32.partialorder %v641_v7, 0.0  ;;  %v1415_v17 = vmul.f32 %v6485_v48, %v641_v7  ;;  %v6575_v10 = vpop.eup %5365  ;;  %v1315_v31 = vmul.f32 1.442695, %v1230_v51  ;;  %v851_v27 = vpop.permute.xlu2 %850 }
 0x1a8   : > { %vm6577_vm4 = vmpackc.low %vm705_vm3, %vm703_vm2  ;;  %vm704_vm5 = vcmp.gt.f32.partialorder %v640_v22, 0.0  ;;  %vm706_vm6 = vcmp.gt.f32.partialorder %v642_v13, 0.0  ;;  %v1414_v28 = vmul.f32 %v6440_v41, %v640_v22  ;;  %v1416_v4 = vmul.f32 %v6490_v49, %v642_v13  ;;  %v6583_v30 = vpop.eup %5367 }
 0x1a9   : > { %v4907_v34 = vpack.c.bf16 %v1415_v17, %v1413_v33  ;;  %vm6585_vm7 = vmpackc.low %vm706_vm6, %vm704_vm5  ;;  %v2590_v48 = vmul.f32 %v6444_v52, %v639_v56  ;;  %v2592_v32 = vmul.f32 %v6465_v11, %v641_v7  ;;  %5373 = vpow2.f32 %v1313_v8  ;;  %v856_v11 = vpop.permute.xlu0 %855  ;;  %v2038_v7 = vpop.permute.xlu1 %2037 }
 0x1aa   : > { %v4955_v15 = vpack.c.bf16 %v1416_v4, %v1414_v28  ;;  %v2591_v37 = vmul.f32 %v6450_v61, %v640_v22  ;;  %v2593_v41 = vmul.f32 %v6475_v62, %v642_v13  ;;  %v6593_v49 = vpop.eup %5369  ;;  %v2156_v59 = vadd.f32 %v6251_v43, %v2033_v55 }
 0x1ab   : > { %4908 = vmatmul.msk.bf16.gmra.mxu0 %vm6577_vm4, %v4907_v34  ;;  %v5004_v38 = vpack.c.bf16 %v2592_v32, %v2590_v48  ;;  %v2157_v39 = vadd.f32 %v6253_v44, %v2033_v55  ;;  %v2154_v52 = vadd.f32 %v6251_v43, %v2028_v40  ;;  %v6600_v42 = vpop.eup %5371  ;;  %v2155_v62 = vadd.f32 %v6253_v44, %v2028_v40 }
 0x1ac   : > { %4956 = vmatmul.msk.bf16.gmra.mxu1 %vm6585_vm7, %v4955_v15  ;;  %v5052_v61 = vpack.c.bf16 %v2593_v41, %v2591_v37  ;;  %v979_v47 = vadd.f32 %v6289_v24, %v856_v11  ;;  %v980_v20 = vadd.f32 %v6293_v26, %v856_v11  ;;  %vm2220_vm8 = vcmp.ge.f32.partialorder %v2156_v59, 0.0  ;;  %v6620_v15 = vld [vmem:[%s6129_s7 + $0xf8] sm:$0xff] }
 0x1ad   : > { %5005 = vmatmul.msk.bf16.gmra.mxu2 %vm6577_vm4, %v5004_v38  ;;  %vm2221_vm9 = vcmp.ge.f32.partialorder %v2157_v39, 0.0  ;;  %v2284_v9 = vmul.f32 0.2, %v2156_v59  ;;  %v2285_v53 = vmul.f32 0.2, %v2157_v39  ;;  %vm2218_vm10 = vcmp.ge.f32.partialorder %v2154_v52, 0.0  ;;  %5279 = vset.pattern.permute.xlu1 %v5873_v19 }
 0x1ae   : > { %5053 = vmatmul.msk.bf16.gmra.mxu3 %vm6585_vm7, %v5052_v61  ;;  %vm2219_vm11 = vcmp.ge.f32.partialorder %v2155_v62, 0.0  ;;  %v2282_v46 = vmul.f32 0.2, %v2154_v52  ;;  %v2283_v54 = vmul.f32 0.2, %v2155_v62  ;;  %vm1043_vm12 = vcmp.ge.f32.partialorder %v979_v47, 0.0  ;;  %5280 = vset.pattern.permute.xlu0 %v5872_v18 }
 0x1af   : > { %v2348_v3 = vsel %vm2220_vm8, %v2156_v59, %v2284_v9  ;;  %v2349_v58 = vsel %vm2221_vm9, %v2157_v39, %v2285_v53  ;;  %vm1044_vm13 = vcmp.ge.f32.partialorder %v980_v20, 0.0  ;;  %v6612_v36 = vpop.eup %5373  ;;  %v1107_v5 = vmul.f32 0.2, %v979_v47  ;;  %v6624_v61 = vld [vmem:[%s6136_s27 + $0x20] sm:$0xff]  ;;  %945 = vperm.xlu1 %5279, %v6620_v15  }
 0x1b0   : > { %v2412_v23 = vsub.f32 0.0, %v2348_v3  ;;  %v2413_v1 = vsub.f32 0.0, %v2349_v58  ;;  %v2346_v2 = vsel %vm2218_vm10, %v2154_v52, %v2282_v46  ;;  %v2347_v16 = vsel %vm2219_vm11, %v2155_v62, %v2283_v54 }
 0x1b1   : > { %v2410_v56 = vsub.f32 0.0, %v2346_v2  ;;  %v2411_v29 = vsub.f32 0.0, %v2347_v16  ;;  %v1108_v51 = vmul.f32 0.2, %v980_v20  ;;  %v2158_v8 = vadd.f32 %v6251_v43, %v2038_v7  ;;  %v861_v59 = vpop.permute.xlu0 %860 }
 0x1b2   : > { %v2502_v22 = vmul.f32 1.442695, %v2412_v23  ;;  %v2504_v13 = vmul.f32 1.442695, %v2413_v1  ;;  %v2159_v33 = vadd.f32 %v6253_v44, %v2038_v7  ;;  %5375 = vpow2.f32 %v1315_v31 }
 0x1b3   : > { %v1171_v17 = vsel %vm1043_vm12, %v979_v47, %v1107_v5  ;;  %v1172_v55 = vsel %vm1044_vm13, %v980_v20, %v1108_v51  ;;  %v2498_v28 = vmul.f32 1.442695, %v2410_v56  ;;  %vm2222_vm14 = vcmp.ge.f32.partialorder %v2158_v8, 0.0  ;;  %v6640_v56 = vld [vmem:[%s6136_s27 + $0x28] sm:$0xff] }
 0x1b4   : > { %v1235_v4 = vsub.f32 0.0, %v1171_v17  ;;  %v1236_v34 = vsub.f32 0.0, %v1172_v55  ;;  %5377 = vpow2.f32 %v2502_v22  ;;  %vm2223_vm15 = vcmp.ge.f32.partialorder %v2159_v33, 0.0 }
 0x1b5   : > { %v2286_v25 = vmul.f32 0.2, %v2158_v8  ;;  %v2287_v48 = vmul.f32 0.2, %v2159_v33  ;;  %5379 = vpow2.f32 %v2504_v13  ;;  %v2500_v32 = vmul.f32 1.442695, %v2411_v29 }
 0x1b6   : > { %v977_v40 = vadd.f32 %v6289_v24, %v851_v27  ;;  %v1325_v31 = vmul.f32 1.442695, %v1235_v4  ;;  %v978_v38 = vadd.f32 %v6293_v26, %v851_v27  ;;  %v1327_v39 = vmul.f32 1.442695, %v1236_v34  ;;  %v866_v4 = vpop.permute.xlu1 %865 }
 0x1b7   : > { %v2350_v37 = vsel %vm2222_vm14, %v2158_v8, %v2286_v25  ;;  %v2351_v41 = vsel %vm2223_vm15, %v2159_v33, %v2287_v48  ;;  %5381 = vpow2.f32 %v2498_v28  ;;  %v981_v53 = vadd.f32 %v6289_v24, %v861_v59 }
 0x1b8   : > { %v2414_v52 = vsub.f32 0.0, %v2350_v37  ;;  %v2415_v11 = vsub.f32 0.0, %v2351_v41  ;;  %vm1041_vm0 = vcmp.ge.f32.partialorder %v977_v40, 0.0  ;;  %v6628_v62 = vpop.eup %5375  ;;  %vm1042_vm1 = vcmp.ge.f32.partialorder %v978_v38, 0.0 }
 0x1b9   : > { %v1105_v47 = vmul.f32 0.2, %v977_v40  ;;  %v1106_v20 = vmul.f32 0.2, %v978_v38  ;;  %5383 = vpow2.f32 %v2500_v32  ;;  %v982_v46 = vadd.f32 %v6293_v26, %v861_v59  ;;  %v1959_v32 = vld [vmem:[%s6129_s7 + $0xe0] sm:$0xff] }
 0x1ba   : > { %v2506_v9 = vmul.f32 1.442695, %v2414_v52  ;;  %v6633_v54 = vpop.eup %5377  ;;  %v579_v0 = vunpack.c.0.s8 %v6624_v61  ;;  %v581_v23 = vunpack.c.1.s8 %v6624_v61  ;;  %5385 = vpow2.f32 %v1325_v31  ;;  %2107 = vperm.xlu2 %5273, %v1959_v32  }
 0x1bb   : > { %v1169_v3 = vsel %vm1041_vm0, %v977_v40, %v1105_v47  ;;  %v1170_v58 = vsel %vm1042_vm1, %v978_v38, %v1106_v20  ;;  %v6637_v1 = vpop.eup %5379  ;;  %v2508_v2 = vmul.f32 1.442695, %v2415_v11  ;;  %vm1045_vm2 = vcmp.ge.f32.partialorder %v981_v53, 0.0 }
 0x1bc   : > { %v1233_v16 = vsub.f32 0.0, %v1169_v3  ;;  %5387 = vpow2.f32 %v1327_v39  ;;  %vm1046_vm3 = vcmp.ge.f32.partialorder %v982_v46, 0.0  ;;  %v1109_v29 = vmul.f32 0.2, %v981_v53 }
 0x1bd   : > { %v1110_v5 = vmul.f32 0.2, %v982_v46  ;;  %5389 = vpow2.f32 %v2506_v9  ;;  %v1234_v51 = vsub.f32 0.0, %v1170_v58  ;;  %v643_v22 = vcvt.s32.f32 %v579_v0  ;;  %v6642_v13 = vpop.eup %5381  ;;  %v2043_v9 = vpop.permute.xlu2 %2042 }
 0x1be   : > { %v1321_v7 = vmul.f32 1.442695, %v1233_v16  ;;  %v1173_v8 = vsel %vm1045_vm2, %v981_v53, %v1109_v29  ;;  %v645_v33 = vcvt.s32.f32 %v581_v23  ;;  %v580_v17 = vunpack.c.0.s8 %v6640_v56 }
 0x1bf   : > { %v582_v55 = vunpack.c.1.s8 %v6640_v56  ;;  %v6646_v27 = vpop.eup %5383  ;;  %5391 = vpow2.f32 %v2508_v2  ;;  %v1174_v28 = vsel %vm1046_vm3, %v982_v46, %v1110_v5  ;;  %vm707_vm4 = vcmp.gt.f32.partialorder %v643_v22, 0.0 }
 0x1c0   : > { %v1237_v34 = vsub.f32 0.0, %v1173_v8  ;;  %vm709_vm5 = vcmp.gt.f32.partialorder %v645_v33, 0.0  ;;  %v1417_v25 = vmul.f32 %v6521_v45, %v643_v22  ;;  %v1419_v48 = vmul.f32 %v6549_v12, %v645_v33  ;;  %v6651_v40 = vpop.eup %5385 }
 0x1c1   : > { %5393 = vpow2.f32 %v1321_v7  ;;  %v1323_v31 = vmul.f32 1.442695, %v1234_v51  ;;  %vm6653_vm6 = vmpackc.low %vm709_vm5, %vm707_vm4  ;;  %v644_v41 = vcvt.s32.f32 %v580_v17  ;;  %v646_v38 = vcvt.s32.f32 %v582_v55 }
 0x1c2   : > { %v6657_v59 = vpop.eup %5387  ;;  %v4910_v39 = vpack.c.bf16 %v1419_v48, %v1417_v25  ;;  %v2594_v52 = vmul.f32 %v6505_v21, %v643_v22  ;;  %v2596_v45 = vmul.f32 %v6513_v35, %v645_v33  ;;  %v983_v12 = vadd.f32 %v6289_v24, %v866_v4  ;;  %5277 = vset.pattern.permute.xlu2 %v5873_v19 }
 0x1c3   : > { %v6662_v11 = vpop.eup %5389  ;;  %v1238_v47 = vsub.f32 0.0, %v1174_v28  ;;  %vm708_vm7 = vcmp.gt.f32.partialorder %v644_v41, 0.0  ;;  %vm710_vm8 = vcmp.gt.f32.partialorder %v646_v38, 0.0  ;;  %v1418_v20 = vmul.f32 %v6531_v57, %v644_v41  ;;  %930 = vperm.xlu2 %5277, %v1959_v32  }
 0x1c4   : > { %v1329_v53 = vmul.f32 1.442695, %v1237_v34  ;;  %4911 = vmatmul.msk.bf16.gmra.mxu0 %vm6653_vm6, %v4910_v39  ;;  %v1420_v46 = vmul.f32 %v6555_v14, %v646_v38  ;;  %v5007_v3 = vpack.c.bf16 %v2596_v45, %v2594_v52  ;;  %v2595_v21 = vmul.f32 %v6509_v50, %v644_v41  ;;  %vm6671_vm9 = vmpackc.low %vm710_vm8, %vm708_vm7 }
 0x1c5   : > { %v6669_v35 = vpop.eup %5391  ;;  %v2597_v0 = vmul.f32 %v6517_v6, %v646_v38  ;;  %v984_v57 = vadd.f32 %v6293_v26, %v866_v4  ;;  %vm1047_vm10 = vcmp.ge.f32.partialorder %v983_v12, 0.0  ;;  %v1111_v23 = vmul.f32 0.2, %v983_v12  ;;  %v2048_v52 = vpop.permute.xlu2 %2047 }
 0x1c6   : > { %v4958_v2 = vpack.c.bf16 %v1420_v46, %v1418_v20  ;;  %5008 = vmatmul.msk.bf16.gmra.mxu2 %vm6653_vm6, %v5007_v3  ;;  %v2160_v14 = vadd.f32 %v6251_v43, %v2043_v9  ;;  %v2161_v50 = vadd.f32 %v6253_v44, %v2043_v9  ;;  %v583_v16 = vunpack.c.2.s8 %v6624_v61  ;;  %v2053_v3 = vpop.permute.xlu0 %2052 }
 0x1c7   : > { %v6682_v29 = vpop.eup %5393  ;;  %v5055_v5 = vpack.c.bf16 %v2597_v0, %v2595_v21  ;;  %vm1048_vm11 = vcmp.ge.f32.partialorder %v984_v57, 0.0  ;;  %v1112_v51 = vmul.f32 0.2, %v984_v57  ;;  %v1175_v6 = vsel %vm1047_vm10, %v983_v12, %v1111_v23 }
 0x1c8   : > { %v1331_v7 = vmul.f32 1.442695, %v1238_v47  ;;  %4959 = vmatmul.msk.bf16.gmra.mxu1 %vm6671_vm9, %v4958_v2  ;;  %vm2224_vm12 = vcmp.ge.f32.partialorder %v2160_v14, 0.0  ;;  %vm2225_vm13 = vcmp.ge.f32.partialorder %v2161_v50, 0.0  ;;  %v2288_v22 = vmul.f32 0.2, %v2160_v14 }
 0x1c9   : > { %5056 = vmatmul.msk.bf16.gmra.mxu3 %vm6671_vm9, %v5055_v5  ;;  %v1176_v8 = vsel %vm1048_vm11, %v984_v57, %v1112_v51  ;;  %v1239_v33 = vsub.f32 0.0, %v1175_v6  ;;  %v2289_v17 = vmul.f32 0.2, %v2161_v50  ;;  %v585_v55 = vunpack.c.3.s8 %v6624_v61 }
 0x1ca   : > { %v1240_v28 = vsub.f32 0.0, %v1176_v8  ;;  %v2352_v4 = vsel %vm2224_vm12, %v2160_v14, %v2288_v22  ;;  %v647_v34 = vcvt.s32.f32 %v583_v16  ;;  %v584_v25 = vunpack.c.2.s8 %v6640_v56 }
 0x1cb   : > { %5395 = vpow2.f32 %v1323_v31  ;;  %v2353_v48 = vsel %vm2225_vm13, %v2161_v50, %v2289_v17  ;;  %v2416_v37 = vsub.f32 0.0, %v2352_v4  ;;  %v649_v41 = vcvt.s32.f32 %v585_v55  ;;  %5278 = vset.pattern.permute.xlu2 %v5872_v18 }
 0x1cc   : > { %5397 = vpow2.f32 %v1329_v53  ;;  %v2417_v38 = vsub.f32 0.0, %v2353_v48  ;;  %v1421_v39 = vmul.f32 %v6612_v36, %v647_v34  ;;  %v1333_v45 = vmul.f32 1.442695, %v1239_v33  ;;  %2122 = vperm.xlu2 %5278, %v6620_v15  }
 0x1cd   : > { %5399 = vpow2.f32 %v1331_v7  ;;  %v1423_v61 = vmul.f32 %v6575_v10, %v649_v41  ;;  %v586_v19 = vunpack.c.3.s8 %v6640_v56  ;;  %v1335_v12 = vmul.f32 1.442695, %v1240_v28  ;;  %v876_v8 = vpop.permute.xlu2 %875  ;;  %v6743_v10 = vld [vmem:[%s6136_s27 + $0x38] sm:$0xff] }
 0x1ce   : > { %vm711_vm14 = vcmp.gt.f32.partialorder %v647_v34, 0.0  ;;  %vm713_vm15 = vcmp.gt.f32.partialorder %v649_v41, 0.0  ;;  %v648_v47 = vcvt.s32.f32 %v584_v25  ;;  %v2510_v32 = vmul.f32 1.442695, %v2416_v37 }
 0x1cf   : > { %v650_v31 = vcvt.s32.f32 %v586_v19  ;;  %v2598_v20 = vmul.f32 %v6569_v63, %v647_v34  ;;  %v2600_v9 = vmul.f32 %v6593_v49, %v649_v41  ;;  %v2512_v53 = vmul.f32 1.442695, %v2417_v38  ;;  %vm6699_vm1 = vmpackc.low %vm713_vm15, %vm711_vm14  ;;  %v871_v49 = vpop.permute.xlu1 %870 }
 0x1d0   : > { %v4913_v46 = vpack.c.bf16 %v1423_v61, %v1421_v39  ;;  %vm712_vm0 = vcmp.gt.f32.partialorder %v648_v47, 0.0  ;;  %v1422_v36 = vmul.f32 %v6628_v62, %v648_v47  ;;  %v2599_v58 = vmul.f32 %v6571_v60, %v648_v47 }
 0x1d1   : > { %v6697_v21 = vpop.eup %5395  ;;  %vm714_vm2 = vcmp.gt.f32.partialorder %v650_v31, 0.0  ;;  %v1424_v56 = vmul.f32 %v6583_v30, %v650_v31  ;;  %v2601_v63 = vmul.f32 %v6600_v42, %v650_v31  ;;  %v2162_v57 = vadd.f32 %v6251_v43, %v2048_v52 }
 0x1d2   : > { %v6706_v0 = vpop.eup %5397  ;;  %v2163_v62 = vadd.f32 %v6253_v44, %v2048_v52  ;;  %v985_v23 = vadd.f32 %v6289_v24, %v871_v49  ;;  %v986_v2 = vadd.f32 %v6293_v26, %v871_v49  ;;  %v5010_v50 = vpack.c.bf16 %v2600_v9, %v2598_v20  ;;  %vm6722_vm5 = vmpackc.low %vm714_vm2, %vm712_vm0 }
 0x1d3   : > { %v6713_v14 = vpop.eup %5399  ;;  %v4961_v30 = vpack.c.bf16 %v1424_v56, %v1422_v36  ;;  %v2164_v60 = vadd.f32 %v6251_v43, %v2053_v3  ;;  %v2165_v42 = vadd.f32 %v6253_v44, %v2053_v3  ;;  %vm2226_vm3 = vcmp.ge.f32.partialorder %v2162_v57, 0.0  ;;  %v6738_v36 = vld [vmem:[%s6136_s27 + $0x30] sm:$0xff] }
 0x1d4   : > { %4914 = vmatmul.msk.bf16.gmra.mxu0 %vm6699_vm1, %v4913_v46  ;;  %vm2227_vm4 = vcmp.ge.f32.partialorder %v2163_v62, 0.0  ;;  %v2290_v16 = vmul.f32 0.2, %v2162_v57  ;;  %v2291_v5 = vmul.f32 0.2, %v2163_v62  ;;  %vm1049_vm6 = vcmp.ge.f32.partialorder %v985_v23, 0.0 }
 0x1d5   : > { %vm1050_vm7 = vcmp.ge.f32.partialorder %v986_v2, 0.0  ;;  %v1113_v51 = vmul.f32 0.2, %v985_v23  ;;  %v1114_v6 = vmul.f32 0.2, %v986_v2  ;;  %v5058_v15 = vpack.c.bf16 %v2601_v63, %v2599_v58 }
 0x1d6   : > { %5011 = vmatmul.msk.bf16.gmra.mxu2 %vm6699_vm1, %v5010_v50  ;;  %v2354_v7 = vsel %vm2226_vm3, %v2162_v57, %v2290_v16  ;;  %v2355_v22 = vsel %vm2227_vm4, %v2163_v62, %v2291_v5  ;;  %vm2228_vm8 = vcmp.ge.f32.partialorder %v2164_v60, 0.0  ;;  %v2292_v25 = vmul.f32 0.2, %v2164_v60 }
 0x1d7   : > { %v2418_v33 = vsub.f32 0.0, %v2354_v7  ;;  %v2419_v17 = vsub.f32 0.0, %v2355_v22  ;;  %v1177_v55 = vsel %vm1049_vm6, %v985_v23, %v1113_v51  ;;  %v1178_v28 = vsel %vm1050_vm7, %v986_v2, %v1114_v6  ;;  %v2058_v20 = vpop.permute.xlu1 %2057 }
 0x1d8   : > { %4962 = vmatmul.msk.bf16.gmra.mxu1 %vm6722_vm5, %v4961_v30  ;;  %v1241_v4 = vsub.f32 0.0, %v1177_v55  ;;  %v1242_v34 = vsub.f32 0.0, %v1178_v28  ;;  %v2293_v48 = vmul.f32 0.2, %v2165_v42  ;;  %5401 = vpow2.f32 %v1333_v45 }
 0x1d9   : > { %5059 = vmatmul.msk.bf16.gmra.mxu3 %vm6722_vm5, %v5058_v15  ;;  %v2514_v37 = vmul.f32 1.442695, %v2418_v33  ;;  %vm2229_vm9 = vcmp.ge.f32.partialorder %v2165_v42, 0.0  ;;  %v987_v41 = vadd.f32 %v6289_v24, %v876_v8  ;;  %5403 = vpow2.f32 %v1335_v12 }
 0x1da   : > { %v2516_v38 = vmul.f32 1.442695, %v2419_v17  ;;  %v2356_v39 = vsel %vm2228_vm8, %v2164_v60, %v2292_v25  ;;  %v988_v52 = vadd.f32 %v6293_v26, %v876_v8  ;;  %5405 = vpow2.f32 %v2510_v32 }
 0x1db   : > { %v1337_v61 = vmul.f32 1.442695, %v1241_v4  ;;  %v2420_v19 = vsub.f32 0.0, %v2356_v39  ;;  %5407 = vpow2.f32 %v2512_v53  ;;  %v1339_v47 = vmul.f32 1.442695, %v1242_v34 }
 0x1dc   : > { %v2357_v45 = vsel %vm2229_vm9, %v2165_v42, %v2293_v48  ;;  %v1115_v31 = vmul.f32 0.2, %v987_v41  ;;  %5409 = vpow2.f32 %v2514_v37  ;;  %vm1051_vm10 = vcmp.ge.f32.partialorder %v987_v41, 0.0 }
 0x1dd   : > { %v2166_v9 = vadd.f32 %v6251_v43, %v2058_v20  ;;  %5411 = vpow2.f32 %v2516_v38  ;;  %v1116_v12 = vmul.f32 0.2, %v988_v52  ;;  %v2167_v46 = vadd.f32 %v6253_v44, %v2058_v20 }
 0x1de   : > { %v6740_v3 = vpop.eup %5401  ;;  %5413 = vpow2.f32 %v1337_v61  ;;  %v2421_v32 = vsub.f32 0.0, %v2357_v45  ;;  %v2518_v53 = vmul.f32 1.442695, %v2420_v19  ;;  %vm1052_vm11 = vcmp.ge.f32.partialorder %v988_v52, 0.0  ;;  %v2063_v45 = vpop.permute.xlu2 %2062 }
 0x1df   : > { %v6745_v56 = vpop.eup %5403  ;;  %5415 = vpow2.f32 %v1339_v47  ;;  %v6747_v58 = vsel %vm1051_vm10, %v987_v41, %v1115_v31  ;;  %v2294_v63 = vmul.f32 0.2, %v2166_v9  ;;  %vm2230_vm12 = vcmp.ge.f32.partialorder %v2166_v9, 0.0  ;;  %v886_v61 = vpop.permute.xlu1 %885 }
 0x1e0   : > { %v6749_v49 = vpop.eup %5405  ;;  %v2295_v57 = vmul.f32 0.2, %v2167_v46  ;;  %v587_v62 = vunpack.c.0.s8 %v6738_v36  ;;  %v589_v23 = vunpack.c.1.s8 %v6738_v36  ;;  %v1180_v30 = vsel %vm1052_vm11, %v988_v52, %v1116_v12  ;;  %v881_v31 = vpop.permute.xlu0 %880 }
 0x1e1   : > { %v6753_v2 = vpop.eup %5407  ;;  %vm2231_vm13 = vcmp.ge.f32.partialorder %v2167_v46, 0.0  ;;  %v588_v50 = vunpack.c.0.s8 %v6743_v10  ;;  %v590_v60 = vunpack.c.1.s8 %v6743_v10  ;;  %5417 = vpow2.f32 %v2518_v53 }
 0x1e2   : > { %v6757_v42 = vpop.eup %5409  ;;  %v6759_v16 = vmul.f32 1.442695, %v2421_v32  ;;  %v1243_v5 = vsub.f32 0.0, %v6747_v58  ;;  %v651_v18 = vcvt.s32.f32 %v587_v62  ;;  %v2358_v6 = vsel %vm2230_vm12, %v2166_v9, %v2294_v63 }
 0x1e3   : > { %v6762_v51 = vpop.eup %5411  ;;  %v653_v15 = vcvt.s32.f32 %v589_v23  ;;  %v652_v7 = vcvt.s32.f32 %v588_v50  ;;  %v654_v22 = vcvt.s32.f32 %v590_v60  ;;  %v1244_v33 = vsub.f32 0.0, %v1180_v30 }
 0x1e4   : > { %v6764_v8 = vpop.eup %5413  ;;  %v2359_v17 = vsel %vm2231_vm13, %v2167_v46, %v2295_v57  ;;  %vm715_vm14 = vcmp.gt.f32.partialorder %v651_v18, 0.0  ;;  %v1425_v55 = vmul.f32 %v6682_v29, %v651_v18  ;;  %v2422_v34 = vsub.f32 0.0, %v2358_v6 }
 0x1e5   : > { %v6767_v28 = vpop.eup %5415  ;;  %vm717_vm15 = vcmp.gt.f32.partialorder %v653_v15, 0.0  ;;  %v1427_v4 = vmul.f32 %v6651_v40, %v653_v15  ;;  %vm716_vm0 = vcmp.gt.f32.partialorder %v652_v7, 0.0  ;;  %vm718_vm1 = vcmp.gt.f32.partialorder %v654_v22, 0.0 }
 0x1e6   : > { %vm6770_vm2 = vmpackc.low %vm717_vm15, %vm715_vm14  ;;  %v1426_v48 = vmul.f32 %v6697_v21, %v652_v7  ;;  %v1428_v37 = vmul.f32 %v6657_v59, %v654_v22  ;;  %v2602_v41 = vmul.f32 %v6642_v13, %v651_v18  ;;  %v2423_v38 = vsub.f32 0.0, %v2359_v17 }
 0x1e7   : > { %v4916_v29 = vpack.c.bf16 %v1427_v4, %v1425_v55  ;;  %vm6777_vm3 = vmpackc.low %vm718_vm1, %vm716_vm0  ;;  %v2604_v40 = vmul.f32 %v6633_v54, %v653_v15  ;;  %v2603_v52 = vmul.f32 %v6646_v27, %v652_v7  ;;  %v6783_v19 = vpop.eup %5417  ;;  %v2605_v21 = vmul.f32 %v6637_v1, %v654_v22  ;;  %v2073_v4 = vpop.permute.xlu1 %2072 }
 0x1e8   : > { %v4964_v47 = vpack.c.bf16 %v1428_v37, %v1426_v48  ;;  %v991_v59 = vadd.f32 %v6289_v24, %v886_v61  ;;  %v992_v13 = vadd.f32 %v6293_v26, %v886_v61  ;;  %v2168_v54 = vadd.f32 %v6251_v43, %v2063_v45 }
 0x1e9   : > { %4917 = vmatmul.msk.bf16.gmra.mxu0 %vm6770_vm2, %v4916_v29  ;;  %v5013_v20 = vpack.c.bf16 %v2604_v40, %v2602_v41  ;;  %v2169_v27 = vadd.f32 %v6253_v44, %v2063_v45  ;;  %v989_v9 = vadd.f32 %v6289_v24, %v881_v31  ;;  %v5061_v1 = vpack.c.bf16 %v2605_v21, %v2603_v52 }
 0x1ea   : > { %4965 = vmatmul.msk.bf16.gmra.mxu1 %vm6777_vm3, %v4964_v47  ;;  %vm1055_vm4 = vcmp.ge.f32.partialorder %v991_v59, 0.0  ;;  %vm1056_vm5 = vcmp.ge.f32.partialorder %v992_v13, 0.0  ;;  %v1119_v12 = vmul.f32 0.2, %v991_v59  ;;  %v1120_v46 = vmul.f32 0.2, %v992_v13 }
 0x1eb   : > { %5014 = vmatmul.msk.bf16.gmra.mxu2 %vm6770_vm2, %v5013_v20  ;;  %vm2232_vm6 = vcmp.ge.f32.partialorder %v2168_v54, 0.0  ;;  %vm2233_vm7 = vcmp.ge.f32.partialorder %v2169_v27, 0.0  ;;  %v2296_v32 = vmul.f32 0.2, %v2168_v54  ;;  %v1341_v53 = vmul.f32 1.442695, %v1243_v5  ;;  %5062 = vmatmul.msk.bf16.gmra.mxu3 %vm6777_vm3, %v5061_v1  ;;  %v2068_v20 = vpop.permute.xlu2 %2067 }
 0x1ec   : > { %v1183_v58 = vsel %vm1055_vm4, %v991_v59, %v1119_v12  ;;  %v2297_v63 = vmul.f32 0.2, %v2169_v27  ;;  %v990_v57 = vadd.f32 %v6293_v26, %v881_v31  ;;  %v1343_v62 = vmul.f32 1.442695, %v1244_v33 }
 0x1ed   : > { %v1184_v23 = vsel %vm1056_vm5, %v992_v13, %v1120_v46  ;;  %v1247_v30 = vsub.f32 0.0, %v1183_v58  ;;  %v2360_v50 = vsel %vm2232_vm6, %v2168_v54, %v2296_v32  ;;  %v2522_v60 = vmul.f32 1.442695, %v2422_v34 }
 0x1ee   : > { %v1248_v18 = vsub.f32 0.0, %v1184_v23  ;;  %v2361_v6 = vsel %vm2233_vm7, %v2169_v27, %v2297_v63  ;;  %v1117_v15 = vmul.f32 0.2, %v989_v9  ;;  %5419 = vpow2.f32 %v6759_v16  ;;  %v1698_v63 = vpop.f32.mrf.mxu0 }
 0x1ef   : > { %v2524_v7 = vmul.f32 1.442695, %v2423_v38  ;;  %vm1053_vm8 = vcmp.ge.f32.partialorder %v989_v9, 0.0  ;;  %v1118_v5 = vmul.f32 0.2, %v990_v57  ;;  %5421 = vpow2.f32 %v1341_v53 }
 0x1f0   : > { %v2424_v22 = vsub.f32 0.0, %v2360_v50  ;;  %vm1054_vm9 = vcmp.ge.f32.partialorder %v990_v57, 0.0  ;;  %5423 = vpow2.f32 %v1343_v62  ;;  %v1349_v17 = vmul.f32 1.442695, %v1247_v30 }
 0x1f1   : > { %v2425_v55 = vsub.f32 0.0, %v2361_v6  ;;  %5425 = vpow2.f32 %v2522_v60  ;;  %v1351_v33 = vmul.f32 1.442695, %v1248_v18  ;;  %v6801_v25 = vsel %vm1053_vm8, %v989_v9, %v1117_v15  ;;  %v896_v15 = vpop.permute.xlu0 %895 }
 0x1f2   : > { %v2172_v34 = vadd.f32 %v6251_v43, %v2073_v4  ;;  %5427 = vpow2.f32 %v2524_v7  ;;  %v6804_v48 = vsel %vm1054_vm9, %v990_v57, %v1118_v5  ;;  %v6806_v16 = vmul.f32 1.442695, %v2424_v22  ;;  %v1787_v57 = vpop.f32.mrf.mxu1 }
 0x1f3   : > { %v2173_v37 = vadd.f32 %v6253_v44, %v2073_v4  ;;  %v591_v41 = vunpack.c.2.s8 %v6738_v36  ;;  %v593_v38 = vunpack.c.3.s8 %v6738_v36  ;;  %5429 = vpow2.f32 %v1349_v17 }
 0x1f4   : > { %v6811_v29 = vpop.eup %5419  ;;  %v6813_v39 = vmul.f32 1.442695, %v2425_v55  ;;  %v1245_v40 = vsub.f32 0.0, %v6801_v25  ;;  %v592_v52 = vunpack.c.2.s8 %v6743_v10  ;;  %5431 = vpow2.f32 %v1351_v33 }
 0x1f5   : > { %v6817_v61 = vpop.eup %5421  ;;  %v1246_v47 = vsub.f32 0.0, %v6804_v48  ;;  %v2300_v21 = vmul.f32 0.2, %v2172_v34  ;;  %v655_v59 = vcvt.s32.f32 %v591_v41  ;;  %vm2236_vm10 = vcmp.ge.f32.partialorder %v2172_v34, 0.0 }
 0x1f6   : > { %v6820_v13 = vpop.eup %5423  ;;  %v657_v36 = vcvt.s32.f32 %v593_v38  ;;  %v594_v45 = vunpack.c.3.s8 %v6743_v10  ;;  %v656_v31 = vcvt.s32.f32 %v592_v52  ;;  %vm2237_vm11 = vcmp.ge.f32.partialorder %v2173_v37, 0.0 }
 0x1f7   : > { %v6823_v54 = vpop.eup %5425  ;;  %vm719_vm12 = vcmp.gt.f32.partialorder %v655_v59, 0.0  ;;  %v1429_v27 = vmul.f32 %v6706_v0, %v655_v59  ;;  %v2170_v9 = vadd.f32 %v6251_v43, %v2068_v20  ;;  %v2301_v32 = vmul.f32 0.2, %v2173_v37 }
 0x1f8   : > { %v6827_v1 = vpop.eup %5427  ;;  %vm721_vm13 = vcmp.gt.f32.partialorder %v657_v36, 0.0  ;;  %v1431_v12 = vmul.f32 %v6740_v3, %v657_v36  ;;  %v658_v46 = vcvt.s32.f32 %v594_v45  ;;  %vm720_vm14 = vcmp.gt.f32.partialorder %v656_v31, 0.0 }
 0x1f9   : > { %v2364_v10 = vsel %vm2236_vm10, %v2172_v34, %v2300_v21  ;;  %vm6831_vm15 = vmpackc.low %vm721_vm13, %vm719_vm12  ;;  %v2606_v58 = vmul.f32 %v6662_v11, %v655_v59  ;;  %v2608_v0 = vmul.f32 %v6749_v49, %v657_v36  ;;  %v6837_v62 = vpop.eup %5429  ;;  %v1430_v3 = vmul.f32 %v6713_v14, %v656_v31  ;;  %v891_v36 = vpop.permute.xlu2 %890 }
 0x1fa   : > { %v4919_v23 = vpack.c.bf16 %v1431_v12, %v1429_v27  ;;  %vm722_vm0 = vcmp.gt.f32.partialorder %v658_v46, 0.0  ;;  %v1432_v30 = vmul.f32 %v6745_v56, %v658_v46  ;;  %v6841_v50 = vpop.eup %5431  ;;  %v2607_v11 = vmul.f32 %v6669_v35, %v656_v31  ;;  %v6865_v27 = vpop.f32.mrf.mxu2 }
 0x1fb   : > { %vm6843_vm1 = vmpackc.low %vm722_vm0, %vm720_vm14  ;;  %v5016_v18 = vpack.c.bf16 %v2608_v0, %v2606_v58  ;;  %v2609_v49 = vmul.f32 %v6753_v2, %v658_v46  ;;  %v2171_v6 = vadd.f32 %v6253_v44, %v2068_v20  ;;  %vm2234_vm2 = vcmp.ge.f32.partialorder %v2170_v9, 0.0  ;;  %v2078_v2 = vpop.permute.xlu1 %2077  ;;  %v1529_v20 = vld [vmem:[#allocation2 + $0xb0] sm:$0xff]  ;;  %v6873_v53 = vpop.f32.mrf.mxu1 }
 0x1fc   : > { %4920 = vmatmul.msk.bf16.gmra.mxu0 %vm6831_vm15, %v4919_v23  ;;  %v4967_v14 = vpack.c.bf16 %v1432_v30, %v1430_v3  ;;  %v2298_v56 = vmul.f32 0.2, %v2170_v9  ;;  %v995_v7 = vadd.f32 %v6289_v24, %v896_v15  ;;  %v996_v35 = vadd.f32 %v6293_v26, %v896_v15 }
 0x1fd   : > { %5017 = vmatmul.msk.bf16.gmra.mxu2 %vm6831_vm15, %v5016_v18  ;;  %v5064_v5 = vpack.c.bf16 %v2609_v49, %v2607_v11  ;;  %vm2235_vm3 = vcmp.ge.f32.partialorder %v2171_v6, 0.0  ;;  %v2299_v22 = vmul.f32 0.2, %v2171_v6  ;;  %v2365_v17 = vsel %vm2237_vm11, %v2173_v37, %v2301_v32 }
 0x1fe   : > { %4968 = vmatmul.msk.bf16.gmra.mxu1 %vm6843_vm1, %v4967_v14  ;;  %vm1059_vm4 = vcmp.ge.f32.partialorder %v995_v7, 0.0  ;;  %v1123_v55 = vmul.f32 0.2, %v995_v7  ;;  %v2174_v4 = vadd.f32 %v6251_v43, %v2078_v2  ;;  %v1345_v33 = vmul.f32 1.442695, %v1245_v40  ;;  %v6881_v14 = vld [vmem:[%s6136_s27 + $0x40] sm:$0xff] }
 0x1ff   : > { %5065 = vmatmul.msk.bf16.gmra.mxu3 %vm6843_vm1, %v5064_v5  ;;  %v2362_v25 = vsel %vm2234_vm2, %v2170_v9, %v2298_v56  ;;  %vm1060_vm5 = vcmp.ge.f32.partialorder %v996_v35, 0.0  ;;  %v1124_v34 = vmul.f32 0.2, %v996_v35  ;;  %v2428_v41 = vsub.f32 0.0, %v2364_v10  ;;  %v6867_v9 = vpop.f32.mrf.mxu3 }
 0x200   : > { %v2363_v38 = vsel %vm2235_vm3, %v2171_v6, %v2299_v22  ;;  %v2175_v52 = vadd.f32 %v6253_v44, %v2078_v2  ;;  %vm2238_vm6 = vcmp.ge.f32.partialorder %v2174_v4, 0.0  ;;  %5433 = vpow2.f32 %v6806_v16  ;;  %v6871_v16 = vpop.f32.mrf.mxu0 }
 0x201   : > { %v2429_v37 = vsub.f32 0.0, %v2365_v17  ;;  %v1187_v21 = vsel %vm1059_vm4, %v995_v7, %v1123_v55  ;;  %v2302_v59 = vmul.f32 0.2, %v2174_v4  ;;  %v2426_v45 = vsub.f32 0.0, %v2362_v25 }
 0x202   : > { %v1188_v40 = vsel %vm1060_vm5, %v996_v35, %v1124_v34  ;;  %vm2239_vm7 = vcmp.ge.f32.partialorder %v2175_v52, 0.0  ;;  %v2303_v31 = vmul.f32 0.2, %v2175_v52  ;;  %v1347_v12 = vmul.f32 1.442695, %v1246_v47  ;;  %v6890_v34 = vpop.f32.mrf.mxu2 }
 0x203   : > { %v2427_v46 = vsub.f32 0.0, %v2363_v38  ;;  %v2366_v32 = vsel %vm2238_vm6, %v2174_v4, %v2302_v59  ;;  %v1788_v10 = vadd.f32 %v1787_v57, %v1698_v63  ;;  %5435 = vpow2.f32 %v6813_v39  ;;  %v901_v57 = vpop.permute.xlu0 %900  ;;  %v906_v17 = vpop.permute.xlu1 %905 }
 0x204   : > { %v2534_v58 = vmul.f32 1.442695, %v2428_v41  ;;  %v1251_v0 = vsub.f32 0.0, %v1187_v21  ;;  %v2367_v23 = vsel %vm2239_vm7, %v2175_v52, %v2303_v31  ;;  %v2536_v3 = vmul.f32 1.442695, %v2429_v37  ;;  %v6898_v21 = vpop.f32.mrf.mxu1 }
 0x205   : > { %v1252_v30 = vsub.f32 0.0, %v1188_v40  ;;  %v1867_v60 = vadd.f32 %v1788_v10, %v1529_v20  ;;  %v993_v18 = vadd.f32 %v6289_v24, %v891_v36  ;;  %5437 = vpow2.f32 %v1345_v33 }
 0x206   : > { %v2530_v48 = vmul.f32 1.442695, %v2426_v45  ;;  %v2430_v47 = vsub.f32 0.0, %v2366_v32  ;;  %v994_v63 = vadd.f32 %v6293_v26, %v891_v36  ;;  %v6878_v11 = vpop.eup %5433  ;;  %5439 = vpow2.f32 %v1347_v12  ;;  %v6907_v12 = vld [vmem:[%s6136_s27 + $0x48] sm:$0xff] }
 0x207   : > { %v2532_v49 = vmul.f32 1.442695, %v2427_v46  ;;  %v2431_v39 = vsub.f32 0.0, %v2367_v23  ;;  %1899 = vst [vmem:[#allocation2 + $0xb0] sm:$0xff] %v1867_v60  ;;  %5441 = vpow2.f32 %v2534_v58  ;;  %v1357_v6 = vmul.f32 1.442695, %v1251_v0  ;;  %v6892_v41 = vpop.f32.mrf.mxu3 }
 0x208   : > { %v1121_v15 = vmul.f32 0.2, %v993_v18  ;;  %5443 = vpow2.f32 %v2536_v3  ;;  %v1359_v56 = vmul.f32 1.442695, %v1252_v30  ;;  %vm1057_vm8 = vcmp.ge.f32.partialorder %v993_v18, 0.0  ;;  %v6896_v37 = vpop.f32.mrf.mxu0 }
 0x209   : > { %v997_v7 = vadd.f32 %v6289_v24, %v901_v57  ;;  %v6884_v5 = vpop.eup %5435  ;;  %5445 = vpow2.f32 %v2530_v48  ;;  %v2538_v22 = vmul.f32 1.442695, %v2430_v47  ;;  %v1122_v35 = vmul.f32 0.2, %v994_v63 }
 0x20a   : > { %5447 = vpow2.f32 %v2532_v49  ;;  %v2540_v2 = vmul.f32 1.442695, %v2431_v39  ;;  %vm1058_vm9 = vcmp.ge.f32.partialorder %v994_v63, 0.0  ;;  %v595_v55 = vunpack.c.0.s8 %v6881_v14 }
 0x20b   : > { %v6887_v4 = vpop.eup %5437  ;;  %5449 = vpow2.f32 %v1357_v6  ;;  %v1185_v33 = vsel %vm1057_vm8, %v993_v18, %v1121_v15  ;;  %v998_v25 = vadd.f32 %v6293_v26, %v901_v57  ;;  %v1125_v52 = vmul.f32 0.2, %v997_v7  ;;  %v2707_v15 = vld [vmem:[#allocation2 + $0x148] sm:$0xff] }
 0x20c   : > { %v6894_v38 = vpop.eup %5439  ;;  %5451 = vpow2.f32 %v1359_v56  ;;  %v1186_v36 = vsel %vm1058_vm9, %v994_v63, %v1122_v35  ;;  %vm1061_vm10 = vcmp.ge.f32.partialorder %v997_v7, 0.0  ;;  %v597_v45 = vunpack.c.1.s8 %v6881_v14 }
 0x20d   : > { %v6900_v59 = vpop.eup %5441  ;;  %5453 = vpow2.f32 %v2538_v22  ;;  %v1249_v31 = vsub.f32 0.0, %v1185_v33  ;;  %v659_v20 = vcvt.s32.f32 %v595_v55  ;;  %vm1062_vm11 = vcmp.ge.f32.partialorder %v998_v25, 0.0 }
 0x20e   : > { %v6904_v40 = vpop.eup %5443  ;;  %5455 = vpow2.f32 %v2540_v2  ;;  %v1126_v32 = vmul.f32 0.2, %v998_v25  ;;  %v6912_v10 = vadd.f32 %v6289_v24, %v906_v17  ;;  %v661_v58 = vcvt.s32.f32 %v597_v45  ;;  %v1530_v2 = vld [vmem:[#allocation2 + $0x1b0] sm:$0xff] }
 0x20f   : > { %v6909_v46 = vpop.eup %5445  ;;  %v1250_v23 = vsub.f32 0.0, %v1186_v36  ;;  %v1189_v3 = vsel %vm1061_vm10, %v997_v7, %v1125_v52  ;;  %vm723_vm12 = vcmp.gt.f32.partialorder %v659_v20, 0.0  ;;  %v1433_v30 = vmul.f32 %v6764_v8, %v659_v20 }
 0x210   : > { %v6914_v0 = vpop.eup %5447  ;;  %v6920_v18 = vadd.f32 %v6293_v26, %v906_v17  ;;  %vm725_vm13 = vcmp.gt.f32.partialorder %v661_v58, 0.0  ;;  %v1435_v48 = vmul.f32 %v6817_v61, %v661_v58  ;;  %v596_v47 = vunpack.c.0.s8 %v6907_v12 }
 0x211   : > { %v6917_v60 = vpop.eup %5449  ;;  %v1353_v57 = vmul.f32 1.442695, %v1249_v31  ;;  %vm6926_vm14 = vmpackc.low %vm725_vm13, %vm723_vm12  ;;  %v598_v39 = vunpack.c.1.s8 %v6907_v12  ;;  %v2610_v8 = vmul.f32 %v6757_v42, %v659_v20  ;;  %v2612_v6 = vmul.f32 %v6783_v19, %v661_v58  ;;  %v2083_v19 = vpop.permute.xlu2 %2082 }
 0x212   : > { %v6924_v63 = vpop.eup %5451  ;;  %v1190_v61 = vsel %vm1062_vm11, %v998_v25, %v1126_v32  ;;  %v4922_v7 = vpack.c.bf16 %v1435_v48, %v1433_v30  ;;  %v660_v22 = vcvt.s32.f32 %v596_v47  ;;  %v2870_v35 = vadd.f32 %v6867_v9, %v6865_v27  ;;  %v6946_v27 = vpop.f32.mrf.mxu2 }
 0x213   : > { %v6933_v56 = vpop.eup %5453  ;;  %v1253_v55 = vsub.f32 0.0, %v1189_v3  ;;  %v662_v33 = vcvt.s32.f32 %v598_v39  ;;  %v5019_v52 = vpack.c.bf16 %v2612_v6, %v2610_v8  ;;  %v1790_v42 = vadd.f32 %v6873_v53, %v6871_v16  ;;  %v6948_v9 = vpop.f32.mrf.mxu3  ;;  %v1531_v3 = vld [vmem:[#allocation2 + $0xd8] sm:$0xff] }
 0x214   : > { %v6938_v17 = vpop.eup %5455  ;;  %4923 = vmatmul.msk.bf16.gmra.mxu0 %vm6926_vm14, %v4922_v7  ;;  %vm724_vm15 = vcmp.gt.f32.partialorder %v660_v22, 0.0  ;;  %v1434_v25 = vmul.f32 %v6767_v28, %v660_v22  ;;  %v2611_v36 = vmul.f32 %v6762_v51, %v660_v22  ;;  %v2949_v45 = vadd.f32 %v2870_v35, %v2707_v15  ;;  %v1705_v20 = vpop.f32.mrf.mxu0  ;;  %v2708_v28 = vld [vmem:[#allocation2 + $0x1d0] sm:$0xff] }
 0x215   : > { %vm726_vm0 = vcmp.gt.f32.partialorder %v662_v33, 0.0  ;;  %v1436_v31 = vmul.f32 %v6820_v13, %v662_v33  ;;  %5020 = vmatmul.msk.bf16.gmra.mxu2 %vm6926_vm14, %v5019_v52  ;;  %v2613_v16 = vmul.f32 %v6811_v29, %v662_v33  ;;  %v1868_v53 = vadd.f32 %v1790_v42, %v1530_v2  ;;  %v1794_v32 = vpop.f32.mrf.mxu1 }
 0x216   : > { %v1355_v58 = vmul.f32 1.442695, %v1250_v23  ;;  %vm1063_vm1 = vcmp.ge.f32.partialorder %v6912_v10, 0.0  ;;  %vm6956_vm2 = vmpackc.low %vm726_vm0, %vm724_vm15  ;;  %2981 = vst [vmem:[#allocation2 + $0x148] sm:$0xff] %v2949_v45  ;;  %v2872_v13 = vadd.f32 %v6892_v41, %v6890_v34  ;;  %v1793_v29 = vadd.f32 %v6898_v21, %v6896_v37  ;;  %v2709_v45 = vld [vmem:[#allocation2 + $0x100] sm:$0xff] }
 0x217   : > { %v4970_v30 = vpack.c.bf16 %v1436_v31, %v1434_v25  ;;  %v5067_v48 = vpack.c.bf16 %v2613_v16, %v2611_v36  ;;  %1900 = vst [vmem:[#allocation2 + $0x1b0] sm:$0xff] %v1868_v53  ;;  %v599_v23 = vunpack.c.2.s8 %v6881_v14  ;;  %v601_v47 = vunpack.c.3.s8 %v6881_v14 }
 0x218   : > { %5457 = vpow2.f32 %v1353_v57  ;;  %v1254_v49 = vsub.f32 0.0, %v1190_v61  ;;  %v1127_v39 = vmul.f32 0.2, %v6912_v10  ;;  %v2176_v8 = vadd.f32 %v6251_v43, %v2083_v19 }
 0x219   : > { %v1361_v6 = vmul.f32 1.442695, %v1253_v55  ;;  %v1128_v34 = vmul.f32 0.2, %v6920_v18  ;;  %4971 = vmatmul.msk.bf16.gmra.mxu1 %vm6956_vm2, %v4970_v30  ;;  %5068 = vmatmul.msk.bf16.gmra.mxu3 %vm6956_vm2, %v5067_v48  ;;  %v2950_v41 = vadd.f32 %v2872_v13, %v2708_v28  ;;  %v1869_v37 = vadd.f32 %v1793_v29, %v1531_v3  ;;  %v2088_v30 = vpop.permute.xlu2 %2087 }
 0x21a   : > { %v663_v21 = vcvt.s32.f32 %v599_v23  ;;  %v665_v15 = vcvt.s32.f32 %v601_v47  ;;  %v600_v14 = vunpack.c.2.s8 %v6907_v12  ;;  %v602_v57 = vunpack.c.3.s8 %v6907_v12 }
 0x21b   : > { %5459 = vpow2.f32 %v1355_v58  ;;  %vm1064_vm3 = vcmp.ge.f32.partialorder %v6920_v18, 0.0  ;;  %v2177_v61 = vadd.f32 %v6253_v44, %v2083_v19  ;;  %2982 = vst [vmem:[#allocation2 + $0x1d0] sm:$0xff] %v2950_v41  ;;  %v1363_v7 = vmul.f32 1.442695, %v1254_v49  ;;  %v2787_v19 = vpop.f32.mrf.mxu2  ;;  %v2876_v25 = vpop.f32.mrf.mxu3 }
 0x21c   : > { %v2304_v22 = vmul.f32 0.2, %v2176_v8  ;;  %1901 = vst [vmem:[#allocation2 + $0xd8] sm:$0xff] %v1869_v37  ;;  %v1437_v35 = vmul.f32 %v6887_v4, %v663_v21  ;;  %v1439_v2 = vmul.f32 %v6837_v62, %v665_v15  ;;  %v1191_v55 = vsel %vm1063_vm1, %v6912_v10, %v1127_v39  ;;  %v1532_v10 = vld [vmem:[#allocation2 + $0x18] sm:$0xff]  ;;  %v1708_v31 = vpop.f32.mrf.mxu0 }
 0x21d   : > { %vm2240_vm4 = vcmp.ge.f32.partialorder %v2176_v8, 0.0  ;;  %v664_v33 = vcvt.s32.f32 %v600_v14  ;;  %v666_v12 = vcvt.s32.f32 %v602_v57  ;;  %5461 = vpow2.f32 %v1361_v6  ;;  %v1797_v16 = vpop.f32.mrf.mxu1  ;;  %v2710_v57 = vld [vmem:[#allocation2 + $0xc8] sm:$0xff] }
 0x21e   : > { %v6982_v52 = vpop.eup %5457  ;;  %v1192_v42 = vsel %vm1064_vm3, %v6920_v18, %v1128_v34  ;;  %vm727_vm5 = vcmp.gt.f32.partialorder %v663_v21, 0.0  ;;  %vm729_vm6 = vcmp.gt.f32.partialorder %v665_v15, 0.0  ;;  %vm2241_vm7 = vcmp.ge.f32.partialorder %v2177_v61, 0.0 }
 0x21f   : > { %v2305_v4 = vmul.f32 0.2, %v2177_v61  ;;  %v2614_v62 = vmul.f32 %v6823_v54, %v663_v21  ;;  %v2616_v36 = vmul.f32 %v6878_v11, %v665_v15  ;;  %v2368_v53 = vsel %vm2240_vm4, %v2176_v8, %v2304_v22  ;;  %vm6994_vm8 = vmpackc.low %vm729_vm6, %vm727_vm5 }
 0x220   : > { %v4925_v58 = vpack.c.bf16 %v1439_v2, %v1437_v35  ;;  %v2875_v18 = vadd.f32 %v6948_v9, %v6946_v27  ;;  %v1795_v51 = vadd.f32 %v1794_v32, %v1705_v20  ;;  %v1438_v54 = vmul.f32 %v6894_v38, %v664_v33  ;;  %v911_v32 = vpop.permute.xlu1 %910  ;;  %v1533_v35 = vld [vmem:[#allocation2 + $0x50] sm:$0xff] }
 0x221   : > { %v6990_v28 = vpop.eup %5459  ;;  %v1440_v11 = vmul.f32 %v6841_v50, %v666_v12  ;;  %v2615_v3 = vmul.f32 %v6827_v1, %v664_v33  ;;  %v2617_v29 = vmul.f32 %v6884_v5, %v666_v12  ;;  %v2178_v9 = vadd.f32 %v6251_v43, %v2088_v30  ;;  %v2093_v1 = vpop.permute.xlu0 %2092 }
 0x222   : > { %v2951_v48 = vadd.f32 %v2875_v18, %v2709_v45  ;;  %v1870_v27 = vadd.f32 %v1795_v51, %v1532_v10  ;;  %v2179_v20 = vadd.f32 %v6253_v44, %v2088_v30  ;;  %vm728_vm9 = vcmp.gt.f32.partialorder %v664_v33, 0.0  ;;  %v916_v13 = vpop.permute.xlu2 %915 }
 0x223   : > { %vm730_vm10 = vcmp.gt.f32.partialorder %v666_v12, 0.0  ;;  %v5022_v23 = vpack.c.bf16 %v2616_v36, %v2614_v62  ;;  %v1001_v47 = vadd.f32 %v6289_v24, %v911_v32  ;;  %v7005_v38 = vpop.eup %5461  ;;  %5463 = vpow2.f32 %v1363_v7  ;;  %v7020_v2 = vpop.f32.mrf.mxu2 }
 0x224   : > { %v1255_v50 = vsub.f32 0.0, %v1191_v55  ;;  %4926 = vmatmul.msk.bf16.gmra.mxu0 %vm6994_vm8, %v4925_v58  ;;  %2983 = vst [vmem:[#allocation2 + $0x100] sm:$0xff] %v2951_v48  ;;  %v1256_v5 = vsub.f32 0.0, %v1192_v42  ;;  %v2369_v49 = vsel %vm2241_vm7, %v2177_v61, %v2305_v4  ;;  %v2432_v39 = vsub.f32 0.0, %v2368_v53  ;;  %vm7014_vm11 = vmpackc.low %vm730_vm10, %vm728_vm9  ;;  %v7022_v55 = vpop.f32.mrf.mxu3  ;;  %v7029_v62 = vpop.f32.mrf.mxu0 }
 0x225   : > { %v4973_v8 = vpack.c.bf16 %v1440_v11, %v1438_v54  ;;  %5023 = vmatmul.msk.bf16.gmra.mxu2 %vm6994_vm8, %v5022_v23  ;;  %1902 = vst [vmem:[#allocation2 + $0x18] sm:$0xff] %v1870_v27  ;;  %v5070_v34 = vpack.c.bf16 %v2617_v29, %v2615_v3  ;;  %v2306_v41 = vmul.f32 0.2, %v2178_v9  ;;  %v2307_v37 = vmul.f32 0.2, %v2179_v20  ;;  %v7031_v36 = vpop.f32.mrf.mxu1  ;;  %v7039_v3 = vld [vmem:[%s6136_s27 + $0x50] sm:$0xff] }
 0x226   : > { %v1002_v21 = vadd.f32 %v6293_v26, %v911_v32  ;;  %vm2242_vm12 = vcmp.ge.f32.partialorder %v2178_v9, 0.0  ;;  %vm2243_vm13 = vcmp.ge.f32.partialorder %v2179_v20, 0.0  ;;  %v1129_v15 = vmul.f32 0.2, %v1001_v47  ;;  %v7051_v23 = vld [vmem:[%s6136_s27 + $0x58] sm:$0xff] }
 0x227   : > { %v2180_v14 = vadd.f32 %v6251_v43, %v2093_v1  ;;  %v1365_v61 = vmul.f32 1.442695, %v1255_v50  ;;  %v2433_v7 = vsub.f32 0.0, %v2369_v49  ;;  %vm1065_vm14 = vcmp.ge.f32.partialorder %v1001_v47, 0.0 }
 0x228   : > { %v2877_v22 = vadd.f32 %v2876_v25, %v2787_v19  ;;  %v1367_v33 = vmul.f32 1.442695, %v1256_v5  ;;  %v2542_v12 = vmul.f32 1.442695, %v2432_v39  ;;  %v2181_v42 = vadd.f32 %v6253_v44, %v2093_v1 }
 0x229   : > { %4974 = vmatmul.msk.bf16.gmra.mxu1 %vm7014_vm11, %v4973_v8  ;;  %5071 = vmatmul.msk.bf16.gmra.mxu3 %vm7014_vm11, %v5070_v34  ;;  %v1798_v4 = vadd.f32 %v1797_v16, %v1708_v31  ;;  %v7033_v19 = vpop.eup %5463  ;;  %v2370_v25 = vsel %vm2242_vm12, %v2178_v9, %v2306_v41  ;;  %v2371_v45 = vsel %vm2243_vm13, %v2179_v20, %v2307_v37  ;;  %v1130_v10 = vmul.f32 0.2, %v1002_v21  ;;  %v2098_v9 = vpop.permute.xlu1 %2097 }
 0x22a   : > { %v2952_v53 = vadd.f32 %v2877_v22, %v2710_v57  ;;  %vm1066_vm15 = vcmp.ge.f32.partialorder %v1002_v21, 0.0  ;;  %v1193_v58 = vsel %vm1065_vm14, %v1001_v47, %v1129_v15  ;;  %v2308_v18 = vmul.f32 0.2, %v2180_v14 }
 0x22b   : > { %v1871_v51 = vadd.f32 %v1798_v4, %v1533_v35  ;;  %5465 = vpow2.f32 %v1365_v61  ;;  %v2544_v31 = vmul.f32 1.442695, %v2433_v7  ;;  %vm2244_vm0 = vcmp.ge.f32.partialorder %v2180_v14, 0.0  ;;  %v2792_v41 = vpop.f32.mrf.mxu2 }
 0x22c   : > { %2984 = vst [vmem:[#allocation2 + $0xc8] sm:$0xff] %v2952_v53  ;;  %5467 = vpow2.f32 %v1367_v33  ;;  %v2434_v16 = vsub.f32 0.0, %v2370_v25  ;;  %v2435_v54 = vsub.f32 0.0, %v2371_v45  ;;  %v2309_v11 = vmul.f32 0.2, %v2181_v42  ;;  %v2881_v37 = vpop.f32.mrf.mxu3  ;;  %v1713_v61 = vpop.f32.mrf.mxu0 }
 0x22d   : > { %1903 = vst [vmem:[#allocation2 + $0x50] sm:$0xff] %v1871_v51  ;;  %v7041_v29 = vsel %vm1066_vm15, %v1002_v21, %v1130_v10  ;;  %v1257_v30 = vsub.f32 0.0, %v1193_v58  ;;  %vm2245_vm1 = vcmp.ge.f32.partialorder %v2181_v42, 0.0  ;;  %v1003_v48 = vadd.f32 %v6289_v24, %v916_v13  ;;  %v1802_v7 = vpop.f32.mrf.mxu1 }
 0x22e   : > { %5469 = vpow2.f32 %v2542_v12  ;;  %v7044_v27 = vsel %vm2244_vm0, %v2180_v14, %v2308_v18  ;;  %v7047_v20 = vadd.f32 %v6293_v26, %v916_v13  ;;  %v603_v32 = vunpack.c.0.s8 %v7039_v3 }
 0x22f   : > { %5471 = vpow2.f32 %v2544_v31  ;;  %v7053_v47 = vmul.f32 1.442695, %v2434_v16  ;;  %v7055_v50 = vmul.f32 1.442695, %v2435_v54  ;;  %v1258_v1 = vsub.f32 0.0, %v7041_v29 }
 0x230   : > { %v7058_v5 = vsel %vm2245_vm1, %v2181_v42, %v2309_v11  ;;  %v7062_v39 = vmul.f32 1.442695, %v1257_v30  ;;  %v2436_v8 = vsub.f32 0.0, %v7044_v27  ;;  %v1131_v6 = vmul.f32 0.2, %v1003_v48  ;;  %v2711_v11 = vld [vmem:[#allocation2 + $0x40] sm:$0xff] }
 0x231   : > { %v7060_v49 = vpop.eup %5465  ;;  %v605_v34 = vunpack.c.1.s8 %v7039_v3  ;;  %vm1067_vm2 = vcmp.ge.f32.partialorder %v1003_v48, 0.0  ;;  %v667_v15 = vcvt.s32.f32 %v603_v32  ;;  %v604_v14 = vunpack.c.0.s8 %v7051_v23  ;;  %v926_v32 = vpop.permute.xlu1 %925 }
 0x232   : > { %v7066_v21 = vpop.eup %5467  ;;  %v606_v57 = vunpack.c.1.s8 %v7051_v23  ;;  %v2437_v22 = vsub.f32 0.0, %v7058_v5  ;;  %vm1068_vm3 = vcmp.ge.f32.partialorder %v7047_v20, 0.0  ;;  %v2182_v35 = vadd.f32 %v6251_v43, %v2098_v9 }
 0x233   : > { %v669_v33 = vcvt.s32.f32 %v605_v34  ;;  %v1132_v42 = vmul.f32 0.2, %v7047_v20  ;;  %vm731_vm4 = vcmp.gt.f32.partialorder %v667_v15, 0.0  ;;  %v1441_v4 = vmul.f32 %v6982_v52, %v667_v15 }
 0x234   : > { %v7073_v12 = vpop.eup %5469  ;;  %v668_v25 = vcvt.s32.f32 %v604_v14  ;;  %v1195_v10 = vsel %vm1067_vm2, %v1003_v48, %v1131_v6  ;;  %v2183_v53 = vadd.f32 %v6253_v44, %v2098_v9  ;;  %v670_v51 = vcvt.s32.f32 %v606_v57  ;;  %v1534_v9 = vld [vmem:[#allocation2 + $0x168] sm:$0xff] }
 0x235   : > { %v7077_v45 = vpop.eup %5471  ;;  %vm733_vm5 = vcmp.gt.f32.partialorder %v669_v33, 0.0  ;;  %v1443_v58 = vmul.f32 %v6917_v60, %v669_v33  ;;  %v2618_v52 = vmul.f32 %v6909_v46, %v667_v15  ;;  %vm2246_vm8 = vcmp.ge.f32.partialorder %v2182_v35, 0.0 }
 0x236   : > { %vm7082_vm6 = vmpackc.low %vm733_vm5, %vm731_vm4  ;;  %vm732_vm7 = vcmp.gt.f32.partialorder %v668_v25, 0.0  ;;  %v1442_v13 = vmul.f32 %v6990_v28, %v668_v25  ;;  %v2620_v16 = vmul.f32 %v6900_v59, %v669_v33  ;;  %v2619_v54 = vmul.f32 %v6914_v0, %v668_v25  ;;  %v7109_v25 = vpop.f32.mrf.mxu2 }
 0x237   : > { %v4928_v31 = vpack.c.bf16 %v1443_v58, %v1441_v4  ;;  %vm734_vm9 = vcmp.gt.f32.partialorder %v670_v51, 0.0  ;;  %v1444_v60 = vmul.f32 %v6924_v63, %v670_v51  ;;  %v2621_v30 = vmul.f32 %v6904_v40, %v670_v51  ;;  %v2712_v63 = vld [vmem:[#allocation2 + $0x1f8] sm:$0xff]  ;;  %v1535_v4 = vld [vmem:[#allocation2 + $0x130] sm:$0xff] }
 0x238   : > { %v2880_v48 = vadd.f32 %v7022_v55, %v7020_v2  ;;  %v2310_v28 = vmul.f32 0.2, %v2182_v35  ;;  %vm7097_vm10 = vmpackc.low %vm734_vm9, %vm732_vm7  ;;  %v5025_v46 = vpack.c.bf16 %v2620_v16, %v2618_v52  ;;  %v1800_v0 = vadd.f32 %v7031_v36, %v7029_v62  ;;  %v7111_v62 = vpop.f32.mrf.mxu3  ;;  %v2103_v52 = vpop.permute.xlu2 %2102 }
 0x239   : > { %4929 = vmatmul.msk.bf16.gmra.mxu0 %vm7082_vm6, %v4928_v31  ;;  %v1007_v40 = vadd.f32 %v6289_v24, %v926_v32  ;;  %v4976_v6 = vpack.c.bf16 %v1444_v60, %v1442_v13  ;;  %v5073_v2 = vpack.c.bf16 %v2621_v30, %v2619_v54  ;;  %v2882_v34 = vadd.f32 %v2881_v37, %v2792_v41  ;;  %v7118_v37 = vpop.f32.mrf.mxu0 }
 0x23a   : > { %v2953_v55 = vadd.f32 %v2880_v48, %v2711_v11  ;;  %v1196_v15 = vsel %vm1068_vm3, %v7047_v20, %v1132_v42  ;;  %v1259_v14 = vsub.f32 0.0, %v1195_v10  ;;  %v2311_v57 = vmul.f32 0.2, %v2183_v53  ;;  %5026 = vmatmul.msk.bf16.gmra.mxu2 %vm7082_vm6, %v5025_v46  ;;  %v7120_v42 = vpop.f32.mrf.mxu1 }
 0x23b   : > { %v1872_v33 = vadd.f32 %v1800_v0, %v1534_v9  ;;  %4977 = vmatmul.msk.bf16.gmra.mxu1 %vm7097_vm10, %v4976_v6  ;;  %5074 = vmatmul.msk.bf16.gmra.mxu3 %vm7097_vm10, %v5073_v2  ;;  %v1008_v36 = vadd.f32 %v6293_v26, %v926_v32  ;;  %v2954_v20 = vadd.f32 %v2882_v34, %v2712_v63  ;;  %5473 = vpow2.f32 %v7053_v47 }
 0x23c   : > { %2985 = vst [vmem:[#allocation2 + $0x40] sm:$0xff] %v2953_v55  ;;  %v1803_v41 = vadd.f32 %v1802_v7, %v1713_v61  ;;  %v1371_v10 = vmul.f32 1.442695, %v1258_v1  ;;  %vm2247_vm11 = vcmp.ge.f32.partialorder %v2183_v53, 0.0  ;;  %v1135_v58 = vmul.f32 0.2, %v1007_v40 }
 0x23d   : > { %1904 = vst [vmem:[#allocation2 + $0x168] sm:$0xff] %v1872_v33  ;;  %v1260_v18 = vsub.f32 0.0, %v1196_v15  ;;  %v2374_v51 = vsel %vm2246_vm8, %v2182_v35, %v2310_v28  ;;  %vm1071_vm12 = vcmp.ge.f32.partialorder %v1007_v40, 0.0  ;;  %5475 = vpow2.f32 %v7055_v50 }
 0x23e   : > { %2986 = vst [vmem:[#allocation2 + $0x1f8] sm:$0xff] %v2954_v20  ;;  %v1873_v13 = vadd.f32 %v1803_v41, %v1535_v4  ;;  %v2550_v61 = vmul.f32 1.442695, %v2436_v8  ;;  %v2552_v47 = vmul.f32 1.442695, %v2437_v22  ;;  %5477 = vpow2.f32 %v7062_v39  ;;  %v921_v8 = vpop.permute.xlu0 %920  ;;  %v7146_v9 = vpop.f32.mrf.mxu2 }
 0x23f   : > { %v1373_v29 = vmul.f32 1.442695, %v1259_v14  ;;  %v2375_v1 = vsel %vm2247_vm11, %v2183_v53, %v2311_v57  ;;  %v1136_v7 = vmul.f32 0.2, %v1008_v36  ;;  %v2438_v31 = vsub.f32 0.0, %v2374_v51  ;;  %v2113_v14 = vpop.permute.xlu1 %2112 }
 0x240   : > { %1905 = vst [vmem:[#allocation2 + $0x130] sm:$0xff] %v1873_v13  ;;  %vm1072_vm13 = vcmp.ge.f32.partialorder %v1008_v36, 0.0  ;;  %v1199_v35 = vsel %vm1071_vm12, %v1007_v40, %v1135_v58  ;;  %v2184_v16 = vadd.f32 %v6251_v43, %v2103_v52  ;;  %5479 = vpow2.f32 %v1371_v10  ;;  %v7148_v32 = vpop.f32.mrf.mxu3 }
 0x241   : > { %v1375_v50 = vmul.f32 1.442695, %v1260_v18  ;;  %v7133_v54 = vpop.eup %5473  ;;  %5481 = vpow2.f32 %v2550_v61  ;;  %v2439_v27 = vsub.f32 0.0, %v2375_v1  ;;  %v2185_v5 = vadd.f32 %v6253_v44, %v2103_v52  ;;  %v7156_v0 = vpop.f32.mrf.mxu0 }
 0x242   : > { %v607_v39 = vunpack.c.2.s8 %v7039_v3  ;;  %5483 = vpow2.f32 %v2552_v47  ;;  %v7137_v22 = vsel %vm1072_vm13, %v1008_v36, %v1136_v7  ;;  %v1263_v53 = vsub.f32 0.0, %v1199_v35  ;;  %v2713_v47 = vld [vmem:[#allocation2 + $0x20] sm:$0xff] }
 0x243   : > { %v7140_v11 = vadd.f32 %v6289_v24, %v921_v8  ;;  %v7142_v60 = vpop.eup %5475  ;;  %5485 = vpow2.f32 %v1373_v29  ;;  %v7144_v30 = vmul.f32 1.442695, %v2438_v31  ;;  %v2312_v48 = vmul.f32 0.2, %v2184_v16  ;;  %v1536_v31 = vld [vmem:[#allocation2 + $0x48] sm:$0xff] }
 0x244   : > { %v7150_v28 = vpop.eup %5477  ;;  %5487 = vpow2.f32 %v1375_v50  ;;  %vm2248_vm14 = vcmp.ge.f32.partialorder %v2184_v16, 0.0  ;;  %v7153_v59 = vadd.f32 %v6293_v26, %v921_v8  ;;  %v609_v46 = vunpack.c.3.s8 %v7039_v3 }
 0x245   : > { %v7158_v40 = vpop.f32.mrf.mxu1  ;;  %v7160_v63 = vmul.f32 1.442695, %v2439_v27  ;;  %v1264_v6 = vsub.f32 0.0, %v7137_v22  ;;  %vm2249_vm15 = vcmp.ge.f32.partialorder %v2185_v5, 0.0  ;;  %v671_v2 = vcvt.s32.f32 %v607_v39 }
 0x246   : > { %v7163_v55 = vpop.eup %5479  ;;  %v7165_v34 = vmul.f32 1.442695, %v1263_v53  ;;  %v2313_v15 = vmul.f32 0.2, %v2185_v5  ;;  %vm1069_vm0 = vcmp.ge.f32.partialorder %v7140_v11, 0.0  ;;  %v673_v57 = vcvt.s32.f32 %v609_v46 }
 0x247   : > { %v7168_v3 = vpop.eup %5481  ;;  %v7171_v33 = vsel %vm2248_vm14, %v2184_v16, %v2312_v48  ;;  %v7174_v4 = vadd.f32 %v6251_v43, %v2113_v14  ;;  %vm735_vm1 = vcmp.gt.f32.partialorder %v671_v2, 0.0  ;;  %v1445_v36 = vmul.f32 %v7005_v38, %v671_v2 }
 0x248   : > { %v7177_v20 = vpop.eup %5483  ;;  %vm1070_vm2 = vcmp.ge.f32.partialorder %v7153_v59, 0.0  ;;  %vm737_vm3 = vcmp.gt.f32.partialorder %v673_v57, 0.0  ;;  %v1447_v41 = vmul.f32 %v7060_v49, %v673_v57  ;;  %v608_v10 = vunpack.c.2.s8 %v7051_v23 }
 0x249   : > { %v7182_v58 = vpop.eup %5485  ;;  %v1133_v18 = vmul.f32 0.2, %v7140_v11  ;;  %vm7185_vm4 = vmpackc.low %vm737_vm3, %vm735_vm1  ;;  %v610_v13 = vunpack.c.3.s8 %v7051_v23  ;;  %v2622_v38 = vmul.f32 %v6933_v56, %v671_v2  ;;  %v2624_v61 = vmul.f32 %v7073_v12, %v673_v57 }
 0x24a   : > { %v7192_v29 = vpop.eup %5487  ;;  %v2377_v49 = vsel %vm2249_vm15, %v2185_v5, %v2313_v15  ;;  %v4931_v1 = vpack.c.bf16 %v1447_v41, %v1445_v36  ;;  %v672_v7 = vcvt.s32.f32 %v608_v10  ;;  %v2885_v52 = vadd.f32 %v7111_v62, %v7109_v25  ;;  %v2108_v5 = vpop.permute.xlu2 %2107 }
 0x24b   : > { %v2189_v35 = vadd.f32 %v6253_v44, %v2113_v14  ;;  %v674_v16 = vcvt.s32.f32 %v610_v13  ;;  %v5028_v50 = vpack.c.bf16 %v2624_v61, %v2622_v38  ;;  %v1805_v56 = vadd.f32 %v7120_v42, %v7118_v37  ;;  %v7208_v37 = vpop.f32.mrf.mxu2  ;;  %v936_v14 = vpop.permute.xlu0 %935 }
 0x24c   : > { %4932 = vmatmul.msk.bf16.gmra.mxu0 %vm7185_vm4, %v4931_v1  ;;  %vm736_vm5 = vcmp.gt.f32.partialorder %v672_v7, 0.0  ;;  %v1446_v23 = vmul.f32 %v7033_v19, %v672_v7  ;;  %v2623_v12 = vmul.f32 %v6938_v17, %v672_v7  ;;  %v2955_v27 = vadd.f32 %v2885_v52, %v2713_v47  ;;  %v7210_v42 = vpop.f32.mrf.mxu3 }
 0x24d   : > { %vm738_vm6 = vcmp.gt.f32.partialorder %v674_v16, 0.0  ;;  %v1448_v25 = vmul.f32 %v7066_v21, %v674_v16  ;;  %5029 = vmatmul.msk.bf16.gmra.mxu2 %vm7185_vm4, %v5028_v50  ;;  %v2625_v62 = vmul.f32 %v7077_v45, %v674_v16  ;;  %v1874_v8 = vadd.f32 %v1805_v56, %v1536_v31  ;;  %v7221_v45 = vpop.f32.mrf.mxu0  ;;  %v7223_v53 = vpop.f32.mrf.mxu1 }
 0x24e   : > { %v1134_v39 = vmul.f32 0.2, %v7153_v59  ;;  %vm2252_vm7 = vcmp.ge.f32.partialorder %v7174_v4, 0.0  ;;  %v2316_v17 = vmul.f32 0.2, %v7174_v4  ;;  %vm7216_vm8 = vmpackc.low %vm738_vm6, %vm736_vm5  ;;  %2987 = vst [vmem:[#allocation2 + $0x20] sm:$0xff] %v2955_v27  ;;  %v2186_v21 = vadd.f32 %v6251_v43, %v2108_v5 }
 0x24f   : > { %v2317_v48 = vmul.f32 0.2, %v2189_v35  ;;  %v4979_v46 = vpack.c.bf16 %v1448_v25, %v1446_v23  ;;  %v5076_v2 = vpack.c.bf16 %v2625_v62, %v2623_v12  ;;  %1906 = vst [vmem:[#allocation2 + $0x48] sm:$0xff] %v1874_v8  ;;  %v2187_v15 = vadd.f32 %v6253_v44, %v2108_v5 }
 0x250   : > { %5489 = vpow2.f32 %v7144_v30  ;;  %v2440_v57 = vsub.f32 0.0, %v7171_v33  ;;  %vm2253_vm9 = vcmp.ge.f32.partialorder %v2189_v35, 0.0  ;;  %v1011_v36 = vadd.f32 %v6289_v24, %v936_v14 }
 0x251   : > { %5491 = vpow2.f32 %v7160_v63  ;;  %v1383_v41 = vmul.f32 1.442695, %v1264_v6  ;;  %v2441_v10 = vsub.f32 0.0, %v2377_v49  ;;  %v1197_v51 = vsel %vm1069_vm0, %v7140_v11, %v1133_v18  ;;  %4980 = vmatmul.msk.bf16.gmra.mxu1 %vm7216_vm8, %v4979_v46  ;;  %5077 = vmatmul.msk.bf16.gmra.mxu3 %vm7216_vm8, %v5076_v2  ;;  %v2714_v18 = vld [vmem:[#allocation2 + $0x128] sm:$0xff]  ;;  %v1537_v49 = vld [vmem:[#allocation2 + $0x180] sm:$0xff] }
 0x252   : > { %5493 = vpow2.f32 %v7165_v34  ;;  %v1198_v30 = vsel %vm1070_vm2, %v7153_v59, %v1134_v39  ;;  %v2380_v22 = vsel %vm2252_vm7, %v7174_v4, %v2316_v17  ;;  %v2314_v63 = vmul.f32 0.2, %v2186_v21  ;;  %v2118_v34 = vpop.permute.xlu1 %2117 }
 0x253   : > { %v2381_v6 = vsel %vm2253_vm9, %v2189_v35, %v2317_v48  ;;  %vm2250_vm10 = vcmp.ge.f32.partialorder %v2186_v21, 0.0  ;;  %v2315_v11 = vmul.f32 0.2, %v2187_v15  ;;  %v1012_v33 = vadd.f32 %v6293_v26, %v936_v14  ;;  %v7251_v1 = vpop.f32.mrf.mxu2 }
 0x254   : > { %v2558_v13 = vmul.f32 1.442695, %v2440_v57  ;;  %v1261_v38 = vsub.f32 0.0, %v1197_v51  ;;  %vm2251_vm11 = vcmp.ge.f32.partialorder %v2187_v15, 0.0  ;;  %v1139_v61 = vmul.f32 0.2, %v1011_v36  ;;  %v7253_v7 = vpop.f32.mrf.mxu3  ;;  %v931_v57 = vpop.permute.xlu2 %930 }
 0x255   : > { %v2560_v47 = vmul.f32 1.442695, %v2441_v10  ;;  %vm1075_vm12 = vcmp.ge.f32.partialorder %v1011_v36, 0.0  ;;  %v2887_v59 = vadd.f32 %v7148_v32, %v7146_v9  ;;  %v1808_v4 = vadd.f32 %v7158_v40, %v7156_v0  ;;  %v7258_v56 = vpop.f32.mrf.mxu0  ;;  %v7260_v23 = vpop.f32.mrf.mxu1 }
 0x256   : > { %v7255_v52 = vpop.eup %5489  ;;  %v1262_v31 = vsub.f32 0.0, %v1198_v30  ;;  %v2444_v35 = vsub.f32 0.0, %v2380_v22  ;;  %v2445_v16 = vsub.f32 0.0, %v2381_v6  ;;  %v2378_v50 = vsel %vm2250_vm10, %v2186_v21, %v2314_v63  ;;  %v7275_v22 = vld [vmem:[%s6136_s27 + $0x60] sm:$0xff] }
 0x257   : > { %v7262_v9 = vpop.eup %5491  ;;  %v2379_v32 = vsel %vm2251_vm11, %v2187_v15, %v2315_v11  ;;  %v1140_v0 = vmul.f32 0.2, %v1012_v33  ;;  %v2190_v40 = vadd.f32 %v6251_v43, %v2118_v34  ;;  %v2956_v12 = vadd.f32 %v2887_v59, %v2714_v18 }
 0x258   : > { %v7266_v27 = vpop.eup %5493  ;;  %vm1076_vm13 = vcmp.ge.f32.partialorder %v1012_v33, 0.0  ;;  %v1203_v5 = vsel %vm1075_vm12, %v1011_v36, %v1139_v61  ;;  %v2191_v25 = vadd.f32 %v6253_v44, %v2118_v34  ;;  %v1875_v62 = vadd.f32 %v1808_v4, %v1537_v49  ;;  %v7294_v49 = vld [vmem:[%s6136_s27 + $0x68] sm:$0xff] }
 0x259   : > { %5495 = vpow2.f32 %v1383_v41  ;;  %v1377_v8 = vmul.f32 1.442695, %v1261_v38  ;;  %v2442_v39 = vsub.f32 0.0, %v2378_v50  ;;  %2988 = vst [vmem:[#allocation2 + $0x128] sm:$0xff] %v2956_v12  ;;  %v1379_v17 = vmul.f32 1.442695, %v1262_v31 }
 0x25a   : > { %5497 = vpow2.f32 %v2558_v13  ;;  %v2443_v19 = vsub.f32 0.0, %v2379_v32  ;;  %1907 = vst [vmem:[#allocation2 + $0x180] sm:$0xff] %v1875_v62  ;;  %v2566_v21 = vmul.f32 1.442695, %v2444_v35  ;;  %v1204_v48 = vsel %vm1076_vm13, %v1012_v33, %v1140_v0 }
 0x25b   : > { %v1267_v46 = vsub.f32 0.0, %v1203_v5  ;;  %v2318_v2 = vmul.f32 0.2, %v2190_v40  ;;  %5499 = vpow2.f32 %v2560_v47  ;;  %v2568_v15 = vmul.f32 1.442695, %v2445_v16  ;;  %v7270_v41 = vpop.f32.mrf.mxu2  ;;  %v7290_v47 = vpop.permute.xlu0 %940 }
 0x25c   : > { %vm2254_vm14 = vcmp.ge.f32.partialorder %v2190_v40, 0.0  ;;  %v2319_v14 = vmul.f32 0.2, %v2191_v25  ;;  %5501 = vpow2.f32 %v1377_v8  ;;  %v2562_v36 = vmul.f32 1.442695, %v2442_v39  ;;  %v7272_v10 = vpop.f32.mrf.mxu3 }
 0x25d   : > { %vm2255_vm15 = vcmp.ge.f32.partialorder %v2191_v25, 0.0  ;;  %5503 = vpow2.f32 %v1379_v17  ;;  %v2564_v51 = vmul.f32 1.442695, %v2443_v19  ;;  %v1268_v30 = vsub.f32 0.0, %v1204_v48  ;;  %v7277_v63 = vpop.f32.mrf.mxu0  ;;  %v7279_v6 = vpop.f32.mrf.mxu1 }
 0x25e   : > { %5505 = vpow2.f32 %v2566_v21  ;;  %v1389_v33 = vmul.f32 1.442695, %v1267_v46  ;;  %v2382_v18 = vsel %vm2254_vm14, %v2190_v40, %v2318_v2  ;;  %v2383_v38 = vsel %vm2255_vm15, %v2191_v25, %v2319_v14 }
 0x25f   : > { %v7281_v11 = vpop.eup %5495  ;;  %5507 = vpow2.f32 %v2568_v15  ;;  %v1009_v61 = vadd.f32 %v6289_v24, %v931_v57  ;;  %v7288_v34 = vadd.f32 %v6293_v26, %v931_v57  ;;  %v611_v59 = vunpack.c.0.s8 %v7275_v22 }
 0x260   : > { %v7284_v13 = vpop.eup %5497  ;;  %5509 = vpow2.f32 %v2562_v36  ;;  %v7298_v31 = vmul.f32 1.442695, %v1268_v30  ;;  %v2446_v35 = vsub.f32 0.0, %v2382_v18  ;;  %v2447_v50 = vsub.f32 0.0, %v2383_v38  ;;  %v2123_v18 = vpop.permute.xlu2 %2122 }
 0x261   : > { %v7296_v4 = vpop.eup %5499  ;;  %5511 = vpow2.f32 %v2564_v51  ;;  %v613_v32 = vunpack.c.1.s8 %v7275_v22  ;;  %v675_v0 = vcvt.s32.f32 %v611_v59  ;;  %vm1073_vm0 = vcmp.ge.f32.partialorder %v1009_v61, 0.0 }
 0x262   : > { %v7300_v16 = vpop.eup %5501  ;;  %5513 = vpow2.f32 %v1389_v33  ;;  %v7307_v12 = vadd.f32 %v6289_v24, %v7290_v47  ;;  %v612_v5 = vunpack.c.0.s8 %v7294_v49  ;;  %v614_v25 = vunpack.c.1.s8 %v7294_v49 }
 0x263   : > { %v7303_v40 = vpop.eup %5503  ;;  %vm1074_vm1 = vcmp.ge.f32.partialorder %v7288_v34, 0.0  ;;  %v677_v8 = vcvt.s32.f32 %v613_v32  ;;  %vm739_vm2 = vcmp.gt.f32.partialorder %v675_v0, 0.0  ;;  %v1449_v39 = vmul.f32 %v7150_v28, %v675_v0  ;;  %v7315_v17 = vpop.f32.mrf.mxu2 }
 0x264   : > { %v7311_v62 = vpop.eup %5505  ;;  %v7317_v19 = vpop.f32.mrf.mxu3  ;;  %v1137_v48 = vmul.f32 0.2, %v1009_v61  ;;  %v676_v46 = vcvt.s32.f32 %v612_v5  ;;  %v678_v2 = vcvt.s32.f32 %v614_v25  ;;  %v2626_v15 = vmul.f32 %v7133_v54, %v675_v0  ;;  %v2715_v25 = vld [vmem:[#allocation2 + $0x1a0] sm:$0xff] }
 0x265   : > { %10128 = vst [vmem:[#allocation25_spill] sm:$0xff] %v7311_v62  ;;  %v7319_v21 = vpop.eup %5507  ;;  %v1138_v51 = vmul.f32 0.2, %v7288_v34  ;;  %vm741_vm3 = vcmp.gt.f32.partialorder %v677_v8, 0.0  ;;  %v1451_v28 = vmul.f32 %v7182_v58, %v677_v8  ;;  %v2628_v30 = vmul.f32 %v7168_v3, %v677_v8  ;;  %v1538_v8 = vld [vmem:[#allocation2 + $0x110] sm:$0xff] }
 0x266   : > { %10129 = vst [vmem:[#allocation26_spill] sm:$0xff] %v7319_v21  ;;  %v7322_v14 = vpop.f32.mrf.mxu0  ;;  %v7326_v36 = vpop.eup %5509  ;;  %vm7334_vm4 = vmpackc.low %vm741_vm3, %vm739_vm2  ;;  %vm740_vm5 = vcmp.gt.f32.partialorder %v676_v46, 0.0  ;;  %vm742_vm6 = vcmp.gt.f32.partialorder %v678_v2, 0.0  ;;  %v1450_v54 = vmul.f32 %v7163_v55, %v676_v46  ;;  %v1452_v38 = vmul.f32 %v7192_v29, %v678_v2 }
 0x267   : > { %v7324_v57 = vpop.f32.mrf.mxu1  ;;  %v7331_v33 = vpop.eup %5511  ;;  %v4934_v32 = vpack.c.bf16 %v1451_v28, %v1449_v39  ;;  %vm7342_vm7 = vmpackc.low %vm742_vm6, %vm740_vm5  ;;  %v5031_v3 = vpack.c.bf16 %v2628_v30, %v2626_v15  ;;  %v2627_v0 = vmul.f32 %v7142_v60, %v676_v46  ;;  %v2629_v5 = vmul.f32 %v7177_v20, %v678_v2  ;;  %v2716_v39 = vld [vmem:[#allocation2 + $0x1f0] sm:$0xff] }
 0x268   : > { %10130 = vst [vmem:[#allocation27_spill] sm:$0xff] %v7331_v33  ;;  %v7340_v59 = vpop.eup %5513  ;;  %v2570_v21 = vmul.f32 1.442695, %v2446_v35  ;;  %v4982_v33 = vpack.c.bf16 %v1452_v38, %v1450_v54  ;;  %v2890_v55 = vadd.f32 %v7210_v42, %v7208_v37  ;;  %v1810_v29 = vadd.f32 %v7223_v53, %v7221_v45  ;;  %v946_v42 = vpop.permute.xlu1 %945 }
 0x269   : > { %v7352_v28 = vmul.f32 1.442695, %v2447_v50  ;;  %v1201_v62 = vsel %vm1073_vm0, %v1009_v61, %v1137_v48  ;;  %4935 = vmatmul.msk.bf16.gmra.mxu0 %vm7334_vm4, %v4934_v32  ;;  %5032 = vmatmul.msk.bf16.gmra.mxu2 %vm7334_vm4, %v5031_v3  ;;  %v5079_v60 = vpack.c.bf16 %v2629_v5, %v2627_v0  ;;  %v2892_v20 = vadd.f32 %v7253_v7, %v7251_v1  ;;  %v1539_v61 = vld [vmem:[#allocation2 + $0x118] sm:$0xff] }
 0x26a   : > { %v1202_v37 = vsel %vm1074_vm1, %v7288_v34, %v1138_v51  ;;  %4983 = vmatmul.msk.bf16.gmra.mxu1 %vm7342_vm7, %v4982_v33  ;;  %v2957_v45 = vadd.f32 %v2890_v55, %v2715_v25  ;;  %v1876_v53 = vadd.f32 %v1810_v29, %v1538_v8  ;;  %v615_v35 = vunpack.c.2.s8 %v7275_v22  ;;  %v1540_v55 = vld [vmem:[#allocation2 + $0x98] sm:$0xff] }
 0x26b   : > { %v7369_v50 = vadd.f32 %v6293_v26, %v7290_v47  ;;  %v1141_v48 = vmul.f32 0.2, %v7307_v12  ;;  %5080 = vmatmul.msk.bf16.gmra.mxu3 %vm7342_vm7, %v5079_v60  ;;  %v2958_v1 = vadd.f32 %v2892_v20, %v2716_v39  ;;  %v1813_v7 = vadd.f32 %v7260_v23, %v7258_v56  ;;  %v2718_v39 = vld [vmem:[#allocation2 + $0x78] sm:$0xff]  ;;  %v1541_v60 = vld [vmem:[#allocation2 + $0x120] sm:$0xff] }
 0x26c   : > { %5515 = vpow2.f32 %v7298_v31  ;;  %vm1077_vm8 = vcmp.ge.f32.partialorder %v7307_v12, 0.0  ;;  %2989 = vst [vmem:[#allocation2 + $0x1a0] sm:$0xff] %v2957_v45  ;;  %v617_v47 = vunpack.c.3.s8 %v7275_v22  ;;  %v616_v2 = vunpack.c.2.s8 %v7294_v49 }
 0x26d   : > { %v1265_v30 = vsub.f32 0.0, %v1201_v62  ;;  %v1266_v33 = vsub.f32 0.0, %v1202_v37  ;;  %1908 = vst [vmem:[#allocation2 + $0x110] sm:$0xff] %v1876_v53  ;;  %v1877_v56 = vadd.f32 %v1813_v7, %v1539_v61  ;;  %v618_v23 = vunpack.c.3.s8 %v7294_v49  ;;  %v10139_v61 = vld [vmem:[#allocation25_spill] sm:$0xff] }
 0x26e   : > { %v7376_v34 = vpop.f32.mrf.mxu2  ;;  %v7378_v46 = vpop.f32.mrf.mxu3  ;;  %5517 = vpow2.f32 %v2570_v21  ;;  %v7390_v31 = vadd.f32 %v6289_v24, %v946_v42  ;;  %2990 = vst [vmem:[#allocation2 + $0x1f0] sm:$0xff] %v2958_v1  ;;  %v679_v54 = vcvt.s32.f32 %v615_v35  ;;  %v681_v22 = vcvt.s32.f32 %v617_v47  ;;  %v2719_v35 = vld [vmem:[#allocation2 + $0x70] sm:$0xff] }
 0x26f   : > { %v7384_v15 = vpop.f32.mrf.mxu0  ;;  %v7386_v51 = vpop.f32.mrf.mxu1  ;;  %vm1078_vm9 = vcmp.ge.f32.partialorder %v7369_v50, 0.0  ;;  %v1142_v38 = vmul.f32 0.2, %v7369_v50  ;;  %v7397_v62 = vsel %vm1077_vm8, %v7307_v12, %v1141_v48  ;;  %v7400_v32 = vadd.f32 %v6293_v26, %v946_v42  ;;  %1909 = vst [vmem:[#allocation2 + $0x118] sm:$0xff] %v1877_v56 }
 0x270   : > { %v1453_v24 = vmul.f32 %v7300_v16, %v679_v54  ;;  %v1455_v49 = vmul.f32 %v7266_v27, %v681_v22  ;;  %v680_v21 = vcvt.s32.f32 %v616_v2  ;;  %v682_v58 = vcvt.s32.f32 %v618_v23  ;;  %v2717_v16 = vld [vmem:[#allocation2 + $0xe8] sm:$0xff] }
 0x271   : > { %v1385_v3 = vmul.f32 1.442695, %v1265_v30  ;;  %v1387_v0 = vmul.f32 1.442695, %v1266_v33  ;;  %v7405_v5 = vadd.f32 %v6251_v43, %v2123_v18  ;;  %vm743_vm10 = vcmp.gt.f32.partialorder %v679_v54, 0.0 }
 0x272   : > { %v7407_v25 = vpop.eup %5515  ;;  %vm745_vm11 = vcmp.gt.f32.partialorder %v681_v22, 0.0  ;;  %v1454_v12 = vmul.f32 %v7303_v40, %v680_v21  ;;  %v1456_v26 = vmul.f32 %v7281_v11, %v682_v58  ;;  %v2630_v8 = vmul.f32 %v7255_v52, %v679_v54  ;;  %v1543_v54 = vld [vmem:[#allocation2 + $0x108] sm:$0xff] }
 0x273   : > { %vm744_vm12 = vcmp.gt.f32.partialorder %v680_v21, 0.0  ;;  %v2632_v27 = vmul.f32 %v7284_v13, %v681_v22  ;;  %v2895_v29 = vadd.f32 %v7272_v10, %v7270_v41  ;;  %v1815_v43 = vadd.f32 %v7279_v6, %v7277_v63  ;;  %vm7428_vm14 = vmpackc.low %vm745_vm11, %vm743_vm10 }
 0x274   : > { %v7417_v40 = vpop.eup %5517  ;;  %v4937_v11 = vpack.c.bf16 %v1455_v49, %v1453_v24  ;;  %vm746_vm13 = vcmp.gt.f32.partialorder %v682_v58, 0.0  ;;  %v2897_v52 = vadd.f32 %v7317_v19, %v7315_v17  ;;  %v1818_v13 = vadd.f32 %v7324_v57, %v7322_v14 }
 0x275   : > { %v2631_v10 = vmul.f32 %v7262_v9, %v680_v21  ;;  %v2633_v63 = vmul.f32 %v7296_v4, %v682_v58  ;;  %v2959_v6 = vadd.f32 %v2895_v29, %v2717_v16  ;;  %v1878_v45 = vadd.f32 %v1815_v43, %v1540_v55  ;;  %vm7438_vm0 = vmpackc.low %vm746_vm13, %vm744_vm12  ;;  %v7443_v4 = vld [vmem:[%s6136_s27 + $0x70] sm:$0xff] }
 0x276   : > { %v2812_v20 = vpop.f32.mrf.mxu2  ;;  %v2901_v37 = vpop.f32.mrf.mxu3  ;;  %v2193_v53 = vadd.f32 %v6253_v44, %v2123_v18  ;;  %v4985_v17 = vpack.c.bf16 %v1456_v26, %v1454_v12  ;;  %v2960_v19 = vadd.f32 %v2897_v52, %v2718_v39  ;;  %v1879_v14 = vadd.f32 %v1818_v13, %v1541_v60  ;;  %v2720_v18 = vld [vmem:[#allocation2 + $0x90] sm:$0xff] }
 0x277   : > { %v1206_v57 = vsel %vm1078_vm9, %v7369_v50, %v1142_v38  ;;  %vm1079_vm15 = vcmp.ge.f32.partialorder %v7390_v31, 0.0  ;;  %v5034_v44 = vpack.c.bf16 %v2632_v27, %v2630_v8  ;;  %2991 = vst [vmem:[#allocation2 + $0xe8] sm:$0xff] %v2959_v6  ;;  %v2900_v48 = vadd.f32 %v7378_v46, %v7376_v34  ;;  %v1542_v46 = vld [vmem:[#allocation2 + $0x150] sm:$0xff] }
 0x278   : > { %5519 = vpow2.f32 %v1385_v3  ;;  %vm1080_vm1 = vcmp.ge.f32.partialorder %v7400_v32, 0.0  ;;  %v1143_v50 = vmul.f32 0.2, %v7390_v31  ;;  %1910 = vst [vmem:[#allocation2 + $0x98] sm:$0xff] %v1878_v45  ;;  %v1820_v1 = vadd.f32 %v7386_v51, %v7384_v15  ;;  %v7462_v51 = vld [vmem:[%s6136_s27 + $0x78] sm:$0xff] }
 0x279   : > { %v1733_v42 = vpop.f32.mrf.mxu0  ;;  %5521 = vpow2.f32 %v1387_v0  ;;  %v1144_v7 = vmul.f32 0.2, %v7400_v32  ;;  %v2320_v47 = vmul.f32 0.2, %v7405_v5  ;;  %4938 = vmatmul.msk.bf16.gmra.mxu0 %vm7428_vm14, %v4937_v11  ;;  %5035 = vmatmul.msk.bf16.gmra.mxu2 %vm7428_vm14, %v5034_v44  ;;  %v5082_v34 = vpack.c.bf16 %v2633_v63, %v2631_v10  ;;  %2992 = vst [vmem:[#allocation2 + $0x78] sm:$0xff] %v2960_v19  ;;  %v2721_v10 = vld [vmem:[#allocation2 + $0x1d8] sm:$0xff] }
 0x27a   : > { %vm2256_vm2 = vcmp.ge.f32.partialorder %v7405_v5, 0.0  ;;  %v2321_v2 = vmul.f32 0.2, %v2193_v53  ;;  %4986 = vmatmul.msk.bf16.gmra.mxu1 %vm7438_vm0, %v4985_v17  ;;  %1911 = vst [vmem:[#allocation2 + $0x120] sm:$0xff] %v1879_v14  ;;  %v619_v15 = vunpack.c.0.s8 %v7443_v4  ;;  %v2961_v30 = vadd.f32 %v2900_v48, %v2719_v35  ;;  %v1544_v63 = vld [vmem:[#allocation2 + $0x60] sm:$0xff]  ;;  %v2722_v35 = vld [vmem:[#allocation2 + $0xd0] sm:$0xff] }
 0x27b   : > { %v1822_v41 = vpop.f32.mrf.mxu1  ;;  %v1269_v33 = vsub.f32 0.0, %v7397_v62  ;;  %v1270_v56 = vsub.f32 0.0, %v1206_v57  ;;  %vm2257_vm3 = vcmp.ge.f32.partialorder %v2193_v53, 0.0  ;;  %5083 = vmatmul.msk.bf16.gmra.mxu3 %vm7438_vm0, %v5082_v34  ;;  %v621_v23 = vunpack.c.1.s8 %v7443_v4 }
 0x27c   : > { %v1207_v24 = vsel %vm1079_vm15, %v7390_v31, %v1143_v50  ;;  %2993 = vst [vmem:[#allocation2 + $0x70] sm:$0xff] %v2961_v30  ;;  %v1880_v49 = vadd.f32 %v1820_v1, %v1542_v46  ;;  %v2902_v21 = vadd.f32 %v2901_v37, %v2812_v20  ;;  %v1823_v58 = vadd.f32 %v1822_v41, %v1733_v42  ;;  %v10140_v1 = vld [vmem:[#allocation27_spill] sm:$0xff] }
 0x27d   : > { %v1208_v62 = vsel %vm1080_vm1, %v7400_v32, %v1144_v7  ;;  %v2384_v3 = vsel %vm2256_vm2, %v7405_v5, %v2320_v47  ;;  %v620_v0 = vunpack.c.0.s8 %v7462_v51  ;;  %v622_v12 = vunpack.c.1.s8 %v7462_v51  ;;  %v10141_v47 = vld [vmem:[#allocation26_spill] sm:$0xff] }
 0x27e   : > { %v5520_v16 = vpop.eup %5519  ;;  %v2385_v31 = vsel %vm2257_vm3, %v2193_v53, %v2321_v2  ;;  %v683_v55 = vcvt.s32.f32 %v619_v15  ;;  %1912 = vst [vmem:[#allocation2 + $0x150] sm:$0xff] %v1880_v49  ;;  %v2962_v27 = vadd.f32 %v2902_v21, %v2720_v18  ;;  %v1881_v29 = vadd.f32 %v1823_v58, %v1543_v54 }
 0x27f   : > { %v5522_v43 = vpop.eup %5521  ;;  %5523 = vpow2.f32 %v7352_v28  ;;  %v1393_v32 = vmul.f32 1.442695, %v1269_v33  ;;  %v1395_v39 = vmul.f32 1.442695, %v1270_v56  ;;  %v685_v60 = vcvt.s32.f32 %v621_v23 }
 0x280   : > { %v2815_v22 = vpop.f32.mrf.mxu2  ;;  %v1271_v5 = vsub.f32 0.0, %v1207_v24  ;;  %v1272_v20 = vsub.f32 0.0, %v1208_v62  ;;  %2994 = vst [vmem:[#allocation2 + $0x90] sm:$0xff] %v2962_v27  ;;  %v2448_v52 = vsub.f32 0.0, %v2384_v3  ;;  %v2449_v13 = vsub.f32 0.0, %v2385_v31 }
 0x281   : > { %v1735_v26 = vpop.f32.mrf.mxu0  ;;  %v684_v42 = vcvt.s32.f32 %v620_v0  ;;  %v686_v41 = vcvt.s32.f32 %v622_v12  ;;  %1913 = vst [vmem:[#allocation2 + $0x108] sm:$0xff] %v1881_v29  ;;  %vm747_vm4 = vcmp.gt.f32.partialorder %v683_v55, 0.0  ;;  %vm749_vm5 = vcmp.gt.f32.partialorder %v685_v60, 0.0 }
 0x282   : > { %v2904_v38 = vpop.f32.mrf.mxu3  ;;  %v1457_v6 = vmul.f32 %v5520_v16, %v683_v55  ;;  %v2634_v28 = vmul.f32 %v7326_v36, %v683_v55  ;;  %v1459_v45 = vmul.f32 %v7340_v59, %v685_v60  ;;  %v2636_v17 = vmul.f32 %v10139_v61, %v685_v60  ;;  %vm4939_vm8 = vmpackc.low %vm749_vm5, %vm747_vm4  ;;  %v1545_v16 = vld [vmem:[#allocation2 + $0xe0] sm:$0xff] }
 0x283   : > { %v1824_v8 = vpop.f32.mrf.mxu1  ;;  %v2905_v37 = vadd.f32 %v2904_v38, %v2815_v22  ;;  %vm748_vm6 = vcmp.gt.f32.partialorder %v684_v42, 0.0  ;;  %v1458_v53 = vmul.f32 %v5522_v43, %v684_v42  ;;  %vm750_vm7 = vcmp.gt.f32.partialorder %v686_v41, 0.0 }
 0x284   : > { %v1825_v11 = vadd.f32 %v1824_v8, %v1735_v26  ;;  %v1460_v57 = vmul.f32 %v7407_v25, %v686_v41  ;;  %v1397_v50 = vmul.f32 1.442695, %v1271_v5  ;;  %v2635_v7 = vmul.f32 %v10140_v1, %v684_v42  ;;  %vm7491_vm9 = vmpackc.low %vm750_vm7, %vm748_vm6  ;;  %v2723_v42 = vld [vmem:[#allocation2 + $0xb8] sm:$0xff] }
 0x285   : > { %v2963_v9 = vadd.f32 %v2905_v37, %v2721_v10  ;;  %v5524_v48 = vpop.eup %5523  ;;  %v2637_v36 = vmul.f32 %v10141_v47, %v686_v41  ;;  %5525 = vpow2.f32 %v1393_v32  ;;  %v2574_v59 = vmul.f32 1.442695, %v2448_v52  ;;  %v2725_v47 = vld [vmem:[#allocation2 + $0xa8] sm:$0xff] }
 0x286   : > { %v1882_v44 = vadd.f32 %v1825_v11, %v1544_v63  ;;  %v1399_v46 = vmul.f32 1.442695, %v1272_v20  ;;  %v4940_v2 = vpack.c.bf16 %v1459_v45, %v1457_v6  ;;  %v5037_v15 = vpack.c.bf16 %v2636_v17, %v2634_v28  ;;  %v1546_v6 = vld [vmem:[#allocation2 + $0x188] sm:$0xff] }
 0x287   : > { %2995 = vst [vmem:[#allocation2 + $0x1d8] sm:$0xff] %v2963_v9  ;;  %5527 = vpow2.f32 %v1395_v39  ;;  %v2576_v33 = vmul.f32 1.442695, %v2449_v13  ;;  %v4988_v56 = vpack.c.bf16 %v1460_v57, %v1458_v53  ;;  %v5085_v23 = vpack.c.bf16 %v2637_v36, %v2635_v7 }
 0x288   : > { %v2817_v19 = vpop.f32.mrf.mxu2  ;;  %1914 = vst [vmem:[#allocation2 + $0x60] sm:$0xff] %v1882_v44  ;;  %5529 = vpow2.f32 %v1397_v50  ;;  %v623_v18 = vunpack.c.2.s8 %v7443_v4  ;;  %v625_v54 = vunpack.c.3.s8 %v7443_v4  ;;  %v624_v38 = vunpack.c.2.s8 %v7462_v51  ;;  %v1547_v44 = vld [vmem:[#allocation2 + $0x138] sm:$0xff] }
 0x289   : > { %4941 = vmatmul.msk.bf16.gmra.mxu0 %vm4939_vm8, %v4940_v2  ;;  %5038 = vmatmul.msk.bf16.gmra.mxu2 %vm4939_vm8, %v5037_v15  ;;  %5531 = vpow2.f32 %v2574_v59  ;;  %v626_v24 = vunpack.c.3.s8 %v7462_v51 }
 0x28a   : > { %v2906_v14 = vpop.f32.mrf.mxu3  ;;  %4989 = vmatmul.msk.bf16.gmra.mxu1 %vm7491_vm9, %v4988_v56  ;;  %5533 = vpow2.f32 %v1399_v46  ;;  %v687_v58 = vcvt.s32.f32 %v623_v18  ;;  %v689_v3 = vcvt.s32.f32 %v625_v54  ;;  %v688_v12 = vcvt.s32.f32 %v624_v38  ;;  %v1548_v46 = vld [vmem:[#allocation2 + $0x140] sm:$0xff]  ;;  %v2726_v56 = vld [vmem:[#allocation2 + $0x1c8] sm:$0xff] }
 0x28b   : > { %v2907_v34 = vadd.f32 %v2906_v14, %v2817_v19  ;;  %5086 = vmatmul.msk.bf16.gmra.mxu3 %vm7491_vm9, %v5085_v23  ;;  %v5526_v22 = vpop.eup %5525  ;;  %5535 = vpow2.f32 %v2576_v33  ;;  %v690_v26 = vcvt.s32.f32 %v626_v24  ;;  %v2724_v14 = vld [vmem:[#allocation2 + $0x88] sm:$0xff]  ;;  %v1549_v38 = vld [vmem:[#allocation2 + $0x80] sm:$0xff] }
 0x28c   : > { %vm751_vm10 = vcmp.gt.f32.partialorder %v687_v58, 0.0  ;;  %vm753_vm11 = vcmp.gt.f32.partialorder %v689_v3, 0.0  ;;  %v1461_v4 = vmul.f32 %v5526_v22, %v687_v58  ;;  %vm752_vm12 = vcmp.gt.f32.partialorder %v688_v12, 0.0 }
 0x28d   : > { %v2964_v30 = vadd.f32 %v2907_v34, %v2722_v35  ;;  %v5528_v21 = vpop.eup %5527  ;;  %v2638_v51 = vmul.f32 %v7417_v40, %v687_v58  ;;  %vm754_vm13 = vcmp.gt.f32.partialorder %v690_v26, 0.0  ;;  %v2639_v37 = vmul.f32 %v5524_v48, %v688_v12  ;;  %vm4942_vm14 = vmpackc.low %vm753_vm11, %vm751_vm10 }
 0x28e   : > { %v5530_v62 = vpop.eup %5529  ;;  %v1462_v39 = vmul.f32 %v5528_v21, %v688_v12  ;;  %vm4990_vm15 = vmpackc.low %vm754_vm13, %vm752_vm12 }
 0x28f   : > { %2996 = vst [vmem:[#allocation2 + $0xd0] sm:$0xff] %v2964_v30  ;;  %v5532_v0 = vpop.eup %5531  ;;  %v1463_v29 = vmul.f32 %v5530_v62, %v689_v3  ;;  %v2727_v62 = vld [vmem:[#allocation2 + $0x170] sm:$0xff] }
 0x290   : > { %v5534_v8 = vpop.eup %5533  ;;  %v2640_v43 = vmul.f32 %v5532_v0, %v689_v3 }
 0x291   : > { %v1738_v49 = vpop.f32.mrf.mxu0  ;;  %v5536_v55 = vpop.eup %5535  ;;  %v1464_v60 = vmul.f32 %v5534_v8, %v690_v26  ;;  %v4943_v52 = vpack.c.bf16 %v1463_v29, %v1461_v4 }
 0x292   : > { %v2641_v11 = vmul.f32 %v5536_v55, %v690_v26  ;;  %v5040_v13 = vpack.c.bf16 %v2640_v43, %v2638_v51  ;;  %v1550_v26 = vld [vmem:[#allocation2 + $0x1a8] sm:$0xff] }
 0x293   : > { %v4991_v10 = vpack.c.bf16 %v1464_v60, %v1462_v39  ;;  %v1551_v39 = vld [vmem:[#allocation2 + $0x1b8] sm:$0xff] }
 0x294   : > { %v5088_v63 = vpack.c.bf16 %v2641_v11, %v2639_v37  ;;  %v2729_v11 = vld [vmem:[#allocation2 + $0x68] sm:$0xff] }
 0x296   : > { %v1827_v31 = vpop.f32.mrf.mxu1 }
 0x297   : > { %v1828_v27 = vadd.f32 %v1827_v31, %v1738_v49 }
 0x298   : > { %v2820_v32 = vpop.f32.mrf.mxu2 }
 0x299   : > { %v1883_v5 = vadd.f32 %v1828_v27, %v1545_v16  ;;  %v1740_v20 = vpop.f32.mrf.mxu0  ;;  %4944 = vmatmul.msk.bf16.gmra.mxu0 %vm4942_vm14, %v4943_v52  ;;  %5041 = vmatmul.msk.bf16.gmra.mxu2 %vm4942_vm14, %v5040_v13  ;;  %v2728_v27 = vld [vmem:[#allocation2 + $0x178] sm:$0xff] }
 0x29a   : > { %4992 = vmatmul.msk.bf16.gmra.mxu1 %vm4990_vm15, %v4991_v10 }
 0x29b   : > { %1915 = vst [vmem:[#allocation2 + $0xe0] sm:$0xff] %v1883_v5  ;;  %5089 = vmatmul.msk.bf16.gmra.mxu3 %vm4990_vm15, %v5088_v63 }
 0x29c   : > { %v2909_v41 = vpop.f32.mrf.mxu3 }
 0x29d   : > { %v2910_v40 = vadd.f32 %v2909_v41, %v2820_v32  ;;  %v1552_v41 = vld [vmem:[#allocation2 + $0x28] sm:$0xff] }
 0x29e   : > { %v1829_v28 = vpop.f32.mrf.mxu1 }
 0x29f   : > { %v2965_v45 = vadd.f32 %v2910_v40, %v2723_v42  ;;  %v1830_v53 = vadd.f32 %v1829_v28, %v1740_v20 }
 0x2a0   : > { %v2822_v61 = vpop.f32.mrf.mxu2 }
 0x2a1   : > { %2997 = vst [vmem:[#allocation2 + $0xb8] sm:$0xff] %v2965_v45  ;;  %v1884_v17 = vadd.f32 %v1830_v53, %v1546_v6  ;;  %v1743_v19 = vpop.f32.mrf.mxu0  ;;  %v2730_v45 = vld [vmem:[#allocation2 + $0x190] sm:$0xff] }
 0x2a3   : > { %1916 = vst [vmem:[#allocation2 + $0x188] sm:$0xff] %v1884_v17 }
 0x2a4   : > { %v2911_v57 = vpop.f32.mrf.mxu3 }
 0x2a5   : > { %v2912_v9 = vadd.f32 %v2911_v57, %v2822_v61 }
 0x2a6   : > { %v1832_v35 = vpop.f32.mrf.mxu1 }
 0x2a7   : > { %v2966_v48 = vadd.f32 %v2912_v9, %v2724_v14  ;;  %v1833_v50 = vadd.f32 %v1832_v35, %v1743_v19  ;;  %v1553_v14 = vld [vmem:[#allocation2 + $0x1e8] sm:$0xff] }
 0x2a8   : > { %v2825_v1 = vpop.f32.mrf.mxu2 }
 0x2a9   : > { %2998 = vst [vmem:[#allocation2 + $0x88] sm:$0xff] %v2966_v48  ;;  %v1885_v7 = vadd.f32 %v1833_v50, %v1547_v44  ;;  %v1745_v34 = vpop.f32.mrf.mxu0  ;;  %v2731_v48 = vld [vmem:[#allocation2 + $0x198] sm:$0xff] }
 0x2ab   : > { %1917 = vst [vmem:[#allocation2 + $0x138] sm:$0xff] %v1885_v7 }
 0x2ac   : > { %v2914_v36 = vpop.f32.mrf.mxu3 }
 0x2ad   : > { %v2915_v59 = vadd.f32 %v2914_v36, %v2825_v1 }
 0x2ae   : > { %v1834_v2 = vpop.f32.mrf.mxu1 }
 0x2af   : > { %v2967_v25 = vadd.f32 %v2915_v59, %v2725_v47  ;;  %v1835_v15 = vadd.f32 %v1834_v2, %v1745_v34  ;;  %v1554_v47 = vld [vmem:[#allocation2 + $0xf8] sm:$0xff] }
 0x2b0   : > { %v2827_v33 = vpop.f32.mrf.mxu2 }
 0x2b1   : > { %2999 = vst [vmem:[#allocation2 + $0xa8] sm:$0xff] %v2967_v25  ;;  %v1886_v30 = vadd.f32 %v1835_v15, %v1548_v46  ;;  %v2732_v25 = vld [vmem:[#allocation2 + $0x38] sm:$0xff] }
 0x2b3   : > { %1918 = vst [vmem:[#allocation2 + $0x140] sm:$0xff] %v1886_v30 }
 0x2b4   : > { %v2916_v23 = vpop.f32.mrf.mxu3 }
 0x2b5   : > { %v2917_v18 = vadd.f32 %v2916_v23, %v2827_v33 }
 0x2b6   : > { %v1748_v22 = vpop.f32.mrf.mxu0 }
 0x2b7   : > { %v2968_v54 = vadd.f32 %v2917_v18, %v2726_v56  ;;  %v1555_v56 = vld [vmem:[#allocation2 + $0x160] sm:$0xff] }
 0x2b8   : > { %v1837_v24 = vpop.f32.mrf.mxu1 }
 0x2b9   : > { %3000 = vst [vmem:[#allocation2 + $0x1c8] sm:$0xff] %v2968_v54  ;;  %v1838_v49 = vadd.f32 %v1837_v24, %v1748_v22  ;;  %v2733_v24 = vld [vmem:[#allocation2 + $0xc0] sm:$0xff] }
 0x2bb   : > { %v1887_v21 = vadd.f32 %v1838_v49, %v1549_v38 }
 0x2bd   : > { %1919 = vst [vmem:[#allocation2 + $0x80] sm:$0xff] %v1887_v21  ;;  %v2830_v58 = vpop.f32.mrf.mxu2 }
 0x2be   : > { %v2919_v3 = vpop.f32.mrf.mxu3  ;;  %v1750_v0 = vpop.f32.mrf.mxu0 }
 0x2bf   : > { %v2920_v12 = vadd.f32 %v2919_v3, %v2830_v58 }
 0x2c0   : > { %v1839_v8 = vpop.f32.mrf.mxu1 }
 0x2c1   : > { %v2969_v16 = vadd.f32 %v2920_v12, %v2727_v62  ;;  %v1840_v31 = vadd.f32 %v1839_v8, %v1750_v0  ;;  %v1556_v62 = vld [vmem:[#allocation2 + $0x30] sm:$0xff] }
 0x2c3   : > { %3001 = vst [vmem:[#allocation2 + $0x170] sm:$0xff] %v2969_v16  ;;  %v1888_v55 = vadd.f32 %v1840_v31, %v1550_v26  ;;  %v2734_v16 = vld [vmem:[#allocation2 + $0x1c0] sm:$0xff] }
 0x2c5   : > { %1920 = vst [vmem:[#allocation2 + $0x1a8] sm:$0xff] %v1888_v55  ;;  %v2832_v4 = vpop.f32.mrf.mxu2 }
 0x2c6   : > { %v2921_v29 = vpop.f32.mrf.mxu3 }
 0x2c7   : > { %v2922_v51 = vadd.f32 %v2921_v29, %v2832_v4 }
 0x2c9   : > { %v2970_v43 = vadd.f32 %v2922_v51, %v2728_v27  ;;  %v1753_v32 = vpop.f32.mrf.mxu0  ;;  %v1557_v27 = vld [vmem:[#allocation2 + $0x1e0] sm:$0xff] }
 0x2cb   : > { %3002 = vst [vmem:[#allocation2 + $0x178] sm:$0xff] %v2970_v43 }
 0x2ce   : > { %v1842_v60 = vpop.f32.mrf.mxu1 }
 0x2cf   : > { %v1843_v5 = vadd.f32 %v1842_v60, %v1753_v32  ;;  %v2735_v60 = vld [vmem:[#allocation2 + $0x158] sm:$0xff] }
 0x2d0   : > { %v2835_v20 = vpop.f32.mrf.mxu2 }
 0x2d1   : > { %v1889_v37 = vadd.f32 %v1843_v5, %v1551_v39  ;;  %v1755_v13 = vpop.f32.mrf.mxu0 }
 0x2d3   : > { %1921 = vst [vmem:[#allocation2 + $0x1b8] sm:$0xff] %v1889_v37 }
 0x2d4   : > { %v2924_v52 = vpop.f32.mrf.mxu3 }
 0x2d5   : > { %v2925_v42 = vadd.f32 %v2924_v52, %v2835_v20 }
 0x2d6   : > { %v1844_v10 = vpop.f32.mrf.mxu1 }
 0x2d7   : > { %v2971_v40 = vadd.f32 %v2925_v42, %v2729_v11  ;;  %v1845_v63 = vadd.f32 %v1844_v10, %v1755_v13  ;;  %v1558_v11 = vld [vmem:[#allocation2] sm:$0xff] }
 0x2d8   : > { %v2837_v28 = vpop.f32.mrf.mxu2 }
 0x2d9   : > { %3003 = vst [vmem:[#allocation2 + $0x68] sm:$0xff] %v2971_v40  ;;  %v1890_v6 = vadd.f32 %v1845_v63, %v1552_v41  ;;  %v2736_v40 = vld [vmem:[#allocation2 + $0x10] sm:$0xff] }
 0x2db   : > { %1922 = vst [vmem:[#allocation2 + $0x28] sm:$0xff] %v1890_v6 }
 0x2dc   : > { %v2926_v53 = vpop.f32.mrf.mxu3 }
 0x2dd   : > { %v2927_v61 = vadd.f32 %v2926_v53, %v2837_v28 }
 0x2df   : > { %v2972_v17 = vadd.f32 %v2927_v61, %v2730_v45  ;;  %v1559_v45 = vld [vmem:[#allocation2 + $0xf0] sm:$0xff] }
 0x2e1   : > { %3004 = vst [vmem:[#allocation2 + $0x190] sm:$0xff] %v2972_v17 }
 0x2e6   : > { %v1758_v19 = vpop.f32.mrf.mxu0 }
 0x2e7   : > { %v1847_v57 = vpop.f32.mrf.mxu1 }
 0x2e8   : > { %v1848_v9 = vadd.f32 %v1847_v57, %v1758_v19  ;;  %v2737_v57 = vld [vmem:[#allocation2 + $0x58] sm:$0xff] }
 0x2ea   : > { %v1891_v44 = vadd.f32 %v1848_v9, %v1553_v14 }
 0x2ec   : > { %1923 = vst [vmem:[#allocation2 + $0x1e8] sm:$0xff] %v1891_v44  ;;  %v2840_v35 = vpop.f32.mrf.mxu2 }
 0x2ee   : > { %v2929_v50 = vpop.f32.mrf.mxu3  ;;  %v1760_v1 = vpop.f32.mrf.mxu0 }
 0x2ef   : > { %v2930_v7 = vadd.f32 %v2929_v50, %v2840_v35  ;;  %v1849_v36 = vpop.f32.mrf.mxu1 }
 0x2f0   : > { %v1850_v34 = vadd.f32 %v1849_v36, %v1760_v1 }
 0x2f1   : > { %v2973_v59 = vadd.f32 %v2930_v7, %v2731_v48  ;;  %v1560_v48 = vld [vmem:[#allocation2 + $0x8] sm:$0xff] }
 0x2f2   : > { %v1892_v46 = vadd.f32 %v1850_v34, %v1554_v47  ;;  %v2738_v34 = vld [vmem:[#allocation2 + $0xa0] sm:$0xff] }
 0x2f3   : > { %3005 = vst [vmem:[#allocation2 + $0x198] sm:$0xff] %v2973_v59 }
 0x2f4   : > { %1924 = vst [vmem:[#allocation2 + $0xf8] sm:$0xff] %v1892_v46  ;;  %v2842_v2 = vpop.f32.mrf.mxu2 }
 0x2f6   : > { %v2931_v15 = vpop.f32.mrf.mxu3  ;;  %v1763_v30 = vpop.f32.mrf.mxu0 }
 0x2f7   : > { %v2932_v33 = vadd.f32 %v2931_v15, %v2842_v2  ;;  %v1852_v23 = vpop.f32.mrf.mxu1 }
 0x2f8   : > { %v1853_v18 = vadd.f32 %v1852_v23, %v1763_v30 }
 0x2f9   : > { %v2974_v54 = vadd.f32 %v2932_v33, %v2732_v25 }
 0x2fa   : > { %v1893_v22 = vadd.f32 %v1853_v18, %v1555_v56 }
 0x2fb   : > { %3006 = vst [vmem:[#allocation2 + $0x38] sm:$0xff] %v2974_v54 }
 0x2fc   : > { %1925 = vst [vmem:[#allocation2 + $0x160] sm:$0xff] %v1893_v22  ;;  %v2845_v38 = vpop.f32.mrf.mxu2 }
 0x2fe   : > { %v2934_v49 = vpop.f32.mrf.mxu3  ;;  %v1765_v21 = vpop.f32.mrf.mxu0 }
 0x2ff   : > { %v2935_v58 = vadd.f32 %v2934_v49, %v2845_v38  ;;  %v1854_v3 = vpop.f32.mrf.mxu1 }
 0x300   : > { %v1855_v0 = vadd.f32 %v1854_v3, %v1765_v21 }
 0x301   : > { %v2975_v12 = vadd.f32 %v2935_v58, %v2733_v24 }
 0x302   : > { %v1894_v26 = vadd.f32 %v1855_v0, %v1556_v62 }
 0x303   : > { %3007 = vst [vmem:[#allocation2 + $0xc0] sm:$0xff] %v2975_v12 }
 0x304   : > { %1926 = vst [vmem:[#allocation2 + $0x30] sm:$0xff] %v1894_v26  ;;  %v2847_v8 = vpop.f32.mrf.mxu2 }
 0x306   : > { %v2936_v31 = vpop.f32.mrf.mxu3  ;;  %v1768_v55 = vpop.f32.mrf.mxu0 }
 0x307   : > { %v2937_v4 = vadd.f32 %v2936_v31, %v2847_v8  ;;  %v1857_v29 = vpop.f32.mrf.mxu1 }
 0x308   : > { %v1858_v51 = vadd.f32 %v1857_v29, %v1768_v55 }
 0x309   : > { %v2976_v43 = vadd.f32 %v2937_v4, %v2734_v16 }
 0x30a   : > { %v1895_v32 = vadd.f32 %v1858_v51, %v1557_v27 }
 0x30b   : > { %3008 = vst [vmem:[#allocation2 + $0x1c0] sm:$0xff] %v2976_v43 }
 0x30c   : > { %1927 = vst [vmem:[#allocation2 + $0x1e0] sm:$0xff] %v1895_v32  ;;  %v2850_v39 = vpop.f32.mrf.mxu2 }
 0x30e   : > { %v2939_v5 = vpop.f32.mrf.mxu3  ;;  %v1770_v20 = vpop.f32.mrf.mxu0 }
 0x30f   : > { %v2940_v37 = vadd.f32 %v2939_v5, %v2850_v39  ;;  %v1859_v52 = vpop.f32.mrf.mxu1 }
 0x310   : > { %v1860_v13 = vadd.f32 %v1859_v52, %v1770_v20 }
 0x311   : > { %v2977_v42 = vadd.f32 %v2940_v37, %v2735_v60 }
 0x312   : > { %v1896_v41 = vadd.f32 %v1860_v13, %v1558_v11 }
 0x313   : > { %3009 = vst [vmem:[#allocation2 + $0x158] sm:$0xff] %v2977_v42 }
 0x314   : > { %1928 = vst [vmem:[#allocation2] sm:$0xff] %v1896_v41  ;;  %v2852_v10 = vpop.f32.mrf.mxu2 }
 0x316   : > { %v2941_v63 = vpop.f32.mrf.mxu3  ;;  %v1773_v6 = vpop.f32.mrf.mxu0 }
 0x317   : > { %v2942_v28 = vadd.f32 %v2941_v63, %v2852_v10  ;;  %v1862_v53 = vpop.f32.mrf.mxu1 }
 0x318   : > { %v1863_v61 = vadd.f32 %v1862_v53, %v1773_v6 }
 0x319   : > { %v2978_v17 = vadd.f32 %v2942_v28, %v2736_v40 }
 0x31a   : > { %v1897_v19 = vadd.f32 %v1863_v61, %v1559_v45 }
 0x31b   : > { %3010 = vst [vmem:[#allocation2 + $0x10] sm:$0xff] %v2978_v17 }
 0x31c   : > { %1929 = vst [vmem:[#allocation2 + $0xf0] sm:$0xff] %v1897_v19  ;;  %v2855_v14 = vpop.f32.mrf.mxu2 }
 0x31e   : > { %v2944_v9 = vpop.f32.mrf.mxu3  ;;  %v1775_v44 = vpop.f32.mrf.mxu0 }
 0x31f   : > { %v2945_v35 = vadd.f32 %v2944_v9, %v2855_v14  ;;  %v1864_v50 = vpop.f32.mrf.mxu1 }
 0x320   : > { %v1865_v1 = vadd.f32 %v1864_v50, %v1775_v44 }
 0x321   : > { %v2979_v7 = vadd.f32 %v2945_v35, %v2737_v57 }
 0x322   : > { %v1898_v47 = vadd.f32 %v1865_v1, %v1560_v48 }
 0x323   : > { %3011 = vst [vmem:[#allocation2 + $0x58] sm:$0xff] %v2979_v7 }
 0x324   : > { %1930 = vst [vmem:[#allocation2 + $0x8] sm:$0xff] %v1898_v47  ;;  %v2857_v36 = vpop.f32.mrf.mxu2 }
 0x326   : > { %v2946_v59 = vpop.f32.mrf.mxu3 }
 0x327   : > { %v2947_v46 = vadd.f32 %v2946_v59, %v2857_v36 }
 0x329   : > { %v2980_v2 = vadd.f32 %v2947_v46, %v2738_v34 }
 0x32b   : > { %3012 = vst [vmem:[#allocation2 + $0xa0] sm:$0xff] %v2980_v2 }
 0x32c PF: > { %s10144_s3 = sld [smem:[#allocation18_spill]] }
 0x332   : > { %p5090_p11 = scmp.ne.s32.totalorder %s10144_s3, 1 }
 0x334   : > { %3016 = sbr.rel (%p5090_p11) target bundleno = 1278 (0x4fe), region = 79 }
 0x339   : > { %v7507_v25 = vld [vmem:[#allocation2 + $0x50] sm:$0xff]  ;;  %v5874_v15 = vmov 32   ;;  %v7509_v30 = vld [vmem:[#allocation2 + $0xd8] sm:$0xff]  ;;  %s10145_s21 = sld [smem:[#allocation139_spill]]  ;;  %v3063_v23 = vld [vmem:[#allocation2 + $0x108] sm:$0xff]  ;;  %s5875_s29 = smov 32  }
 0x33a   : > { %5539 = vset.pattern.permute.xlu2 %v5874_v15  ;;  %5538 = vset.pattern.permute.xlu1 %v5874_v15  ;;  %v7511_v33 = vld [vmem:[#allocation2 + $0xb0] sm:$0xff]  ;;  %v3066_v54 = vld [vmem:[#allocation2 + $0x188] sm:$0xff]  ;;  %v7529_v24 = vld [vmem:[#allocation2 + $0x18] sm:$0xff] }
 0x33b   : > { %5537 = vset.pattern.permute.xlu0 %v5874_v15  ;;  %3137 = vperm.xlu2 %5539, %v7507_v25   ;;  %v7527_v38 = vld [vmem:[#allocation2 + $0x168] sm:$0xff]  ;;  %v7531_v49 = vld [vmem:[#allocation2 + $0x1b0] sm:$0xff]  ;;  %v3069_v21 = vld [vmem:[#allocation2 + $0x80] sm:$0xff] }
 0x33c   : > { %3127 = vperm.xlu1 %5538, %v7509_v30   ;;  %3117 = vperm.xlu0 %5537, %v7511_v33   ;;  %v7539_v62 = vld [vmem:[#allocation2 + $0x180] sm:$0xff]  ;;  %v7541_v3 = vld [vmem:[#allocation2 + $0x48] sm:$0xff]  ;;  %v7543_v0 = vld [vmem:[#allocation2 + $0x130] sm:$0xff] }
 0x33d   : > { %v3072_v12 = vld [vmem:[#allocation2 + $0x28] sm:$0xff]  ;;  %v7551_v8 = vld [vmem:[#allocation2 + $0x98] sm:$0xff]  ;;  %v7555_v31 = vld [vmem:[#allocation2 + $0x110] sm:$0xff] }
 0x33e   : > { %v7553_v16 = vld [vmem:[#allocation2 + $0x118] sm:$0xff]  ;;  %v3075_v27 = vld [vmem:[#allocation2 + $0x160] sm:$0xff]  ;;  %v7566_v51 = vld [vmem:[#allocation2 + $0x150] sm:$0xff] }
 0x33f   : > { %v7517_v56 = vld [vmem:[%s10145_s21] ss:$0 sm:$0xff]  ;;  %v3071_v55 = vld [vmem:[#allocation2 + $0x1b8] sm:$0xff]  ;;  %v3073_v39 = vld [vmem:[#allocation2 + $0x1e8] sm:$0xff] }
 0x340   : > { %v7522_v18 = vmul.f32 %v7517_v56, %v3063_v23  ;;  %v7525_v22 = vmul.f32 %v7517_v56, %v3066_v54  ;;  %v7537_v58 = vmul.f32 %v7517_v56, %v3069_v21  ;;  %v7549_v26 = vmul.f32 %v7517_v56, %v3072_v12  ;;  %v7568_v43 = vld [vmem:[#allocation2 + $0x120] sm:$0xff]  ;;  %v3074_v32 = vld [vmem:[#allocation2 + $0xf8] sm:$0xff]  ;;  %v3076_v42 = vld [vmem:[#allocation2 + $0x30] sm:$0xff] }
 0x341   : > { %v7561_v4 = vmul.f32 %v7517_v56, %v3071_v55  ;;  %v7564_v29 = vmul.f32 %v7517_v56, %v3075_v27  ;;  %v7573_v60 = vmul.f32 %v7517_v56, %v3074_v32  ;;  %v7576_v5 = vmul.f32 %v7517_v56, %v3073_v39  ;;  %v3078_v20 = vld [vmem:[#allocation2] sm:$0xff]  ;;  %v7595_v63 = vld [vmem:[#allocation2 + $0x138] sm:$0xff]  ;;  %v3080_v6 = vld [vmem:[#allocation2 + $0x8] sm:$0xff] }
 0x342   : > { %10146 = vst [vmem:[#allocation28_spill] sm:$0xff] %v7522_v18  ;;  %v7579_v37 = vmul.f32 %v7517_v56, %v3078_v20  ;;  %v7581_v11 = vld [vmem:[#allocation2 + $0xe0] sm:$0xff]  ;;  %v7591_v10 = vmul.f32 %v7517_v56, %v3076_v42  ;;  %v3079_v28 = vld [vmem:[#allocation2 + $0xf0] sm:$0xff]  ;;  %v7600_v45 = vmul.f32 %v7517_v56, %v3080_v6  ;;  %v7605_v61 = vld [vmem:[#allocation2 + $0x1a8] sm:$0xff] }
 0x343   : > { %10147 = vst [vmem:[#allocation29_spill] sm:$0xff] %v7525_v22  ;;  %3142 = vperm.xlu2 %5539, %v7527_v38   ;;  %v7583_v52 = vld [vmem:[#allocation2 + $0x60] sm:$0xff]  ;;  %v7603_v53 = vmul.f32 %v7517_v56, %v3079_v28  ;;  %v7608_v17 = vld [vmem:[#allocation2 + $0x148] sm:$0xff]  ;;  %v7615_v57 = vld [vmem:[#allocation2 + $0x1d0] sm:$0xff] }
 0x344   : > { %3132 = vperm.xlu1 %5538, %v7529_v24   ;;  %3122 = vperm.xlu0 %5537, %v7531_v49   ;;  %10148 = vst [vmem:[#allocation30_spill] sm:$0xff] %v7537_v58  ;;  %v3077_v13 = vld [vmem:[#allocation2 + $0x1e0] sm:$0xff]  ;;  %v7611_v19 = vld [vmem:[#allocation2 + $0xc8] sm:$0xff]  ;;  %v7624_v35 = vld [vmem:[#allocation2 + $0x1f8] sm:$0xff] }
 0x345   : > { %10149 = vst [vmem:[#allocation31_spill] sm:$0xff] %v7549_v26  ;;  %v7588_v41 = vmul.f32 %v7517_v56, %v3077_v13  ;;  %v7593_v40 = vld [vmem:[#allocation2 + $0x140] sm:$0xff]  ;;  %v7633_v1 = vld [vmem:[#allocation2 + $0x1f0] sm:$0xff]  ;;  %v7637_v47 = vld [vmem:[#allocation2 + $0x128] sm:$0xff] }
 0x346   : > { %10150 = vst [vmem:[#allocation32_spill] sm:$0xff] %v7561_v4  ;;  %v7613_v14 = vld [vmem:[#allocation2 + $0x100] sm:$0xff]  ;;  %v7644_v34 = vld [vmem:[#allocation2 + $0x70] sm:$0xff]  ;;  %v7646_v59 = vld [vmem:[#allocation2 + $0x78] sm:$0xff] }
 0x347   : > { %10151 = vst [vmem:[#allocation33_spill] sm:$0xff] %v7564_v29  ;;  %v7622_v44 = vld [vmem:[#allocation2 + $0x20] sm:$0xff]  ;;  %v7648_v46 = vld [vmem:[#allocation2 + $0xe8] sm:$0xff]  ;;  %v7691_v29 = vld [vmem:[#allocation2 + $0x170] sm:$0xff] }
 0x348   : > { %10152 = vst [vmem:[#allocation34_spill] sm:$0xff] %v7573_v60  ;;  %v7626_v48 = vld [vmem:[#allocation2 + $0x40] sm:$0xff]  ;;  %v7704_v58 = vld [vmem:[#allocation2 + $0x198] sm:$0xff]  ;;  %v7706_v60 = vld [vmem:[#allocation2 + $0x190] sm:$0xff] }
 0x349   : > { %10153 = vst [vmem:[#allocation35_spill] sm:$0xff] %v7576_v5  ;;  %v7635_v7 = vld [vmem:[#allocation2 + $0x1a0] sm:$0xff] }
 0x34a   : > { %10154 = vst [vmem:[#allocation36_spill] sm:$0xff] %v7579_v37  ;;  %v7689_v37 = vld [vmem:[#allocation2 + $0x178] sm:$0xff]  ;;  %v7719_v18 = vld [vmem:[#allocation2 + $0x1c0] sm:$0xff] }
 0x34b   : > { %3157 = vperm.xlu2 %5539, %v7539_v62   ;;  %10155 = vst [vmem:[#allocation37_spill] sm:$0xff] %v7588_v41 }
 0x34c   : > { %3152 = vperm.xlu1 %5538, %v7541_v3   ;;  %3147 = vperm.xlu0 %5537, %v7543_v0   ;;  %10156 = vst [vmem:[#allocation38_spill] sm:$0xff] %v7591_v10  ;;  %v7708_v10 = vld [vmem:[#allocation2 + $0x68] sm:$0xff] }
 0x34d   : > { %10157 = vst [vmem:[#allocation39_spill] sm:$0xff] %v7600_v45  ;;  %v7693_v45 = vld [vmem:[#allocation2 + $0x1c8] sm:$0xff] }
 0x34e   : > { %10158 = vst [vmem:[#allocation40_spill] sm:$0xff] %v7603_v53 }
 0x34f   : > { %10173 = vst [vmem:[#allocation55_spill] sm:$0xff] %v7704_v58 }
 0x350   : > { %10174 = vst [vmem:[#allocation56_spill] sm:$0xff] %v7706_v60 }
 0x351   : > { %10175 = vst [vmem:[#allocation57_spill] sm:$0xff] %v7708_v10 }
 0x353   : > { %3172 = vperm.xlu2 %5539, %v7551_v8  }
 0x354   : > { %3167 = vperm.xlu1 %5538, %v7553_v16   ;;  %3162 = vperm.xlu0 %5537, %v7555_v31  }
 0x35b   : > { %3187 = vperm.xlu2 %5539, %v3063_v23  }
 0x35c   : > { %3182 = vperm.xlu1 %5538, %v7566_v51   ;;  %3177 = vperm.xlu0 %5537, %v7568_v43  }
 0x363   : > { %3202 = vperm.xlu2 %5539, %v3066_v54   ;;  %v7659_v54 = vld [vmem:[#allocation2 + $0xd0] sm:$0xff] }
 0x364   : > { %3197 = vperm.xlu1 %5538, %v7581_v11   ;;  %3192 = vperm.xlu0 %5537, %v7583_v52  }
 0x36b   : > { %3217 = vperm.xlu2 %5539, %v3069_v21   ;;  %v7661_v21 = vld [vmem:[#allocation2 + $0x1d8] sm:$0xff] }
 0x36c   : > { %3212 = vperm.xlu1 %5538, %v7593_v40   ;;  %3207 = vperm.xlu0 %5537, %v7595_v63  }
 0x373   : > { %3232 = vperm.xlu2 %5539, %v3072_v12   ;;  %v7663_v12 = vld [vmem:[#allocation2 + $0x90] sm:$0xff] }
 0x374   : > { %3227 = vperm.xlu1 %5538, %v3071_v55   ;;  %3222 = vperm.xlu0 %5537, %v7605_v61  }
 0x37b   : > { %3247 = vperm.xlu2 %5539, %v3075_v27  }
 0x37c   : > { %3242 = vperm.xlu1 %5538, %v3074_v32   ;;  %3237 = vperm.xlu0 %5537, %v3073_v39   ;;  %v7674_v39 = vld [vmem:[#allocation2 + $0xa8] sm:$0xff] }
 0x383   : > { %3262 = vperm.xlu2 %5539, %v3078_v20   ;;  %v7676_v20 = vld [vmem:[#allocation2 + $0x88] sm:$0xff] }
 0x384   : > { %3257 = vperm.xlu1 %5538, %v3077_v13   ;;  %3252 = vperm.xlu0 %5537, %v3076_v42   ;;  %v7678_v13 = vld [vmem:[#allocation2 + $0xb8] sm:$0xff] }
 0x38b   : > { %3857 = vperm.xlu2 %5539, %v7608_v17  }
 0x38c   : > { %3272 = vperm.xlu1 %5538, %v3080_v6   ;;  %3267 = vperm.xlu0 %5537, %v3079_v28  }
 0x393   : > { %3872 = vperm.xlu2 %5539, %v7611_v19  }
 0x394   : > { %3867 = vperm.xlu1 %5538, %v7613_v14   ;;  %3862 = vperm.xlu0 %5537, %v7615_v57  }
 0x395   : > { %v7620_v9 = vpop.permute.xlu2 %3137 }
 0x396   : > { %10159 = vst [vmem:[#allocation41_spill] sm:$0xff] %v7620_v9  ;;  %5542 = vrcp.f32 %v7620_v9 }
 0x39b   : > { %3887 = vperm.xlu2 %5539, %v7622_v44  }
 0x39c   : > { %3882 = vperm.xlu1 %5538, %v7624_v35   ;;  %3877 = vperm.xlu0 %5537, %v7626_v48  }
 0x39d   : > { %v7631_v50 = vpop.permute.xlu2 %3142 }
 0x39e   : > { %10160 = vst [vmem:[#allocation42_spill] sm:$0xff] %v7631_v50  ;;  %5544 = vrcp.f32 %v7631_v50 }
 0x3a3   : > { %3902 = vperm.xlu2 %5539, %v7633_v1  }
 0x3a4   : > { %3897 = vperm.xlu1 %5538, %v7635_v7   ;;  %3892 = vperm.xlu0 %5537, %v7637_v47  }
 0x3a5   : > { %v7642_v36 = vpop.permute.xlu2 %3157 }
 0x3a6   : > { %10161 = vst [vmem:[#allocation43_spill] sm:$0xff] %v7642_v36  ;;  %5546 = vrcp.f32 %v7642_v36 }
 0x3ab   : > { %3917 = vperm.xlu2 %5539, %v7644_v34  }
 0x3ac   : > { %3912 = vperm.xlu1 %5538, %v7646_v59   ;;  %3907 = vperm.xlu0 %5537, %v7648_v46  }
 0x3ad   : > { %v7653_v2 = vpop.permute.xlu2 %3172 }
 0x3ae   : > { %10162 = vst [vmem:[#allocation44_spill] sm:$0xff] %v7653_v2  ;;  %v7655_v15 = vpop.permute.xlu1 %3127  ;;  %v7657_v23 = vpop.permute.xlu0 %3117  ;;  %5548 = vrcp.f32 %v7653_v2 }
 0x3af   : > { %10163 = vst [vmem:[#allocation45_spill] sm:$0xff] %v7655_v15  ;;  %5550 = vrcp.f32 %v7655_v15 }
 0x3b0   : > { %5552 = vrcp.f32 %v7657_v23 }
 0x3b3   : > { %3932 = vperm.xlu2 %5539, %v7659_v54  }
 0x3b4   : > { %3927 = vperm.xlu1 %5538, %v7661_v21   ;;  %3922 = vperm.xlu0 %5537, %v7663_v12  }
 0x3b5   : > { %v7668_v55 = vpop.permute.xlu2 %3187 }
 0x3b6   : > { %10164 = vst [vmem:[#allocation46_spill] sm:$0xff] %v7668_v55  ;;  %v7670_v27 = vpop.permute.xlu1 %3132  ;;  %v7672_v32 = vpop.permute.xlu0 %3122 }
 0x3b7   : > { %10165 = vst [vmem:[#allocation47_spill] sm:$0xff] %v7670_v27 }
 0x3b8   : > { %10166 = vst [vmem:[#allocation48_spill] sm:$0xff] %v7672_v32 }
 0x3bb   : > { %3947 = vperm.xlu2 %5539, %v7674_v39  }
 0x3bc   : > { %3942 = vperm.xlu1 %5538, %v7676_v20   ;;  %3937 = vperm.xlu0 %5537, %v7678_v13  }
 0x3bd   : > { %v7683_v42 = vpop.permute.xlu2 %3202 }
 0x3be   : > { %10167 = vst [vmem:[#allocation49_spill] sm:$0xff] %v7683_v42  ;;  %v7685_v6 = vpop.permute.xlu1 %3152  ;;  %v7687_v28 = vpop.permute.xlu0 %3147 }
 0x3bf   : > { %10168 = vst [vmem:[#allocation50_spill] sm:$0xff] %v7685_v6 }
 0x3c0   : > { %10169 = vst [vmem:[#allocation51_spill] sm:$0xff] %v7687_v28 }
 0x3c3   : > { %3962 = vperm.xlu2 %5539, %v7689_v37  }
 0x3c4   : > { %3957 = vperm.xlu1 %5538, %v7691_v29   ;;  %3952 = vperm.xlu0 %5537, %v7693_v45  }
 0x3c5   : > { %v7698_v26 = vpop.permute.xlu2 %3217 }
 0x3c6   : > { %10170 = vst [vmem:[#allocation52_spill] sm:$0xff] %v7698_v26  ;;  %v7700_v41 = vpop.permute.xlu1 %3167  ;;  %v7702_v53 = vpop.permute.xlu0 %3162  ;;  %v7721_v26 = vld [vmem:[#allocation2 + $0xc0] sm:$0xff] }
 0x3c7   : > { %10171 = vst [vmem:[#allocation53_spill] sm:$0xff] %v7700_v41 }
 0x3c8   : > { %10172 = vst [vmem:[#allocation54_spill] sm:$0xff] %v7702_v53  ;;  %v7723_v53 = vld [vmem:[#allocation2 + $0x38] sm:$0xff] }
 0x3c9   : > { %10179 = vst [vmem:[#allocation61_spill] sm:$0xff] %v7721_v26 }
 0x3ca   : > { %10180 = vst [vmem:[#allocation62_spill] sm:$0xff] %v7723_v53 }
 0x3cb   : > { %3977 = vperm.xlu2 %5539, %v7704_v58   ;;  %v3817_v58 = vld [vmem:[#allocation2 + $0x158] sm:$0xff] }
 0x3cc   : > { %3972 = vperm.xlu1 %5538, %v7706_v60   ;;  %3967 = vperm.xlu0 %5537, %v7708_v10  }
 0x3cd   : > { %v7713_v22 = vpop.permute.xlu2 %3232 }
 0x3ce   : > { %10176 = vst [vmem:[#allocation58_spill] sm:$0xff] %v7713_v22  ;;  %v7715_v4 = vpop.permute.xlu1 %3182  ;;  %v7717_v5 = vpop.permute.xlu0 %3177 }
 0x3cf   : > { %10177 = vst [vmem:[#allocation59_spill] sm:$0xff] %v7715_v4  ;;  %v7734_v4 = vld [vmem:[#allocation2 + $0x58] sm:$0xff] }
 0x3d0   : > { %10178 = vst [vmem:[#allocation60_spill] sm:$0xff] %v7717_v5  ;;  %v7737_v5 = vld [vmem:[#allocation2 + $0x10] sm:$0xff] }
 0x3d1   : > { %10184 = vst [vmem:[#allocation66_spill] sm:$0xff] %v7737_v5 }
 0x3d3   : > { %3992 = vperm.xlu2 %5539, %v7719_v18  }
 0x3d4   : > { %3987 = vperm.xlu1 %5538, %v7721_v26   ;;  %3982 = vperm.xlu0 %5537, %v7723_v53   ;;  %v7752_v26 = vmul.f32 %v7517_v56, %v7507_v25  ;;  %v3820_v25 = vld [vmem:[#allocation2 + $0xa0] sm:$0xff] }
 0x3d5   : > { %v7728_v60 = vpop.permute.xlu2 %3247 }
 0x3d6   : > { %10181 = vst [vmem:[#allocation63_spill] sm:$0xff] %v7728_v60  ;;  %v7730_v10 = vpop.permute.xlu1 %3197  ;;  %v7732_v22 = vpop.permute.xlu0 %3192 }
 0x3d7   : > { %10182 = vst [vmem:[#allocation64_spill] sm:$0xff] %v7730_v10 }
 0x3d8   : > { %10183 = vst [vmem:[#allocation65_spill] sm:$0xff] %v7732_v22  ;;  %v7748_v22 = vpop.eup %5542 }
 0x3d9   : > { %10188 = vst [vmem:[#allocation70_spill] sm:$0xff] %v7748_v22 }
 0x3da   : > { %10189 = vst [vmem:[#allocation71_spill] sm:$0xff] %v7752_v26  ;;  %v7773_v26 = vmul.f32 %v7517_v56, %v7531_v49  ;;  %v7793_v49 = vmul.f32 %v7517_v56, %v7551_v8  ;;  %v7814_v8 = vmul.f32 %v7517_v56, %v7568_v43 }
 0x3db   : > { %4007 = vperm.xlu2 %5539, %v7734_v4  }
 0x3dc   : > { %4002 = vperm.xlu1 %5538, %v7737_v5   ;;  %3997 = vperm.xlu0 %5537, %v3817_v58   ;;  %v7757_v5 = vmul.f32 %v7517_v56, %v7509_v30  ;;  %v7761_v58 = vmul.f32 %v7517_v56, %v7511_v33  ;;  %10194 = vst [vmem:[#allocation76_spill] sm:$0xff] %v7773_v26 }
 0x3dd   : > { %v7742_v53 = vpop.permute.xlu2 %3262  ;;  %v7777_v30 = vmul.f32 %v7517_v56, %v7539_v62  ;;  %v7781_v33 = vmul.f32 %v7517_v56, %v7541_v3  ;;  %10199 = vst [vmem:[#allocation81_spill] sm:$0xff] %v7793_v49  ;;  %v7797_v62 = vmul.f32 %v7517_v56, %v7553_v16  ;;  %v7801_v3 = vmul.f32 %v7517_v56, %v7555_v31 }
 0x3de   : > { %10185 = vst [vmem:[#allocation67_spill] sm:$0xff] %v7742_v53  ;;  %v7744_v60 = vpop.permute.xlu1 %3212  ;;  %v7746_v10 = vpop.permute.xlu0 %3207  ;;  %v7765_v53 = vmul.f32 %v7517_v56, %v7527_v38  ;;  %v3336_v38 = vmul.f32 %v7748_v22, %v7620_v9  ;;  %v7818_v16 = vmul.f32 %v7517_v56, %v7581_v11  ;;  %v7823_v31 = vmul.f32 %v7517_v56, %v7583_v52 }
 0x3df   : > { %10186 = vst [vmem:[#allocation68_spill] sm:$0xff] %v7744_v60  ;;  %v7769_v60 = vmul.f32 %v7517_v56, %v7529_v24  ;;  %v7789_v24 = vmul.f32 %v7517_v56, %v7543_v0  ;;  %v7810_v0 = vmul.f32 %v7517_v56, %v7566_v51  ;;  %v7827_v49 = vmul.f32 %v7517_v56, %v7593_v40 }
 0x3e0   : > { %10187 = vst [vmem:[#allocation69_spill] sm:$0xff] %v7746_v10  ;;  %v7831_v51 = vmul.f32 %v7517_v56, %v7595_v63  ;;  %v3337_v52 = vsub.f32 1.0, %v3336_v38  ;;  %v3346_v38 = vand.u32 2147483648, %v7620_v9 }
 0x3e1   : > { %10190 = vst [vmem:[#allocation72_spill] sm:$0xff] %v7757_v5  ;;  %v7785_v5 = vpop.eup %5544 }
 0x3e2   : > { %10191 = vst [vmem:[#allocation73_spill] sm:$0xff] %v7761_v58  ;;  %v7836_v11 = vpop.eup %5546 }
 0x3e3   : > { %10192 = vst [vmem:[#allocation74_spill] sm:$0xff] %v7765_v53 }
 0x3e4   : > { %10193 = vst [vmem:[#allocation75_spill] sm:$0xff] %v7769_v60  ;;  %4012 = vperm.xlu0 %5537, %v3820_v25   ;;  %v7840_v25 = vmul.f32 %v7517_v56, %v7605_v61 }
 0x3e5   : > { %10195 = vst [vmem:[#allocation77_spill] sm:$0xff] %v7777_v30  ;;  %v7806_v30 = vld [vmem:[%s10145_s21 + $0x1] ss:$0 sm:$0xff]  ;;  %v7834_v43 = vpop.permute.xlu2 %3857 }
 0x3e6   : > { %10196 = vst [vmem:[#allocation78_spill] sm:$0xff] %v7781_v33  ;;  %v7845_v40 = vpop.permute.xlu1 %3227  ;;  %v7847_v63 = vpop.permute.xlu0 %3222  ;;  %v7859_v56 = vmul.f32 %v7806_v30, %v7613_v14  ;;  %v7863_v61 = vmul.f32 %v7806_v30, %v7615_v57  ;;  %v3361_v14 = vand.u32 2147483648, %v7631_v50  ;;  %v7881_v57 = vmul.f32 %v7806_v30, %v7633_v1 }
 0x3e7   : > { %10197 = vst [vmem:[#allocation79_spill] sm:$0xff] %v7785_v5  ;;  %5554 = vrcp.f32 %v7834_v43  ;;  %vm4020_vm0 = vweird.f32 %v7834_v43 }
 0x3e8   : > { %10198 = vst [vmem:[#allocation80_spill] sm:$0xff] %v7789_v24  ;;  %5556 = vrcp.f32 %v7668_v55 }
 0x3e9   : > { %10200 = vst [vmem:[#allocation82_spill] sm:$0xff] %v7797_v62  ;;  %v7919_v62 = vmul.f32 %v7806_v30, %v7659_v54  ;;  %5558 = vrcp.f32 %v7670_v27 }
 0x3ea   : > { %10201 = vst [vmem:[#allocation83_spill] sm:$0xff] %v7801_v3  ;;  %5560 = vrcp.f32 %v7672_v32 }
 0x3eb   : > { %10202 = vst [vmem:[#allocation84_spill] sm:$0xff] %v7810_v0  ;;  %v3396_v0 = vmul.f32 %v7836_v11, %v7642_v36 }
 0x3ec   : > { %10203 = vst [vmem:[#allocation85_spill] sm:$0xff] %v7814_v8  ;;  %v7902_v8 = vmul.f32 %v7806_v30, %v7644_v34  ;;  %v7923_v34 = vmul.f32 %v7806_v30, %v7661_v21 }
 0x3ed   : > { %10204 = vst [vmem:[#allocation86_spill] sm:$0xff] %v7818_v16  ;;  %v3351_v16 = vmul.f32 %v7785_v5, %v7631_v50  ;;  %v3397_v3 = vsub.f32 1.0, %v3396_v0 }
 0x3ee   : > { %10205 = vst [vmem:[#allocation87_spill] sm:$0xff] %v7823_v31  ;;  %v7895_v31 = vmul.f32 %v7806_v30, %v7637_v47  ;;  %v7914_v47 = vor.u32 1.1754944e-38, %v3346_v38  ;;  %v7932_v38 = vpop.permute.xlu2 %3872  ;;  %v7943_v0 = vpop.permute.xlu0 %3237 }
 0x3ef   : > { %10206 = vst [vmem:[#allocation88_spill] sm:$0xff] %v7827_v49  ;;  %v7851_v49 = vmul.f32 %v7806_v30, %v7608_v17  ;;  %v7872_v17 = vmul.f32 %v7806_v30, %v7624_v35  ;;  %v3338_v35 = vmul.f32 %v7748_v22, %v3337_v52  ;;  %v7906_v52 = vmul.f32 %v7806_v30, %v7646_v59 }
 0x3f0   : > { %10207 = vst [vmem:[#allocation89_spill] sm:$0xff] %v7831_v51  ;;  %v7855_v51 = vmul.f32 %v7806_v30, %v7611_v19  ;;  %v7876_v19 = vmul.f32 %v7806_v30, %v7626_v48  ;;  %v7891_v48 = vmul.f32 %v7806_v30, %v7635_v7  ;;  %v7910_v7 = vmul.f32 %v7806_v30, %v7648_v46 }
 0x3f1   : > { %10208 = vst [vmem:[#allocation90_spill] sm:$0xff] %v7836_v11  ;;  %v7925_v59 = vor.u32 1.1754944e-38, %v3361_v14  ;;  %v3406_v46 = vand.u32 2147483648, %v7642_v36  ;;  %v7935_v33 = vadd.f32 %v7748_v22, %v3338_v35  ;;  %v7941_v14 = vpop.permute.xlu1 %3242  ;;  %v7965_v36 = vmul.f32 %v7806_v30, %v7676_v20 }
 0x3f2   : > { %10209 = vst [vmem:[#allocation91_spill] sm:$0xff] %v7840_v25  ;;  %v7868_v25 = vmul.f32 %v7806_v30, %v7622_v44  ;;  %v7886_v44 = vpop.eup %5548  ;;  %5562 = vrcp.f32 %v7932_v38  ;;  %vm4065_vm4 = vweird.f32 %v7932_v38 }
 0x3f3   : > { %10210 = vst [vmem:[#allocation92_spill] sm:$0xff] %v7845_v40  ;;  %v3352_v40 = vsub.f32 1.0, %v3351_v16  ;;  %v7897_v1 = vpop.eup %5550  ;;  %v3441_v21 = vmul.f32 %v7886_v44, %v7653_v2  ;;  %5564 = vrcp.f32 %v7685_v6 }
 0x3f4   : > { %10211 = vst [vmem:[#allocation93_spill] sm:$0xff] %v7847_v63  ;;  %v7912_v16 = vpop.eup %5552  ;;  %v7930_v63 = vmul.f32 %v7806_v30, %v7663_v12  ;;  %v3306_v53 = vmul.f32 %v7897_v1, %v7655_v15  ;;  %v3398_v12 = vmul.f32 %v7836_v11, %v3397_v3  ;;  %5566 = vrcp.f32 %v7687_v28 }
 0x3f5   : > { %10212 = vst [vmem:[#allocation94_spill] sm:$0xff] %v7886_v44  ;;  %v3353_v54 = vmul.f32 %v7785_v5, %v3352_v40  ;;  %v7945_v24 = vpop.eup %5554  ;;  %v3276_v35 = vmul.f32 %v7912_v16, %v7657_v23  ;;  %v3451_v40 = vand.u32 2147483648, %v7653_v2  ;;  %5568 = vrcp.f32 %v7700_v41 }
 0x3f6   : > { %10213 = vst [vmem:[#allocation95_spill] sm:$0xff] %v7897_v1  ;;  %v3307_v3 = vsub.f32 1.0, %v3306_v53  ;;  %v7979_v20 = vpop.eup %5556  ;;  %v7990_v2 = vadd.f32 %v7836_v11, %v3398_v12  ;;  %v7995_v53 = vmul.f32 %v7806_v30, %v7689_v37  ;;  %v8009_v12 = vmul.f32 %v7806_v30, %v7693_v45  ;;  %v8013_v37 = vpop.permute.xlu0 %3252 }
 0x3f7   : > { %10214 = vst [vmem:[#allocation96_spill] sm:$0xff] %v7914_v47  ;;  %v7969_v47 = vmul.f32 %v7806_v30, %v7678_v13  ;;  %v7972_v26 = vadd.f32 %v7785_v5, %v3353_v54  ;;  %v7981_v58 = vor.u32 1.1754944e-38, %v3451_v40  ;;  %v7987_v60 = vpop.eup %5558  ;;  %v8001_v40 = vpop.permute.xlu2 %3887  ;;  %vm4021_vm1 = vweird.f32 %v7945_v24 }
 0x3f8   : > { %10215 = vst [vmem:[#allocation97_spill] sm:$0xff] %v7925_v59  ;;  %v3316_v59 = vand.u32 2147483648, %v7655_v15  ;;  %v3331_v15 = vand.u32 2147483648, %v7670_v27  ;;  %5570 = vrcp.f32 %v8001_v40  ;;  %vm4022_vm2 = vmor %vm4020_vm0, %vm4021_vm1  ;;  %vm4110_vm8 = vweird.f32 %v8001_v40 }
 0x3f9   : > { %10216 = vst [vmem:[#allocation98_spill] sm:$0xff] %v7935_v33  ;;  %v3442_v33 = vsub.f32 1.0, %v3441_v21  ;;  %v3496_v21 = vand.u32 2147483648, %v7668_v55  ;;  %5572 = vrcp.f32 %v7683_v42 }
 0x3fa   : > { %10217 = vst [vmem:[#allocation99_spill] sm:$0xff] %v7941_v14  ;;  %v7958_v14 = vmul.f32 %v7806_v30, %v7674_v39  ;;  %v4016_v39 = vmul.f32 %v7945_v24, %v7834_v43  ;;  %v7984_v54 = vor.u32 1.1754944e-38, %v3316_v59  ;;  %v8003_v59 = vpop.eup %5560 }
 0x3fb   : > { %10218 = vst [vmem:[#allocation100_spill] sm:$0xff] %v7943_v0  ;;  %v7961_v0 = vor.u32 1.1754944e-38, %v3406_v46  ;;  %v3277_v46 = vsub.f32 1.0, %v3276_v35  ;;  %v7999_v35 = vmul.f32 %v7806_v30, %v7691_v29  ;;  %v3443_v13 = vmul.f32 %v7886_v44, %v3442_v33 }
 0x3fc   : > { %10220 = vst [vmem:[#allocation102_spill] sm:$0xff] %v7972_v26  ;;  %v3308_v29 = vmul.f32 %v7897_v1, %v3307_v3  ;;  %v3321_v26 = vmul.f32 %v7987_v60, %v7670_v27  ;;  %v8029_v3 = vmul.f32 %v7979_v20, %v7668_v55 }
 0x3fd   : > { %10219 = vst [vmem:[#allocation101_spill] sm:$0xff] %v7961_v0  ;;  %v3286_v0 = vand.u32 2147483648, %v7657_v23  ;;  %v8036_v33 = vadd.f32 %v7886_v44, %v3443_v13 }
 0x3fe   : > { %10221 = vst [vmem:[#allocation103_spill] sm:$0xff] %v7979_v20  ;;  %v8045_v55 = vadd.f32 %v7897_v1, %v3308_v29  ;;  %v3322_v13 = vsub.f32 1.0, %v3321_v26  ;;  %v10241_v29 = vld [vmem:[#allocation54_spill] sm:$0xff]  ;;  %v4024_v26 = vand.u32 2147483647, %v7834_v43 }
 0x3ff   : > { %10222 = vst [vmem:[#allocation104_spill] sm:$0xff] %v7981_v58  ;;  %v4017_v58 = vsub.f32 1.0, %v4016_v39  ;;  %v8017_v11 = vor.u32 1.1754944e-38, %v3286_v0  ;;  %v8025_v39 = vpop.eup %5562  ;;  %v3291_v0 = vmul.f32 %v8003_v59, %v7672_v32  ;;  %5574 = vrcp.f32 %v10241_v29 }
 0x400   : > { %10223 = vst [vmem:[#allocation105_spill] sm:$0xff] %v7984_v54  ;;  %v3278_v54 = vmul.f32 %v7912_v16, %v3277_v46  ;;  %v3301_v46 = vand.u32 2147483648, %v7672_v32  ;;  %vm4025_vm3 = vcmp.eq.f32.partialorder %v4024_v26, 8.507059e+37  ;;  %vm4066_vm5 = vweird.f32 %v8025_v39 }
 0x401   : > { %10224 = vst [vmem:[#allocation106_spill] sm:$0xff] %v7990_v2  ;;  %v8011_v2 = vpop.permute.xlu1 %3257  ;;  %v4018_v45 = vmul.f32 %v7945_v24, %v4017_v58  ;;  %vm4067_vm6 = vmor %vm4065_vm4, %vm4066_vm5 }
 0x402   : > { %10225 = vst [vmem:[#allocation107_spill] sm:$0xff] %v8011_v2  ;;  %v8038_v2 = vor.u32 1.1754944e-38, %v3496_v21  ;;  %v8048_v20 = vadd.f32 %v7912_v16, %v3278_v54  ;;  %v10235_v21 = vld [vmem:[#allocation55_spill] sm:$0xff]  ;;  %v8061_v44 = vor.u32 1.1754944e-38, %v3301_v46  ;;  %v8064_v54 = vpop.permute.xlu2 %3902 }
 0x403   : > { %10226 = vst [vmem:[#allocation108_spill] sm:$0xff] %v8013_v37  ;;  %v8042_v37 = vpop.eup %5564  ;;  %v8056_v58 = vmul.f32 %v7806_v30, %v10235_v21  ;;  %v4019_v1 = vadd.f32 %v7945_v24, %v4018_v45  ;;  %v3391_v45 = vand.u32 2147483648, %v7685_v6  ;;  %5576 = vrcp.f32 %v8064_v54 }
 0x404   : > { %10227 = vst [vmem:[#allocation109_spill] sm:$0xff] %v8017_v11  ;;  %v8050_v11 = vor.u32 1.1754944e-38, %v3331_v15  ;;  %v4026_v15 = vand.u32 2147483648, %v7834_v43  ;;  %v8066_v10 = vpop.eup %5566  ;;  %v3381_v21 = vmul.f32 %v8042_v37, %v7685_v6  ;;  %vm4155_vm12 = vweird.f32 %v8064_v54 }
 0x405   : > { %10228 = vst [vmem:[#allocation110_spill] sm:$0xff] %v8029_v3  ;;  %v8077_v46 = vpop.eup %5568  ;;  %v3323_v3 = vmul.f32 %v7987_v60, %v3322_v13  ;;  %v4023_v27 = vsel %vm4022_vm2, %v7945_v24, %v4019_v1  ;;  %v3366_v50 = vmul.f32 %v8066_v10, %v7687_v28  ;;  %v3436_v13 = vand.u32 2147483648, %v7700_v41 }
 0x406   : > { %10229 = vst [vmem:[#allocation111_spill] sm:$0xff] %v8036_v33  ;;  %v3292_v33 = vsub.f32 1.0, %v3291_v0  ;;  %v8075_v0 = vpop.permute.xlu0 %3267  ;;  %v3382_v43 = vsub.f32 1.0, %v3381_v21  ;;  %v8101_v1 = vor.u32 1.1754944e-38, %v3391_v45 }
 0x407   : > { %10230 = vst [vmem:[#allocation112_spill] sm:$0xff] %v8038_v2  ;;  %v4061_v2 = vmul.f32 %v8025_v39, %v7932_v38  ;;  %v8109_v26 = vadd.f32 %v7987_v60, %v3323_v3  ;;  %v3367_v45 = vsub.f32 1.0, %v3366_v50 }
 0x408   : > { %10231 = vst [vmem:[#allocation113_spill] sm:$0xff] %v8042_v37 }
 0x409   : > { %10232 = vst [vmem:[#allocation114_spill] sm:$0xff] %v8045_v55  ;;  %v8083_v55 = vpop.eup %5570 }
 0x40a   : > { %10233 = vst [vmem:[#allocation115_spill] sm:$0xff] %v8048_v20  ;;  %v4027_v20 = vor.u32 1.1754944e-38, %v4026_v15  ;;  %v8091_v5 = vpop.eup %5572  ;;  %vm4111_vm9 = vweird.f32 %v8083_v55 }
 0x40b   : > { %10234 = vst [vmem:[#allocation116_spill] sm:$0xff] %v8050_v11  ;;  %v8073_v11 = vpop.permute.xlu1 %3272  ;;  %v8106_v9 = vpop.eup %5574  ;;  %v8116_v6 = vmul.f32 %v8091_v5, %v7683_v42  ;;  %v4071_v42 = vand.u32 2147483648, %v7932_v38  ;;  %vm4112_vm10 = vmor %vm4110_vm8, %vm4111_vm9 }
 0x40c   : > { %10236 = vst [vmem:[#allocation55_spill] sm:$0xff] %v8061_v44  ;;  %v4062_v44 = vsub.f32 1.0, %v4061_v2  ;;  %v3426_v2 = vmul.f32 %v8077_v46, %v7700_v41  ;;  %v4028_v24 = vsel %vm4025_vm3, %v4027_v20, %v4023_v27  ;;  %v8120_v20 = vpop.permute.xlu2 %3917  ;;  %v8131_v15 = vpop.eup %5576  ;;  %v3411_v50 = vmul.f32 %v8106_v9, %v10241_v29 }
 0x40d   : > { %10237 = vst [vmem:[#allocation117_spill] sm:$0xff] %v8066_v10  ;;  %v4029_v22 = vmul.f32 %v4028_v24, %v7851_v49  ;;  %v8124_v24 = vor.u32 1.1754944e-38, %v3436_v13  ;;  %v3421_v13 = vand.u32 2147483648, %v10241_v29  ;;  %v10251_v49 = vld [vmem:[#allocation60_spill] sm:$0xff]  ;;  %vm4156_vm13 = vweird.f32 %v8131_v15 }
 0x40e   : > { %10238 = vst [vmem:[#allocation118_spill] sm:$0xff] %v8073_v11  ;;  %v3376_v11 = vand.u32 2147483648, %v7687_v28  ;;  %v4063_v21 = vmul.f32 %v8025_v39, %v4062_v44  ;;  %v3383_v44 = vmul.f32 %v8042_v37, %v3382_v43  ;;  %v10256_v28 = vld [vmem:[#allocation57_spill] sm:$0xff]  ;;  %vm8254_vm14 = vmor %vm4155_vm12, %vm4156_vm13  ;;  %vm4200_vm15 = vweird.f32 %v8120_v20 }
 0x40f   : > { %10239 = vst [vmem:[#allocation119_spill] sm:$0xff] %v8075_v0  ;;  %v3293_v0 = vmul.f32 %v8003_v59, %v3292_v33  ;;  %v4106_v33 = vmul.f32 %v8083_v55, %v8001_v40  ;;  %4527 = vrot.lane.b32.xlu1 %v4029_v22, %s5875_s29  ;;  %v8161_v29 = vor.u32 1.1754944e-38, %v3421_v13 }
 0x410   : > { %10240 = vst [vmem:[#allocation120_spill] sm:$0xff] %v8077_v46  ;;  %v8118_v27 = vor.u32 1.1754944e-38, %v3376_v11  ;;  %v3427_v11 = vsub.f32 1.0, %v3426_v2  ;;  %v4064_v22 = vadd.f32 %v8025_v39, %v4063_v21  ;;  %v4069_v2 = vand.u32 2147483647, %v7932_v38 }
 0x411   : > { %10242 = vst [vmem:[#allocation121_spill] sm:$0xff] %v8091_v5  ;;  %v8112_v32 = vadd.f32 %v8003_v59, %v3293_v0  ;;  %v8129_v0 = vpop.permute.xlu0 %3862  ;;  %v10250_v5 = vld [vmem:[#allocation59_spill] sm:$0xff]  ;;  %v4107_v43 = vsub.f32 1.0, %v4106_v33  ;;  %v8153_v38 = vadd.f32 %v8042_v37, %v3383_v44 }
 0x412   : > { %10243 = vst [vmem:[#allocation122_spill] sm:$0xff] %v8101_v1  ;;  %5578 = vrcp.f32 %v10250_v5  ;;  %v3428_v21 = vmul.f32 %v8077_v46, %v3427_v11  ;;  %v4072_v1 = vor.u32 1.1754944e-38, %v4071_v42  ;;  %v4068_v41 = vsel %vm4067_vm6, %v8025_v39, %v4064_v22 }
 0x413   : > { %10244 = vst [vmem:[#allocation123_spill] sm:$0xff] %v8106_v9  ;;  %v8127_v3 = vpop.permute.xlu1 %3867  ;;  %5580 = vrcp.f32 %v10251_v49  ;;  %vm4070_vm7 = vcmp.eq.f32.partialorder %v4069_v2, 8.507059e+37  ;;  %v8165_v42 = vmul.f32 %v7806_v30, %v10256_v28  ;;  %v4116_v11 = vand.u32 2147483648, %v8001_v40 }
 0x414   : > { %10245 = vst [vmem:[#allocation124_spill] sm:$0xff] %v8109_v26  ;;  %5582 = vrcp.f32 %v8120_v20  ;;  %v4073_v39 = vsel %vm4070_vm7, %v4072_v1, %v4068_v41  ;;  %v8184_v41 = vadd.f32 %v8077_v46, %v3428_v21  ;;  %v4159_v46 = vand.u32 2147483647, %v8064_v54 }
 0x415   : > { %10246 = vst [vmem:[#allocation125_spill] sm:$0xff] %v8112_v32  ;;  %5584 = vrcp.f32 %v8127_v3  ;;  %v3412_v32 = vsub.f32 1.0, %v3411_v50  ;;  %v4074_v2 = vmul.f32 %v4073_v39, %v7855_v51  ;;  %v4114_v39 = vand.u32 2147483647, %v8001_v40 }
 0x416   : > { %10247 = vst [vmem:[#allocation126_spill] sm:$0xff] %v8116_v6  ;;  %v3368_v6 = vmul.f32 %v8066_v10, %v3367_v45  ;;  %v10253_v45 = vld [vmem:[#allocation56_spill] sm:$0xff]  ;;  %5586 = vrcp.f32 %v8129_v0  ;;  %vm4050_vm0 = vweird.f32 %v8127_v3  ;;  %vm4160_vm1 = vcmp.eq.f32.partialorder %v4159_v46, 8.507059e+37 }
 0x417   : > { %10248 = vst [vmem:[#allocation127_spill] sm:$0xff] %v8118_v27  ;;  %v4108_v27 = vmul.f32 %v8083_v55, %v4107_v43  ;;  %v8157_v33 = vmul.f32 %v7806_v30, %v10253_v45  ;;  %v8168_v43 = vpop.permute.xlu2 %3932  ;;  %v3413_v51 = vmul.f32 %v8106_v9, %v3412_v32  ;;  %4533 = vrot.lane.b32.xlu1 %v4074_v2, %s5875_s29  ;;  %vm4115_vm11 = vcmp.eq.f32.partialorder %v4114_v39, 8.507059e+37 }
 0x418   : > { %10249 = vst [vmem:[#allocation128_spill] sm:$0xff] %v8124_v24  ;;  %v4151_v24 = vmul.f32 %v8131_v15, %v8064_v54  ;;  %v8159_v26 = vpop.eup %5578  ;;  %v8173_v50 = vadd.f32 %v8066_v10, %v3368_v6  ;;  %5588 = vrcp.f32 %v8168_v43  ;;  %vm4035_vm2 = vweird.f32 %v8129_v0 }
 0x419   : > { %10252 = vst [vmem:[#allocation129_spill] sm:$0xff] %v8153_v38  ;;  %v8170_v44 = vpop.eup %5580  ;;  %v8179_v45 = vpop.permute.xlu0 %3877  ;;  %v4109_v6 = vadd.f32 %v8083_v55, %v4108_v27  ;;  %v8202_v38 = vmul.f32 %v7806_v30, %v7719_v18  ;;  %v4117_v27 = vor.u32 1.1754944e-38, %v4116_v11  ;;  %vm4245_vm7 = vweird.f32 %v8168_v43 }
 0x41a   : > { %10254 = vst [vmem:[#allocation56_spill] sm:$0xff] %v8159_v26  ;;  %v4152_v22 = vsub.f32 1.0, %v4151_v24  ;;  %v8181_v28 = vpop.eup %5582  ;;  %v8198_v21 = vmul.f32 %v8170_v44, %v10251_v49  ;;  %v10263_v49 = vld [vmem:[#allocation62_spill] sm:$0xff]  ;;  %vm4080_vm13 = vweird.f32 %v8179_v45 }
 0x41b   : > { %10255 = vst [vmem:[#allocation130_spill] sm:$0xff] %v8161_v29  ;;  %v8177_v13 = vpop.permute.xlu1 %3882  ;;  %v8189_v24 = vpop.eup %5584  ;;  %v4196_v32 = vmul.f32 %v8181_v28, %v8120_v20  ;;  %v4113_v40 = vsel %vm4112_vm10, %v8083_v55, %v4109_v6  ;;  %v8216_v18 = vmul.f32 %v7806_v30, %v10263_v49  ;;  %v8226_v55 = vmul.f32 %v8159_v26, %v10250_v5 }
 0x41c   : > { %10257 = vst [vmem:[#allocation57_spill] sm:$0xff] %v8170_v44  ;;  %v4153_v1 = vmul.f32 %v8131_v15, %v4152_v22  ;;  %v4046_v2 = vmul.f32 %v8189_v24, %v8127_v3  ;;  %v4118_v11 = vsel %vm4115_vm11, %v4117_v27, %v4113_v40  ;;  %v8222_v22 = vadd.f32 %v8106_v9, %v3413_v51 }
 0x41d   : > { %10258 = vst [vmem:[#allocation131_spill] sm:$0xff] %v8173_v50  ;;  %v8219_v50 = vpop.eup %5586  ;;  %v4119_v6 = vmul.f32 %v4118_v11, %v7868_v25  ;;  %5590 = vrcp.f32 %v8177_v13  ;;  %v4161_v49 = vand.u32 2147483648, %v8064_v54  ;;  %v4197_v39 = vsub.f32 1.0, %v4196_v32  ;;  %v10267_v11 = vld [vmem:[#allocation65_spill] sm:$0xff] }
 0x41e   : > { %10259 = vst [vmem:[#allocation132_spill] sm:$0xff] %v8184_v41  ;;  %v10261_v41 = vld [vmem:[#allocation61_spill] sm:$0xff]  ;;  %v4031_v27 = vmul.f32 %v8219_v50, %v8129_v0  ;;  %v4206_v40 = vand.u32 2147483648, %v8120_v20  ;;  %v4047_v51 = vsub.f32 1.0, %v4046_v2  ;;  %5592 = vrcp.f32 %v8179_v45  ;;  %v10268_v2 = vld [vmem:[#allocation66_spill] sm:$0xff] }
 0x41f   : > { %10260 = vst [vmem:[#allocation133_spill] sm:$0xff] %v8198_v21  ;;  %v8212_v29 = vmul.f32 %v7806_v30, %v10261_v41  ;;  %v4154_v26 = vadd.f32 %v8131_v15, %v4153_v1  ;;  %5594 = vrcp.f32 %v10267_v11  ;;  %v4056_v32 = vand.u32 2147483648, %v8127_v3  ;;  %4539 = vrot.lane.b32.xlu1 %v4119_v6, %s5875_s29  ;;  %v8259_v37 = vpop.permute.xlu2 %3947  ;;  %v8261_v11 = vpop.eup %5588 }
 0x420   : > { %10264 = vst [vmem:[#allocation62_spill] sm:$0xff] %v8216_v18  ;;  %v8247_v41 = vmul.f32 %v7806_v30, %v7734_v4  ;;  %v4032_v1 = vsub.f32 1.0, %v4031_v27  ;;  %v4162_v18 = vor.u32 1.1754944e-38, %v4161_v49  ;;  %v4198_v4 = vmul.f32 %v8181_v28, %v4197_v39 }
 0x421   : > { %10262 = vst [vmem:[#allocation61_spill] sm:$0xff] %v8212_v29  ;;  %v8239_v25 = vpop.permute.xlu0 %3892  ;;  %v4207_v27 = vor.u32 1.1754944e-38, %v4206_v40  ;;  %v4057_v54 = vor.u32 1.1754944e-38, %v4056_v32  ;;  %v4041_v49 = vand.u32 2147483648, %v8129_v0  ;;  %5596 = vrcp.f32 %v8259_v37 }
 0x422   : > { %10265 = vst [vmem:[#allocation134_spill] sm:$0xff] %v8222_v22  ;;  %v8251_v22 = vmul.f32 %v7806_v30, %v10268_v2  ;;  %v4158_v30 = vsel %vm8254_vm14, %v8131_v15, %v4154_v26  ;;  %v4048_v2 = vmul.f32 %v8189_v24, %v4047_v51  ;;  %v4033_v44 = vmul.f32 %v8219_v50, %v4032_v1 }
 0x423   : > { %10266 = vst [vmem:[#allocation135_spill] sm:$0xff] %v8226_v55  ;;  %v8237_v5 = vpop.permute.xlu1 %3897  ;;  %v8268_v6 = vpop.eup %5590  ;;  %v4163_v39 = vsel %vm4160_vm1, %v4162_v18, %v4158_v30  ;;  %v4241_v15 = vmul.f32 %v8261_v11, %v8168_v43  ;;  %v4199_v18 = vadd.f32 %v8181_v28, %v4198_v4  ;;  %vm4201_vm3 = vweird.f32 %v8181_v28 }
 0x424   : > { %10269 = vst [vmem:[#allocation66_spill] sm:$0xff] %v8251_v22  ;;  %v8274_v22 = vpop.eup %5592  ;;  %v4164_v26 = vmul.f32 %v4163_v39, %v7881_v57  ;;  %v4091_v46 = vmul.f32 %v8268_v6, %v8177_v13  ;;  %5598 = vrcp.f32 %v8237_v5  ;;  %v4204_v51 = vand.u32 2147483647, %v8120_v20  ;;  %vm4202_vm5 = vmor %vm4200_vm15, %vm4201_vm3 }
 0x425   : > { %v8281_v55 = vpop.eup %5594  ;;  %v4076_v40 = vmul.f32 %v8274_v22, %v8179_v45  ;;  %v4049_v57 = vadd.f32 %v8189_v24, %v4048_v2  ;;  %vm4051_vm4 = vweird.f32 %v8189_v24  ;;  %v4042_v1 = vor.u32 1.1754944e-38, %v4041_v49 }
 0x426   : > { %10272 = vst [vmem:[#allocation136_spill] sm:$0xff] %v8281_v55  ;;  %v4251_v30 = vand.u32 2147483648, %v8168_v43  ;;  %v4101_v39 = vand.u32 2147483648, %v8177_v13  ;;  %5600 = vrcp.f32 %v8239_v25  ;;  %v4203_v2 = vsel %vm4202_vm5, %v8181_v28, %v4199_v18  ;;  %vm4052_vm8 = vmor %vm4050_vm0, %vm4051_vm4 }
 0x427   : > { %4545 = vrot.lane.b32.xlu1 %v4164_v26, %s5875_s29  ;;  %vm4205_vm6 = vcmp.eq.f32.partialorder %v4204_v51, 8.507059e+37  ;;  %v4054_v55 = vand.u32 2147483647, %v8127_v3  ;;  %v4034_v49 = vadd.f32 %v8219_v50, %v4033_v44  ;;  %v4242_v21 = vsub.f32 1.0, %v4241_v15  ;;  %v8312_v20 = vpop.eup %5596  ;;  %v8316_v44 = vpop.permute.xlu2 %3962 }
 0x428   : > { %v4092_v9 = vsub.f32 1.0, %v4091_v46  ;;  %v4086_v29 = vand.u32 2147483648, %v8179_v45  ;;  %v4208_v10 = vsel %vm4205_vm6, %v4207_v27, %v4203_v2  ;;  %v4077_v28 = vsub.f32 1.0, %v4076_v40 }
 0x429   : > { %v8293_v32 = vpop.permute.xlu0 %3907  ;;  %v4053_v26 = vsel %vm4052_vm8, %v8189_v24, %v4049_v57  ;;  %vm4055_vm9 = vcmp.eq.f32.partialorder %v4054_v55, 8.507059e+37  ;;  %vm4036_vm10 = vweird.f32 %v8219_v50  ;;  %v4252_v46 = vor.u32 1.1754944e-38, %v4251_v30 }
 0x42a   : > { %v8318_v15 = vpop.eup %5598  ;;  %vm4095_vm11 = vweird.f32 %v8177_v13  ;;  %v4102_v27 = vor.u32 1.1754944e-38, %v4101_v39  ;;  %v4058_v18 = vsel %vm4055_vm9, %v4057_v54, %v4053_v26  ;;  %vm8323_vm12 = vmor %vm4035_vm2, %vm4036_vm10  ;;  %v4209_v24 = vmul.f32 %v4208_v10, %v7902_v8 }
 0x42b   : > { %v8300_v4 = vpop.permute.xlu1 %3912  ;;  %v4059_v55 = vmul.f32 %v4058_v18, %v7859_v56  ;;  %v4038_v40 = vsel %vm8323_vm12, %v8219_v50, %v4034_v49  ;;  %v4039_v51 = vand.u32 2147483647, %v8129_v0  ;;  %v4243_v54 = vmul.f32 %v8261_v11, %v4242_v21 }
 0x42c   : > { %v8334_v57 = vpop.eup %5600  ;;  %v4093_v30 = vmul.f32 %v8268_v6, %v4092_v9  ;;  %v4087_v39 = vor.u32 1.1754944e-38, %v4086_v29  ;;  %5602 = vrcp.f32 %v8316_v44  ;;  %v4078_v2 = vmul.f32 %v8274_v22, %v4077_v28 }
 0x42d   : > { %v4286_v10 = vmul.f32 %v8312_v20, %v8259_v37  ;;  %4531 = vrot.lane.b32.xlu0 %v4059_v55, %s5875_s29  ;;  %vm4040_vm14 = vcmp.eq.f32.partialorder %v4039_v51, 8.507059e+37  ;;  %5604 = vrcp.f32 %v8300_v4  ;;  %v4296_v8 = vand.u32 2147483648, %v8259_v37 }
 0x42e   : > { %v4136_v56 = vmul.f32 %v8318_v15, %v8237_v5  ;;  %v4146_v9 = vand.u32 2147483648, %v8237_v5  ;;  %v4043_v29 = vsel %vm4040_vm14, %v4042_v1, %v4038_v40  ;;  %v4121_v50 = vmul.f32 %v8334_v57, %v8239_v25 }
 0x42f   : > { %v4131_v21 = vand.u32 2147483648, %v8239_v25  ;;  %4551 = vrot.lane.b32.xlu1 %v4209_v24, %s5875_s29  ;;  %v4044_v49 = vmul.f32 %v4043_v29, %v7863_v61  ;;  %5606 = vrcp.f32 %v8293_v32  ;;  %v4244_v28 = vadd.f32 %v8261_v11, %v4243_v54 }
 0x430   : > { %vm4246_vm15 = vweird.f32 %v8261_v11  ;;  %v4249_v26 = vand.u32 2147483647, %v8168_v43  ;;  %v4094_v1 = vadd.f32 %v8268_v6, %v4093_v30  ;;  %v4287_v3 = vsub.f32 1.0, %v4286_v10  ;;  %v8380_v10 = vpop.permute.xlu2 %3977 }
 0x431   : > { %v8348_v0 = vpop.permute.xlu0 %3922  ;;  %4529 = vrot.lane.b32.xlu2 %v4044_v49, %s5875_s29  ;;  %vm4247_vm0 = vmor %vm4245_vm7, %vm4246_vm15  ;;  %vm4096_vm1 = vweird.f32 %v8268_v6  ;;  %v4099_v61 = vand.u32 2147483647, %v8177_v13  ;;  %v4079_v24 = vadd.f32 %v8274_v22, %v4078_v2  ;;  %vm4290_vm2 = vweird.f32 %v8259_v37 }
 0x432   : > { %v8368_v55 = vpop.eup %5602  ;;  %v4137_v40 = vsub.f32 1.0, %v4136_v56  ;;  %v4248_v51 = vsel %vm4247_vm0, %v8261_v11, %v4244_v28  ;;  %vm4250_vm3 = vcmp.eq.f32.partialorder %v4249_v26, 8.507059e+37  ;;  %vm4097_vm4 = vmor %vm4095_vm11, %vm4096_vm1  ;;  %vm4081_vm5 = vweird.f32 %v8274_v22 }
 0x433   : > { %v8360_v18 = vpop.permute.xlu1 %3927  ;;  %v8375_v43 = vpop.eup %5604  ;;  %vm4140_vm6 = vweird.f32 %v8237_v5  ;;  %v4253_v54 = vsel %vm4250_vm3, %v4252_v46, %v4248_v51  ;;  %v4098_v30 = vsel %vm4097_vm4, %v8268_v6, %v4094_v1  ;;  %vm4100_vm7 = vcmp.eq.f32.partialorder %v4099_v61, 8.507059e+37  ;;  %vm4082_vm8 = vmor %vm4080_vm13, %vm4081_vm5 }
 0x434   : > { %v4084_v2 = vand.u32 2147483647, %v8179_v45  ;;  %v4122_v56 = vsub.f32 1.0, %v4121_v50  ;;  %v4341_v11 = vand.u32 2147483648, %v8316_v44  ;;  %v4254_v13 = vmul.f32 %v4253_v54, %v7919_v62 }
 0x435   : > { %v4103_v29 = vsel %vm4100_vm7, %v4102_v27, %v4098_v30  ;;  %v8386_v49 = vpop.eup %5606  ;;  %v4331_v46 = vmul.f32 %v8368_v55, %v8316_v44  ;;  %v4083_v28 = vsel %vm4082_vm8, %v8274_v22, %v4079_v24  ;;  %v4288_v50 = vmul.f32 %v8312_v20, %v4287_v3 }
 0x436   : > { %v4104_v6 = vmul.f32 %v4103_v29, %v7872_v17  ;;  %vm4085_vm9 = vcmp.eq.f32.partialorder %v4084_v2, 8.507059e+37  ;;  %v4181_v26 = vmul.f32 %v8375_v43, %v8300_v4  ;;  %5608 = vrcp.f32 %v8380_v10 }
 0x437   : > { %v4088_v62 = vsel %vm4085_vm9, %v4087_v39, %v4083_v28  ;;  %v4297_v45 = vor.u32 1.1754944e-38, %v4296_v8  ;;  %v4138_v27 = vmul.f32 %v8318_v15, %v4137_v40  ;;  %v4147_v1 = vor.u32 1.1754944e-38, %v4146_v9  ;;  %4557 = vrot.lane.b32.xlu1 %v4254_v13, %s5875_s29 }
 0x438   : > { %4537 = vrot.lane.b32.xlu0 %v4104_v6, %s5875_s29  ;;  %v4089_v17 = vmul.f32 %v4088_v62, %v7876_v19  ;;  %v4123_v22 = vmul.f32 %v8334_v57, %v4122_v56  ;;  %vm4125_vm10 = vweird.f32 %v8239_v25  ;;  %v4166_v3 = vmul.f32 %v8386_v49, %v8293_v32 }
 0x439   : > { %5610 = vrcp.f32 %v8360_v18  ;;  %v8405_v39 = vpop.permute.xlu0 %3937  ;;  %v4132_v8 = vor.u32 1.1754944e-38, %v4131_v21  ;;  %v4332_v61 = vsub.f32 1.0, %v4331_v46  ;;  %v8407_v9 = vor.u32 1.1754944e-38, %v4341_v11 }
 0x43a   : > { %v4191_v24 = vand.u32 2147483648, %v8300_v4  ;;  %4535 = vrot.lane.b32.xlu2 %v4089_v17, %s5875_s29  ;;  %v4182_v19 = vsub.f32 1.0, %v4181_v26  ;;  %5612 = vrcp.f32 %v8348_v0  ;;  %v4289_v40 = vadd.f32 %v8312_v20, %v4288_v50 }
 0x43b   : > { %vm4291_vm11 = vweird.f32 %v8312_v20  ;;  %v8414_v51 = vpop.permute.xlu1 %3942  ;;  %v4294_v54 = vand.u32 2147483647, %v8259_v37  ;;  %v4139_v30 = vadd.f32 %v8318_v15, %v4138_v27  ;;  %vm4141_vm13 = vweird.f32 %v8318_v15 }
 0x43c   : > { %vm8418_vm12 = vmor %vm4290_vm2, %vm4291_vm11  ;;  %v4144_v2 = vand.u32 2147483647, %v8237_v5  ;;  %v8426_v56 = vpop.eup %5608  ;;  %v4167_v11 = vsub.f32 1.0, %v4166_v3  ;;  %v4124_v29 = vadd.f32 %v8334_v57, %v4123_v22  ;;  %vm4126_vm15 = vweird.f32 %v8334_v57  ;;  %v8445_v5 = vpop.permute.xlu2 %3992 }
 0x43d   : > { %v4293_v13 = vsel %vm8418_vm12, %v8312_v20, %v4289_v40  ;;  %vm4142_vm14 = vmor %vm4140_vm6, %vm4141_vm13  ;;  %vm4335_vm0 = vweird.f32 %v8316_v44  ;;  %v4376_v37 = vmul.f32 %v8426_v56, %v8380_v10  ;;  %vm4295_vm1 = vcmp.eq.f32.partialorder %v4294_v54, 8.507059e+37 }
 0x43e   : > { %v4143_v46 = vsel %vm4142_vm14, %v8318_v15, %v4139_v30  ;;  %vm4145_vm2 = vcmp.eq.f32.partialorder %v4144_v2, 8.507059e+37  ;;  %vm8441_vm3 = vmor %vm4125_vm10, %vm4126_vm15  ;;  %vm4185_vm4 = vweird.f32 %v8300_v4  ;;  %v4298_v28 = vsel %vm4295_vm1, %v4297_v45, %v4293_v13 }
 0x43f   : > { %v8447_v6 = vpop.eup %5610  ;;  %v4148_v50 = vsel %vm4145_vm2, %v4147_v1, %v4143_v46  ;;  %v4128_v26 = vsel %vm8441_vm3, %v8334_v57, %v4124_v29  ;;  %v4129_v15 = vand.u32 2147483647, %v8239_v25  ;;  %v4176_v62 = vand.u32 2147483648, %v8293_v32 }
 0x440   : > { %v4386_v27 = vand.u32 2147483648, %v8380_v10  ;;  %v4299_v17 = vmul.f32 %v4298_v28, %v7958_v14  ;;  %v4149_v22 = vmul.f32 %v4148_v50, %v7891_v48  ;;  %v8458_v3 = vpop.eup %5612  ;;  %v4333_v40 = vmul.f32 %v8368_v55, %v4332_v61 }
 0x441   : > { %v4377_v45 = vsub.f32 1.0, %v4376_v37  ;;  %vm4130_vm5 = vcmp.eq.f32.partialorder %v4129_v15, 8.507059e+37  ;;  %5614 = vrcp.f32 %v8445_v5  ;;  %v4183_v57 = vmul.f32 %v8375_v43, %v4182_v19  ;;  %v8471_v21 = vpop.permute.xlu0 %3952 }
 0x442   : > { %v4192_v1 = vor.u32 1.1754944e-38, %v4191_v24  ;;  %v4226_v25 = vmul.f32 %v8447_v6, %v8360_v18  ;;  %4563 = vrot.lane.b32.xlu1 %v4299_v17, %s5875_s29  ;;  %4543 = vrot.lane.b32.xlu0 %v4149_v22, %s5875_s29  ;;  %v4133_v14 = vsel %vm4130_vm5, %v4132_v8, %v4128_v26  ;;  %v4168_v48 = vmul.f32 %v8386_v49, %v4167_v11 }
 0x443   : > { %vm4170_vm6 = vweird.f32 %v8293_v32  ;;  %v4134_v61 = vmul.f32 %v4133_v14, %v7895_v31  ;;  %5616 = vrcp.f32 %v8414_v51  ;;  %v4177_v19 = vor.u32 1.1754944e-38, %v4176_v62  ;;  %v8483_v11 = vpop.permute.xlu1 %3957 }
 0x444   : > { %v8473_v24 = vor.u32 1.1754944e-38, %v4386_v27  ;;  %v4236_v54 = vand.u32 2147483648, %v8360_v18  ;;  %5618 = vrcp.f32 %v8405_v39  ;;  %v4378_v30 = vmul.f32 %v8426_v56, %v4377_v45  ;;  %v8509_v22 = vpop.permute.xlu2 %4007 }
 0x445   : > { %v4211_v8 = vmul.f32 %v8458_v3, %v8348_v0  ;;  %v4221_v2 = vand.u32 2147483648, %v8348_v0  ;;  %4541 = vrot.lane.b32.xlu2 %v4134_v61, %s5875_s29  ;;  %v4334_v31 = vadd.f32 %v8368_v55, %v4333_v40  ;;  %v4227_v13 = vsub.f32 1.0, %v4226_v25 }
 0x446   : > { %vm4336_vm7 = vweird.f32 %v8368_v55  ;;  %v4339_v29 = vand.u32 2147483647, %v8316_v44  ;;  %v4184_v37 = vadd.f32 %v8375_v43, %v4183_v57  ;;  %v4431_v20 = vand.u32 2147483648, %v8445_v5 }
 0x447   : > { %v8488_v46 = vpop.eup %5614  ;;  %vm4337_vm8 = vmor %vm4335_vm0, %vm4336_vm7  ;;  %vm4186_vm9 = vweird.f32 %v8375_v43  ;;  %v4189_v28 = vand.u32 2147483647, %v8300_v4  ;;  %v4169_v50 = vadd.f32 %v8386_v49, %v4168_v48  ;;  %vm4380_vm10 = vweird.f32 %v8380_v10 }
 0x448   : > { %v4421_v26 = vmul.f32 %v8488_v46, %v8445_v5  ;;  %v4338_v15 = vsel %vm4337_vm8, %v8368_v55, %v4334_v31  ;;  %vm4340_vm11 = vcmp.eq.f32.partialorder %v4339_v29, 8.507059e+37  ;;  %vm4187_vm12 = vmor %vm4185_vm4, %vm4186_vm9  ;;  %vm4171_vm13 = vweird.f32 %v8386_v49 }
 0x449   : > { %v8503_v44 = vpop.eup %5616  ;;  %vm4230_vm14 = vweird.f32 %v8360_v18  ;;  %v4343_v62 = vsel %vm4340_vm11, %v8407_v9, %v4338_v15  ;;  %v4188_v27 = vsel %vm4187_vm12, %v8375_v43, %v4184_v37  ;;  %vm4190_vm15 = vcmp.eq.f32.partialorder %v4189_v28, 8.507059e+37  ;;  %vm4172_vm0 = vmor %vm4170_vm6, %vm4171_vm13 }
 0x44a   : > { %v4174_v17 = vand.u32 2147483647, %v8293_v32  ;;  %v8511_v55 = vpop.eup %5618  ;;  %v4212_v40 = vsub.f32 1.0, %v4211_v8  ;;  %v4281_v4 = vand.u32 2147483648, %v8414_v51  ;;  %v4344_v45 = vmul.f32 %v4343_v62, %v7995_v53 }
 0x44b   : > { %v4193_v57 = vsel %vm4190_vm15, %v4192_v1, %v4188_v27  ;;  %v4422_v25 = vsub.f32 1.0, %v4421_v26  ;;  %v4173_v43 = vsel %vm4172_vm0, %v8386_v49, %v4169_v50  ;;  %v4271_v14 = vmul.f32 %v8503_v44, %v8414_v51  ;;  %v8529_v49 = vpop.permute.xlu0 %3967 }
 0x44c   : > { %v4194_v9 = vmul.f32 %v4193_v57, %v7906_v52  ;;  %vm4175_vm1 = vcmp.eq.f32.partialorder %v4174_v17, 8.507059e+37  ;;  %v4256_v48 = vmul.f32 %v8511_v55, %v8405_v39  ;;  %4569 = vrot.lane.b32.xlu1 %v4344_v45, %s5875_s29  ;;  %5620 = vrcp.f32 %v8509_v22 }
 0x44d   : > { %v4178_v61 = vsel %vm4175_vm1, %v4177_v19, %v4173_v43  ;;  %v4228_v53 = vmul.f32 %v8447_v6, %v4227_v13  ;;  %v4237_v32 = vor.u32 1.1754944e-38, %v4236_v54  ;;  %vm4215_vm2 = vweird.f32 %v8348_v0 }
 0x44e   : > { %4549 = vrot.lane.b32.xlu0 %v4194_v9, %s5875_s29  ;;  %v4179_v52 = vmul.f32 %v4178_v61, %v7910_v7  ;;  %v4213_v1 = vmul.f32 %v8458_v3, %v4212_v40  ;;  %v4222_v8 = vor.u32 1.1754944e-38, %v4221_v2  ;;  %v8532_v31 = vor.u32 1.1754944e-38, %v4431_v20  ;;  %v8541_v7 = vpop.permute.xlu1 %3972 }
 0x44f   : > { %5622 = vrcp.f32 %v8483_v11  ;;  %v4423_v19 = vmul.f32 %v8488_v46, %v4422_v25  ;;  %v8536_v29 = vor.u32 1.1754944e-38, %v4281_v4  ;;  %v4266_v54 = vand.u32 2147483648, %v8405_v39 }
 0x450   : > { %4547 = vrot.lane.b32.xlu2 %v4179_v52, %s5875_s29  ;;  %5624 = vrcp.f32 %v8471_v21  ;;  %v4272_v13 = vsub.f32 1.0, %v4271_v14  ;;  %v4257_v37 = vsub.f32 1.0, %v4256_v48  ;;  %v4379_v2 = vadd.f32 %v8426_v56, %v4378_v30 }
 0x451   : > { %vm4381_vm3 = vweird.f32 %v8426_v56  ;;  %v4384_v28 = vand.u32 2147483647, %v8380_v10  ;;  %v4229_v50 = vadd.f32 %v8447_v6, %v4228_v53  ;;  %vm4231_vm5 = vweird.f32 %v8447_v6 }
 0x452   : > { %vm8547_vm4 = vmor %vm4380_vm10, %vm4381_vm3  ;;  %v4234_v26 = vand.u32 2147483647, %v8360_v18  ;;  %v8555_v15 = vpop.eup %5620  ;;  %vm4425_vm6 = vweird.f32 %v8445_v5  ;;  %v4476_v30 = vand.u32 2147483648, %v8509_v22  ;;  %v4214_v10 = vadd.f32 %v8458_v3, %v4213_v1 }
 0x453   : > { %v4383_v62 = vsel %vm8547_vm4, %v8426_v56, %v4379_v2  ;;  %vm4232_vm7 = vmor %vm4230_vm14, %vm4231_vm5  ;;  %vm4216_vm8 = vweird.f32 %v8458_v3  ;;  %vm4275_vm9 = vweird.f32 %v8414_v51  ;;  %v4466_v27 = vmul.f32 %v8555_v15, %v8509_v22  ;;  %v8598_v53 = vpop.permute.xlu0 %3982 }
 0x454   : > { %vm4385_vm10 = vcmp.eq.f32.partialorder %v4384_v28, 8.507059e+37  ;;  %v4233_v17 = vsel %vm4232_vm7, %v8447_v6, %v4229_v50  ;;  %vm4235_vm11 = vcmp.eq.f32.partialorder %v4234_v26, 8.507059e+37  ;;  %vm8572_vm12 = vmor %vm4215_vm2, %vm4216_vm8  ;;  %vm4260_vm13 = vweird.f32 %v8405_v39 }
 0x455   : > { %v8576_v18 = vpop.eup %5622  ;;  %v4388_v40 = vsel %vm4385_vm10, %v8473_v24, %v4383_v62  ;;  %v4238_v4 = vsel %vm4235_vm11, %v4237_v32, %v4233_v17  ;;  %v4218_v45 = vsel %vm8572_vm12, %v8458_v3, %v4214_v10  ;;  %v4219_v6 = vand.u32 2147483647, %v8348_v0 }
 0x456   : > { %v8584_v57 = vpop.eup %5624  ;;  %v4467_v25 = vsub.f32 1.0, %v4466_v27  ;;  %v4316_v9 = vmul.f32 %v8576_v18, %v8483_v11  ;;  %v4389_v43 = vmul.f32 %v4388_v40, %v8056_v58  ;;  %v4239_v14 = vmul.f32 %v4238_v4, %v7923_v34  ;;  %v8608_v2 = vpop.permute.xlu1 %3987 }
 0x457   : > { %v4273_v48 = vmul.f32 %v8503_v44, %v4272_v13  ;;  %v4301_v24 = vmul.f32 %v8584_v57, %v8471_v21  ;;  %vm4220_vm14 = vcmp.eq.f32.partialorder %v4219_v6, 8.507059e+37  ;;  %5626 = vrcp.f32 %v8541_v7 }
 0x458   : > { %v4258_v0 = vmul.f32 %v8511_v55, %v4257_v37  ;;  %v4267_v3 = vor.u32 1.1754944e-38, %v4266_v54  ;;  %v4326_v61 = vand.u32 2147483648, %v8483_v11  ;;  %4575 = vrot.lane.b32.xlu1 %v4389_v43, %s5875_s29  ;;  %4555 = vrot.lane.b32.xlu0 %v4239_v14, %s5875_s29  ;;  %v4223_v58 = vsel %vm4220_vm14, %v4222_v8, %v4218_v45  ;;  %v10296_v14 = vld [vmem:[#allocation79_spill] sm:$0xff] }
 0x459   : > { %v8600_v34 = vor.u32 1.1754944e-38, %v4476_v30  ;;  %v4311_v32 = vand.u32 2147483648, %v8471_v21  ;;  %v4224_v52 = vmul.f32 %v4223_v58, %v7930_v63  ;;  %5628 = vrcp.f32 %v8529_v49 }
 0x45a   : > { %v4468_v1 = vmul.f32 %v8555_v15, %v4467_v25  ;;  %v4317_v54 = vsub.f32 1.0, %v4316_v9  ;;  %v4371_v13 = vand.u32 2147483648, %v8541_v7  ;;  %v4424_v37 = vadd.f32 %v8488_v46, %v4423_v19 }
 0x45b   : > { %vm4470_vm15 = vweird.f32 %v8509_v22  ;;  %v4302_v8 = vsub.f32 1.0, %v4301_v24  ;;  %4553 = vrot.lane.b32.xlu2 %v4224_v52, %s5875_s29  ;;  %vm4426_vm0 = vweird.f32 %v8488_v46  ;;  %v4429_v63 = vand.u32 2147483647, %v8445_v5 }
 0x45c   : > { %v4274_v20 = vadd.f32 %v8503_v44, %v4273_v48  ;;  %vm4320_vm1 = vweird.f32 %v8483_v11  ;;  %v4356_v28 = vand.u32 2147483648, %v8529_v49  ;;  %vm4427_vm2 = vmor %vm4425_vm6, %vm4426_vm0  ;;  %vm4276_vm3 = vweird.f32 %v8503_v44 }
 0x45d   : > { %v4279_v19 = vand.u32 2147483647, %v8414_v51  ;;  %v4259_v50 = vadd.f32 %v8511_v55, %v4258_v0  ;;  %v8622_v26 = vpop.eup %5626  ;;  %v4428_v30 = vsel %vm4427_vm2, %v8488_v46, %v4424_v37  ;;  %vm4430_vm4 = vcmp.eq.f32.partialorder %v4429_v63, 8.507059e+37  ;;  %vm4277_vm5 = vmor %vm4275_vm9, %vm4276_vm3 }
 0x45e   : > { %vm4261_vm7 = vweird.f32 %v8511_v55  ;;  %v4264_v62 = vand.u32 2147483647, %v8405_v39  ;;  %vm4305_vm6 = vweird.f32 %v8471_v21  ;;  %v4361_v5 = vmul.f32 %v8622_v26, %v8541_v7  ;;  %v8672_v0 = vpop.permute.xlu1 %4002 }
 0x45f   : > { %v4433_v10 = vsel %vm4430_vm4, %v8532_v31, %v4428_v30  ;;  %v4278_v27 = vsel %vm4277_vm5, %v8503_v44, %v4274_v20  ;;  %vm4280_vm8 = vcmp.eq.f32.partialorder %v4279_v19, 8.507059e+37  ;;  %vm4262_vm10 = vmor %vm4260_vm13, %vm4261_vm7  ;;  %v8636_v46 = vpop.eup %5628  ;;  %v4318_v40 = vmul.f32 %v8576_v18, %v4317_v54 }
 0x460   : > { %v4434_v51 = vmul.f32 %v4433_v10, %v8202_v38  ;;  %v4283_v17 = vsel %vm4280_vm8, %v8536_v29, %v4278_v27  ;;  %v4263_v56 = vsel %vm4262_vm10, %v8511_v55, %v4259_v50  ;;  %vm4265_vm9 = vcmp.eq.f32.partialorder %v4264_v62, 8.507059e+37 }
 0x461   : > { %v4362_v4 = vsub.f32 1.0, %v4361_v5  ;;  %v4284_v31 = vmul.f32 %v4283_v17, %v7965_v36  ;;  %v4268_v45 = vsel %vm4265_vm9, %v4267_v3, %v4263_v56  ;;  %v4303_v44 = vmul.f32 %v8584_v57, %v4302_v8  ;;  %v8653_v36 = vpop.permute.xlu0 %3997  ;;  %v10287_v17 = vld [vmem:[#allocation41_spill] sm:$0xff]  ;;  %v10288_v56 = vld [vmem:[#allocation70_spill] sm:$0xff] }
 0x462   : > { %v4346_v39 = vmul.f32 %v8636_v46, %v8529_v49  ;;  %4581 = vrot.lane.b32.xlu1 %v4434_v51, %s5875_s29  ;;  %v4269_v38 = vmul.f32 %v4268_v45, %v7969_v47  ;;  %5630 = vrcp.f32 %v8608_v2  ;;  %v4327_v29 = vor.u32 1.1754944e-38, %v4326_v61 }
 0x463   : > { %v4312_v55 = vor.u32 1.1754944e-38, %v4311_v32  ;;  %v8649_v6 = vor.u32 1.1754944e-38, %v4371_v13  ;;  %4561 = vrot.lane.b32.xlu0 %v4284_v31, %s5875_s29  ;;  %5632 = vrcp.f32 %v8598_v53  ;;  %v8655_v25 = vor.u32 1.1754944e-38, %v4356_v28 }
 0x464   : > { %4559 = vrot.lane.b32.xlu2 %v4269_v38, %s5875_s29  ;;  %v4416_v9 = vand.u32 2147483648, %v8608_v2  ;;  %v4469_v47 = vadd.f32 %v8555_v15, %v4468_v1  ;;  %vm4471_vm11 = vweird.f32 %v8555_v15  ;;  %v4363_v43 = vmul.f32 %v8622_v26, %v4362_v4 }
 0x465   : > { %vm4365_vm12 = vweird.f32 %v8541_v7  ;;  %vm8665_vm13 = vmor %vm4470_vm15, %vm4471_vm11  ;;  %v4474_v48 = vand.u32 2147483647, %v8509_v22  ;;  %v4319_v24 = vadd.f32 %v8576_v18, %v4318_v40  ;;  %vm4321_vm14 = vweird.f32 %v8576_v18 }
 0x466   : > { %v4347_v3 = vsub.f32 1.0, %v4346_v39  ;;  %vm4350_vm0 = vweird.f32 %v8529_v49  ;;  %v4473_v61 = vsel %vm8665_vm13, %v8555_v15, %v4469_v47  ;;  %vm8680_vm15 = vmor %vm4320_vm1, %vm4321_vm14  ;;  %v4324_v22 = vand.u32 2147483647, %v8483_v11 }
 0x467   : > { %v4304_v32 = vadd.f32 %v8584_v57, %v4303_v44  ;;  %vm4475_vm2 = vcmp.eq.f32.partialorder %v4474_v48, 8.507059e+37  ;;  %v4323_v52 = vsel %vm8680_vm15, %v8576_v18, %v4319_v24  ;;  %vm4306_vm3 = vweird.f32 %v8584_v57  ;;  %v10297_v48 = vld [vmem:[#allocation47_spill] sm:$0xff] }
 0x468   : > { %v4309_v1 = vand.u32 2147483647, %v8471_v21  ;;  %v8691_v15 = vpop.eup %5630  ;;  %v4401_v54 = vand.u32 2147483648, %v8598_v53  ;;  %v4478_v13 = vsel %vm4475_vm2, %v8600_v34, %v4473_v61  ;;  %vm4325_vm1 = vcmp.eq.f32.partialorder %v4324_v22, 8.507059e+37  ;;  %vm4307_vm4 = vmor %vm4305_vm6, %vm4306_vm3 }
 0x469   : > { %5634 = vrcp.f32 %v8672_v0  ;;  %v8698_v11 = vpop.eup %5632  ;;  %v4406_v18 = vmul.f32 %v8691_v15, %v8608_v2  ;;  %v4479_v37 = vmul.f32 %v4478_v13, %v8247_v41  ;;  %v4328_v8 = vsel %vm4325_vm1, %v4327_v29, %v4323_v52  ;;  %v8722_v10 = vpop.permute.xlu0 %4012 }
 0x46a   : > { %v4308_v63 = vsel %vm4307_vm4, %v8584_v57, %v4304_v32  ;;  %v4348_v20 = vmul.f32 %v8636_v46, %v4347_v3  ;;  %v4391_v34 = vmul.f32 %v8698_v11, %v8598_v53  ;;  %v4329_v21 = vmul.f32 %v4328_v8, %v7999_v35 }
 0x46b   : > { %vm4310_vm5 = vcmp.eq.f32.partialorder %v4309_v1, 8.507059e+37  ;;  %v4407_v28 = vsub.f32 1.0, %v4406_v18  ;;  %vm4410_vm7 = vweird.f32 %v8608_v2  ;;  %4587 = vrot.lane.b32.xlu1 %v4479_v37, %s5875_s29  ;;  %5636 = vrcp.f32 %v8653_v36 }
 0x46c   : > { %v4313_v19 = vsel %vm4310_vm5, %v4312_v55, %v4308_v63  ;;  %v8711_v41 = vor.u32 1.1754944e-38, %v4416_v9  ;;  %v4392_v50 = vsub.f32 1.0, %v4391_v34  ;;  %vm4395_vm6 = vweird.f32 %v8598_v53  ;;  %4567 = vrot.lane.b32.xlu0 %v4329_v21, %s5875_s29  ;;  %v10370_v63 = vld [vmem:[#allocation76_spill] sm:$0xff]  ;;  %v10411_v9 = vld [vmem:[#allocation90_spill] sm:$0xff] }
 0x46d   : > { %v8714_v57 = vor.u32 1.1754944e-38, %v4401_v54  ;;  %v4314_v35 = vmul.f32 %v4313_v19, %v8009_v12  ;;  %v4461_v30 = vand.u32 2147483648, %v8672_v0  ;;  %v4364_v62 = vadd.f32 %v8622_v26, %v4363_v43 }
 0x46e   : > { %vm4366_vm8 = vweird.f32 %v8622_v26  ;;  %v4369_v5 = vand.u32 2147483647, %v8541_v7  ;;  %vm3280_vm10 = vweird.f32 %v7657_v23  ;;  %vm3281_vm9 = vweird.f32 %v7912_v16 }
 0x46f   : > { %v8724_v27 = vpop.eup %5634  ;;  %v4408_v51 = vmul.f32 %v8691_v15, %v4407_v28  ;;  %4565 = vrot.lane.b32.xlu2 %v4314_v35, %s5875_s29  ;;  %vm4455_vm11 = vweird.f32 %v8672_v0  ;;  %vm4367_vm13 = vmor %vm4365_vm12, %vm4366_vm8  ;;  %v4349_v12 = vadd.f32 %v8636_v46, %v4348_v20  ;;  %vm4351_vm14 = vweird.f32 %v8636_v46  ;;  %v10311_v20 = vld [vmem:[#allocation117_spill] sm:$0xff]  ;;  %v10356_v28 = vld [vmem:[#allocation50_spill] sm:$0xff] }
 0x470   : > { %vm3340_vm15 = vweird.f32 %v10287_v17  ;;  %vm3341_vm2 = vweird.f32 %v10288_v56  ;;  %v4451_v40 = vmul.f32 %v8724_v27, %v8672_v0  ;;  %v4368_v4 = vsel %vm4367_vm13, %v8622_v26, %v4364_v62  ;;  %vm8742_vm1 = vmor %vm4350_vm0, %vm4351_vm14  ;;  %v10386_v35 = vld [vmem:[#allocation74_spill] sm:$0xff] }
 0x471   : > { %vm4370_vm3 = vcmp.eq.f32.partialorder %v4369_v5, 8.507059e+37  ;;  %v4354_v7 = vand.u32 2147483647, %v8529_v49  ;;  %v4393_v45 = vmul.f32 %v8698_v11, %v4392_v50  ;;  %v4353_v39 = vsel %vm8742_vm1, %v8636_v46, %v4349_v12  ;;  %v8753_v26 = vpop.eup %5636  ;;  %v10318_v5 = vld [vmem:[#allocation51_spill] sm:$0xff]  ;;  %vm8852_vm1 = vmor %vm3280_vm10, %vm3281_vm9 }
 0x472   : > { %v4373_v44 = vsel %vm4370_vm3, %v8649_v6, %v4368_v4  ;;  %5638 = vrcp.f32 %v8722_v10  ;;  %vm3326_vm12 = vweird.f32 %v7987_v60  ;;  %v4452_v38 = vsub.f32 1.0, %v4451_v40  ;;  %v10294_v6 = vld [vmem:[#allocation48_spill] sm:$0xff] }
 0x473   : > { %v4462_v29 = vor.u32 1.1754944e-38, %v4461_v30  ;;  %v4374_v55 = vmul.f32 %v4373_v44, %v8157_v33  ;;  %vm4355_vm0 = vcmp.eq.f32.partialorder %v4354_v7, 8.507059e+37  ;;  %v10291_v49 = vand.u32 2147483647, %v7657_v23  ;;  %v10295_v33 = vld [vmem:[#allocation42_spill] sm:$0xff]  ;;  %v10317_v30 = vld [vmem:[#allocation61_spill] sm:$0xff] }
 0x474   : > { %v4436_v46 = vmul.f32 %v8753_v26, %v8653_v36  ;;  %v4358_v47 = vsel %vm4355_vm0, %v8655_v25, %v4353_v39  ;;  %v4409_v43 = vadd.f32 %v8691_v15, %v4408_v51  ;;  %vm4411_vm13 = vweird.f32 %v8691_v15  ;;  %v10321_v40 = vld [vmem:[#allocation64_spill] sm:$0xff]  ;;  %v10328_v44 = vld [vmem:[#allocation133_spill] sm:$0xff] }
 0x475   : > { %vm8759_vm4 = vcmp.eq.f32.partialorder %v10291_v49, 8.507059e+37  ;;  %v4453_v24 = vmul.f32 %v8724_v27, %v4452_v38  ;;  %v4446_v3 = vand.u32 2147483648, %v8653_v36  ;;  %v4359_v61 = vmul.f32 %v4358_v47, %v8165_v42  ;;  %vm8778_vm5 = vmor %vm4410_vm7, %vm4411_vm13  ;;  %4573 = vrot.lane.b32.xlu0 %v4374_v55, %s5875_s29  ;;  %v10330_v38 = vld [vmem:[#allocation57_spill] sm:$0xff]  ;;  %v5670_v55 = vld [vmem:[#allocation2 + $0x158] sm:$0xff] }
 0x476   : > { %v4414_v58 = vand.u32 2147483647, %v8608_v2  ;;  %v4437_v22 = vsub.f32 1.0, %v4436_v46  ;;  %v4413_v32 = vsel %vm8778_vm5, %v8691_v15, %v4409_v43  ;;  %v4394_v52 = vadd.f32 %v8698_v11, %v4393_v45  ;;  %v10327_v45 = vld [vmem:[#allocation123_spill] sm:$0xff]  ;;  %v10331_v46 = vld [vmem:[#allocation62_spill] sm:$0xff]  ;;  %v10332_v43 = vld [vmem:[#allocation65_spill] sm:$0xff] }
 0x477   : > { %vm4396_vm0 = vweird.f32 %v8698_v11  ;;  %v10300_v42 = vand.u32 2147483647, %v10287_v17  ;;  %v10303_v54 = vand.u32 2147483647, %v10297_v48  ;;  %v4399_v13 = vand.u32 2147483647, %v8598_v53  ;;  %4571 = vrot.lane.b32.xlu2 %v4359_v61, %s5875_s29 }
 0x478   : > { %vm4415_vm13 = vcmp.eq.f32.partialorder %v4414_v58, 8.507059e+37  ;;  %vm8803_vm5 = vmor %vm4395_vm6, %vm4396_vm0  ;;  %v4454_v18 = vadd.f32 %v8724_v27, %v4453_v24  ;;  %vm4456_vm3 = vweird.f32 %v8724_v27  ;;  %v8810_v37 = vpop.eup %5638  ;;  %v10308_v8 = vand.u32 2147483647, %v10294_v6  ;;  %v8881_v17 = vld [vmem:[%s10145_s21 + $0x1] ss:$0 sm:$0xff]  ;;  %v10334_v25 = vld [vmem:[#allocation69_spill] sm:$0xff] }
 0x479   : > { %vm8791_vm14 = vcmp.eq.f32.partialorder %v10300_v42, 8.507059e+37  ;;  %vm8797_vm7 = vcmp.eq.f32.partialorder %v10303_v54, 8.507059e+37  ;;  %v4438_v34 = vmul.f32 %v8753_v26, %v4437_v22  ;;  %v4418_v53 = vsel %vm4415_vm13, %v8711_v41, %v4413_v32  ;;  %vm8827_vm6 = vmor %vm4455_vm11, %vm4456_vm3  ;;  %v10333_v24 = vld [vmem:[#allocation136_spill] sm:$0xff]  ;;  %v10335_v22 = vld [vmem:[#allocation66_spill] sm:$0xff] }
 0x47a   : > { %vm8814_vm8 = vcmp.eq.f32.partialorder %v10308_v8, 8.507059e+37  ;;  %v4398_v21 = vsel %vm8803_vm5, %v8698_v11, %v4394_v52  ;;  %v4459_v19 = vand.u32 2147483647, %v8672_v0  ;;  %v10314_v50 = vand.u32 2147483647, %v10295_v33  ;;  %v10341_v42 = vld [vmem:[#allocation113_spill] sm:$0xff] }
 0x47b   : > { %v4481_v41 = vmul.f32 %v8810_v37, %v8722_v10  ;;  %v4419_v62 = vmul.f32 %v4418_v53, %v10317_v30  ;;  %vm4400_vm13 = vcmp.eq.f32.partialorder %v4399_v13, 8.507059e+37  ;;  %v4458_v11 = vsel %vm8827_vm6, %v8724_v27, %v4454_v18  ;;  %vm8862_vm6 = vmor %vm3340_vm15, %vm3341_vm2  ;;  %v10342_v54 = vld [vmem:[#allocation54_spill] sm:$0xff]  ;;  %v10343_v13 = vld [vmem:[#allocation115_spill] sm:$0xff] }
 0x47c   : > { %vm8834_vm0 = vcmp.eq.f32.partialorder %v10314_v50, 8.507059e+37  ;;  %v4403_v0 = vsel %vm4400_vm13, %v8714_v57, %v4398_v21  ;;  %vm4460_vm3 = vcmp.eq.f32.partialorder %v4459_v19, 8.507059e+37  ;;  %v4439_v51 = vadd.f32 %v8753_v26, %v4438_v34  ;;  %v10350_v34 = vld [vmem:[#allocation109_spill] sm:$0xff]  ;;  %v10351_v53 = vld [vmem:[#allocation124_spill] sm:$0xff]  ;;  %v10377_v52 = vld [vmem:[#allocation102_spill] sm:$0xff] }
 0x47d   : > { %vm4441_vm5 = vweird.f32 %v8753_v26  ;;  %5640 = vrcp.f32 %v10321_v40  ;;  %v4482_v27 = vsub.f32 1.0, %v4481_v41  ;;  %v4463_v4 = vsel %vm4460_vm3, %v4462_v29, %v4458_v11  ;;  %4579 = vrot.lane.b32.xlu0 %v4419_v62, %s5875_s29  ;;  %v10362_v30 = vld [vmem:[#allocation125_spill] sm:$0xff]  ;;  %v10380_v18 = vld [vmem:[#allocation131_spill] sm:$0xff] }
 0x47e   : > { %v4444_v31 = vand.u32 2147483647, %v8653_v36  ;;  %v10324_v23 = vand.u32 2147483647, %v10318_v5  ;;  %v10329_v39 = vsub.f32 1.0, %v10328_v44  ;;  %v3851_v49 = vmul.f32 %v8881_v17, %v5670_v55  ;;  %v10369_v44 = vld [vmem:[#allocation120_spill] sm:$0xff] }
 0x47f   : > { %vm4440_vm15 = vweird.f32 %v8653_v36  ;;  %v4404_v47 = vmul.f32 %v4403_v0, %v10331_v46  ;;  %v8888_v61 = vmul.f32 %v10333_v24, %v10332_v43  ;;  %5642 = vrcp.f32 %v10334_v25  ;;  %v10371_v46 = vld [vmem:[#allocation96_spill] sm:$0xff] }
 0x480   : > { %vm8868_vm10 = vcmp.eq.f32.partialorder %v10324_v23, 8.507059e+37  ;;  %v8876_v29 = vmul.f32 %v10330_v38, %v10329_v39  ;;  %v4447_v58 = vor.u32 1.1754944e-38, %v4446_v3  ;;  %v4464_v32 = vmul.f32 %v4463_v4, %v10335_v22  ;;  %vm8894_vm2 = vmor %vm4440_vm15, %vm4441_vm5  ;;  %v10365_v4 = vld [vmem:[#allocation98_spill] sm:$0xff]  ;;  %v10376_v22 = vld [vmem:[#allocation71_spill] sm:$0xff] }
 0x481   : > { %vm10338_vm13 = vweird.f32 %v10297_v48  ;;  %v4483_v3 = vmul.f32 %v8810_v37, %v4482_v27  ;;  %v4443_v15 = vsel %vm8894_vm2, %v8753_v26, %v4439_v51  ;;  %v3283_v48 = vsel %vm8852_vm1, %v7912_v16, %v10343_v13  ;;  %4577 = vrot.lane.b32.xlu2 %v4404_v47, %s5875_s29  ;;  %v10363_v51 = vld [vmem:[#allocation75_spill] sm:$0xff]  ;;  %v10407_v47 = vld [vmem:[#allocation68_spill] sm:$0xff] }
 0x482   : > { %vm8902_vm3 = vmor %vm10338_vm13, %vm3326_vm12  ;;  %vm10344_vm12 = vweird.f32 %v8003_v59  ;;  %vm10345_vm5 = vweird.f32 %v10294_v6  ;;  %vm8925_vm13 = vcmp.eq.f32.partialorder %v4444_v31, 8.507059e+37  ;;  %vm4486_vm9 = vweird.f32 %v8810_v37  ;;  %v10364_v27 = vld [vmem:[#allocation55_spill] sm:$0xff] }
 0x483   : > { %vm8921_vm15 = vmor %vm10345_vm5, %vm10344_vm12  ;;  %v5876_v26 = vmov 0.0   ;;  %v3288_v16 = vsel %vm8759_vm4, %v10350_v34, %v3283_v48  ;;  %v3328_v6 = vsel %vm8902_vm3, %v7987_v60, %v10351_v53  ;;  %vm10352_vm1 = vweird.f32 %v10296_v14  ;;  %v10360_v60 = vld [vmem:[#allocation73_spill] sm:$0xff]  ;;  %v8965_v11 = vpop.eup %5640  ;;  %v4528_v48 = vpop.permute.xlu1 %4527 }
 0x484   : > { %3017 = vst [vmem:[%s6138_s30] sm:$0xff] %v5876_v26  ;;  %vm10353_vm2 = vweird.f32 %v10295_v33  ;;  %vm3385_vm5 = vweird.f32 %v10356_v28  ;;  %v10357_v19 = vand.u32 2147483647, %v10342_v54  ;;  %vm3755_vm4 = vcmask 261120   ;;  %v10361_v33 = vld [vmem:[#allocation116_spill] sm:$0xff]  ;;  %v10381_v34 = vld [vmem:[#allocation97_spill] sm:$0xff] }
 0x485   : > { %vm8943_vm12 = vmor %vm10353_vm2, %vm10352_vm1  ;;  %v3289_v50 = vmul.f32 %v3288_v16, %v10360_v60  ;;  %3018 = vst [vmem:[%s6138_s30 + $0x8] sm:$0xff] %v5876_v26  ;;  %v3333_v41 = vsel %vm8797_vm7, %v10361_v33, %v3328_v6  ;;  %v3298_v62 = vsel %vm8921_vm15, %v8003_v59, %v10362_v30  ;;  %v4448_v0 = vsel %vm8925_vm13, %v4447_v58, %v4443_v15  ;;  %v8997_v57 = vpop.eup %5642  ;;  %v10382_v16 = vld [vmem:[#allocation60_spill] sm:$0xff]  ;;  %v10385_v6 = vld [vmem:[#allocation127_spill] sm:$0xff] }
 0x486   : > { %vm8950_vm11 = vcmp.eq.f32.partialorder %v10357_v19, 8.507059e+37  ;;  %3019 = vst [vmem:[%s6138_s30 + $0x10] sm:$0xff] %v5876_v26  ;;  %v8972_v12 = vmul.f32 %v3333_v41, %v10363_v51  ;;  %v3303_v2 = vsel %vm8814_vm8, %v10364_v27, %v3298_v62  ;;  %v3343_v59 = vsel %vm8862_vm6, %v10288_v56, %v10365_v4  ;;  %v10387_v19 = vld [vmem:[#allocation45_spill] sm:$0xff]  ;;  %4585 = vrot.lane.b32.xlu0 %v4464_v32, %s5875_s29  ;;  %v10391_v41 = vld [vmem:[#allocation80_spill] sm:$0xff]  ;;  %v10400_v4 = vld [vmem:[#allocation134_spill] sm:$0xff] }
 0x487   : > { %v10366_v31 = vand.u32 2147483647, %v10356_v28  ;;  %vm3431_vm3 = vweird.f32 %v10369_v44  ;;  %v4484_v39 = vadd.f32 %v8810_v37, %v4483_v3  ;;  %vm10053_vm15 = vcmask 523520   ;;  %3756 = vst.msk [vmem:[%s6138_s30] sm:$0xff] %vm3755_vm4, %v3289_v50  ;;  %v10379_v3 = vld [vmem:[#allocation53_spill] sm:$0xff] }
 0x488   : > { %v8992_v55 = vmul.f32 %v3303_v2, %v10370_v63  ;;  %v3348_v56 = vsel %vm8791_vm14, %v10371_v46, %v3343_v59  ;;  %vm10372_vm8 = vweird.f32 %v10311_v20  ;;  %vm10373_vm6 = vweird.f32 %v10318_v5  ;;  %3020 = vst [vmem:[%s6138_s30 + $0x18] sm:$0xff] %v5876_v26  ;;  %v10378_v5 = vld [vmem:[#allocation95_spill] sm:$0xff]  ;;  %v5672_v2 = vld [vmem:[#allocation2 + $0xa0] sm:$0xff]  ;;  %v10405_v46 = vld [vmem:[#allocation130_spill] sm:$0xff] }
 0x489   : > { %vm8983_vm7 = vcmp.eq.f32.partialorder %v10366_v31, 8.507059e+37  ;;  %vm9003_vm13 = vmor %vm10373_vm6, %vm10372_vm8  ;;  %vm4485_vm1 = vweird.f32 %v8722_v10  ;;  %v4491_v58 = vand.u32 2147483648, %v8722_v10  ;;  %v9012_v1 = vmul.f32 %v3348_v56, %v10376_v22  ;;  %3021 = vst [vmem:[%s6138_s30 + $0x20] sm:$0xff] %v5876_v26  ;;  %v10406_v56 = vld [vmem:[#allocation59_spill] sm:$0xff] }
 0x48a   : > { %v3358_v36 = vsel %vm8943_vm12, %v10296_v14, %v10377_v52  ;;  %vm3311_vm14 = vweird.f32 %v10378_v5  ;;  %vm3430_vm2 = vweird.f32 %v10379_v3  ;;  %v4449_v15 = vmul.f32 %v4448_v0, %v3851_v49  ;;  %vm9036_vm8 = vmor %vm4485_vm1, %vm4486_vm9  ;;  %4624 = vst.msk [vmem:[%s6138_s30] sm:$0xff] %vm10053_vm15, %v4528_v48  ;;  %v10409_v52 = vld [vmem:[#allocation129_spill] sm:$0xff] }
 0x48b   : > { %v4489_v13 = vand.u32 2147483647, %v8722_v10  ;;  %v3373_v8 = vsel %vm9003_vm13, %v10311_v20, %v10380_v18  ;;  %v3363_v14 = vsel %vm8834_vm0, %v10381_v34, %v3358_v36  ;;  %vm3460_vm12 = vweird.f32 %v10382_v16  ;;  %3022 = vst [vmem:[%s6138_s30 + $0x28] sm:$0xff] %v5876_v26  ;;  %v10436_v18 = vld [vmem:[#allocation72_spill] sm:$0xff] }
 0x48c   : > { %v3464_v53 = vand.u32 2147483647, %v10382_v16  ;;  %v3378_v20 = vsel %vm8868_vm10, %v10385_v6, %v3373_v8  ;;  %v9046_v21 = vmul.f32 %v3363_v14, %v10386_v35  ;;  %vm3310_vm0 = vweird.f32 %v10387_v19  ;;  %3023 = vst [vmem:[%s6138_s30 + $0x30] sm:$0xff] %v5876_v26  ;;  %4583 = vrot.lane.b32.xlu2 %v4449_v15, %s5875_s29  ;;  %v10410_v15 = vld [vmem:[#allocation43_spill] sm:$0xff] }
 0x48d   : > { %v10388_v60 = vand.u32 2147483647, %v10379_v3  ;;  %v3466_v50 = vand.u32 2147483648, %v10382_v16  ;;  %v3502_v33 = vsub.f32 1.0, %v8888_v61  ;;  %v4488_v7 = vsel %vm9036_vm8, %v8810_v37, %v4484_v39  ;;  %v10396_v61 = vld [vmem:[#allocation135_spill] sm:$0xff]  ;;  %3024 = vst [vmem:[%s6138_s30 + $0x38] sm:$0xff] %v5876_v26 }
 0x48e   : > { %v9064_v30 = vmul.f32 %v3378_v20, %v10391_v41  ;;  %vm10392_vm10 = vweird.f32 %v10327_v45  ;;  %vm10393_vm9 = vweird.f32 %v10342_v54  ;;  %v3472_v32 = vsub.f32 1.0, %v10396_v61  ;;  %v10404_v39 = vld [vmem:[#allocation93_spill] sm:$0xff]  ;;  %3025 = vst [vmem:[%s6138_s30 + $0x40] sm:$0xff] %v5876_v26  ;;  %v10423_v61 = vld [vmem:[#allocation132_spill] sm:$0xff] }
 0x48f   : > { %vm9051_vm6 = vcmp.eq.f32.partialorder %v10388_v60, 8.507059e+37  ;;  %vm9070_vm13 = vmor %vm10393_vm9, %vm10392_vm10  ;;  %v3459_v0 = vadd.f32 %v10330_v38, %v8876_v29  ;;  %vm3461_vm1 = vweird.f32 %v10330_v38  ;;  %v4492_v37 = vor.u32 1.1754944e-38, %v4491_v58  ;;  %3026 = vst [vmem:[%s6138_s30 + $0x48] sm:$0xff] %v5876_v26  ;;  %v10408_v58 = vld [vmem:[#allocation83_spill] sm:$0xff]  ;;  %v10422_v3 = vld [vmem:[#allocation85_spill] sm:$0xff] }
 0x490   : > { %v10397_v51 = vand.u32 2147483647, %v10387_v19  ;;  %v9088_v54 = vmul.f32 %v8965_v11, %v10321_v40  ;;  %v3854_v29 = vmul.f32 %v5672_v2, %v8881_v17  ;;  %vm4490_vm10 = vcmp.eq.f32.partialorder %v4489_v13, 8.507059e+37  ;;  %v10412_v13 = vld [vmem:[#allocation56_spill] sm:$0xff]  ;;  %3027 = vst [vmem:[%s6138_s30 + $0x50] sm:$0xff] %v5876_v26 }
 0x491   : > { %v3418_v59 = vsel %vm9070_vm13, %v10327_v45, %v10400_v4  ;;  %vm10401_vm9 = vweird.f32 %v10341_v42  ;;  %v3546_v17 = vmul.f32 %v8997_v57, %v10334_v25  ;;  %5644 = vrcp.f32 %v10404_v39  ;;  %3028 = vst [vmem:[%s6138_s30 + $0x58] sm:$0xff] %v5876_v26  ;;  %v10430_v4 = vld [vmem:[#allocation128_spill] sm:$0xff] }
 0x492   : > { %vm9082_vm8 = vcmp.eq.f32.partialorder %v10397_v51, 8.507059e+37  ;;  %vm9102_vm15 = vmor %vm3385_vm5, %vm10401_vm9  ;;  %v4493_v63 = vsel %vm4490_vm10, %v4492_v37, %v4488_v7  ;;  %v3423_v45 = vsel %vm8950_vm11, %v10405_v46, %v3418_v59  ;;  %vm3475_vm13 = vweird.f32 %v10406_v56  ;;  %3029 = vst [vmem:[%s6138_s30 + $0x60] sm:$0xff] %v5876_v26 }
 0x493   : > { %v3503_v28 = vmul.f32 %v10333_v24, %v3502_v33  ;;  %5646 = vrcp.f32 %v10407_v47  ;;  %v9120_v22 = vmul.f32 %v3423_v45, %v10408_v58  ;;  %v3388_v36 = vsel %vm9102_vm15, %v10341_v42, %v10409_v52  ;;  %vm9133_vm10 = vmor %vm3460_vm12, %vm3461_vm1  ;;  %v10415_v42 = vld [vmem:[#allocation122_spill] sm:$0xff]  ;;  %3030 = vst [vmem:[%s6138_s30 + $0x68] sm:$0xff] %v5876_v26  ;;  %v10435_v52 = vld [vmem:[#allocation105_spill] sm:$0xff] }
 0x494   : > { %vm3400_vm5 = vweird.f32 %v10410_v15  ;;  %vm3401_vm11 = vweird.f32 %v10411_v9  ;;  %v3473_v48 = vmul.f32 %v10412_v13, %v3472_v32  ;;  %vm3465_vm9 = vcmp.eq.f32.partialorder %v3464_v53, 8.507059e+37  ;;  %v10419_v53 = vld [vmem:[#allocation78_spill] sm:$0xff]  ;;  %3031 = vst [vmem:[%s6138_s30 + $0x70] sm:$0xff] %v5876_v26 }
 0x495   : > { %v3467_v8 = vor.u32 1.1754944e-38, %v3466_v50  ;;  %v3393_v34 = vsel %vm8983_vm7, %v10415_v42, %v3388_v36  ;;  %v10416_v14 = vand.u32 2147483647, %v10406_v56  ;;  %v3509_v16 = vand.u32 2147483647, %v10332_v43  ;;  %vm9161_vm7 = vmor %vm3430_vm2, %vm3431_vm3  ;;  %3032 = vst [vmem:[%s6138_s30 + $0x78] sm:$0xff] %v5876_v26 }
 0x496   : > { %v4494_v6 = vmul.f32 %v4493_v63, %v3854_v29  ;;  %v9152_v20 = vmul.f32 %v3393_v34, %v10419_v53  ;;  %v3463_v23 = vsel %vm9133_vm10, %v10330_v38, %v3459_v0  ;;  %v3517_v60 = vsub.f32 1.0, %v9088_v54  ;;  %v9173_v38 = vpop.permute.xlu1 %4533  ;;  %vm9194_vm2 = vmor %vm3310_vm0, %vm3311_vm14  ;;  %v10431_v63 = vld [vmem:[#allocation82_spill] sm:$0xff]  ;;  %3033 = vst [vmem:[%s6138_s30 + $0x80] sm:$0xff] %v5876_v26  ;;  %v10440_v53 = vld [vmem:[#allocation100_spill] sm:$0xff] }
 0x497   : > { %vm9144_vm15 = vcmp.eq.f32.partialorder %v10416_v14, 8.507059e+37  ;;  %v3511_v50 = vand.u32 2147483648, %v10332_v43  ;;  %v3547_v33 = vsub.f32 1.0, %v3546_v17  ;;  %v3468_v7 = vsel %vm3465_vm9, %v3467_v8, %v3463_v23  ;;  %v9182_v0 = vpop.eup %5644  ;;  %v9214_v17 = vpop.permute.xlu2 %4529  ;;  %v10432_v45 = vld [vmem:[#allocation114_spill] sm:$0xff]  ;;  %3034 = vst [vmem:[%s6138_s30 + $0x88] sm:$0xff] %v5876_v26  ;;  %v10441_v23 = vld [vmem:[#allocation87_spill] sm:$0xff]  ;;  %vm9282_vm9 = vmor %vm3400_vm5, %vm3401_vm11 }
 0x498   : > { %v3504_v41 = vadd.f32 %v10333_v24, %v3503_v28  ;;  %vm3506_vm12 = vweird.f32 %v10333_v24  ;;  %v9176_v62 = vmul.f32 %v3468_v7, %v10422_v3  ;;  %v3433_v32 = vsel %vm9161_vm7, %v10369_v44, %v10423_v61  ;;  %4589 = vrot.lane.b32.xlu2 %v4494_v6, %s5875_s29  ;;  %3035 = vst [vmem:[%s6138_s30 + $0x90] sm:$0xff] %v5876_v26  ;;  %v10457_v28 = vld [vmem:[#allocation101_spill] sm:$0xff] }
 0x499   : > { %v10424_v37 = vand.u32 2147483647, %v10410_v15  ;;  %vm3476_vm1 = vweird.f32 %v10412_v13  ;;  %v10429_v44 = vand.u32 2147483648, %v10406_v56  ;;  %v3524_v29 = vand.u32 2147483647, %v10321_v40  ;;  %v9207_v31 = vpop.eup %5646  ;;  %3036 = vst [vmem:[%s6138_s30 + $0x98] sm:$0xff] %v5876_v26 }
 0x49a   : > { %v3438_v59 = vsel %vm9051_vm6, %v10430_v4, %v3433_v32  ;;  %v3474_v19 = vadd.f32 %v10412_v13, %v3473_v48  ;;  %vm3505_vm14 = vweird.f32 %v10332_v43  ;;  %v3313_v10 = vsel %vm9194_vm2, %v10378_v5, %v10432_v45  ;;  %3037 = vst [vmem:[%s6138_s30 + $0xa0] sm:$0xff] %v5876_v26  ;;  %v10446_v32 = vld [vmem:[#allocation84_spill] sm:$0xff]  ;;  %v10454_v45 = vld [vmem:[#allocation103_spill] sm:$0xff] }
 0x49b   : > { %vm9186_vm3 = vcmp.eq.f32.partialorder %v10424_v37, 8.507059e+37  ;;  %v3482_v2 = vor.u32 1.1754944e-38, %v10429_v44  ;;  %v9217_v46 = vmul.f32 %v3438_v59, %v10431_v63  ;;  %vm9225_vm0 = vmor %vm3505_vm14, %vm3506_vm12  ;;  %vm3510_vm6 = vcmp.eq.f32.partialorder %v3509_v16, 8.507059e+37  ;;  %3038 = vst [vmem:[%s6138_s30 + $0xa8] sm:$0xff] %v5876_v26  ;;  %v10447_v15 = vld [vmem:[#allocation52_spill] sm:$0xff]  ;;  %v10448_v44 = vld [vmem:[#allocation106_spill] sm:$0xff] }
 0x49c   : > { %v3512_v43 = vor.u32 1.1754944e-38, %v3511_v50  ;;  %v3548_v58 = vmul.f32 %v8997_v57, %v3547_v33  ;;  %v3318_v36 = vsel %vm9082_vm8, %v10435_v52, %v3313_v10  ;;  %v3518_v5 = vmul.f32 %v8965_v11, %v3517_v60  ;;  %vm9250_vm8 = vmor %vm3475_vm13, %vm3476_vm1  ;;  %v10442_v33 = vld [vmem:[#allocation92_spill] sm:$0xff]  ;;  %3039 = vst [vmem:[%s6138_s30 + $0xb0] sm:$0xff] %v5876_v26 }
 0x49d   : > { %v3591_v48 = vmul.f32 %v9182_v0, %v10404_v39  ;;  %v9241_v8 = vmul.f32 %v3318_v36, %v10436_v18  ;;  %v3508_v42 = vsel %vm9225_vm0, %v10333_v24, %v3504_v41  ;;  %v3526_v34 = vand.u32 2147483648, %v10321_v40  ;;  %v10439_v24 = vld [vmem:[#allocation94_spill] sm:$0xff]  ;;  %3040 = vst [vmem:[%s6138_s30 + $0xb8] sm:$0xff] %v5876_v26 }
 0x49e   : > { %v3561_v14 = vmul.f32 %v9207_v31, %v10407_v47  ;;  %v3554_v16 = vand.u32 2147483647, %v10334_v25  ;;  %v3513_v6 = vsel %vm3510_vm6, %v3512_v43, %v3508_v42  ;;  %vm3446_vm10 = vweird.f32 %v10439_v24  ;;  %v9291_v49 = vpop.permute.xlu1 %4539  ;;  %3041 = vst [vmem:[%s6138_s30 + $0xc0] sm:$0xff] %v5876_v26  ;;  %v10465_v41 = vld [vmem:[#allocation86_spill] sm:$0xff] }
 0x49f   : > { %v3556_v56 = vand.u32 2147483648, %v10334_v25  ;;  %5648 = vrcp.f32 %v10440_v53  ;;  %v9266_v35 = vmul.f32 %v3513_v6, %v10441_v23  ;;  %v3478_v60 = vsel %vm9250_vm8, %v10412_v13, %v3474_v19  ;;  %v10445_v13 = vld [vmem:[#allocation44_spill] sm:$0xff]  ;;  %v10452_v19 = vld [vmem:[#allocation110_spill] sm:$0xff]  ;;  %v9335_v36 = vpop.permute.xlu2 %4535  ;;  %3042 = vst [vmem:[%s6138_s30 + $0xc8] sm:$0xff] %v5876_v26  ;;  %v10463_v23 = vld [vmem:[#allocation49_spill] sm:$0xff] }
 0x4a0   : > { %v3549_v50 = vadd.f32 %v8997_v57, %v3548_v58  ;;  %vm3551_vm13 = vweird.f32 %v8997_v57  ;;  %5650 = vrcp.f32 %v10442_v33  ;;  %v3483_v7 = vsel %vm9144_vm15, %v3482_v2, %v3478_v60  ;;  %3043 = vst [vmem:[%s6138_s30 + $0xd0] sm:$0xff] %v5876_v26 }
 0x4a1   : > { %vm3445_vm7 = vweird.f32 %v10445_v13  ;;  %v3519_v3 = vadd.f32 %v8965_v11, %v3518_v5  ;;  %vm3521_vm12 = vweird.f32 %v8965_v11  ;;  %v3592_v61 = vsub.f32 1.0, %v3591_v48  ;;  %v10460_v48 = vld [vmem:[#allocation77_spill] sm:$0xff]  ;;  %3044 = vst [vmem:[%s6138_s30 + $0xd8] sm:$0xff] %v5876_v26 }
 0x4a2   : > { %v9294_v37 = vmul.f32 %v3483_v7, %v10446_v32  ;;  %5652 = vrcp.f32 %v10447_v15  ;;  %v3562_v54 = vsub.f32 1.0, %v3561_v14  ;;  %vm3550_vm5 = vweird.f32 %v10334_v25  ;;  %3045 = vst [vmem:[%s6138_s30 + $0xe0] sm:$0xff] %v5876_v26  ;;  %v10468_v25 = vld [vmem:[#allocation99_spill] sm:$0xff] }
 0x4a3   : > { %v3403_v2 = vsel %vm9282_vm9, %v10411_v9, %v10448_v44  ;;  %v10449_v4 = vand.u32 2147483647, %v10445_v13  ;;  %v10453_v63 = vsub.f32 1.0, %v10452_v19  ;;  %vm3520_vm15 = vweird.f32 %v10321_v40  ;;  %vm9318_vm2 = vmor %vm3550_vm5, %vm3551_vm13  ;;  %v10462_v40 = vld [vmem:[#allocation89_spill] sm:$0xff]  ;;  %3046 = vst [vmem:[%s6138_s30 + $0xe8] sm:$0xff] %v5876_v26 }
 0x4a4   : > { %v3557_v9 = vor.u32 1.1754944e-38, %v3556_v56  ;;  %v3408_v43 = vsel %vm9186_vm3, %v10457_v28, %v3403_v2  ;;  %vm9329_vm1 = vmor %vm3520_vm15, %vm3521_vm12  ;;  %v3527_v52 = vor.u32 1.1754944e-38, %v3526_v34  ;;  %vm3555_vm14 = vcmp.eq.f32.partialorder %v3554_v16, 8.507059e+37  ;;  %v10466_v2 = vld [vmem:[#allocation108_spill] sm:$0xff]  ;;  %3047 = vst [vmem:[%s6138_s30 + $0xf0] sm:$0xff] %v5876_v26 }
 0x4a5   : > { %vm9306_vm11 = vcmp.eq.f32.partialorder %v10449_v4, 8.507059e+37  ;;  %v9313_v10 = vmul.f32 %v10454_v45, %v10453_v63  ;;  %v3553_v5 = vsel %vm9318_vm2, %v8997_v57, %v3549_v50  ;;  %v9341_v51 = vmul.f32 %v3408_v43, %v10460_v48  ;;  %v9343_v18 = vpop.eup %5648  ;;  %v10461_v57 = vld [vmem:[#allocation126_spill] sm:$0xff]  ;;  %vm9397_vm13 = vmor %vm3445_vm7, %vm3446_vm10  ;;  %v10471_v43 = vld [vmem:[#allocation121_spill] sm:$0xff]  ;;  %3048 = vst [vmem:[%s6138_s30 + $0xf8] sm:$0xff] %v5876_v26 }
 0x4a6   : > { %vm3525_vm3 = vcmp.eq.f32.partialorder %v3524_v29, 8.507059e+37  ;;  %v3593_v42 = vmul.f32 %v9182_v0, %v3592_v61  ;;  %v3558_v27 = vsel %vm3555_vm14, %v3557_v9, %v3553_v5  ;;  %v3523_v34 = vsel %vm9329_vm1, %v8965_v11, %v3519_v3  ;;  %v9353_v14 = vpop.eup %5650  ;;  %v10467_v4 = vld [vmem:[#allocation46_spill] sm:$0xff]  ;;  %v9391_v9 = vpop.permute.xlu1 %4545  ;;  %3759 = vst.msk [vmem:[%s6138_s30 + $0x18] sm:$0xff] %vm3755_vm4, %v8972_v12 }
 0x4a7   : > { %v3532_v16 = vsub.f32 1.0, %v10461_v57  ;;  %v3563_v6 = vmul.f32 %v9207_v31, %v3562_v54  ;;  %v9360_v29 = vmul.f32 %v3558_v27, %v10462_v40  ;;  %v3528_v56 = vsel %vm3525_vm3, %v3527_v52, %v3523_v34  ;;  %v10475_v27 = vld [vmem:[#allocation111_spill] sm:$0xff]  ;;  %3757 = vst.msk [vmem:[%s6138_s30 + $0x8] sm:$0xff] %vm3755_vm4, %v8992_v55 }
 0x4a8   : > { %vm3491_vm0 = vweird.f32 %v10454_v45  ;;  %v10464_v60 = vand.u32 2147483648, %v10463_v23  ;;  %v3586_v11 = vand.u32 2147483648, %v10447_v15  ;;  %v3571_v7 = vand.u32 2147483648, %v10407_v47  ;;  %v9374_v61 = vpop.eup %5652  ;;  %3762 = vst.msk [vmem:[%s6138_s30 + $0x30] sm:$0xff] %vm3755_vm4, %v9064_v30 }
 0x4a9   : > { %v9372_v3 = vmul.f32 %v3528_v56, %v10465_v41  ;;  %v3599_v32 = vand.u32 2147483647, %v10404_v39  ;;  %v3601_v54 = vand.u32 2147483648, %v10404_v39  ;;  %v3636_v44 = vmul.f32 %v9343_v18, %v10440_v53  ;;  %v10482_v56 = vld [vmem:[#allocation81_spill] sm:$0xff]  ;;  %v4542_v41 = vpop.permute.xlu2 %4541  ;;  %3760 = vst.msk [vmem:[%s6138_s30 + $0x20] sm:$0xff] %vm3755_vm4, %v9012_v1 }
 0x4aa   : > { %v9365_v50 = vor.u32 1.1754944e-38, %v10464_v60  ;;  %5654 = vrcp.f32 %v10466_v2  ;;  %vm3490_vm6 = vweird.f32 %v10467_v4  ;;  %v3606_v19 = vmul.f32 %v9353_v14, %v10442_v33  ;;  %3765 = vst.msk [vmem:[%s6138_s30 + $0x48] sm:$0xff] %vm3755_vm4, %v9120_v22 }
 0x4ab   : > { %v3594_v63 = vadd.f32 %v9182_v0, %v3593_v42  ;;  %vm3596_vm8 = vweird.f32 %v9182_v0  ;;  %5656 = vrcp.f32 %v10468_v25  ;;  %v3533_v58 = vmul.f32 %v10471_v43, %v3532_v16  ;;  %3763 = vst.msk [vmem:[%s6138_s30 + $0x38] sm:$0xff] %vm3755_vm4, %v9152_v20 }
 0x4ac   : > { %v3564_v52 = vadd.f32 %v9207_v31, %v3563_v6  ;;  %vm3566_vm9 = vweird.f32 %v9207_v31  ;;  %v3569_v5 = vand.u32 2147483647, %v10407_v47  ;;  %v10472_v48 = vand.u32 2147483647, %v10467_v4  ;;  %3768 = vst.msk [vmem:[%s6138_s30 + $0x60] sm:$0xff] %vm3755_vm4, %v9176_v62 }
 0x4ad   : > { %v9415_v42 = vmul.f32 %v9374_v61, %v10447_v15  ;;  %vm3565_vm10 = vweird.f32 %v10407_v47  ;;  %vm3595_vm7 = vweird.f32 %v10404_v39  ;;  %v3448_v34 = vsel %vm9397_vm13, %v10439_v24, %v10475_v27  ;;  %v10478_v39 = vld [vmem:[#allocation104_spill] sm:$0xff]  ;;  %v10487_v27 = vld [vmem:[#allocation119_spill] sm:$0xff]  ;;  %3766 = vst.msk [vmem:[%s6138_s30 + $0x50] sm:$0xff] %vm3755_vm4, %v9217_v46 }
 0x4ae   : > { %vm9409_vm12 = vcmp.eq.f32.partialorder %v10472_v48, 8.507059e+37  ;;  %v3572_v57 = vor.u32 1.1754944e-38, %v3571_v7  ;;  %vm9427_vm5 = vmor %vm3595_vm7, %vm3596_vm8  ;;  %v3602_v6 = vor.u32 1.1754944e-38, %v3601_v54  ;;  %v3637_v40 = vsub.f32 1.0, %v3636_v44  ;;  %v10483_v7 = vld [vmem:[#allocation58_spill] sm:$0xff]  ;;  %v10485_v44 = vld [vmem:[#allocation91_spill] sm:$0xff]  ;;  %v4552_v30 = vpop.permute.xlu1 %4551 }
 0x4af   : > { %v3453_v26 = vsel %vm9306_vm11, %v10478_v39, %v3448_v34  ;;  %vm9439_vm15 = vmor %vm3565_vm10, %vm3566_vm9  ;;  %v3607_v24 = vsub.f32 1.0, %v3606_v19  ;;  %vm3600_vm2 = vcmp.eq.f32.partialorder %v3599_v32, 8.507059e+37  ;;  %vm10481_vm1 = vcmask 523520   ;;  %v10513_v46 = vld [vmem:[#allocation32_spill] sm:$0xff]  ;;  %3758 = vst.msk [vmem:[%s6138_s30 + $0x10] sm:$0xff] %vm3755_vm4, %v9241_v8 }
 0x4b0   : > { %4627 = vst.msk [vmem:[%s6138_s30 + $0x18] sm:$0xff] %vm10481_vm1, %v9173_v38  ;;  %v3598_v12 = vsel %vm9427_vm5, %v9182_v0, %v3594_v63  ;;  %v9450_v60 = vmul.f32 %v3453_v26, %v10482_v56  ;;  %v9452_v59 = vpop.eup %5654  ;;  %5658 = vrcp.f32 %v10483_v7  ;;  %vm3570_vm11 = vcmp.eq.f32.partialorder %v3569_v5, 8.507059e+37  ;;  %vm10484_vm3 = vmmov %vm10481_vm1 }
 0x4b1   : > { %v3603_v32 = vsel %vm3600_vm2, %v3602_v6, %v3598_v12  ;;  %v3568_v38 = vsel %vm9439_vm15, %v9207_v31, %v3564_v52  ;;  %v9461_v54 = vpop.eup %5656  ;;  %v3489_v0 = vadd.f32 %v10454_v45, %v9313_v10  ;;  %vm3536_vm14 = vweird.f32 %v10471_v43  ;;  %4625 = vst.msk [vmem:[%s6138_s30 + $0x8] sm:$0xff] %vm10484_vm3, %v9214_v17  ;;  %v9479_v10 = vpop.permute.xlu0 %4531  ;;  %v10486_v52 = vld [vmem:[#allocation88_spill] sm:$0xff]  ;;  %vm10488_vm13 = vmmov %vm10481_vm1  ;;  %v10491_v6 = vld [vmem:[#allocation107_spill] sm:$0xff] }
 0x4b2   : > { %v9470_v19 = vmul.f32 %v3603_v32, %v10485_v44  ;;  %v3573_v55 = vsel %vm3570_vm11, %v3572_v57, %v3568_v38  ;;  %v3584_v63 = vand.u32 2147483647, %v10447_v15  ;;  %v9473_v28 = vor.u32 1.1754944e-38, %v3586_v11  ;;  %4630 = vst.msk [vmem:[%s6138_s30 + $0x30] sm:$0xff] %vm10488_vm13, %v9291_v49  ;;  %vm9499_vm9 = vmor %vm3490_vm6, %vm3491_vm0  ;;  %v10499_v32 = vld [vmem:[#allocation28_spill] sm:$0xff] }
 0x4b3   : > { %v3638_v31 = vmul.f32 %v9343_v18, %v3637_v40  ;;  %v9482_v5 = vmul.f32 %v3573_v55, %v10486_v52  ;;  %v9485_v17 = vadd.f32 %v10471_v43, %v3533_v58  ;;  %vm3535_vm8 = vweird.f32 %v10463_v23  ;;  %vm10495_vm10 = vmmov %vm10481_vm1  ;;  %v10500_v55 = vld [vmem:[#allocation63_spill] sm:$0xff]  ;;  %3771 = vst.msk [vmem:[%s6138_s30 + $0x78] sm:$0xff] %vm3755_vm4, %v9266_v35 }
 0x4b4   : > { %v3608_v11 = vmul.f32 %v9353_v14, %v3607_v24  ;;  %v3681_v48 = vmul.f32 %v9452_v59, %v10466_v2  ;;  %5660 = vrcp.f32 %v10487_v27  ;;  %v3577_v34 = vsub.f32 1.0, %v9415_v42  ;;  %4628 = vst.msk [vmem:[%s6138_s30 + $0x20] sm:$0xff] %vm10495_vm10, %v9335_v36  ;;  %v10496_v24 = vld [vmem:[#allocation112_spill] sm:$0xff]  ;;  %vm10498_vm5 = vmmov %vm10481_vm1 }
 0x4b5   : > { %v3614_v57 = vand.u32 2147483647, %v10442_v33  ;;  %v3651_v16 = vmul.f32 %v9461_v54, %v10468_v25  ;;  %5662 = vrcp.f32 %v10491_v6  ;;  %v10492_v49 = vand.u32 2147483647, %v10463_v23  ;;  %4633 = vst.msk [vmem:[%s6138_s30 + $0x48] sm:$0xff] %vm10498_vm5, %v9391_v9  ;;  %vm10503_vm11 = vmmov %vm10484_vm3 }
 0x4b6   : > { %vm3611_vm6 = vweird.f32 %v9353_v14  ;;  %v3616_v42 = vand.u32 2147483648, %v10442_v33  ;;  %v3646_v40 = vand.u32 2147483648, %v10440_v53  ;;  %v3493_v1 = vsel %vm9499_vm9, %v10454_v45, %v3489_v0  ;;  %v9526_v39 = vpop.eup %5658  ;;  %v10497_v45 = vld [vmem:[#allocation118_spill] sm:$0xff]  ;;  %4631 = vst.msk [vmem:[%s6138_s30 + $0x38] sm:$0xff] %vm10503_vm11, %v4542_v41 }
 0x4b7   : > { %vm9513_vm0 = vcmp.eq.f32.partialorder %v10492_v49, 8.507059e+37  ;;  %v3639_v26 = vadd.f32 %v9343_v18, %v3638_v31  ;;  %vm3641_vm7 = vweird.f32 %v9343_v18  ;;  %v3644_v47 = vand.u32 2147483647, %v10440_v53  ;;  %3769 = vst.msk [vmem:[%s6138_s30 + $0x68] sm:$0xff] %vm3755_vm4, %v9294_v37 }
 0x4b8   : > { %v3498_v36 = vsel %vm9409_vm12, %v10496_v24, %v3493_v1  ;;  %v3609_v12 = vadd.f32 %v9353_v14, %v3608_v11  ;;  %v3682_v56 = vsub.f32 1.0, %v3681_v48  ;;  %5664 = vrcp.f32 %v10497_v45  ;;  %v4548_v48 = vpop.permute.xlu2 %4547  ;;  %3761 = vst.msk [vmem:[%s6138_s30 + $0x28] sm:$0xff] %vm3755_vm4, %v9046_v21 }
 0x4b9   : > { %v9543_v38 = vmul.f32 %v3498_v36, %v10499_v32  ;;  %v3578_v0 = vmul.f32 %v9374_v61, %v3577_v34  ;;  %v3629_v22 = vand.u32 2147483647, %v10483_v7  ;;  %v3652_v44 = vsub.f32 1.0, %v3651_v16  ;;  %v4558_v34 = vpop.permute.xlu1 %4557  ;;  %3774 = vst.msk [vmem:[%s6138_s30 + $0x90] sm:$0xff] %vm3755_vm4, %v9360_v29 }
 0x4ba   : > { %vm3640_vm12 = vweird.f32 %v10440_v53  ;;  %v9551_v13 = vpop.eup %5660  ;;  %vm3581_vm15 = vweird.f32 %v9374_v61  ;;  %v3621_v9 = vmul.f32 %v9526_v39, %v10483_v7  ;;  %5666 = vrcp.f32 %v10500_v55  ;;  %3772 = vst.msk [vmem:[%s6138_s30 + $0x80] sm:$0xff] %vm3755_vm4, %v9372_v3 }
 0x4bb   : > { %vm3610_vm2 = vweird.f32 %v10442_v33  ;;  %vm9560_vm1 = vmor %vm3640_vm12, %vm3641_vm7  ;;  %v3647_v53 = vor.u32 1.1754944e-38, %v3646_v40  ;;  %v9566_v20 = vpop.eup %5662  ;;  %v3631_v52 = vand.u32 2147483648, %v10483_v7  ;;  %v3617_v33 = vor.u32 1.1754944e-38, %v3616_v42  ;;  %v10509_v42 = vld [vmem:[#allocation35_spill] sm:$0xff]  ;;  %3764 = vst.msk [vmem:[%s6138_s30 + $0x40] sm:$0xff] %vm3755_vm4, %v9341_v51 }
 0x4bc   : > { %vm9571_vm3 = vmor %vm3610_vm2, %vm3611_vm6  ;;  %vm3645_vm13 = vcmp.eq.f32.partialorder %v3644_v47, 8.507059e+37  ;;  %v3643_v41 = vsel %vm9560_vm1, %v9343_v18, %v3639_v26  ;;  %vm3580_vm9 = vweird.f32 %v10447_v15  ;;  %vm3615_vm10 = vcmp.eq.f32.partialorder %v3614_v57, 8.507059e+37  ;;  %v4538_v57 = vpop.permute.xlu0 %4537  ;;  %3777 = vst.msk [vmem:[%s6138_s30 + $0xa8] sm:$0xff] %vm3755_vm4, %v9470_v19 }
 0x4bd   : > { %v3683_v58 = vmul.f32 %v9452_v59, %v3682_v56  ;;  %vm10506_vm6 = vmmov %vm10498_vm5  ;;  %v3648_v16 = vsel %vm3645_vm13, %v3647_v53, %v3643_v41  ;;  %v3613_v49 = vsel %vm9571_vm3, %v9353_v14, %v3609_v12  ;;  %v3653_v18 = vmul.f32 %v9461_v54, %v3652_v44  ;;  %3775 = vst.msk [vmem:[%s6138_s30 + $0x98] sm:$0xff] %vm3755_vm4, %v9482_v5  ;;  %v10538_v5 = vld [vmem:[#allocation40_spill] sm:$0xff] }
 0x4be   : > { %4636 = vst.msk [vmem:[%s6138_s30 + $0x60] sm:$0xff] %vm10506_vm6, %v4552_v30  ;;  %vm9592_vm7 = vmor %vm3535_vm8, %vm3536_vm14  ;;  %v3726_v30 = vmul.f32 %v9551_v13, %v10487_v27  ;;  %v9603_v14 = vmul.f32 %v3648_v16, %v10509_v42  ;;  %v3618_v40 = vsel %vm3615_vm10, %v3617_v33, %v3613_v49  ;;  %v9605_v1 = vpop.eup %5664  ;;  %vm9609_vm14 = vcmp.eq.f32.partialorder %v3584_v63, 8.507059e+37 }
 0x4bf   : > { %v3622_v26 = vsub.f32 1.0, %v3621_v9  ;;  %v3696_v47 = vmul.f32 %v9566_v20, %v10491_v6  ;;  %vm10512_vm8 = vmmov %vm10498_vm5  ;;  %v9618_v24 = vmul.f32 %v3618_v40, %v10513_v46  ;;  %v3538_v36 = vsel %vm9592_vm7, %v10471_v43, %v9485_v17  ;;  %v10515_v17 = vld [vmem:[#allocation29_spill] sm:$0xff]  ;;  %3767 = vst.msk [vmem:[%s6138_s30 + $0x58] sm:$0xff] %vm3755_vm4, %v9450_v60 }
 0x4c0   : > { %4634 = vst.msk [vmem:[%s6138_s30 + $0x50] sm:$0xff] %vm10512_vm8, %v4548_v48  ;;  %v3659_v63 = vand.u32 2147483647, %v10468_v25  ;;  %v3661_v12 = vand.u32 2147483648, %v10468_v25  ;;  %v3691_v56 = vand.u32 2147483648, %v10466_v2  ;;  %v3543_v32 = vsel %vm9513_vm0, %v9365_v50, %v3538_v36  ;;  %v9633_v44 = vpop.eup %5666  ;;  %vm10514_vm12 = vmmov %vm10506_vm6  ;;  %v4554_v49 = vpop.permute.xlu2 %4553  ;;  %v10531_v36 = vld [vmem:[#allocation30_spill] sm:$0xff] }
 0x4c1   : > { %v3684_v9 = vadd.f32 %v9452_v59, %v3683_v58  ;;  %vm3686_vm5 = vweird.f32 %v9452_v59  ;;  %v3689_v43 = vand.u32 2147483647, %v10466_v2  ;;  %4626 = vst.msk [vmem:[%s6138_s30 + $0x10] sm:$0xff] %vm10514_vm12, %v9479_v10  ;;  %v9642_v31 = vmul.f32 %v3543_v32, %v10515_v17  ;;  %v10516_v10 = vld [vmem:[#allocation67_spill] sm:$0xff]  ;;  %vm10517_vm11 = vmmov %vm10506_vm6  ;;  %v4564_v62 = vpop.permute.xlu1 %4563 }
 0x4c2   : > { %v3654_v8 = vadd.f32 %v9461_v54, %v3653_v18  ;;  %vm3656_vm0 = vweird.f32 %v9461_v54  ;;  %v3741_v50 = vmul.f32 %v9605_v1, %v10497_v45  ;;  %v3727_v4 = vsub.f32 1.0, %v3726_v30  ;;  %4639 = vst.msk [vmem:[%s6138_s30 + $0x78] sm:$0xff] %vm10517_vm11, %v4558_v34  ;;  %vm9684_vm8 = vmor %vm3580_vm9, %vm3581_vm15  ;;  %v10527_v18 = vld [vmem:[#allocation38_spill] sm:$0xff] }
 0x4c3   : > { %v3579_v53 = vadd.f32 %v9374_v61, %v3578_v0  ;;  %vm3625_vm2 = vweird.f32 %v10483_v7  ;;  %5668 = vrcp.f32 %v10516_v10  ;;  %v3697_v11 = vsub.f32 1.0, %v3696_v47  ;;  %3780 = vst.msk [vmem:[%s6138_s30 + $0xc0] sm:$0xff] %vm3755_vm4, %v9603_v14  ;;  %v10542_v0 = vld [vmem:[#allocation31_spill] sm:$0xff] }
 0x4c4   : > { %vm3685_vm1 = vweird.f32 %v10466_v2  ;;  %v3623_v33 = vmul.f32 %v9526_v39, %v3622_v26  ;;  %v3666_v48 = vmul.f32 %v9633_v44, %v10500_v55  ;;  %vm3655_vm3 = vweird.f32 %v10468_v25  ;;  %v4544_v40 = vpop.permute.xlu0 %4543  ;;  %v10529_v26 = vld [vmem:[#allocation34_spill] sm:$0xff]  ;;  %3778 = vst.msk [vmem:[%s6138_s30 + $0xb0] sm:$0xff] %vm3755_vm4, %v9618_v24 }
 0x4c5   : > { %vm3687_vm13 = vmor %vm3685_vm1, %vm3686_vm5  ;;  %v3692_v35 = vor.u32 1.1754944e-38, %v3691_v56  ;;  %vm9672_vm6 = vcmp.eq.f32.partialorder %v3659_v63, 8.507059e+37  ;;  %v3662_v41 = vor.u32 1.1754944e-38, %v3661_v12  ;;  %vm3690_vm7 = vcmp.eq.f32.partialorder %v3689_v43, 8.507059e+37  ;;  %3770 = vst.msk [vmem:[%s6138_s30 + $0x70] sm:$0xff] %vm3755_vm4, %v9543_v38 }
 0x4c6   : > { %vm9668_vm10 = vmor %vm3655_vm3, %vm3656_vm0  ;;  %v3688_v25 = vsel %vm3687_vm13, %v9452_v59, %v3684_v9  ;;  %v3742_v58 = vsub.f32 1.0, %v3741_v50  ;;  %v3728_v34 = vmul.f32 %v9551_v13, %v3727_v4  ;;  %vm9696_vm12 = vcmp.eq.f32.partialorder %v3629_v22, 8.507059e+37  ;;  %v10545_v59 = vld [vmem:[#allocation39_spill] sm:$0xff]  ;;  %3773 = vst.msk [vmem:[%s6138_s30 + $0x88] sm:$0xff] %vm3755_vm4, %v9642_v31 }
 0x4c7   : > { %vm10524_vm5 = vmmov %vm10517_vm11  ;;  %v3693_v16 = vsel %vm3690_vm7, %v3692_v35, %v3688_v25  ;;  %v3658_v21 = vsel %vm9668_vm10, %v9461_v54, %v3654_v8  ;;  %v3698_v15 = vmul.f32 %v9566_v20, %v3697_v11  ;;  %v3583_v22 = vsel %vm9684_vm8, %v9374_v61, %v3579_v53 }
 0x4c8   : > { %4629 = vst.msk [vmem:[%s6138_s30 + $0x28] sm:$0xff] %vm10524_vm5, %v4538_v57  ;;  %v9705_v30 = vmul.f32 %v3693_v16, %v10527_v18  ;;  %v3663_v54 = vsel %vm9672_vm6, %v3662_v41, %v3658_v21  ;;  %v3632_v57 = vor.u32 1.1754944e-38, %v3631_v52  ;;  %v3667_v42 = vsub.f32 1.0, %v3666_v48  ;;  %vm10528_vm15 = vmmov %vm10524_vm5  ;;  %v4560_v53 = vpop.permute.xlu2 %4559 }
 0x4c9   : > { %4637 = vst.msk [vmem:[%s6138_s30 + $0x68] sm:$0xff] %vm10528_vm15, %v4554_v49  ;;  %v9717_v29 = vmul.f32 %v3663_v54, %v10529_v26  ;;  %v3588_v47 = vsel %vm9609_vm14, %v9473_v28, %v3583_v22  ;;  %v9722_v46 = vpop.eup %5668  ;;  %vm3626_vm9 = vweird.f32 %v9526_v39  ;;  %v3706_v61 = vand.u32 2147483648, %v10491_v6  ;;  %vm10530_vm0 = vmmov %vm10524_vm5  ;;  %v10550_v26 = vld [vmem:[#allocation36_spill] sm:$0xff] }
 0x4ca   : > { %v3736_v52 = vand.u32 2147483648, %v10487_v27  ;;  %4642 = vst.msk [vmem:[%s6138_s30 + $0x90] sm:$0xff] %vm10530_vm0, %v4564_v62  ;;  %v9730_v63 = vmul.f32 %v3588_v47, %v10531_v36  ;;  %v3743_v12 = vmul.f32 %v9605_v1, %v3742_v58  ;;  %v3729_v23 = vadd.f32 %v9551_v13, %v3728_v34  ;;  %vm9750_vm11 = vmor %vm3625_vm2, %vm3626_vm9  ;;  %v10546_v62 = vld [vmem:[#allocation33_spill] sm:$0xff] }
 0x4cb   : > { %vm3731_vm14 = vweird.f32 %v9551_v13  ;;  %v3734_v28 = vand.u32 2147483647, %v10487_v27  ;;  %v3624_v56 = vadd.f32 %v9526_v39, %v3623_v33  ;;  %v3699_v32 = vadd.f32 %v9566_v20, %v3698_v15  ;;  %vm10534_vm10 = vmmov %vm10530_vm0  ;;  %3783 = vst.msk [vmem:[%s6138_s30 + $0xd8] sm:$0xff] %vm3755_vm4, %v9705_v30 }
 0x4cc   : > { %vm3701_vm1 = vweird.f32 %v9566_v20  ;;  %v3704_v9 = vand.u32 2147483647, %v10491_v6  ;;  %v3668_v3 = vmul.f32 %v9633_v44, %v3667_v42  ;;  %v3711_v17 = vmul.f32 %v9722_v46, %v10516_v10  ;;  %4632 = vst.msk [vmem:[%s6138_s30 + $0x40] sm:$0xff] %vm10534_vm10, %v4544_v40  ;;  %vm10537_vm9 = vmmov %vm10530_vm0  ;;  %v4550_v58 = vpop.permute.xlu0 %4549 }
 0x4cd   : > { %vm3700_vm3 = vweird.f32 %v10491_v6  ;;  %vm3730_vm13 = vweird.f32 %v10487_v27  ;;  %v3707_v51 = vor.u32 1.1754944e-38, %v3706_v61  ;;  %v3749_v7 = vand.u32 2147483647, %v10497_v45  ;;  %4640 = vst.msk [vmem:[%s6138_s30 + $0x80] sm:$0xff] %vm10537_vm9, %v4560_v53 }
 0x4ce   : > { %v3751_v8 = vand.u32 2147483648, %v10497_v45  ;;  %vm3732_vm2 = vmor %vm3730_vm13, %vm3731_vm14  ;;  %v3737_v50 = vor.u32 1.1754944e-38, %v3736_v52  ;;  %v3744_v6 = vadd.f32 %v9605_v1, %v3743_v12  ;;  %vm3746_vm7 = vweird.f32 %v9605_v1  ;;  %3781 = vst.msk [vmem:[%s6138_s30 + $0xc8] sm:$0xff] %vm3755_vm4, %v9717_v29 }
 0x4cf   : > { %vm9770_vm6 = vmor %vm3700_vm3, %vm3701_vm1  ;;  %vm3735_vm8 = vcmp.eq.f32.partialorder %v3734_v28, 8.507059e+37  ;;  %v3733_v4 = vsel %vm3732_vm2, %v9551_v13, %v3729_v23  ;;  %vm3705_vm5 = vcmp.eq.f32.partialorder %v3704_v9, 8.507059e+37  ;;  %v3628_v33 = vsel %vm9750_vm11, %v9526_v39, %v3624_v56  ;;  %v4570_v39 = vpop.permute.xlu1 %4569  ;;  %3776 = vst.msk [vmem:[%s6138_s30 + $0xa0] sm:$0xff] %vm3755_vm4, %v9730_v63 }
 0x4d0   : > { %v3738_v19 = vsel %vm3735_vm8, %v3737_v50, %v3733_v4  ;;  %v3703_v11 = vsel %vm9770_vm6, %v9566_v20, %v3699_v32  ;;  %vm3745_vm15 = vweird.f32 %v10497_v45  ;;  %v3633_v60 = vsel %vm9696_vm12, %v3632_v57, %v3628_v33  ;;  %v10541_v45 = vld [vmem:[#allocation37_spill] sm:$0xff]  ;;  %vm10543_vm14 = vmmov %vm10537_vm9 }
 0x4d1   : > { %v3739_v13 = vmul.f32 %v3738_v19, %v10538_v5  ;;  %v3708_v48 = vsel %vm3705_vm5, %v3707_v51, %v3703_v11  ;;  %vm9797_vm0 = vmor %vm3745_vm15, %vm3746_vm7  ;;  %v3752_v35 = vor.u32 1.1754944e-38, %v3751_v8  ;;  %v3634_v41 = vmul.f32 %v3633_v60, %v10542_v0  ;;  %4645 = vst.msk [vmem:[%s6138_s30 + $0xa8] sm:$0xff] %vm10543_vm14, %v4570_v39 }
 0x4d2   : > { %v3709_v2 = vmul.f32 %v3708_v48, %v10541_v45  ;;  %v3674_v25 = vand.u32 2147483647, %v10500_v55  ;;  %v3676_v37 = vand.u32 2147483648, %v10500_v55  ;;  %vm3750_vm12 = vcmp.eq.f32.partialorder %v3749_v7, 8.507059e+37  ;;  %vm10544_vm11 = vmmov %vm10537_vm9 }
 0x4d3   : > { %v3748_v34 = vsel %vm9797_vm0, %v9605_v1, %v3744_v6  ;;  %v3669_v14 = vadd.f32 %v9633_v44, %v3668_v3  ;;  %vm3671_vm1 = vweird.f32 %v9633_v44  ;;  %v3712_v16 = vsub.f32 1.0, %v3711_v17  ;;  %4635 = vst.msk [vmem:[%s6138_s30 + $0x58] sm:$0xff] %vm10544_vm11, %v4550_v58  ;;  %vm10547_vm2 = vmmov %vm10537_vm9 }
 0x4d4   : > { %v3753_v21 = vsel %vm3750_vm12, %v3752_v35, %v3748_v34  ;;  %vm3670_vm3 = vweird.f32 %v10500_v55  ;;  %v3677_v1 = vor.u32 1.1754944e-38, %v3676_v37  ;;  %vm3675_vm10 = vcmp.eq.f32.partialorder %v3674_v25, 8.507059e+37  ;;  %v4566_v55 = vpop.permute.xlu2 %4565  ;;  %3786 = vst.msk [vmem:[%s6138_s30 + $0xf0] sm:$0xff] %vm3755_vm4, %v3739_v13  ;;  %v4556_v22 = vpop.permute.xlu0 %4555  ;;  %vm10548_vm8 = vmmov %vm10547_vm2 }
 0x4d5   : > { %v3754_v15 = vmul.f32 %v3753_v21, %v10545_v59  ;;  %vm3672_vm13 = vmor %vm3670_vm3, %vm3671_vm1  ;;  %v3713_v49 = vmul.f32 %v9722_v46, %v3712_v16  ;;  %v3721_v30 = vand.u32 2147483648, %v10516_v10  ;;  %4643 = vst.msk [vmem:[%s6138_s30 + $0x98] sm:$0xff] %vm10547_vm2, %v4566_v55  ;;  %vm3716_vm6 = vweird.f32 %v9722_v46 }
 0x4d6   : > { %v3673_v24 = vsel %vm3672_vm13, %v9633_v44, %v3669_v14  ;;  %v3719_v44 = vand.u32 2147483647, %v10516_v10  ;;  %3784 = vst.msk [vmem:[%s6138_s30 + $0xe0] sm:$0xff] %vm3755_vm4, %v3709_v2  ;;  %vm3715_vm7 = vweird.f32 %v10516_v10  ;;  %vm10549_vm15 = vmmov %vm10547_vm2 }
 0x4d7   : > { %v3678_v38 = vsel %vm3675_vm10, %v3677_v1, %v3673_v24  ;;  %v3714_v54 = vadd.f32 %v9722_v46, %v3713_v49  ;;  %v4576_v31 = vpop.permute.xlu1 %4575  ;;  %vm3717_vm5 = vmor %vm3715_vm7, %vm3716_vm6  ;;  %v3722_v57 = vor.u32 1.1754944e-38, %v3721_v30  ;;  %4638 = vst.msk [vmem:[%s6138_s30 + $0x70] sm:$0xff] %vm10549_vm15, %v4556_v22 }
 0x4d8   : > { %v3679_v18 = vmul.f32 %v3678_v38, %v10546_v62  ;;  %4648 = vst.msk [vmem:[%s6138_s30 + $0xc0] sm:$0xff] %vm10548_vm8, %v4576_v31  ;;  %vm3720_vm9 = vcmp.eq.f32.partialorder %v3719_v44, 8.507059e+37  ;;  %vm10551_vm0 = vmmov %vm10547_vm2 }
 0x4d9   : > { %3787 = vst.msk [vmem:[%s6138_s30 + $0xf8] sm:$0xff] %vm3755_vm4, %v3754_v15  ;;  %v3718_v42 = vsel %vm3717_vm5, %v9722_v46, %v3714_v54  ;;  %vm10552_vm12 = vmmov %vm10551_vm0 }
 0x4da   : > { %3779 = vst.msk [vmem:[%s6138_s30 + $0xb8] sm:$0xff] %vm3755_vm4, %v3634_v41  ;;  %v3723_v40 = vsel %vm3720_vm9, %v3722_v57, %v3718_v42  ;;  %vm10553_vm14 = vmmov %vm10551_vm0 }
 0x4db   : > { %3782 = vst.msk [vmem:[%s6138_s30 + $0xd0] sm:$0xff] %vm3755_vm4, %v3679_v18  ;;  %v3724_v29 = vmul.f32 %v3723_v40, %v10550_v26  ;;  %vm10554_vm1 = vmmov %vm10551_vm0 }
 0x4dc   : > { %v4572_v10 = vpop.permute.xlu2 %4571  ;;  %v4562_v46 = vpop.permute.xlu0 %4561  ;;  %vm10555_vm11 = vmmov %vm10551_vm0 }
 0x4dd   : > { %4646 = vst.msk [vmem:[%s6138_s30 + $0xb0] sm:$0xff] %vm10551_vm0, %v4572_v10  ;;  %vm10556_vm3 = vmmov %vm10551_vm0 }
 0x4de   : > { %3785 = vst.msk [vmem:[%s6138_s30 + $0xe8] sm:$0xff] %vm3755_vm4, %v3724_v29  ;;  %vm10557_vm4 = vmmov %vm10551_vm0 }
 0x4df   : > { %v4582_v47 = vpop.permute.xlu1 %4581  ;;  %4641 = vst.msk [vmem:[%s6138_s30 + $0x88] sm:$0xff] %vm10553_vm14, %v4562_v46  ;;  %vm10558_vm13 = vmmov %vm10551_vm0 }
 0x4e0   : > { %4651 = vst.msk [vmem:[%s6138_s30 + $0xd8] sm:$0xff] %vm10552_vm12, %v4582_v47  ;;  %vm10559_vm10 = vmmov %vm10551_vm0 }
 0x4e1   : > { %vm10560_vm2 = vmmov %vm10551_vm0 }
 0x4e2   : > { %vm10561_vm6 = vmmov %vm10551_vm0 }
 0x4e4   : > { %v4578_v61 = vpop.permute.xlu2 %4577  ;;  %v4568_v36 = vpop.permute.xlu0 %4567 }
 0x4e5   : > { %4649 = vst.msk [vmem:[%s6138_s30 + $0xc8] sm:$0xff] %vm10554_vm1, %v4578_v61 }
 0x4e6   : > { %4644 = vst.msk [vmem:[%s6138_s30 + $0xa0] sm:$0xff] %vm10556_vm3, %v4568_v36 }
 0x4e7   : > { %v4588_v52 = vpop.permute.xlu1 %4587 }
 0x4e8   : > { %4654 = vst.msk [vmem:[%s6138_s30 + $0xf0] sm:$0xff] %vm10555_vm11, %v4588_v52 }
 0x4ec   : > { %v4584_v63 = vpop.permute.xlu2 %4583  ;;  %v4574_v12 = vpop.permute.xlu0 %4573 }
 0x4ed   : > { %4652 = vst.msk [vmem:[%s6138_s30 + $0xe0] sm:$0xff] %vm10557_vm4, %v4584_v63 }
 0x4ee   : > { %4647 = vst.msk [vmem:[%s6138_s30 + $0xb8] sm:$0xff] %vm10558_vm13, %v4574_v12 }
 0x4f4   : > { %v4590_v23 = vpop.permute.xlu2 %4589  ;;  %v4580_v28 = vpop.permute.xlu0 %4579 }
 0x4f5   : > { %4655 = vst.msk [vmem:[%s6138_s30 + $0xf8] sm:$0xff] %vm10559_vm10, %v4590_v23 }
 0x4f6   : > { %4650 = vst.msk [vmem:[%s6138_s30 + $0xd0] sm:$0xff] %vm10560_vm2, %v4580_v28 }
 0x4fc   : > { %v4586_v56 = vpop.permute.xlu0 %4585 }
 0x4fd   : > { %4653 = vst.msk [vmem:[%s6138_s30 + $0xe8] sm:$0xff] %vm10561_vm6, %v4586_v56 }
 0x4fe PF: > { %s5114_s23 = sshll.u32 %s5853_s16, 8  ;;  %s10562_s1 = sld [smem:[#allocation140_spill]] }
 0x4ff   : > { %s4669_s8 = sshll.u32 %s6138_s30, 4  ;;  %s10564_s27 = sand.u32 1, %s5821_s0   ;;  %s4670_s8 = int_to_ptr.vmem [resolvable:$true] %s4669_s8 }
 0x500   : > { %s4657_s26 = scalar_lea.sflag [#allocation8], %s10564_s27 }
 0x504   : > { %s10563_s25 = smov %s10562_s1  ;;  %s4668_s28 = scalar_lea.hbm %s10562_s1, %s5114_s23 }
 0x505   : > { %s4671_s20 = sshll.u32 %s4668_s28, 4  ;;  %s5745_s16 = scalar_lea.hbm %s10563_s25, 512  ;;  %s4672_s20 = int_to_ptr.hbm [resolvable:$true] %s4671_s20 }
 0x506   : > { %s5739_s3 = sshra.s32 %s4672_s20, 4  ;;  %s5740_s3 = int_to_ptr.hbm [resolvable:$true] %s5739_s3 }
 0x507   : > { %s5741_s10 = scalar_lea.hbm %s5740_s3, 256  ;;  %p5746_p1 = scmp.lt.s32.totalorder %s5740_s3, %s10563_s25 }
 0x508   : > { %p5742_p12 = scmp.ne.s32.totalorder %s5740_s3, %s5741_s10  ;;  %p5747_p6 = scmp.lt.s32.totalorder %s5745_s16, %s5741_s10 }
 0x50a   : > { %p5743_p13 = pnand %p5742_p12, %p6045_p2  ;;  %p5748_p10 = por %p5747_p6, %p5746_p1 }
 0x50c   : > { %p5744_p0 = pneg %p5743_p13 }
 0x50e   : > { %p5749_p3 = pnand %p5748_p10, %p5744_p0 }
 0x510   : > { %5752 = shalt.err (!%p5749_p3)
}
 0x511   : > { %s5877_s30 = smov 128   ;;  %s5878_s12 = smov 8  }
 0x512   : > { %5119 = dma.vmem_to_hbm [thread:$0]  (%p6045_p2), %s4670_s8, 4096, %s4672_s20, %s4657_s26, %s5877_s30, %s5877_s30, %s5878_s12  }
 0x513 PF: > { %p5125_p5 = scmp.ge.s32.totalorder %s5865_s19, 2  ;;  %s4686_s15 = sand.u32 1, %s5817_s9  }
 0x514   : > { %s4687_s23 = scalar_lea.sflag [#allocation8], %s4686_s15 }
 0x515   : > { %p5122_p7 = pnand %p5125_p5, %p6054_p4 }
 0x517   : > { %p5123_p8 = pneg %p5122_p7 }
 0x519   : > { %5812 = dma.done.wait (%p5123_p8), %s4687_s23, 4096  }
 0x51a   : > { %5814 = vsyncadd (%p5123_p8), %s4687_s23, 4294963200  ;;  %s36_s19 = sadd.s32 1, %s5865_s19   ;;  %s10566_s2 = sld [smem:[#allocation15_spill]] }
 0x51b   : > { %p9909_p9 = scmp.ge.s32.totalorder %s36_s19, 6   ;;  %s10567_s10 = sld [smem:[#allocation22_spill]] }
 0x51c   : > { %s10568_s7 = sld [smem:[#allocation24_spill]]  ;;  %s10574_s9 = smov %s5821_s0 }
 0x51d   : > { %s10569_s28 = sld [smem:[#allocation17_spill]]  ;;  %s10576_s1 = smov %s5833_s11 }
 0x51e   : > { %s10570_s14 = sld [smem:[#allocation23_spill]]  ;;  %s10578_s12 = smov %s5841_s13 }
 0x51f   : > { %s10571_s15 = sld [smem:[#allocation19_spill]]  ;;  %s10580_s16 = smov %s5861_s18 }
 0x520   : > { %s10572_s17 = sld [smem:[#allocation20_spill]]  ;;  %s10575_s0 = smov %s10566_s2 }
 0x521   : > { %s10573_s8 = sld [smem:[#allocation21_spill]] }
 0x522   : > { %s10577_s11 = smov %s10568_s7 }
 0x523   : > { %s10579_s13 = smov %s10569_s28  ;;  %35 = sbr.rel (!%p9909_p9) target bundleno = 20 (0x14), region = 137 }
 0x527   : > { %s10581_s18 = smov %s10573_s8 }
 0x528   :  { %4693 = vsyncpa [#allocation7], 1 }
 0x529   :  { %4695 = vsyncpa [#allocation7 + $0x1], 1 }
 0x52a   :  { %4696 = vsyncpa [#allocation8], 1 }
 0x52b   :  { %4698 = vsyncpa [#allocation8 + $0x1], 1 }

</bundles_post_ra>
